<compile_context>
chip_gen: v7x
topology: tpu7x:2x2x1
jax: 0.10.0
libtpu: 0.0.40
codegen_flags: <defaults>
</compile_context>

<pallas_src>
import functools

import jax
import jax.numpy as jnp
from jax.experimental import pallas as pl
from jax.experimental.pallas import tpu as pltpu


def _round_up(x, m):
    return ((x + m - 1) // m) * m


# ----------------------------------------------------------------------------
# Fused matmul + frozen-BN (+ residual) (+ ReLU) Pallas kernel
# ----------------------------------------------------------------------------
def _matmul_bn_kernel(*refs, relu, has_residual):
    if has_residual:
        a_ref, b_ref, s_ref, c_ref, r_ref, o_ref, acc_ref = refs
    else:
        a_ref, b_ref, s_ref, c_ref, o_ref, acc_ref = refs
        r_ref = None

    k = pl.program_id(2)

    @pl.when(k == 0)
    def _():
        acc_ref[...] = jnp.zeros_like(acc_ref)

    # bf16 x bf16 -> f32, accumulated in a resident VMEM scratch block.
    acc_ref[...] += jnp.dot(a_ref[...], b_ref[...],
                            preferred_element_type=jnp.float32)

    @pl.when(k == pl.num_programs(2) - 1)
    def _():
        out = acc_ref[...] * s_ref[...] + c_ref[...]
        if has_residual:
            out = out + r_ref[...].astype(jnp.float32)
        if relu:
            out = jnp.maximum(out, 0.0)
        o_ref[...] = out.astype(o_ref.dtype)


def matmul_bn(a, b_p, scale_p, bias_p, *, relu, n_real, residual=None):
    """a:(M,K) bf16 @ pre-padded b_p:(Kp,Np) bf16; fused BN affine/add/ReLU.

    scale_p/bias_p are pre-padded f32 (1, Np).  Returns bf16 (M, n_real)."""
    M, K = a.shape
    Kp, Np = b_p.shape

    TK = 256 if Kp % 256 == 0 else 128
    TN = 256 if Np % 256 == 0 else 128
    if M % 512 == 0:
        TM = 512
    else:
        TM = min(256, _round_up(M, 16))      # bf16 sublane tile = 16
    Mp = _round_up(M, TM)

    if (Mp, Kp) == (M, K):
        a_p = a
    else:
        a_p = jnp.zeros((Mp, Kp), jnp.bfloat16).at[:M, :K].set(a)

    in_specs = [
        pl.BlockSpec((TM, TK), lambda i, j, k: (i, k)),
        pl.BlockSpec((TK, TN), lambda i, j, k: (k, j)),
        pl.BlockSpec((1, TN), lambda i, j, k: (0, j)),
        pl.BlockSpec((1, TN), lambda i, j, k: (0, j)),
    ]
    args = [a_p, b_p, scale_p, bias_p]

    has_residual = residual is not None
    if has_residual:
        if residual.shape == (Mp, Np):
            r_p = residual
        else:
            r_p = jnp.zeros((Mp, Np), residual.dtype).at[
                :M, :residual.shape[1]].set(residual)
        in_specs.append(pl.BlockSpec((TM, TN), lambda i, j, k: (i, j)))
        args.append(r_p)

    out = pl.pallas_call(
        functools.partial(_matmul_bn_kernel, relu=relu,
                          has_residual=has_residual),
        out_shape=jax.ShapeDtypeStruct((Mp, Np), jnp.bfloat16),
        grid_spec=pltpu.PrefetchScalarGridSpec(
            num_scalar_prefetch=0,
            grid=(Mp // TM, Np // TN, Kp // TK),
            in_specs=in_specs,
            out_specs=pl.BlockSpec((TM, TN), lambda i, j, k: (i, j)),
            scratch_shapes=[pltpu.VMEM((TM, TN), jnp.float32)],
        ),
        compiler_params=pltpu.CompilerParams(
            dimension_semantics=("parallel", "parallel", "arbitrary"),
            vmem_limit_bytes=32 * 1024 * 1024,
        ),
    )(*args)
    return out[:M, :n_real]


# ----------------------------------------------------------------------------
# 3x3 / stride-2 / pad-1 max pool (torchvision resnet maxpool)
# ----------------------------------------------------------------------------
def _maxpool_kernel(x_ref, o_ref, *, oh, ow):
    # x_ref: (4, 1, oh+1, ow+1, C) phase-decomposed padded activation, where
    # slot 2*ph+pw holds padded pixel (2r+ph, 2q+pw).
    # output(i,j) = max over padded rows {2i,2i+1,2i+2} x cols {2j,2j+1,2j+2}
    #             = max over (phase, coarse-offset) in {(0,0),(1,0),(0,1)}^2.
    taps = ((0, 0), (1, 0), (0, 1))
    result = None
    for ph, dh in taps:
        for pw, dw in taps:
            v = x_ref[2 * ph + pw, :, dh:dh + oh, dw:dw + ow, :]
            result = v if result is None else jnp.maximum(result, v)
    o_ref[...] = result


def maxpool3x3_s2(x):
    n, h, w, c = x.shape
    oh = (h + 2 - 3) // 2 + 1
    ow = (w + 2 - 3) // 2 + 1
    hp, wp = 2 * (oh + 1), 2 * (ow + 1)
    xp = jnp.full((n, hp, wp, c), -jnp.inf, x.dtype)
    xp = xp.at[:, 1:1 + h, 1:1 + w, :].set(x)
    # (n,hp,wp,c) -> (4, n, oh+1, ow+1, c): one copy of the map, not 9 windows.
    xr = xp.reshape(n, oh + 1, 2, ow + 1, 2, c)
    xr = jnp.transpose(xr, (2, 4, 0, 1, 3, 5)).reshape(4, n, oh + 1, ow + 1, c)
    return pl.pallas_call(
        functools.partial(_maxpool_kernel, oh=oh, ow=ow),
        out_shape=jax.ShapeDtypeStruct((n, oh, ow, c), x.dtype),
        grid=(n,),
        in_specs=[pl.BlockSpec((4, 1, oh + 1, ow + 1, c),
                               lambda b: (0, b, 0, 0, 0))],
        out_specs=pl.BlockSpec((1, oh, ow, c), lambda b: (b, 0, 0, 0)),
    )(xr)


# ----------------------------------------------------------------------------
# Global average pool (AdaptiveAvgPool2d((1,1)) + flatten) -> f32 features
# ----------------------------------------------------------------------------
def _global_avgpool_kernel(x_ref, o_ref, *, inv_hw):
    o_ref[...] = jnp.sum(x_ref[...].astype(jnp.float32), axis=1) * inv_hw


def global_avgpool(x):
    n, h, w, c = x.shape
    xf = x.reshape(n, h * w, c)
    return pl.pallas_call(
        functools.partial(_global_avgpool_kernel, inv_hw=1.0 / (h * w)),
        out_shape=jax.ShapeDtypeStruct((n, c), jnp.float32),
        grid=(1,),
        in_specs=[pl.BlockSpec((n, h * w, c), lambda i: (0, 0, 0))],
        out_specs=pl.BlockSpec((n, c), lambda i: (0, 0)),
    )(xf)


# ----------------------------------------------------------------------------
# Conv (bias=False) + frozen BN via im2col + Pallas matmul
# ----------------------------------------------------------------------------
def _im2col_bf16(x, kh, kw, stride, pad):
    n, h, w, c = x.shape
    if kh == 1 and kw == 1 and pad == 0:
        xs = x[:, ::stride, ::stride, :].astype(jnp.bfloat16)
        oh, ow = xs.shape[1], xs.shape[2]
        return xs.reshape(n * oh * ow, c), oh, ow
    oh = (h + 2 * pad - kh) // stride + 1
    ow = (w + 2 * pad - kw) // stride + 1
    xp = x if pad == 0 else jnp.pad(x, ((0, 0), (pad, pad), (pad, pad), (0, 0)))
    xp = xp.astype(jnp.bfloat16)
    cols = []
    for i in range(kh):
        for j in range(kw):
            cols.append(xp[:, i:i + stride * oh:stride,
                           j:j + stride * ow:stride, :])
    patches = jnp.stack(cols, axis=3)              # (n, oh, ow, kh*kw, c)
    return patches.reshape(n * oh * ow, kh * kw * c), oh, ow


def conv_bn(x, pk, *, oc, kh, kw, stride, pad, relu, residual=None):
    n = x.shape[0]
    patches, oh, ow = _im2col_bf16(x, kh, kw, stride, pad)
    res2d = None
    if residual is not None:
        res2d = residual.reshape(n * oh * ow, oc)
    out = matmul_bn(patches, pk['w'], pk['scale'], pk['bias'],
                    relu=relu, n_real=oc, residual=res2d)
    return out.reshape(n, oh, ow, oc)


# ----------------------------------------------------------------------------
# Parameter packing (done once at init -- hoisted out of the forward pass)
# ----------------------------------------------------------------------------
def _pack_conv_bn(w, bn):
    """w:(OC,IC,KH,KW) f32 + frozen-BN stats -> padded bf16 weight + f32 affine."""
    oc, ic, kh, kw = w.shape
    K = kh * kw * ic
    Kp, Np = _round_up(K, 128), _round_up(oc, 128)
    w2 = jnp.transpose(w, (2, 3, 1, 0)).reshape(K, oc)
    w_p = jnp.zeros((Kp, Np), jnp.bfloat16).at[:K, :oc].set(
        w2.astype(jnp.bfloat16))
    gamma, beta, mean, var = bn
    scale = gamma / jnp.sqrt(var + 1e-5)
    bias = beta - mean * scale
    s_p = jnp.zeros((1, Np), jnp.float32).at[0, :oc].set(scale)
    b_p = jnp.zeros((1, Np), jnp.float32).at[0, :oc].set(bias)
    return {'w': w_p, 'scale': s_p, 'bias': b_p}


# Static architecture config (kept out of the jitted pytree on purpose).
_LAYER_CFG = ((64, 64, 1), (64, 128, 2), (128, 256, 2), (256, 512, 2))


def init_resnet18_params(key, nc):
    keys = iter(jax.random.split(key, 256))

    def conv_w(oc, ic, kh, kw):
        return 0.1 * jax.random.normal(next(keys), (oc, ic, kh, kw), jnp.float32)

    def bn_p(ch):
        k1, k2, k3, k4 = jax.random.split(next(keys), 4)
        gamma = 1.0 + 0.1 * jax.random.normal(k1, (ch,), jnp.float32)
        beta = 0.1 * jax.random.normal(k2, (ch,), jnp.float32)
        mean = 0.1 * jax.random.normal(k3, (ch,), jnp.float32)
        var = 1.0 + 0.1 * jax.random.uniform(k4, (ch,), jnp.float32)
        return (gamma, beta, mean, var)

    params = {}
    # conv1: pretrained weight has 3 input channels; when nc != 3 the module
    # rebuilds conv1 and copies channel i from pretrained channel (i % 3).
    w3 = conv_w(64, 3, 7, 7)
    w1 = w3 if nc == 3 else w3[:, jnp.arange(nc) % 3, :, :]
    params['conv1'] = _pack_conv_bn(w1, bn_p(64))

    layers = []
    for (in_c, out_c, stride) in _LAYER_CFG:
        blocks = []
        for b in range(2):                       # resnet18: 2 BasicBlocks/layer
            s = stride if b == 0 else 1
            icb = in_c if b == 0 else out_c
            blk = {
                'c1': _pack_conv_bn(conv_w(out_c, icb, 3, 3), bn_p(out_c)),
                'c2': _pack_conv_bn(conv_w(out_c, out_c, 3, 3), bn_p(out_c)),
            }
            if s != 1 or icb != out_c:
                blk['down'] = _pack_conv_bn(conv_w(out_c, icb, 1, 1),
                                            bn_p(out_c))
            blocks.append(blk)
        layers.append(blocks)
    params['layers'] = layers
    return params


# ----------------------------------------------------------------------------
# Forward: dropout(resnet18_without_fc(x)) -> (N, 512)
# ----------------------------------------------------------------------------
def resnet_forward(x_nchw, params):
    x = jnp.transpose(x_nchw, (0, 2, 3, 1)).astype(jnp.float32)   # NCHW -> NHWC
    x = conv_bn(x, params['conv1'], oc=64, kh=7, kw=7, stride=2, pad=3,
                relu=True)                       # bf16 activations from here on
    x = maxpool3x3_s2(x)
    for li, blocks in enumerate(params['layers']):
        _, out_c, layer_stride = _LAYER_CFG[li]
        for bi, blk in enumerate(blocks):
            s = layer_stride if bi == 0 else 1
            if 'down' in blk:
                identity = conv_bn(x, blk['down'], oc=out_c, kh=1, kw=1,
                                   stride=s, pad=0, relu=False)
            else:
                identity = x
            out = conv_bn(x, blk['c1'], oc=out_c, kh=3, kw=3, stride=s, pad=1,
                          relu=True)
            # second conv: BN + residual add + ReLU fused into the epilogue
            x = conv_bn(out, blk['c2'], oc=out_c, kh=3, kw=3, stride=1, pad=1,
                        relu=True, residual=identity)
    feat = global_avgpool(x)                 # AdaptiveAvgPool2d((1,1)) + flatten
    # network.fc = Identity(); dropout(p=resnet_dropout=0.0) = identity
    return feat


if __name__ == "__main__":
    key = jax.random.PRNGKey(0)
    k_param, k_x = jax.random.split(key)

    nc = 4                                        # input_shape[0] != 3 path
    x = jax.random.normal(k_x, (2, nc, 16, 16), jnp.float32)
    params = init_resnet18_params(k_param, nc)

    fwd = jax.jit(resnet_forward)
    out = fwd(x, params)
    jax.block_until_ready(out)

    assert out.shape == (2, 512), out.shape       # n_outputs = 512 for resnet18
    assert out.dtype == jnp.float32
    print("KERNEL_OK")
</pallas_src>

<mosaic_0001>
module attributes {stable_mosaic.version = 11 : i64} {
  func.func @_matmul_bn_kernel(%arg0: i32, %arg1: i32, %arg2: i32, %arg3: memref<128x256xbf16, #tpu.memory_space<vmem>>, %arg4: memref<256x128xbf16, #tpu.memory_space<vmem>>, %arg5: memref<1x128xf32, #tpu.memory_space<vmem>>, %arg6: memref<1x128xf32, #tpu.memory_space<vmem>>, %arg7: memref<128x128xbf16, #tpu.memory_space<vmem>>, %arg8: memref<128x128xf32, #tpu.memory_space<vmem>>) attributes {dimension_semantics = [#tpu.dimension_semantics<parallel>, #tpu.dimension_semantics<parallel>, #tpu.dimension_semantics<arbitrary>], iteration_bounds = array<i64: 1, 1, 1>, scalar_prefetch = 0 : i64, scratch_operands = 1 : i64, tpu.core_type = #tpu.core_type<tc>, window_params = [{transform_indices = @transform_0, window_bounds = array<i64: 128, 256>}, {transform_indices = @transform_1, window_bounds = array<i64: 256, 128>}, {transform_indices = @transform_2, window_bounds = array<i64: 1, 128>}, {transform_indices = @transform_3, window_bounds = array<i64: 1, 128>}, {transform_indices = @transform_4, window_bounds = array<i64: 128, 128>}]} {
    %c0_i32 = arith.constant 0 : i32
    %0 = arith.cmpi eq, %arg2, %c0_i32 : i32
    %1 = arith.extui %0 : i1 to i32
    %c0_i32_0 = arith.constant 0 : i32
    %2 = arith.cmpi ne, %1, %c0_i32_0 : i32
    scf.if %2 {
      %cst_10 = arith.constant 0.000000e+00 : f32
      %12 = vector.broadcast %cst_10 : f32 to vector<128x128xf32>
      %c0_11 = arith.constant 0 : index
      %c0_12 = arith.constant 0 : index
      %13 = vector.load %arg8[%c0_11, %c0_12] : memref<128x128xf32, #tpu.memory_space<vmem>>, vector<128x128xf32>
      tpu.vector_store %arg8[%c0_11, %c0_12], %12 {strides = array<i32>} : memref<128x128xf32, #tpu.memory_space<vmem>>, vector<128x128xf32>,
    } else {
    }
    %c0 = arith.constant 0 : index
    %c0_1 = arith.constant 0 : index
    %3 = vector.load %arg8[%c0, %c0_1] : memref<128x128xf32, #tpu.memory_space<vmem>>, vector<128x128xf32>
    %c0_2 = arith.constant 0 : index
    %c0_3 = arith.constant 0 : index
    %4 = vector.load %arg3[%c0_2, %c0_3] : memref<128x256xbf16, #tpu.memory_space<vmem>>, vector<128x256xbf16>
    %c0_4 = arith.constant 0 : index
    %c0_5 = arith.constant 0 : index
    %5 = vector.load %arg4[%c0_4, %c0_5] : memref<256x128xbf16, #tpu.memory_space<vmem>>, vector<256x128xbf16>
    %cst = arith.constant dense<0.000000e+00> : vector<128x128xf32>
    %6 = tpu.matmul %4, %5, %cst {dimension_numbers = #tpu.dot_dimension_numbers<[1], [0], [0], [1], [0, 0, 1, 1], [], []>} : vector<128x256xbf16>, vector<256x128xbf16>, vector<128x128xf32> -> vector<128x128xf32>
    %7 = arith.addf %3, %6 : vector<128x128xf32>
    %c0_6 = arith.constant 0 : index
    %c0_7 = arith.constant 0 : index
    %8 = vector.load %arg8[%c0_6, %c0_7] : memref<128x128xf32, #tpu.memory_space<vmem>>, vector<128x128xf32>
    tpu.vector_store %arg8[%c0_6, %c0_7], %7 {strides = array<i32>} : memref<128x128xf32, #tpu.memory_space<vmem>>, vector<128x128xf32>,
    %c0_i32_8 = arith.constant 0 : i32
    %9 = arith.cmpi eq, %arg2, %c0_i32_8 : i32
    %10 = arith.extui %9 : i1 to i32
    %c0_i32_9 = arith.constant 0 : i32
    %11 = arith.cmpi ne, %10, %c0_i32_9 : i32
    scf.if %11 {
      %c0_10 = arith.constant 0 : index
      %c0_11 = arith.constant 0 : index
      %12 = vector.load %arg8[%c0_10, %c0_11] : memref<128x128xf32, #tpu.memory_space<vmem>>, vector<128x128xf32>
      %c0_12 = arith.constant 0 : index
      %c0_13 = arith.constant 0 : index
      %13 = vector.load %arg5[%c0_12, %c0_13] : memref<1x128xf32, #tpu.memory_space<vmem>>, vector<1x128xf32>
      %14 = vector.broadcast %13 : vector<1x128xf32> to vector<128x128xf32>
      %15 = arith.mulf %12, %14 : vector<128x128xf32>
      %c0_14 = arith.constant 0 : index
      %c0_15 = arith.constant 0 : index
      %16 = vector.load %arg6[%c0_14, %c0_15] : memref<1x128xf32, #tpu.memory_space<vmem>>, vector<1x128xf32>
      %17 = vector.broadcast %16 : vector<1x128xf32> to vector<128x128xf32>
      %18 = arith.addf %15, %17 : vector<128x128xf32>
      %cst_16 = arith.constant 0.000000e+00 : f32
      %19 = vector.broadcast %cst_16 : f32 to vector<128x128xf32>
      %20 = arith.maximumf %18, %19 : vector<128x128xf32>
      %21 = arith.truncf %20 : vector<128x128xf32> to vector<128x128xbf16>
      %c0_17 = arith.constant 0 : index
      %c0_18 = arith.constant 0 : index
      %22 = vector.load %arg7[%c0_17, %c0_18] : memref<128x128xbf16, #tpu.memory_space<vmem>>, vector<128x128xbf16>
      tpu.vector_store %arg7[%c0_17, %c0_18], %21 {strides = array<i32>} : memref<128x128xbf16, #tpu.memory_space<vmem>>, vector<128x128xbf16>,
    } else {
    }
    return
  }
  func.func @transform_0(%arg0: i32, %arg1: i32, %arg2: i32) -> (i32, i32) {
    %c0_i32 = arith.constant 0 : i32
    return %arg0, %arg2 : i32, i32
  }
  func.func @transform_1(%arg0: i32, %arg1: i32, %arg2: i32) -> (i32, i32) {
    %c0_i32 = arith.constant 0 : i32
    return %arg2, %arg1 : i32, i32
  }
  func.func @transform_2(%arg0: i32, %arg1: i32, %arg2: i32) -> (i32, i32) {
    %c0_i32 = arith.constant 0 : i32
    %c0_i32_0 = arith.constant 0 : i32
    return %c0_i32, %arg1 : i32, i32
  }
  func.func @transform_3(%arg0: i32, %arg1: i32, %arg2: i32) -> (i32, i32) {
    %c0_i32 = arith.constant 0 : i32
    %c0_i32_0 = arith.constant 0 : i32
    return %c0_i32, %arg1 : i32, i32
  }
  func.func @transform_4(%arg0: i32, %arg1: i32, %arg2: i32) -> (i32, i32) {
    %c0_i32 = arith.constant 0 : i32
    return %arg0, %arg1 : i32, i32
  }
}

module attributes {stable_mosaic.version = 11 : i64} {
  func.func @_maxpool_kernel(%arg0: i32, %arg1: memref<4x1x5x5x64xbf16, #tpu.memory_space<vmem>>, %arg2: memref<1x4x4x64xbf16, #tpu.memory_space<vmem>>) attributes {dimension_semantics = [#tpu.dimension_semantics<arbitrary>], iteration_bounds = array<i64: 2>, scalar_prefetch = 0 : i64, scratch_operands = 0 : i64, tpu.core_type = #tpu.core_type<tc>, window_params = [{transform_indices = @transform_0, window_bounds = array<i64: 4, 1, 5, 5, 64>}, {transform_indices = @transform_1, window_bounds = array<i64: 1, 4, 4, 64>}]} {
    %c0 = arith.constant 0 : index
    %c0_0 = arith.constant 0 : index
    %c0_1 = arith.constant 0 : index
    %c0_2 = arith.constant 0 : index
    %c0_3 = arith.constant 0 : index
    %0 = vector.load %arg1[%c0, %c0_0, %c0_1, %c0_2, %c0_3] : memref<4x1x5x5x64xbf16, #tpu.memory_space<vmem>>, vector<1x1x4x4x64xbf16>
    %1 = vector.shape_cast %0 : vector<1x1x4x4x64xbf16> to vector<1x4x4x64xbf16>
    %c1 = arith.constant 1 : index
    %c0_4 = arith.constant 0 : index
    %c0_5 = arith.constant 0 : index
    %c0_6 = arith.constant 0 : index
    %c0_7 = arith.constant 0 : index
    %2 = vector.load %arg1[%c1, %c0_4, %c0_5, %c0_6, %c0_7] : memref<4x1x5x5x64xbf16, #tpu.memory_space<vmem>>, vector<1x1x4x4x64xbf16>
    %3 = vector.shape_cast %2 : vector<1x1x4x4x64xbf16> to vector<1x4x4x64xbf16>
    %4 = arith.maximumf %1, %3 : vector<1x4x4x64xbf16>
    %c0_8 = arith.constant 0 : index
    %c0_9 = arith.constant 0 : index
    %c0_10 = arith.constant 0 : index
    %c1_11 = arith.constant 1 : index
    %c0_12 = arith.constant 0 : index
    %5 = vector.load %arg1[%c0_8, %c0_9, %c0_10, %c1_11, %c0_12] : memref<4x1x5x5x64xbf16, #tpu.memory_space<vmem>>, vector<1x1x4x4x64xbf16>
    %6 = vector.shape_cast %5 : vector<1x1x4x4x64xbf16> to vector<1x4x4x64xbf16>
    %7 = arith.maximumf %4, %6 : vector<1x4x4x64xbf16>
    %c2 = arith.constant 2 : index
    %c0_13 = arith.constant 0 : index
    %c0_14 = arith.constant 0 : index
    %c0_15 = arith.constant 0 : index
    %c0_16 = arith.constant 0 : index
    %8 = vector.load %arg1[%c2, %c0_13, %c0_14, %c0_15, %c0_16] : memref<4x1x5x5x64xbf16, #tpu.memory_space<vmem>>, vector<1x1x4x4x64xbf16>
    %9 = vector.shape_cast %8 : vector<1x1x4x4x64xbf16> to vector<1x4x4x64xbf16>
    %10 = arith.maximumf %7, %9 : vector<1x4x4x64xbf16>
    %c3 = arith.constant 3 : index
    %c0_17 = arith.constant 0 : index
    %c0_18 = arith.constant 0 : index
    %c0_19 = arith.constant 0 : index
    %c0_20 = arith.constant 0 : index
    %11 = vector.load %arg1[%c3, %c0_17, %c0_18, %c0_19, %c0_20] : memref<4x1x5x5x64xbf16, #tpu.memory_space<vmem>>, vector<1x1x4x4x64xbf16>
    %12 = vector.shape_cast %11 : vector<1x1x4x4x64xbf16> to vector<1x4x4x64xbf16>
    %13 = arith.maximumf %10, %12 : vector<1x4x4x64xbf16>
    %c2_21 = arith.constant 2 : index
    %c0_22 = arith.constant 0 : index
    %c0_23 = arith.constant 0 : index
    %c1_24 = arith.constant 1 : index
    %c0_25 = arith.constant 0 : index
    %14 = vector.load %arg1[%c2_21, %c0_22, %c0_23, %c1_24, %c0_25] : memref<4x1x5x5x64xbf16, #tpu.memory_space<vmem>>, vector<1x1x4x4x64xbf16>
    %15 = vector.shape_cast %14 : vector<1x1x4x4x64xbf16> to vector<1x4x4x64xbf16>
    %16 = arith.maximumf %13, %15 : vector<1x4x4x64xbf16>
    %c0_26 = arith.constant 0 : index
    %c0_27 = arith.constant 0 : index
    %c1_28 = arith.constant 1 : index
    %c0_29 = arith.constant 0 : index
    %c0_30 = arith.constant 0 : index
    %17 = vector.load %arg1[%c0_26, %c0_27, %c1_28, %c0_29, %c0_30] : memref<4x1x5x5x64xbf16, #tpu.memory_space<vmem>>, vector<1x1x4x4x64xbf16>
    %18 = vector.shape_cast %17 : vector<1x1x4x4x64xbf16> to vector<1x4x4x64xbf16>
    %19 = arith.maximumf %16, %18 : vector<1x4x4x64xbf16>
    %c1_31 = arith.constant 1 : index
    %c0_32 = arith.constant 0 : index
    %c1_33 = arith.constant 1 : index
    %c0_34 = arith.constant 0 : index
    %c0_35 = arith.constant 0 : index
    %20 = vector.load %arg1[%c1_31, %c0_32, %c1_33, %c0_34, %c0_35] : memref<4x1x5x5x64xbf16, #tpu.memory_space<vmem>>, vector<1x1x4x4x64xbf16>
    %21 = vector.shape_cast %20 : vector<1x1x4x4x64xbf16> to vector<1x4x4x64xbf16>
    %22 = arith.maximumf %19, %21 : vector<1x4x4x64xbf16>
    %c0_36 = arith.constant 0 : index
    %c0_37 = arith.constant 0 : index
    %c1_38 = arith.constant 1 : index
    %c1_39 = arith.constant 1 : index
    %c0_40 = arith.constant 0 : index
    %23 = vector.load %arg1[%c0_36, %c0_37, %c1_38, %c1_39, %c0_40] : memref<4x1x5x5x64xbf16, #tpu.memory_space<vmem>>, vector<1x1x4x4x64xbf16>
    %24 = vector.shape_cast %23 : vector<1x1x4x4x64xbf16> to vector<1x4x4x64xbf16>
    %25 = arith.maximumf %22, %24 : vector<1x4x4x64xbf16>
    %c0_41 = arith.constant 0 : index
    %c0_42 = arith.constant 0 : index
    %c0_43 = arith.constant 0 : index
    %c0_44 = arith.constant 0 : index
    %26 = vector.load %arg2[%c0_41, %c0_42, %c0_43, %c0_44] : memref<1x4x4x64xbf16, #tpu.memory_space<vmem>>, vector<1x4x4x64xbf16>
    tpu.vector_store %arg2[%c0_41, %c0_42, %c0_43, %c0_44], %25 {strides = array<i32>} : memref<1x4x4x64xbf16, #tpu.memory_space<vmem>>, vector<1x4x4x64xbf16>,
    return
  }
  func.func @transform_0(%arg0: i32) -> (i32, i32, i32, i32, i32) {
    %c0_i32 = arith.constant 0 : i32
    %c0_i32_0 = arith.constant 0 : i32
    %c0_i32_1 = arith.constant 0 : i32
    %c0_i32_2 = arith.constant 0 : i32
    %c0_i32_3 = arith.constant 0 : i32
    return %c0_i32, %arg0, %c0_i32_0, %c0_i32_1, %c0_i32_2 : i32, i32, i32, i32, i32
  }
  func.func @transform_1(%arg0: i32) -> (i32, i32, i32, i32) {
    %c0_i32 = arith.constant 0 : i32
    %c0_i32_0 = arith.constant 0 : i32
    %c0_i32_1 = arith.constant 0 : i32
    %c0_i32_2 = arith.constant 0 : i32
    return %arg0, %c0_i32, %c0_i32_0, %c0_i32_1 : i32, i32, i32, i32
  }
}

module attributes {stable_mosaic.version = 11 : i64} {
  func.func @_matmul_bn_kernel(%arg0: i32, %arg1: i32, %arg2: i32, %arg3: memref<32x128xbf16, #tpu.memory_space<vmem>>, %arg4: memref<128x128xbf16, #tpu.memory_space<vmem>>, %arg5: memref<1x128xf32, #tpu.memory_space<vmem>>, %arg6: memref<1x128xf32, #tpu.memory_space<vmem>>, %arg7: memref<32x128xbf16, #tpu.memory_space<vmem>>, %arg8: memref<32x128xf32, #tpu.memory_space<vmem>>) attributes {dimension_semantics = [#tpu.dimension_semantics<parallel>, #tpu.dimension_semantics<parallel>, #tpu.dimension_semantics<arbitrary>], iteration_bounds = array<i64: 1, 1, 5>, scalar_prefetch = 0 : i64, scratch_operands = 1 : i64, tpu.core_type = #tpu.core_type<tc>, window_params = [{transform_indices = @transform_0, window_bounds = array<i64: 32, 128>}, {transform_indices = @transform_1, window_bounds = array<i64: 128, 128>}, {transform_indices = @transform_2, window_bounds = array<i64: 1, 128>}, {transform_indices = @transform_3, window_bounds = array<i64: 1, 128>}, {transform_indices = @transform_4, window_bounds = array<i64: 32, 128>}]} {
    %c0_i32 = arith.constant 0 : i32
    %0 = arith.cmpi eq, %arg2, %c0_i32 : i32
    %1 = arith.extui %0 : i1 to i32
    %c0_i32_0 = arith.constant 0 : i32
    %2 = arith.cmpi ne, %1, %c0_i32_0 : i32
    scf.if %2 {
      %cst_9 = arith.constant 0.000000e+00 : f32
      %12 = vector.broadcast %cst_9 : f32 to vector<32x128xf32>
      %c0_10 = arith.constant 0 : index
      %c0_11 = arith.constant 0 : index
      %13 = vector.load %arg8[%c0_10, %c0_11] : memref<32x128xf32, #tpu.memory_space<vmem>>, vector<32x128xf32>
      tpu.vector_store %arg8[%c0_10, %c0_11], %12 {strides = array<i32>} : memref<32x128xf32, #tpu.memory_space<vmem>>, vector<32x128xf32>,
    } else {
    }
    %c0 = arith.constant 0 : index
    %c0_1 = arith.constant 0 : index
    %3 = vector.load %arg8[%c0, %c0_1] : memref<32x128xf32, #tpu.memory_space<vmem>>, vector<32x128xf32>
    %c0_2 = arith.constant 0 : index
    %c0_3 = arith.constant 0 : index
    %4 = vector.load %arg3[%c0_2, %c0_3] : memref<32x128xbf16, #tpu.memory_space<vmem>>, vector<32x128xbf16>
    %c0_4 = arith.constant 0 : index
    %c0_5 = arith.constant 0 : index
    %5 = vector.load %arg4[%c0_4, %c0_5] : memref<128x128xbf16, #tpu.memory_space<vmem>>, vector<128x128xbf16>
    %cst = arith.constant dense<0.000000e+00> : vector<32x128xf32>
    %6 = tpu.matmul %4, %5, %cst {dimension_numbers = #tpu.dot_dimension_numbers<[1], [0], [0], [1], [0, 0, 1, 1], [], []>} : vector<32x128xbf16>, vector<128x128xbf16>, vector<32x128xf32> -> vector<32x128xf32>
    %7 = arith.addf %3, %6 : vector<32x128xf32>
    %c0_6 = arith.constant 0 : index
    %c0_7 = arith.constant 0 : index
    %8 = vector.load %arg8[%c0_6, %c0_7] : memref<32x128xf32, #tpu.memory_space<vmem>>, vector<32x128xf32>
    tpu.vector_store %arg8[%c0_6, %c0_7], %7 {strides = array<i32>} : memref<32x128xf32, #tpu.memory_space<vmem>>, vector<32x128xf32>,
    %c4_i32 = arith.constant 4 : i32
    %9 = arith.cmpi eq, %arg2, %c4_i32 : i32
    %10 = arith.extui %9 : i1 to i32
    %c0_i32_8 = arith.constant 0 : i32
    %11 = arith.cmpi ne, %10, %c0_i32_8 : i32
    scf.if %11 {
      %c0_9 = arith.constant 0 : index
      %c0_10 = arith.constant 0 : index
      %12 = vector.load %arg8[%c0_9, %c0_10] : memref<32x128xf32, #tpu.memory_space<vmem>>, vector<32x128xf32>
      %c0_11 = arith.constant 0 : index
      %c0_12 = arith.constant 0 : index
      %13 = vector.load %arg5[%c0_11, %c0_12] : memref<1x128xf32, #tpu.memory_space<vmem>>, vector<1x128xf32>
      %14 = vector.broadcast %13 : vector<1x128xf32> to vector<32x128xf32>
      %15 = arith.mulf %12, %14 : vector<32x128xf32>
      %c0_13 = arith.constant 0 : index
      %c0_14 = arith.constant 0 : index
      %16 = vector.load %arg6[%c0_13, %c0_14] : memref<1x128xf32, #tpu.memory_space<vmem>>, vector<1x128xf32>
      %17 = vector.broadcast %16 : vector<1x128xf32> to vector<32x128xf32>
      %18 = arith.addf %15, %17 : vector<32x128xf32>
      %cst_15 = arith.constant 0.000000e+00 : f32
      %19 = vector.broadcast %cst_15 : f32 to vector<32x128xf32>
      %20 = arith.maximumf %18, %19 : vector<32x128xf32>
      %21 = arith.truncf %20 : vector<32x128xf32> to vector<32x128xbf16>
      %c0_16 = arith.constant 0 : index
      %c0_17 = arith.constant 0 : index
      %22 = vector.load %arg7[%c0_16, %c0_17] : memref<32x128xbf16, #tpu.memory_space<vmem>>, vector<32x128xbf16>
      tpu.vector_store %arg7[%c0_16, %c0_17], %21 {strides = array<i32>} : memref<32x128xbf16, #tpu.memory_space<vmem>>, vector<32x128xbf16>,
    } else {
    }
    return
  }
  func.func @transform_0(%arg0: i32, %arg1: i32, %arg2: i32) -> (i32, i32) {
    %c0_i32 = arith.constant 0 : i32
    return %arg0, %arg2 : i32, i32
  }
  func.func @transform_1(%arg0: i32, %arg1: i32, %arg2: i32) -> (i32, i32) {
    %c0_i32 = arith.constant 0 : i32
    return %arg2, %arg1 : i32, i32
  }
  func.func @transform_2(%arg0: i32, %arg1: i32, %arg2: i32) -> (i32, i32) {
    %c0_i32 = arith.constant 0 : i32
    %c0_i32_0 = arith.constant 0 : i32
    return %c0_i32, %arg1 : i32, i32
  }
  func.func @transform_3(%arg0: i32, %arg1: i32, %arg2: i32) -> (i32, i32) {
    %c0_i32 = arith.constant 0 : i32
    %c0_i32_0 = arith.constant 0 : i32
    return %c0_i32, %arg1 : i32, i32
  }
  func.func @transform_4(%arg0: i32, %arg1: i32, %arg2: i32) -> (i32, i32) {
    %c0_i32 = arith.constant 0 : i32
    return %arg0, %arg1 : i32, i32
  }
}

module attributes {stable_mosaic.version = 11 : i64} {
  func.func @_matmul_bn_kernel(%arg0: i32, %arg1: i32, %arg2: i32, %arg3: memref<32x128xbf16, #tpu.memory_space<vmem>>, %arg4: memref<128x128xbf16, #tpu.memory_space<vmem>>, %arg5: memref<1x128xf32, #tpu.memory_space<vmem>>, %arg6: memref<1x128xf32, #tpu.memory_space<vmem>>, %arg7: memref<32x128xbf16, #tpu.memory_space<vmem>>, %arg8: memref<32x128xbf16, #tpu.memory_space<vmem>>, %arg9: memref<32x128xf32, #tpu.memory_space<vmem>>) attributes {dimension_semantics = [#tpu.dimension_semantics<parallel>, #tpu.dimension_semantics<parallel>, #tpu.dimension_semantics<arbitrary>], iteration_bounds = array<i64: 1, 1, 5>, scalar_prefetch = 0 : i64, scratch_operands = 1 : i64, tpu.core_type = #tpu.core_type<tc>, window_params = [{transform_indices = @transform_0, window_bounds = array<i64: 32, 128>}, {transform_indices = @transform_1, window_bounds = array<i64: 128, 128>}, {transform_indices = @transform_2, window_bounds = array<i64: 1, 128>}, {transform_indices = @transform_3, window_bounds = array<i64: 1, 128>}, {transform_indices = @transform_4, window_bounds = array<i64: 32, 128>}, {transform_indices = @transform_5, window_bounds = array<i64: 32, 128>}]} {
    %c0_i32 = arith.constant 0 : i32
    %0 = arith.cmpi eq, %arg2, %c0_i32 : i32
    %1 = arith.extui %0 : i1 to i32
    %c0_i32_0 = arith.constant 0 : i32
    %2 = arith.cmpi ne, %1, %c0_i32_0 : i32
    scf.if %2 {
      %cst_9 = arith.constant 0.000000e+00 : f32
      %12 = vector.broadcast %cst_9 : f32 to vector<32x128xf32>
      %c0_10 = arith.constant 0 : index
      %c0_11 = arith.constant 0 : index
      %13 = vector.load %arg9[%c0_10, %c0_11] : memref<32x128xf32, #tpu.memory_space<vmem>>, vector<32x128xf32>
      tpu.vector_store %arg9[%c0_10, %c0_11], %12 {strides = array<i32>} : memref<32x128xf32, #tpu.memory_space<vmem>>, vector<32x128xf32>,
    } else {
    }
    %c0 = arith.constant 0 : index
    %c0_1 = arith.constant 0 : index
    %3 = vector.load %arg9[%c0, %c0_1] : memref<32x128xf32, #tpu.memory_space<vmem>>, vector<32x128xf32>
    %c0_2 = arith.constant 0 : index
    %c0_3 = arith.constant 0 : index
    %4 = vector.load %arg3[%c0_2, %c0_3] : memref<32x128xbf16, #tpu.memory_space<vmem>>, vector<32x128xbf16>
    %c0_4 = arith.constant 0 : index
    %c0_5 = arith.constant 0 : index
    %5 = vector.load %arg4[%c0_4, %c0_5] : memref<128x128xbf16, #tpu.memory_space<vmem>>, vector<128x128xbf16>
    %cst = arith.constant dense<0.000000e+00> : vector<32x128xf32>
    %6 = tpu.matmul %4, %5, %cst {dimension_numbers = #tpu.dot_dimension_numbers<[1], [0], [0], [1], [0, 0, 1, 1], [], []>} : vector<32x128xbf16>, vector<128x128xbf16>, vector<32x128xf32> -> vector<32x128xf32>
    %7 = arith.addf %3, %6 : vector<32x128xf32>
    %c0_6 = arith.constant 0 : index
    %c0_7 = arith.constant 0 : index
    %8 = vector.load %arg9[%c0_6, %c0_7] : memref<32x128xf32, #tpu.memory_space<vmem>>, vector<32x128xf32>
    tpu.vector_store %arg9[%c0_6, %c0_7], %7 {strides = array<i32>} : memref<32x128xf32, #tpu.memory_space<vmem>>, vector<32x128xf32>,
    %c4_i32 = arith.constant 4 : i32
    %9 = arith.cmpi eq, %arg2, %c4_i32 : i32
    %10 = arith.extui %9 : i1 to i32
    %c0_i32_8 = arith.constant 0 : i32
    %11 = arith.cmpi ne, %10, %c0_i32_8 : i32
    scf.if %11 {
      %c0_9 = arith.constant 0 : index
      %c0_10 = arith.constant 0 : index
      %12 = vector.load %arg9[%c0_9, %c0_10] : memref<32x128xf32, #tpu.memory_space<vmem>>, vector<32x128xf32>
      %c0_11 = arith.constant 0 : index
      %c0_12 = arith.constant 0 : index
      %13 = vector.load %arg5[%c0_11, %c0_12] : memref<1x128xf32, #tpu.memory_space<vmem>>, vector<1x128xf32>
      %14 = vector.broadcast %13 : vector<1x128xf32> to vector<32x128xf32>
      %15 = arith.mulf %12, %14 : vector<32x128xf32>
      %c0_13 = arith.constant 0 : index
      %c0_14 = arith.constant 0 : index
      %16 = vector.load %arg6[%c0_13, %c0_14] : memref<1x128xf32, #tpu.memory_space<vmem>>, vector<1x128xf32>
      %17 = vector.broadcast %16 : vector<1x128xf32> to vector<32x128xf32>
      %18 = arith.addf %15, %17 : vector<32x128xf32>
      %c0_15 = arith.constant 0 : index
      %c0_16 = arith.constant 0 : index
      %19 = vector.load %arg7[%c0_15, %c0_16] : memref<32x128xbf16, #tpu.memory_space<vmem>>, vector<32x128xbf16>
      %20 = arith.extf %19 : vector<32x128xbf16> to vector<32x128xf32>
      %21 = arith.addf %18, %20 : vector<32x128xf32>
      %cst_17 = arith.constant 0.000000e+00 : f32
      %22 = vector.broadcast %cst_17 : f32 to vector<32x128xf32>
      %23 = arith.maximumf %21, %22 : vector<32x128xf32>
      %24 = arith.truncf %23 : vector<32x128xf32> to vector<32x128xbf16>
      %c0_18 = arith.constant 0 : index
      %c0_19 = arith.constant 0 : index
      %25 = vector.load %arg8[%c0_18, %c0_19] : memref<32x128xbf16, #tpu.memory_space<vmem>>, vector<32x128xbf16>
      tpu.vector_store %arg8[%c0_18, %c0_19], %24 {strides = array<i32>} : memref<32x128xbf16, #tpu.memory_space<vmem>>, vector<32x128xbf16>,
    } else {
    }
    return
  }
  func.func @transform_0(%arg0: i32, %arg1: i32, %arg2: i32) -> (i32, i32) {
    %c0_i32 = arith.constant 0 : i32
    return %arg0, %arg2 : i32, i32
  }
  func.func @transform_1(%arg0: i32, %arg1: i32, %arg2: i32) -> (i32, i32) {
    %c0_i32 = arith.constant 0 : i32
    return %arg2, %arg1 : i32, i32
  }
  func.func @transform_2(%arg0: i32, %arg1: i32, %arg2: i32) -> (i32, i32) {
    %c0_i32 = arith.constant 0 : i32
    %c0_i32_0 = arith.constant 0 : i32
    return %c0_i32, %arg1 : i32, i32
  }
  func.func @transform_3(%arg0: i32, %arg1: i32, %arg2: i32) -> (i32, i32) {
    %c0_i32 = arith.constant 0 : i32
    %c0_i32_0 = arith.constant 0 : i32
    return %c0_i32, %arg1 : i32, i32
  }
  func.func @transform_4(%arg0: i32, %arg1: i32, %arg2: i32) -> (i32, i32) {
    %c0_i32 = arith.constant 0 : i32
    return %arg0, %arg1 : i32, i32
  }
  func.func @transform_5(%arg0: i32, %arg1: i32, %arg2: i32) -> (i32, i32) {
    %c0_i32 = arith.constant 0 : i32
    return %arg0, %arg1 : i32, i32
  }
}

module attributes {stable_mosaic.version = 11 : i64} {
  func.func @_matmul_bn_kernel(%arg0: i32, %arg1: i32, %arg2: i32, %arg3: memref<16x128xbf16, #tpu.memory_space<vmem>>, %arg4: memref<128x128xbf16, #tpu.memory_space<vmem>>, %arg5: memref<1x128xf32, #tpu.memory_space<vmem>>, %arg6: memref<1x128xf32, #tpu.memory_space<vmem>>, %arg7: memref<16x128xbf16, #tpu.memory_space<vmem>>, %arg8: memref<16x128xf32, #tpu.memory_space<vmem>>) attributes {dimension_semantics = [#tpu.dimension_semantics<parallel>, #tpu.dimension_semantics<parallel>, #tpu.dimension_semantics<arbitrary>], iteration_bounds = array<i64: 1, 1, 5>, scalar_prefetch = 0 : i64, scratch_operands = 1 : i64, tpu.core_type = #tpu.core_type<tc>, window_params = [{transform_indices = @transform_0, window_bounds = array<i64: 16, 128>}, {transform_indices = @transform_1, window_bounds = array<i64: 128, 128>}, {transform_indices = @transform_2, window_bounds = array<i64: 1, 128>}, {transform_indices = @transform_3, window_bounds = array<i64: 1, 128>}, {transform_indices = @transform_4, window_bounds = array<i64: 16, 128>}]} {
    %c0_i32 = arith.constant 0 : i32
    %0 = arith.cmpi eq, %arg2, %c0_i32 : i32
    %1 = arith.extui %0 : i1 to i32
    %c0_i32_0 = arith.constant 0 : i32
    %2 = arith.cmpi ne, %1, %c0_i32_0 : i32
    scf.if %2 {
      %cst_9 = arith.constant 0.000000e+00 : f32
      %12 = vector.broadcast %cst_9 : f32 to vector<16x128xf32>
      %c0_10 = arith.constant 0 : index
      %c0_11 = arith.constant 0 : index
      %13 = vector.load %arg8[%c0_10, %c0_11] : memref<16x128xf32, #tpu.memory_space<vmem>>, vector<16x128xf32>
      tpu.vector_store %arg8[%c0_10, %c0_11], %12 {strides = array<i32>} : memref<16x128xf32, #tpu.memory_space<vmem>>, vector<16x128xf32>,
    } else {
    }
    %c0 = arith.constant 0 : index
    %c0_1 = arith.constant 0 : index
    %3 = vector.load %arg8[%c0, %c0_1] : memref<16x128xf32, #tpu.memory_space<vmem>>, vector<16x128xf32>
    %c0_2 = arith.constant 0 : index
    %c0_3 = arith.constant 0 : index
    %4 = vector.load %arg3[%c0_2, %c0_3] : memref<16x128xbf16, #tpu.memory_space<vmem>>, vector<16x128xbf16>
    %c0_4 = arith.constant 0 : index
    %c0_5 = arith.constant 0 : index
    %5 = vector.load %arg4[%c0_4, %c0_5] : memref<128x128xbf16, #tpu.memory_space<vmem>>, vector<128x128xbf16>
    %cst = arith.constant dense<0.000000e+00> : vector<16x128xf32>
    %6 = tpu.matmul %4, %5, %cst {dimension_numbers = #tpu.dot_dimension_numbers<[1], [0], [0], [1], [0, 0, 1, 1], [], []>} : vector<16x128xbf16>, vector<128x128xbf16>, vector<16x128xf32> -> vector<16x128xf32>
    %7 = arith.addf %3, %6 : vector<16x128xf32>
    %c0_6 = arith.constant 0 : index
    %c0_7 = arith.constant 0 : index
    %8 = vector.load %arg8[%c0_6, %c0_7] : memref<16x128xf32, #tpu.memory_space<vmem>>, vector<16x128xf32>
    tpu.vector_store %arg8[%c0_6, %c0_7], %7 {strides = array<i32>} : memref<16x128xf32, #tpu.memory_space<vmem>>, vector<16x128xf32>,
    %c4_i32 = arith.constant 4 : i32
    %9 = arith.cmpi eq, %arg2, %c4_i32 : i32
    %10 = arith.extui %9 : i1 to i32
    %c0_i32_8 = arith.constant 0 : i32
    %11 = arith.cmpi ne, %10, %c0_i32_8 : i32
    scf.if %11 {
      %c0_9 = arith.constant 0 : index
      %c0_10 = arith.constant 0 : index
      %12 = vector.load %arg8[%c0_9, %c0_10] : memref<16x128xf32, #tpu.memory_space<vmem>>, vector<16x128xf32>
      %c0_11 = arith.constant 0 : index
      %c0_12 = arith.constant 0 : index
      %13 = vector.load %arg5[%c0_11, %c0_12] : memref<1x128xf32, #tpu.memory_space<vmem>>, vector<1x128xf32>
      %14 = vector.broadcast %13 : vector<1x128xf32> to vector<16x128xf32>
      %15 = arith.mulf %12, %14 : vector<16x128xf32>
      %c0_13 = arith.constant 0 : index
      %c0_14 = arith.constant 0 : index
      %16 = vector.load %arg6[%c0_13, %c0_14] : memref<1x128xf32, #tpu.memory_space<vmem>>, vector<1x128xf32>
      %17 = vector.broadcast %16 : vector<1x128xf32> to vector<16x128xf32>
      %18 = arith.addf %15, %17 : vector<16x128xf32>
      %cst_15 = arith.constant 0.000000e+00 : f32
      %19 = vector.broadcast %cst_15 : f32 to vector<16x128xf32>
      %20 = arith.maximumf %18, %19 : vector<16x128xf32>
      %21 = arith.truncf %20 : vector<16x128xf32> to vector<16x128xbf16>
      %c0_16 = arith.constant 0 : index
      %c0_17 = arith.constant 0 : index
      %22 = vector.load %arg7[%c0_16, %c0_17] : memref<16x128xbf16, #tpu.memory_space<vmem>>, vector<16x128xbf16>
      tpu.vector_store %arg7[%c0_16, %c0_17], %21 {strides = array<i32>} : memref<16x128xbf16, #tpu.memory_space<vmem>>, vector<16x128xbf16>,
    } else {
    }
    return
  }
  func.func @transform_0(%arg0: i32, %arg1: i32, %arg2: i32) -> (i32, i32) {
    %c0_i32 = arith.constant 0 : i32
    return %arg0, %arg2 : i32, i32
  }
  func.func @transform_1(%arg0: i32, %arg1: i32, %arg2: i32) -> (i32, i32) {
    %c0_i32 = arith.constant 0 : i32
    return %arg2, %arg1 : i32, i32
  }
  func.func @transform_2(%arg0: i32, %arg1: i32, %arg2: i32) -> (i32, i32) {
    %c0_i32 = arith.constant 0 : i32
    %c0_i32_0 = arith.constant 0 : i32
    return %c0_i32, %arg1 : i32, i32
  }
  func.func @transform_3(%arg0: i32, %arg1: i32, %arg2: i32) -> (i32, i32) {
    %c0_i32 = arith.constant 0 : i32
    %c0_i32_0 = arith.constant 0 : i32
    return %c0_i32, %arg1 : i32, i32
  }
  func.func @transform_4(%arg0: i32, %arg1: i32, %arg2: i32) -> (i32, i32) {
    %c0_i32 = arith.constant 0 : i32
    return %arg0, %arg1 : i32, i32
  }
}

module attributes {stable_mosaic.version = 11 : i64} {
  func.func @_matmul_bn_kernel(%arg0: i32, %arg1: i32, %arg2: i32, %arg3: memref<16x128xbf16, #tpu.memory_space<vmem>>, %arg4: memref<128x128xbf16, #tpu.memory_space<vmem>>, %arg5: memref<1x128xf32, #tpu.memory_space<vmem>>, %arg6: memref<1x128xf32, #tpu.memory_space<vmem>>, %arg7: memref<16x128xbf16, #tpu.memory_space<vmem>>, %arg8: memref<16x128xf32, #tpu.memory_space<vmem>>) attributes {dimension_semantics = [#tpu.dimension_semantics<parallel>, #tpu.dimension_semantics<parallel>, #tpu.dimension_semantics<arbitrary>], iteration_bounds = array<i64: 1, 1, 1>, scalar_prefetch = 0 : i64, scratch_operands = 1 : i64, tpu.core_type = #tpu.core_type<tc>, window_params = [{transform_indices = @transform_0, window_bounds = array<i64: 16, 128>}, {transform_indices = @transform_1, window_bounds = array<i64: 128, 128>}, {transform_indices = @transform_2, window_bounds = array<i64: 1, 128>}, {transform_indices = @transform_3, window_bounds = array<i64: 1, 128>}, {transform_indices = @transform_4, window_bounds = array<i64: 16, 128>}]} {
    %c0_i32 = arith.constant 0 : i32
    %0 = arith.cmpi eq, %arg2, %c0_i32 : i32
    %1 = arith.extui %0 : i1 to i32
    %c0_i32_0 = arith.constant 0 : i32
    %2 = arith.cmpi ne, %1, %c0_i32_0 : i32
    scf.if %2 {
      %cst_10 = arith.constant 0.000000e+00 : f32
      %12 = vector.broadcast %cst_10 : f32 to vector<16x128xf32>
      %c0_11 = arith.constant 0 : index
      %c0_12 = arith.constant 0 : index
      %13 = vector.load %arg8[%c0_11, %c0_12] : memref<16x128xf32, #tpu.memory_space<vmem>>, vector<16x128xf32>
      tpu.vector_store %arg8[%c0_11, %c0_12], %12 {strides = array<i32>} : memref<16x128xf32, #tpu.memory_space<vmem>>, vector<16x128xf32>,
    } else {
    }
    %c0 = arith.constant 0 : index
    %c0_1 = arith.constant 0 : index
    %3 = vector.load %arg8[%c0, %c0_1] : memref<16x128xf32, #tpu.memory_space<vmem>>, vector<16x128xf32>
    %c0_2 = arith.constant 0 : index
    %c0_3 = arith.constant 0 : index
    %4 = vector.load %arg3[%c0_2, %c0_3] : memref<16x128xbf16, #tpu.memory_space<vmem>>, vector<16x128xbf16>
    %c0_4 = arith.constant 0 : index
    %c0_5 = arith.constant 0 : index
    %5 = vector.load %arg4[%c0_4, %c0_5] : memref<128x128xbf16, #tpu.memory_space<vmem>>, vector<128x128xbf16>
    %cst = arith.constant dense<0.000000e+00> : vector<16x128xf32>
    %6 = tpu.matmul %4, %5, %cst {dimension_numbers = #tpu.dot_dimension_numbers<[1], [0], [0], [1], [0, 0, 1, 1], [], []>} : vector<16x128xbf16>, vector<128x128xbf16>, vector<16x128xf32> -> vector<16x128xf32>
    %7 = arith.addf %3, %6 : vector<16x128xf32>
    %c0_6 = arith.constant 0 : index
    %c0_7 = arith.constant 0 : index
    %8 = vector.load %arg8[%c0_6, %c0_7] : memref<16x128xf32, #tpu.memory_space<vmem>>, vector<16x128xf32>
    tpu.vector_store %arg8[%c0_6, %c0_7], %7 {strides = array<i32>} : memref<16x128xf32, #tpu.memory_space<vmem>>, vector<16x128xf32>,
    %c0_i32_8 = arith.constant 0 : i32
    %9 = arith.cmpi eq, %arg2, %c0_i32_8 : i32
    %10 = arith.extui %9 : i1 to i32
    %c0_i32_9 = arith.constant 0 : i32
    %11 = arith.cmpi ne, %10, %c0_i32_9 : i32
    scf.if %11 {
      %c0_10 = arith.constant 0 : index
      %c0_11 = arith.constant 0 : index
      %12 = vector.load %arg8[%c0_10, %c0_11] : memref<16x128xf32, #tpu.memory_space<vmem>>, vector<16x128xf32>
      %c0_12 = arith.constant 0 : index
      %c0_13 = arith.constant 0 : index
      %13 = vector.load %arg5[%c0_12, %c0_13] : memref<1x128xf32, #tpu.memory_space<vmem>>, vector<1x128xf32>
      %14 = vector.broadcast %13 : vector<1x128xf32> to vector<16x128xf32>
      %15 = arith.mulf %12, %14 : vector<16x128xf32>
      %c0_14 = arith.constant 0 : index
      %c0_15 = arith.constant 0 : index
      %16 = vector.load %arg6[%c0_14, %c0_15] : memref<1x128xf32, #tpu.memory_space<vmem>>, vector<1x128xf32>
      %17 = vector.broadcast %16 : vector<1x128xf32> to vector<16x128xf32>
      %18 = arith.addf %15, %17 : vector<16x128xf32>
      %19 = arith.truncf %18 : vector<16x128xf32> to vector<16x128xbf16>
      %c0_16 = arith.constant 0 : index
      %c0_17 = arith.constant 0 : index
      %20 = vector.load %arg7[%c0_16, %c0_17] : memref<16x128xbf16, #tpu.memory_space<vmem>>, vector<16x128xbf16>
      tpu.vector_store %arg7[%c0_16, %c0_17], %19 {strides = array<i32>} : memref<16x128xbf16, #tpu.memory_space<vmem>>, vector<16x128xbf16>,
    } else {
    }
    return
  }
  func.func @transform_0(%arg0: i32, %arg1: i32, %arg2: i32) -> (i32, i32) {
    %c0_i32 = arith.constant 0 : i32
    return %arg0, %arg2 : i32, i32
  }
  func.func @transform_1(%arg0: i32, %arg1: i32, %arg2: i32) -> (i32, i32) {
    %c0_i32 = arith.constant 0 : i32
    return %arg2, %arg1 : i32, i32
  }
  func.func @transform_2(%arg0: i32, %arg1: i32, %arg2: i32) -> (i32, i32) {
    %c0_i32 = arith.constant 0 : i32
    %c0_i32_0 = arith.constant 0 : i32
    return %c0_i32, %arg1 : i32, i32
  }
  func.func @transform_3(%arg0: i32, %arg1: i32, %arg2: i32) -> (i32, i32) {
    %c0_i32 = arith.constant 0 : i32
    %c0_i32_0 = arith.constant 0 : i32
    return %c0_i32, %arg1 : i32, i32
  }
  func.func @transform_4(%arg0: i32, %arg1: i32, %arg2: i32) -> (i32, i32) {
    %c0_i32 = arith.constant 0 : i32
    return %arg0, %arg1 : i32, i32
  }
}

module attributes {stable_mosaic.version = 11 : i64} {
  func.func @_matmul_bn_kernel(%arg0: i32, %arg1: i32, %arg2: i32, %arg3: memref<16x128xbf16, #tpu.memory_space<vmem>>, %arg4: memref<128x128xbf16, #tpu.memory_space<vmem>>, %arg5: memref<1x128xf32, #tpu.memory_space<vmem>>, %arg6: memref<1x128xf32, #tpu.memory_space<vmem>>, %arg7: memref<16x128xbf16, #tpu.memory_space<vmem>>, %arg8: memref<16x128xbf16, #tpu.memory_space<vmem>>, %arg9: memref<16x128xf32, #tpu.memory_space<vmem>>) attributes {dimension_semantics = [#tpu.dimension_semantics<parallel>, #tpu.dimension_semantics<parallel>, #tpu.dimension_semantics<arbitrary>], iteration_bounds = array<i64: 1, 1, 9>, scalar_prefetch = 0 : i64, scratch_operands = 1 : i64, tpu.core_type = #tpu.core_type<tc>, window_params = [{transform_indices = @transform_0, window_bounds = array<i64: 16, 128>}, {transform_indices = @transform_1, window_bounds = array<i64: 128, 128>}, {transform_indices = @transform_2, window_bounds = array<i64: 1, 128>}, {transform_indices = @transform_3, window_bounds = array<i64: 1, 128>}, {transform_indices = @transform_4, window_bounds = array<i64: 16, 128>}, {transform_indices = @transform_5, window_bounds = array<i64: 16, 128>}]} {
    %c0_i32 = arith.constant 0 : i32
    %0 = arith.cmpi eq, %arg2, %c0_i32 : i32
    %1 = arith.extui %0 : i1 to i32
    %c0_i32_0 = arith.constant 0 : i32
    %2 = arith.cmpi ne, %1, %c0_i32_0 : i32
    scf.if %2 {
      %cst_9 = arith.constant 0.000000e+00 : f32
      %12 = vector.broadcast %cst_9 : f32 to vector<16x128xf32>
      %c0_10 = arith.constant 0 : index
      %c0_11 = arith.constant 0 : index
      %13 = vector.load %arg9[%c0_10, %c0_11] : memref<16x128xf32, #tpu.memory_space<vmem>>, vector<16x128xf32>
      tpu.vector_store %arg9[%c0_10, %c0_11], %12 {strides = array<i32>} : memref<16x128xf32, #tpu.memory_space<vmem>>, vector<16x128xf32>,
    } else {
    }
    %c0 = arith.constant 0 : index
    %c0_1 = arith.constant 0 : index
    %3 = vector.load %arg9[%c0, %c0_1] : memref<16x128xf32, #tpu.memory_space<vmem>>, vector<16x128xf32>
    %c0_2 = arith.constant 0 : index
    %c0_3 = arith.constant 0 : index
    %4 = vector.load %arg3[%c0_2, %c0_3] : memref<16x128xbf16, #tpu.memory_space<vmem>>, vector<16x128xbf16>
    %c0_4 = arith.constant 0 : index
    %c0_5 = arith.constant 0 : index
    %5 = vector.load %arg4[%c0_4, %c0_5] : memref<128x128xbf16, #tpu.memory_space<vmem>>, vector<128x128xbf16>
    %cst = arith.constant dense<0.000000e+00> : vector<16x128xf32>
    %6 = tpu.matmul %4, %5, %cst {dimension_numbers = #tpu.dot_dimension_numbers<[1], [0], [0], [1], [0, 0, 1, 1], [], []>} : vector<16x128xbf16>, vector<128x128xbf16>, vector<16x128xf32> -> vector<16x128xf32>
    %7 = arith.addf %3, %6 : vector<16x128xf32>
    %c0_6 = arith.constant 0 : index
    %c0_7 = arith.constant 0 : index
    %8 = vector.load %arg9[%c0_6, %c0_7] : memref<16x128xf32, #tpu.memory_space<vmem>>, vector<16x128xf32>
    tpu.vector_store %arg9[%c0_6, %c0_7], %7 {strides = array<i32>} : memref<16x128xf32, #tpu.memory_space<vmem>>, vector<16x128xf32>,
    %c8_i32 = arith.constant 8 : i32
    %9 = arith.cmpi eq, %arg2, %c8_i32 : i32
    %10 = arith.extui %9 : i1 to i32
    %c0_i32_8 = arith.constant 0 : i32
    %11 = arith.cmpi ne, %10, %c0_i32_8 : i32
    scf.if %11 {
      %c0_9 = arith.constant 0 : index
      %c0_10 = arith.constant 0 : index
      %12 = vector.load %arg9[%c0_9, %c0_10] : memref<16x128xf32, #tpu.memory_space<vmem>>, vector<16x128xf32>
      %c0_11 = arith.constant 0 : index
      %c0_12 = arith.constant 0 : index
      %13 = vector.load %arg5[%c0_11, %c0_12] : memref<1x128xf32, #tpu.memory_space<vmem>>, vector<1x128xf32>
      %14 = vector.broadcast %13 : vector<1x128xf32> to vector<16x128xf32>
      %15 = arith.mulf %12, %14 : vector<16x128xf32>
      %c0_13 = arith.constant 0 : index
      %c0_14 = arith.constant 0 : index
      %16 = vector.load %arg6[%c0_13, %c0_14] : memref<1x128xf32, #tpu.memory_space<vmem>>, vector<1x128xf32>
      %17 = vector.broadcast %16 : vector<1x128xf32> to vector<16x128xf32>
      %18 = arith.addf %15, %17 : vector<16x128xf32>
      %c0_15 = arith.constant 0 : index
      %c0_16 = arith.constant 0 : index
      %19 = vector.load %arg7[%c0_15, %c0_16] : memref<16x128xbf16, #tpu.memory_space<vmem>>, vector<16x128xbf16>
      %20 = arith.extf %19 : vector<16x128xbf16> to vector<16x128xf32>
      %21 = arith.addf %18, %20 : vector<16x128xf32>
      %cst_17 = arith.constant 0.000000e+00 : f32
      %22 = vector.broadcast %cst_17 : f32 to vector<16x128xf32>
      %23 = arith.maximumf %21, %22 : vector<16x128xf32>
      %24 = arith.truncf %23 : vector<16x128xf32> to vector<16x128xbf16>
      %c0_18 = arith.constant 0 : index
      %c0_19 = arith.constant 0 : index
      %25 = vector.load %arg8[%c0_18, %c0_19] : memref<16x128xbf16, #tpu.memory_space<vmem>>, vector<16x128xbf16>
      tpu.vector_store %arg8[%c0_18, %c0_19], %24 {strides = array<i32>} : memref<16x128xbf16, #tpu.memory_space<vmem>>, vector<16x128xbf16>,
    } else {
    }
    return
  }
  func.func @transform_0(%arg0: i32, %arg1: i32, %arg2: i32) -> (i32, i32) {
    %c0_i32 = arith.constant 0 : i32
    return %arg0, %arg2 : i32, i32
  }
  func.func @transform_1(%arg0: i32, %arg1: i32, %arg2: i32) -> (i32, i32) {
    %c0_i32 = arith.constant 0 : i32
    return %arg2, %arg1 : i32, i32
  }
  func.func @transform_2(%arg0: i32, %arg1: i32, %arg2: i32) -> (i32, i32) {
    %c0_i32 = arith.constant 0 : i32
    %c0_i32_0 = arith.constant 0 : i32
    return %c0_i32, %arg1 : i32, i32
  }
  func.func @transform_3(%arg0: i32, %arg1: i32, %arg2: i32) -> (i32, i32) {
    %c0_i32 = arith.constant 0 : i32
    %c0_i32_0 = arith.constant 0 : i32
    return %c0_i32, %arg1 : i32, i32
  }
  func.func @transform_4(%arg0: i32, %arg1: i32, %arg2: i32) -> (i32, i32) {
    %c0_i32 = arith.constant 0 : i32
    return %arg0, %arg1 : i32, i32
  }
  func.func @transform_5(%arg0: i32, %arg1: i32, %arg2: i32) -> (i32, i32) {
    %c0_i32 = arith.constant 0 : i32
    return %arg0, %arg1 : i32, i32
  }
}

module attributes {stable_mosaic.version = 11 : i64} {
  func.func @_matmul_bn_kernel(%arg0: i32, %arg1: i32, %arg2: i32, %arg3: memref<16x128xbf16, #tpu.memory_space<vmem>>, %arg4: memref<128x128xbf16, #tpu.memory_space<vmem>>, %arg5: memref<1x128xf32, #tpu.memory_space<vmem>>, %arg6: memref<1x128xf32, #tpu.memory_space<vmem>>, %arg7: memref<16x128xbf16, #tpu.memory_space<vmem>>, %arg8: memref<16x128xf32, #tpu.memory_space<vmem>>) attributes {dimension_semantics = [#tpu.dimension_semantics<parallel>, #tpu.dimension_semantics<parallel>, #tpu.dimension_semantics<arbitrary>], iteration_bounds = array<i64: 1, 1, 9>, scalar_prefetch = 0 : i64, scratch_operands = 1 : i64, tpu.core_type = #tpu.core_type<tc>, window_params = [{transform_indices = @transform_0, window_bounds = array<i64: 16, 128>}, {transform_indices = @transform_1, window_bounds = array<i64: 128, 128>}, {transform_indices = @transform_2, window_bounds = array<i64: 1, 128>}, {transform_indices = @transform_3, window_bounds = array<i64: 1, 128>}, {transform_indices = @transform_4, window_bounds = array<i64: 16, 128>}]} {
    %c0_i32 = arith.constant 0 : i32
    %0 = arith.cmpi eq, %arg2, %c0_i32 : i32
    %1 = arith.extui %0 : i1 to i32
    %c0_i32_0 = arith.constant 0 : i32
    %2 = arith.cmpi ne, %1, %c0_i32_0 : i32
    scf.if %2 {
      %cst_9 = arith.constant 0.000000e+00 : f32
      %12 = vector.broadcast %cst_9 : f32 to vector<16x128xf32>
      %c0_10 = arith.constant 0 : index
      %c0_11 = arith.constant 0 : index
      %13 = vector.load %arg8[%c0_10, %c0_11] : memref<16x128xf32, #tpu.memory_space<vmem>>, vector<16x128xf32>
      tpu.vector_store %arg8[%c0_10, %c0_11], %12 {strides = array<i32>} : memref<16x128xf32, #tpu.memory_space<vmem>>, vector<16x128xf32>,
    } else {
    }
    %c0 = arith.constant 0 : index
    %c0_1 = arith.constant 0 : index
    %3 = vector.load %arg8[%c0, %c0_1] : memref<16x128xf32, #tpu.memory_space<vmem>>, vector<16x128xf32>
    %c0_2 = arith.constant 0 : index
    %c0_3 = arith.constant 0 : index
    %4 = vector.load %arg3[%c0_2, %c0_3] : memref<16x128xbf16, #tpu.memory_space<vmem>>, vector<16x128xbf16>
    %c0_4 = arith.constant 0 : index
    %c0_5 = arith.constant 0 : index
    %5 = vector.load %arg4[%c0_4, %c0_5] : memref<128x128xbf16, #tpu.memory_space<vmem>>, vector<128x128xbf16>
    %cst = arith.constant dense<0.000000e+00> : vector<16x128xf32>
    %6 = tpu.matmul %4, %5, %cst {dimension_numbers = #tpu.dot_dimension_numbers<[1], [0], [0], [1], [0, 0, 1, 1], [], []>} : vector<16x128xbf16>, vector<128x128xbf16>, vector<16x128xf32> -> vector<16x128xf32>
    %7 = arith.addf %3, %6 : vector<16x128xf32>
    %c0_6 = arith.constant 0 : index
    %c0_7 = arith.constant 0 : index
    %8 = vector.load %arg8[%c0_6, %c0_7] : memref<16x128xf32, #tpu.memory_space<vmem>>, vector<16x128xf32>
    tpu.vector_store %arg8[%c0_6, %c0_7], %7 {strides = array<i32>} : memref<16x128xf32, #tpu.memory_space<vmem>>, vector<16x128xf32>,
    %c8_i32 = arith.constant 8 : i32
    %9 = arith.cmpi eq, %arg2, %c8_i32 : i32
    %10 = arith.extui %9 : i1 to i32
    %c0_i32_8 = arith.constant 0 : i32
    %11 = arith.cmpi ne, %10, %c0_i32_8 : i32
    scf.if %11 {
      %c0_9 = arith.constant 0 : index
      %c0_10 = arith.constant 0 : index
      %12 = vector.load %arg8[%c0_9, %c0_10] : memref<16x128xf32, #tpu.memory_space<vmem>>, vector<16x128xf32>
      %c0_11 = arith.constant 0 : index
      %c0_12 = arith.constant 0 : index
      %13 = vector.load %arg5[%c0_11, %c0_12] : memref<1x128xf32, #tpu.memory_space<vmem>>, vector<1x128xf32>
      %14 = vector.broadcast %13 : vector<1x128xf32> to vector<16x128xf32>
      %15 = arith.mulf %12, %14 : vector<16x128xf32>
      %c0_13 = arith.constant 0 : index
      %c0_14 = arith.constant 0 : index
      %16 = vector.load %arg6[%c0_13, %c0_14] : memref<1x128xf32, #tpu.memory_space<vmem>>, vector<1x128xf32>
      %17 = vector.broadcast %16 : vector<1x128xf32> to vector<16x128xf32>
      %18 = arith.addf %15, %17 : vector<16x128xf32>
      %cst_15 = arith.constant 0.000000e+00 : f32
      %19 = vector.broadcast %cst_15 : f32 to vector<16x128xf32>
      %20 = arith.maximumf %18, %19 : vector<16x128xf32>
      %21 = arith.truncf %20 : vector<16x128xf32> to vector<16x128xbf16>
      %c0_16 = arith.constant 0 : index
      %c0_17 = arith.constant 0 : index
      %22 = vector.load %arg7[%c0_16, %c0_17] : memref<16x128xbf16, #tpu.memory_space<vmem>>, vector<16x128xbf16>
      tpu.vector_store %arg7[%c0_16, %c0_17], %21 {strides = array<i32>} : memref<16x128xbf16, #tpu.memory_space<vmem>>, vector<16x128xbf16>,
    } else {
    }
    return
  }
  func.func @transform_0(%arg0: i32, %arg1: i32, %arg2: i32) -> (i32, i32) {
    %c0_i32 = arith.constant 0 : i32
    return %arg0, %arg2 : i32, i32
  }
  func.func @transform_1(%arg0: i32, %arg1: i32, %arg2: i32) -> (i32, i32) {
    %c0_i32 = arith.constant 0 : i32
    return %arg2, %arg1 : i32, i32
  }
  func.func @transform_2(%arg0: i32, %arg1: i32, %arg2: i32) -> (i32, i32) {
    %c0_i32 = arith.constant 0 : i32
    %c0_i32_0 = arith.constant 0 : i32
    return %c0_i32, %arg1 : i32, i32
  }
  func.func @transform_3(%arg0: i32, %arg1: i32, %arg2: i32) -> (i32, i32) {
    %c0_i32 = arith.constant 0 : i32
    %c0_i32_0 = arith.constant 0 : i32
    return %c0_i32, %arg1 : i32, i32
  }
  func.func @transform_4(%arg0: i32, %arg1: i32, %arg2: i32) -> (i32, i32) {
    %c0_i32 = arith.constant 0 : i32
    return %arg0, %arg1 : i32, i32
  }
}

module attributes {stable_mosaic.version = 11 : i64} {
  func.func @_matmul_bn_kernel(%arg0: i32, %arg1: i32, %arg2: i32, %arg3: memref<16x128xbf16, #tpu.memory_space<vmem>>, %arg4: memref<128x256xbf16, #tpu.memory_space<vmem>>, %arg5: memref<1x256xf32, #tpu.memory_space<vmem>>, %arg6: memref<1x256xf32, #tpu.memory_space<vmem>>, %arg7: memref<16x256xbf16, #tpu.memory_space<vmem>>, %arg8: memref<16x256xf32, #tpu.memory_space<vmem>>) attributes {dimension_semantics = [#tpu.dimension_semantics<parallel>, #tpu.dimension_semantics<parallel>, #tpu.dimension_semantics<arbitrary>], iteration_bounds = array<i64: 1, 1, 9>, scalar_prefetch = 0 : i64, scratch_operands = 1 : i64, tpu.core_type = #tpu.core_type<tc>, window_params = [{transform_indices = @transform_0, window_bounds = array<i64: 16, 128>}, {transform_indices = @transform_1, window_bounds = array<i64: 128, 256>}, {transform_indices = @transform_2, window_bounds = array<i64: 1, 256>}, {transform_indices = @transform_3, window_bounds = array<i64: 1, 256>}, {transform_indices = @transform_4, window_bounds = array<i64: 16, 256>}]} {
    %c0_i32 = arith.constant 0 : i32
    %0 = arith.cmpi eq, %arg2, %c0_i32 : i32
    %1 = arith.extui %0 : i1 to i32
    %c0_i32_0 = arith.constant 0 : i32
    %2 = arith.cmpi ne, %1, %c0_i32_0 : i32
    scf.if %2 {
      %cst_9 = arith.constant 0.000000e+00 : f32
      %12 = vector.broadcast %cst_9 : f32 to vector<16x256xf32>
      %c0_10 = arith.constant 0 : index
      %c0_11 = arith.constant 0 : index
      %13 = vector.load %arg8[%c0_10, %c0_11] : memref<16x256xf32, #tpu.memory_space<vmem>>, vector<16x256xf32>
      tpu.vector_store %arg8[%c0_10, %c0_11], %12 {strides = array<i32>} : memref<16x256xf32, #tpu.memory_space<vmem>>, vector<16x256xf32>,
    } else {
    }
    %c0 = arith.constant 0 : index
    %c0_1 = arith.constant 0 : index
    %3 = vector.load %arg8[%c0, %c0_1] : memref<16x256xf32, #tpu.memory_space<vmem>>, vector<16x256xf32>
    %c0_2 = arith.constant 0 : index
    %c0_3 = arith.constant 0 : index
    %4 = vector.load %arg3[%c0_2, %c0_3] : memref<16x128xbf16, #tpu.memory_space<vmem>>, vector<16x128xbf16>
    %c0_4 = arith.constant 0 : index
    %c0_5 = arith.constant 0 : index
    %5 = vector.load %arg4[%c0_4, %c0_5] : memref<128x256xbf16, #tpu.memory_space<vmem>>, vector<128x256xbf16>
    %cst = arith.constant dense<0.000000e+00> : vector<16x256xf32>
    %6 = tpu.matmul %4, %5, %cst {dimension_numbers = #tpu.dot_dimension_numbers<[1], [0], [0], [1], [0, 0, 1, 1], [], []>} : vector<16x128xbf16>, vector<128x256xbf16>, vector<16x256xf32> -> vector<16x256xf32>
    %7 = arith.addf %3, %6 : vector<16x256xf32>
    %c0_6 = arith.constant 0 : index
    %c0_7 = arith.constant 0 : index
    %8 = vector.load %arg8[%c0_6, %c0_7] : memref<16x256xf32, #tpu.memory_space<vmem>>, vector<16x256xf32>
    tpu.vector_store %arg8[%c0_6, %c0_7], %7 {strides = array<i32>} : memref<16x256xf32, #tpu.memory_space<vmem>>, vector<16x256xf32>,
    %c8_i32 = arith.constant 8 : i32
    %9 = arith.cmpi eq, %arg2, %c8_i32 : i32
    %10 = arith.extui %9 : i1 to i32
    %c0_i32_8 = arith.constant 0 : i32
    %11 = arith.cmpi ne, %10, %c0_i32_8 : i32
    scf.if %11 {
      %c0_9 = arith.constant 0 : index
      %c0_10 = arith.constant 0 : index
      %12 = vector.load %arg8[%c0_9, %c0_10] : memref<16x256xf32, #tpu.memory_space<vmem>>, vector<16x256xf32>
      %c0_11 = arith.constant 0 : index
      %c0_12 = arith.constant 0 : index
      %13 = vector.load %arg5[%c0_11, %c0_12] : memref<1x256xf32, #tpu.memory_space<vmem>>, vector<1x256xf32>
      %14 = vector.broadcast %13 : vector<1x256xf32> to vector<16x256xf32>
      %15 = arith.mulf %12, %14 : vector<16x256xf32>
      %c0_13 = arith.constant 0 : index
      %c0_14 = arith.constant 0 : index
      %16 = vector.load %arg6[%c0_13, %c0_14] : memref<1x256xf32, #tpu.memory_space<vmem>>, vector<1x256xf32>
      %17 = vector.broadcast %16 : vector<1x256xf32> to vector<16x256xf32>
      %18 = arith.addf %15, %17 : vector<16x256xf32>
      %cst_15 = arith.constant 0.000000e+00 : f32
      %19 = vector.broadcast %cst_15 : f32 to vector<16x256xf32>
      %20 = arith.maximumf %18, %19 : vector<16x256xf32>
      %21 = arith.truncf %20 : vector<16x256xf32> to vector<16x256xbf16>
      %c0_16 = arith.constant 0 : index
      %c0_17 = arith.constant 0 : index
      %22 = vector.load %arg7[%c0_16, %c0_17] : memref<16x256xbf16, #tpu.memory_space<vmem>>, vector<16x256xbf16>
      tpu.vector_store %arg7[%c0_16, %c0_17], %21 {strides = array<i32>} : memref<16x256xbf16, #tpu.memory_space<vmem>>, vector<16x256xbf16>,
    } else {
    }
    return
  }
  func.func @transform_0(%arg0: i32, %arg1: i32, %arg2: i32) -> (i32, i32) {
    %c0_i32 = arith.constant 0 : i32
    return %arg0, %arg2 : i32, i32
  }
  func.func @transform_1(%arg0: i32, %arg1: i32, %arg2: i32) -> (i32, i32) {
    %c0_i32 = arith.constant 0 : i32
    return %arg2, %arg1 : i32, i32
  }
  func.func @transform_2(%arg0: i32, %arg1: i32, %arg2: i32) -> (i32, i32) {
    %c0_i32 = arith.constant 0 : i32
    %c0_i32_0 = arith.constant 0 : i32
    return %c0_i32, %arg1 : i32, i32
  }
  func.func @transform_3(%arg0: i32, %arg1: i32, %arg2: i32) -> (i32, i32) {
    %c0_i32 = arith.constant 0 : i32
    %c0_i32_0 = arith.constant 0 : i32
    return %c0_i32, %arg1 : i32, i32
  }
  func.func @transform_4(%arg0: i32, %arg1: i32, %arg2: i32) -> (i32, i32) {
    %c0_i32 = arith.constant 0 : i32
    return %arg0, %arg1 : i32, i32
  }
}

module attributes {stable_mosaic.version = 11 : i64} {
  func.func @_matmul_bn_kernel(%arg0: i32, %arg1: i32, %arg2: i32, %arg3: memref<16x256xbf16, #tpu.memory_space<vmem>>, %arg4: memref<256x256xbf16, #tpu.memory_space<vmem>>, %arg5: memref<1x256xf32, #tpu.memory_space<vmem>>, %arg6: memref<1x256xf32, #tpu.memory_space<vmem>>, %arg7: memref<16x256xbf16, #tpu.memory_space<vmem>>, %arg8: memref<16x256xf32, #tpu.memory_space<vmem>>) attributes {dimension_semantics = [#tpu.dimension_semantics<parallel>, #tpu.dimension_semantics<parallel>, #tpu.dimension_semantics<arbitrary>], iteration_bounds = array<i64: 1, 1, 9>, scalar_prefetch = 0 : i64, scratch_operands = 1 : i64, tpu.core_type = #tpu.core_type<tc>, window_params = [{transform_indices = @transform_0, window_bounds = array<i64: 16, 256>}, {transform_indices = @transform_1, window_bounds = array<i64: 256, 256>}, {transform_indices = @transform_2, window_bounds = array<i64: 1, 256>}, {transform_indices = @transform_3, window_bounds = array<i64: 1, 256>}, {transform_indices = @transform_4, window_bounds = array<i64: 16, 256>}]} {
    %c0_i32 = arith.constant 0 : i32
    %0 = arith.cmpi eq, %arg2, %c0_i32 : i32
    %1 = arith.extui %0 : i1 to i32
    %c0_i32_0 = arith.constant 0 : i32
    %2 = arith.cmpi ne, %1, %c0_i32_0 : i32
    scf.if %2 {
      %cst_9 = arith.constant 0.000000e+00 : f32
      %12 = vector.broadcast %cst_9 : f32 to vector<16x256xf32>
      %c0_10 = arith.constant 0 : index
      %c0_11 = arith.constant 0 : index
      %13 = vector.load %arg8[%c0_10, %c0_11] : memref<16x256xf32, #tpu.memory_space<vmem>>, vector<16x256xf32>
      tpu.vector_store %arg8[%c0_10, %c0_11], %12 {strides = array<i32>} : memref<16x256xf32, #tpu.memory_space<vmem>>, vector<16x256xf32>,
    } else {
    }
    %c0 = arith.constant 0 : index
    %c0_1 = arith.constant 0 : index
    %3 = vector.load %arg8[%c0, %c0_1] : memref<16x256xf32, #tpu.memory_space<vmem>>, vector<16x256xf32>
    %c0_2 = arith.constant 0 : index
    %c0_3 = arith.constant 0 : index
    %4 = vector.load %arg3[%c0_2, %c0_3] : memref<16x256xbf16, #tpu.memory_space<vmem>>, vector<16x256xbf16>
    %c0_4 = arith.constant 0 : index
    %c0_5 = arith.constant 0 : index
    %5 = vector.load %arg4[%c0_4, %c0_5] : memref<256x256xbf16, #tpu.memory_space<vmem>>, vector<256x256xbf16>
    %cst = arith.constant dense<0.000000e+00> : vector<16x256xf32>
    %6 = tpu.matmul %4, %5, %cst {dimension_numbers = #tpu.dot_dimension_numbers<[1], [0], [0], [1], [0, 0, 1, 1], [], []>} : vector<16x256xbf16>, vector<256x256xbf16>, vector<16x256xf32> -> vector<16x256xf32>
    %7 = arith.addf %3, %6 : vector<16x256xf32>
    %c0_6 = arith.constant 0 : index
    %c0_7 = arith.constant 0 : index
    %8 = vector.load %arg8[%c0_6, %c0_7] : memref<16x256xf32, #tpu.memory_space<vmem>>, vector<16x256xf32>
    tpu.vector_store %arg8[%c0_6, %c0_7], %7 {strides = array<i32>} : memref<16x256xf32, #tpu.memory_space<vmem>>, vector<16x256xf32>,
    %c8_i32 = arith.constant 8 : i32
    %9 = arith.cmpi eq, %arg2, %c8_i32 : i32
    %10 = arith.extui %9 : i1 to i32
    %c0_i32_8 = arith.constant 0 : i32
    %11 = arith.cmpi ne, %10, %c0_i32_8 : i32
    scf.if %11 {
      %c0_9 = arith.constant 0 : index
      %c0_10 = arith.constant 0 : index
      %12 = vector.load %arg8[%c0_9, %c0_10] : memref<16x256xf32, #tpu.memory_space<vmem>>, vector<16x256xf32>
      %c0_11 = arith.constant 0 : index
      %c0_12 = arith.constant 0 : index
      %13 = vector.load %arg5[%c0_11, %c0_12] : memref<1x256xf32, #tpu.memory_space<vmem>>, vector<1x256xf32>
      %14 = vector.broadcast %13 : vector<1x256xf32> to vector<16x256xf32>
      %15 = arith.mulf %12, %14 : vector<16x256xf32>
      %c0_13 = arith.constant 0 : index
      %c0_14 = arith.constant 0 : index
      %16 = vector.load %arg6[%c0_13, %c0_14] : memref<1x256xf32, #tpu.memory_space<vmem>>, vector<1x256xf32>
      %17 = vector.broadcast %16 : vector<1x256xf32> to vector<16x256xf32>
      %18 = arith.addf %15, %17 : vector<16x256xf32>
      %cst_15 = arith.constant 0.000000e+00 : f32
      %19 = vector.broadcast %cst_15 : f32 to vector<16x256xf32>
      %20 = arith.maximumf %18, %19 : vector<16x256xf32>
      %21 = arith.truncf %20 : vector<16x256xf32> to vector<16x256xbf16>
      %c0_16 = arith.constant 0 : index
      %c0_17 = arith.constant 0 : index
      %22 = vector.load %arg7[%c0_16, %c0_17] : memref<16x256xbf16, #tpu.memory_space<vmem>>, vector<16x256xbf16>
      tpu.vector_store %arg7[%c0_16, %c0_17], %21 {strides = array<i32>} : memref<16x256xbf16, #tpu.memory_space<vmem>>, vector<16x256xbf16>,
    } else {
    }
    return
  }
  func.func @transform_0(%arg0: i32, %arg1: i32, %arg2: i32) -> (i32, i32) {
    %c0_i32 = arith.constant 0 : i32
    return %arg0, %arg2 : i32, i32
  }
  func.func @transform_1(%arg0: i32, %arg1: i32, %arg2: i32) -> (i32, i32) {
    %c0_i32 = arith.constant 0 : i32
    return %arg2, %arg1 : i32, i32
  }
  func.func @transform_2(%arg0: i32, %arg1: i32, %arg2: i32) -> (i32, i32) {
    %c0_i32 = arith.constant 0 : i32
    %c0_i32_0 = arith.constant 0 : i32
    return %c0_i32, %arg1 : i32, i32
  }
  func.func @transform_3(%arg0: i32, %arg1: i32, %arg2: i32) -> (i32, i32) {
    %c0_i32 = arith.constant 0 : i32
    %c0_i32_0 = arith.constant 0 : i32
    return %c0_i32, %arg1 : i32, i32
  }
  func.func @transform_4(%arg0: i32, %arg1: i32, %arg2: i32) -> (i32, i32) {
    %c0_i32 = arith.constant 0 : i32
    return %arg0, %arg1 : i32, i32
  }
}

module attributes {stable_mosaic.version = 11 : i64} {
  func.func @_matmul_bn_kernel(%arg0: i32, %arg1: i32, %arg2: i32, %arg3: memref<16x256xbf16, #tpu.memory_space<vmem>>, %arg4: memref<256x256xbf16, #tpu.memory_space<vmem>>, %arg5: memref<1x256xf32, #tpu.memory_space<vmem>>, %arg6: memref<1x256xf32, #tpu.memory_space<vmem>>, %arg7: memref<16x256xbf16, #tpu.memory_space<vmem>>, %arg8: memref<16x256xf32, #tpu.memory_space<vmem>>) attributes {dimension_semantics = [#tpu.dimension_semantics<parallel>, #tpu.dimension_semantics<parallel>, #tpu.dimension_semantics<arbitrary>], iteration_bounds = array<i64: 1, 2, 9>, scalar_prefetch = 0 : i64, scratch_operands = 1 : i64, tpu.core_type = #tpu.core_type<tc>, window_params = [{transform_indices = @transform_0, window_bounds = array<i64: 16, 256>}, {transform_indices = @transform_1, window_bounds = array<i64: 256, 256>}, {transform_indices = @transform_2, window_bounds = array<i64: 1, 256>}, {transform_indices = @transform_3, window_bounds = array<i64: 1, 256>}, {transform_indices = @transform_4, window_bounds = array<i64: 16, 256>}]} {
    %c0_i32 = arith.constant 0 : i32
    %0 = arith.cmpi eq, %arg2, %c0_i32 : i32
    %1 = arith.extui %0 : i1 to i32
    %c0_i32_0 = arith.constant 0 : i32
    %2 = arith.cmpi ne, %1, %c0_i32_0 : i32
    scf.if %2 {
      %cst_9 = arith.constant 0.000000e+00 : f32
      %12 = vector.broadcast %cst_9 : f32 to vector<16x256xf32>
      %c0_10 = arith.constant 0 : index
      %c0_11 = arith.constant 0 : index
      %13 = vector.load %arg8[%c0_10, %c0_11] : memref<16x256xf32, #tpu.memory_space<vmem>>, vector<16x256xf32>
      tpu.vector_store %arg8[%c0_10, %c0_11], %12 {strides = array<i32>} : memref<16x256xf32, #tpu.memory_space<vmem>>, vector<16x256xf32>,
    } else {
    }
    %c0 = arith.constant 0 : index
    %c0_1 = arith.constant 0 : index
    %3 = vector.load %arg8[%c0, %c0_1] : memref<16x256xf32, #tpu.memory_space<vmem>>, vector<16x256xf32>
    %c0_2 = arith.constant 0 : index
    %c0_3 = arith.constant 0 : index
    %4 = vector.load %arg3[%c0_2, %c0_3] : memref<16x256xbf16, #tpu.memory_space<vmem>>, vector<16x256xbf16>
    %c0_4 = arith.constant 0 : index
    %c0_5 = arith.constant 0 : index
    %5 = vector.load %arg4[%c0_4, %c0_5] : memref<256x256xbf16, #tpu.memory_space<vmem>>, vector<256x256xbf16>
    %cst = arith.constant dense<0.000000e+00> : vector<16x256xf32>
    %6 = tpu.matmul %4, %5, %cst {dimension_numbers = #tpu.dot_dimension_numbers<[1], [0], [0], [1], [0, 0, 1, 1], [], []>} : vector<16x256xbf16>, vector<256x256xbf16>, vector<16x256xf32> -> vector<16x256xf32>
    %7 = arith.addf %3, %6 : vector<16x256xf32>
    %c0_6 = arith.constant 0 : index
    %c0_7 = arith.constant 0 : index
    %8 = vector.load %arg8[%c0_6, %c0_7] : memref<16x256xf32, #tpu.memory_space<vmem>>, vector<16x256xf32>
    tpu.vector_store %arg8[%c0_6, %c0_7], %7 {strides = array<i32>} : memref<16x256xf32, #tpu.memory_space<vmem>>, vector<16x256xf32>,
    %c8_i32 = arith.constant 8 : i32
    %9 = arith.cmpi eq, %arg2, %c8_i32 : i32
    %10 = arith.extui %9 : i1 to i32
    %c0_i32_8 = arith.constant 0 : i32
    %11 = arith.cmpi ne, %10, %c0_i32_8 : i32
    scf.if %11 {
      %c0_9 = arith.constant 0 : index
      %c0_10 = arith.constant 0 : index
      %12 = vector.load %arg8[%c0_9, %c0_10] : memref<16x256xf32, #tpu.memory_space<vmem>>, vector<16x256xf32>
      %c0_11 = arith.constant 0 : index
      %c0_12 = arith.constant 0 : index
      %13 = vector.load %arg5[%c0_11, %c0_12] : memref<1x256xf32, #tpu.memory_space<vmem>>, vector<1x256xf32>
      %14 = vector.broadcast %13 : vector<1x256xf32> to vector<16x256xf32>
      %15 = arith.mulf %12, %14 : vector<16x256xf32>
      %c0_13 = arith.constant 0 : index
      %c0_14 = arith.constant 0 : index
      %16 = vector.load %arg6[%c0_13, %c0_14] : memref<1x256xf32, #tpu.memory_space<vmem>>, vector<1x256xf32>
      %17 = vector.broadcast %16 : vector<1x256xf32> to vector<16x256xf32>
      %18 = arith.addf %15, %17 : vector<16x256xf32>
      %cst_15 = arith.constant 0.000000e+00 : f32
      %19 = vector.broadcast %cst_15 : f32 to vector<16x256xf32>
      %20 = arith.maximumf %18, %19 : vector<16x256xf32>
      %21 = arith.truncf %20 : vector<16x256xf32> to vector<16x256xbf16>
      %c0_16 = arith.constant 0 : index
      %c0_17 = arith.constant 0 : index
      %22 = vector.load %arg7[%c0_16, %c0_17] : memref<16x256xbf16, #tpu.memory_space<vmem>>, vector<16x256xbf16>
      tpu.vector_store %arg7[%c0_16, %c0_17], %21 {strides = array<i32>} : memref<16x256xbf16, #tpu.memory_space<vmem>>, vector<16x256xbf16>,
    } else {
    }
    return
  }
  func.func @transform_0(%arg0: i32, %arg1: i32, %arg2: i32) -> (i32, i32) {
    %c0_i32 = arith.constant 0 : i32
    return %arg0, %arg2 : i32, i32
  }
  func.func @transform_1(%arg0: i32, %arg1: i32, %arg2: i32) -> (i32, i32) {
    %c0_i32 = arith.constant 0 : i32
    return %arg2, %arg1 : i32, i32
  }
  func.func @transform_2(%arg0: i32, %arg1: i32, %arg2: i32) -> (i32, i32) {
    %c0_i32 = arith.constant 0 : i32
    %c0_i32_0 = arith.constant 0 : i32
    return %c0_i32, %arg1 : i32, i32
  }
  func.func @transform_3(%arg0: i32, %arg1: i32, %arg2: i32) -> (i32, i32) {
    %c0_i32 = arith.constant 0 : i32
    %c0_i32_0 = arith.constant 0 : i32
    return %c0_i32, %arg1 : i32, i32
  }
  func.func @transform_4(%arg0: i32, %arg1: i32, %arg2: i32) -> (i32, i32) {
    %c0_i32 = arith.constant 0 : i32
    return %arg0, %arg1 : i32, i32
  }
}

module attributes {stable_mosaic.version = 11 : i64} {
  func.func @_matmul_bn_kernel(%arg0: i32, %arg1: i32, %arg2: i32, %arg3: memref<16x128xbf16, #tpu.memory_space<vmem>>, %arg4: memref<128x256xbf16, #tpu.memory_space<vmem>>, %arg5: memref<1x256xf32, #tpu.memory_space<vmem>>, %arg6: memref<1x256xf32, #tpu.memory_space<vmem>>, %arg7: memref<16x256xbf16, #tpu.memory_space<vmem>>, %arg8: memref<16x256xf32, #tpu.memory_space<vmem>>) attributes {dimension_semantics = [#tpu.dimension_semantics<parallel>, #tpu.dimension_semantics<parallel>, #tpu.dimension_semantics<arbitrary>], iteration_bounds = array<i64: 1, 1, 1>, scalar_prefetch = 0 : i64, scratch_operands = 1 : i64, tpu.core_type = #tpu.core_type<tc>, window_params = [{transform_indices = @transform_0, window_bounds = array<i64: 16, 128>}, {transform_indices = @transform_1, window_bounds = array<i64: 128, 256>}, {transform_indices = @transform_2, window_bounds = array<i64: 1, 256>}, {transform_indices = @transform_3, window_bounds = array<i64: 1, 256>}, {transform_indices = @transform_4, window_bounds = array<i64: 16, 256>}]} {
    %c0_i32 = arith.constant 0 : i32
    %0 = arith.cmpi eq, %arg2, %c0_i32 : i32
    %1 = arith.extui %0 : i1 to i32
    %c0_i32_0 = arith.constant 0 : i32
    %2 = arith.cmpi ne, %1, %c0_i32_0 : i32
    scf.if %2 {
      %cst_10 = arith.constant 0.000000e+00 : f32
      %12 = vector.broadcast %cst_10 : f32 to vector<16x256xf32>
      %c0_11 = arith.constant 0 : index
      %c0_12 = arith.constant 0 : index
      %13 = vector.load %arg8[%c0_11, %c0_12] : memref<16x256xf32, #tpu.memory_space<vmem>>, vector<16x256xf32>
      tpu.vector_store %arg8[%c0_11, %c0_12], %12 {strides = array<i32>} : memref<16x256xf32, #tpu.memory_space<vmem>>, vector<16x256xf32>,
    } else {
    }
    %c0 = arith.constant 0 : index
    %c0_1 = arith.constant 0 : index
    %3 = vector.load %arg8[%c0, %c0_1] : memref<16x256xf32, #tpu.memory_space<vmem>>, vector<16x256xf32>
    %c0_2 = arith.constant 0 : index
    %c0_3 = arith.constant 0 : index
    %4 = vector.load %arg3[%c0_2, %c0_3] : memref<16x128xbf16, #tpu.memory_space<vmem>>, vector<16x128xbf16>
    %c0_4 = arith.constant 0 : index
    %c0_5 = arith.constant 0 : index
    %5 = vector.load %arg4[%c0_4, %c0_5] : memref<128x256xbf16, #tpu.memory_space<vmem>>, vector<128x256xbf16>
    %cst = arith.constant dense<0.000000e+00> : vector<16x256xf32>
    %6 = tpu.matmul %4, %5, %cst {dimension_numbers = #tpu.dot_dimension_numbers<[1], [0], [0], [1], [0, 0, 1, 1], [], []>} : vector<16x128xbf16>, vector<128x256xbf16>, vector<16x256xf32> -> vector<16x256xf32>
    %7 = arith.addf %3, %6 : vector<16x256xf32>
    %c0_6 = arith.constant 0 : index
    %c0_7 = arith.constant 0 : index
    %8 = vector.load %arg8[%c0_6, %c0_7] : memref<16x256xf32, #tpu.memory_space<vmem>>, vector<16x256xf32>
    tpu.vector_store %arg8[%c0_6, %c0_7], %7 {strides = array<i32>} : memref<16x256xf32, #tpu.memory_space<vmem>>, vector<16x256xf32>,
    %c0_i32_8 = arith.constant 0 : i32
    %9 = arith.cmpi eq, %arg2, %c0_i32_8 : i32
    %10 = arith.extui %9 : i1 to i32
    %c0_i32_9 = arith.constant 0 : i32
    %11 = arith.cmpi ne, %10, %c0_i32_9 : i32
    scf.if %11 {
      %c0_10 = arith.constant 0 : index
      %c0_11 = arith.constant 0 : index
      %12 = vector.load %arg8[%c0_10, %c0_11] : memref<16x256xf32, #tpu.memory_space<vmem>>, vector<16x256xf32>
      %c0_12 = arith.constant 0 : index
      %c0_13 = arith.constant 0 : index
      %13 = vector.load %arg5[%c0_12, %c0_13] : memref<1x256xf32, #tpu.memory_space<vmem>>, vector<1x256xf32>
      %14 = vector.broadcast %13 : vector<1x256xf32> to vector<16x256xf32>
      %15 = arith.mulf %12, %14 : vector<16x256xf32>
      %c0_14 = arith.constant 0 : index
      %c0_15 = arith.constant 0 : index
      %16 = vector.load %arg6[%c0_14, %c0_15] : memref<1x256xf32, #tpu.memory_space<vmem>>, vector<1x256xf32>
      %17 = vector.broadcast %16 : vector<1x256xf32> to vector<16x256xf32>
      %18 = arith.addf %15, %17 : vector<16x256xf32>
      %19 = arith.truncf %18 : vector<16x256xf32> to vector<16x256xbf16>
      %c0_16 = arith.constant 0 : index
      %c0_17 = arith.constant 0 : index
      %20 = vector.load %arg7[%c0_16, %c0_17] : memref<16x256xbf16, #tpu.memory_space<vmem>>, vector<16x256xbf16>
      tpu.vector_store %arg7[%c0_16, %c0_17], %19 {strides = array<i32>} : memref<16x256xbf16, #tpu.memory_space<vmem>>, vector<16x256xbf16>,
    } else {
    }
    return
  }
  func.func @transform_0(%arg0: i32, %arg1: i32, %arg2: i32) -> (i32, i32) {
    %c0_i32 = arith.constant 0 : i32
    return %arg0, %arg2 : i32, i32
  }
  func.func @transform_1(%arg0: i32, %arg1: i32, %arg2: i32) -> (i32, i32) {
    %c0_i32 = arith.constant 0 : i32
    return %arg2, %arg1 : i32, i32
  }
  func.func @transform_2(%arg0: i32, %arg1: i32, %arg2: i32) -> (i32, i32) {
    %c0_i32 = arith.constant 0 : i32
    %c0_i32_0 = arith.constant 0 : i32
    return %c0_i32, %arg1 : i32, i32
  }
  func.func @transform_3(%arg0: i32, %arg1: i32, %arg2: i32) -> (i32, i32) {
    %c0_i32 = arith.constant 0 : i32
    %c0_i32_0 = arith.constant 0 : i32
    return %c0_i32, %arg1 : i32, i32
  }
  func.func @transform_4(%arg0: i32, %arg1: i32, %arg2: i32) -> (i32, i32) {
    %c0_i32 = arith.constant 0 : i32
    return %arg0, %arg1 : i32, i32
  }
}

module attributes {stable_mosaic.version = 11 : i64} {
  func.func @_matmul_bn_kernel(%arg0: i32, %arg1: i32, %arg2: i32, %arg3: memref<16x256xbf16, #tpu.memory_space<vmem>>, %arg4: memref<256x256xbf16, #tpu.memory_space<vmem>>, %arg5: memref<1x256xf32, #tpu.memory_space<vmem>>, %arg6: memref<1x256xf32, #tpu.memory_space<vmem>>, %arg7: memref<16x256xbf16, #tpu.memory_space<vmem>>, %arg8: memref<16x256xbf16, #tpu.memory_space<vmem>>, %arg9: memref<16x256xf32, #tpu.memory_space<vmem>>) attributes {dimension_semantics = [#tpu.dimension_semantics<parallel>, #tpu.dimension_semantics<parallel>, #tpu.dimension_semantics<arbitrary>], iteration_bounds = array<i64: 1, 1, 9>, scalar_prefetch = 0 : i64, scratch_operands = 1 : i64, tpu.core_type = #tpu.core_type<tc>, window_params = [{transform_indices = @transform_0, window_bounds = array<i64: 16, 256>}, {transform_indices = @transform_1, window_bounds = array<i64: 256, 256>}, {transform_indices = @transform_2, window_bounds = array<i64: 1, 256>}, {transform_indices = @transform_3, window_bounds = array<i64: 1, 256>}, {transform_indices = @transform_4, window_bounds = array<i64: 16, 256>}, {transform_indices = @transform_5, window_bounds = array<i64: 16, 256>}]} {
    %c0_i32 = arith.constant 0 : i32
    %0 = arith.cmpi eq, %arg2, %c0_i32 : i32
    %1 = arith.extui %0 : i1 to i32
    %c0_i32_0 = arith.constant 0 : i32
    %2 = arith.cmpi ne, %1, %c0_i32_0 : i32
    scf.if %2 {
      %cst_9 = arith.constant 0.000000e+00 : f32
      %12 = vector.broadcast %cst_9 : f32 to vector<16x256xf32>
      %c0_10 = arith.constant 0 : index
      %c0_11 = arith.constant 0 : index
      %13 = vector.load %arg9[%c0_10, %c0_11] : memref<16x256xf32, #tpu.memory_space<vmem>>, vector<16x256xf32>
      tpu.vector_store %arg9[%c0_10, %c0_11], %12 {strides = array<i32>} : memref<16x256xf32, #tpu.memory_space<vmem>>, vector<16x256xf32>,
    } else {
    }
    %c0 = arith.constant 0 : index
    %c0_1 = arith.constant 0 : index
    %3 = vector.load %arg9[%c0, %c0_1] : memref<16x256xf32, #tpu.memory_space<vmem>>, vector<16x256xf32>
    %c0_2 = arith.constant 0 : index
    %c0_3 = arith.constant 0 : index
    %4 = vector.load %arg3[%c0_2, %c0_3] : memref<16x256xbf16, #tpu.memory_space<vmem>>, vector<16x256xbf16>
    %c0_4 = arith.constant 0 : index
    %c0_5 = arith.constant 0 : index
    %5 = vector.load %arg4[%c0_4, %c0_5] : memref<256x256xbf16, #tpu.memory_space<vmem>>, vector<256x256xbf16>
    %cst = arith.constant dense<0.000000e+00> : vector<16x256xf32>
    %6 = tpu.matmul %4, %5, %cst {dimension_numbers = #tpu.dot_dimension_numbers<[1], [0], [0], [1], [0, 0, 1, 1], [], []>} : vector<16x256xbf16>, vector<256x256xbf16>, vector<16x256xf32> -> vector<16x256xf32>
    %7 = arith.addf %3, %6 : vector<16x256xf32>
    %c0_6 = arith.constant 0 : index
    %c0_7 = arith.constant 0 : index
    %8 = vector.load %arg9[%c0_6, %c0_7] : memref<16x256xf32, #tpu.memory_space<vmem>>, vector<16x256xf32>
    tpu.vector_store %arg9[%c0_6, %c0_7], %7 {strides = array<i32>} : memref<16x256xf32, #tpu.memory_space<vmem>>, vector<16x256xf32>,
    %c8_i32 = arith.constant 8 : i32
    %9 = arith.cmpi eq, %arg2, %c8_i32 : i32
    %10 = arith.extui %9 : i1 to i32
    %c0_i32_8 = arith.constant 0 : i32
    %11 = arith.cmpi ne, %10, %c0_i32_8 : i32
    scf.if %11 {
      %c0_9 = arith.constant 0 : index
      %c0_10 = arith.constant 0 : index
      %12 = vector.load %arg9[%c0_9, %c0_10] : memref<16x256xf32, #tpu.memory_space<vmem>>, vector<16x256xf32>
      %c0_11 = arith.constant 0 : index
      %c0_12 = arith.constant 0 : index
      %13 = vector.load %arg5[%c0_11, %c0_12] : memref<1x256xf32, #tpu.memory_space<vmem>>, vector<1x256xf32>
      %14 = vector.broadcast %13 : vector<1x256xf32> to vector<16x256xf32>
      %15 = arith.mulf %12, %14 : vector<16x256xf32>
      %c0_13 = arith.constant 0 : index
      %c0_14 = arith.constant 0 : index
      %16 = vector.load %arg6[%c0_13, %c0_14] : memref<1x256xf32, #tpu.memory_space<vmem>>, vector<1x256xf32>
      %17 = vector.broadcast %16 : vector<1x256xf32> to vector<16x256xf32>
      %18 = arith.addf %15, %17 : vector<16x256xf32>
      %c0_15 = arith.constant 0 : index
      %c0_16 = arith.constant 0 : index
      %19 = vector.load %arg7[%c0_15, %c0_16] : memref<16x256xbf16, #tpu.memory_space<vmem>>, vector<16x256xbf16>
      %20 = arith.extf %19 : vector<16x256xbf16> to vector<16x256xf32>
      %21 = arith.addf %18, %20 : vector<16x256xf32>
      %cst_17 = arith.constant 0.000000e+00 : f32
      %22 = vector.broadcast %cst_17 : f32 to vector<16x256xf32>
      %23 = arith.maximumf %21, %22 : vector<16x256xf32>
      %24 = arith.truncf %23 : vector<16x256xf32> to vector<16x256xbf16>
      %c0_18 = arith.constant 0 : index
      %c0_19 = arith.constant 0 : index
      %25 = vector.load %arg8[%c0_18, %c0_19] : memref<16x256xbf16, #tpu.memory_space<vmem>>, vector<16x256xbf16>
      tpu.vector_store %arg8[%c0_18, %c0_19], %24 {strides = array<i32>} : memref<16x256xbf16, #tpu.memory_space<vmem>>, vector<16x256xbf16>,
    } else {
    }
    return
  }
  func.func @transform_0(%arg0: i32, %arg1: i32, %arg2: i32) -> (i32, i32) {
    %c0_i32 = arith.constant 0 : i32
    return %arg0, %arg2 : i32, i32
  }
  func.func @transform_1(%arg0: i32, %arg1: i32, %arg2: i32) -> (i32, i32) {
    %c0_i32 = arith.constant 0 : i32
    return %arg2, %arg1 : i32, i32
  }
  func.func @transform_2(%arg0: i32, %arg1: i32, %arg2: i32) -> (i32, i32) {
    %c0_i32 = arith.constant 0 : i32
    %c0_i32_0 = arith.constant 0 : i32
    return %c0_i32, %arg1 : i32, i32
  }
  func.func @transform_3(%arg0: i32, %arg1: i32, %arg2: i32) -> (i32, i32) {
    %c0_i32 = arith.constant 0 : i32
    %c0_i32_0 = arith.constant 0 : i32
    return %c0_i32, %arg1 : i32, i32
  }
  func.func @transform_4(%arg0: i32, %arg1: i32, %arg2: i32) -> (i32, i32) {
    %c0_i32 = arith.constant 0 : i32
    return %arg0, %arg1 : i32, i32
  }
  func.func @transform_5(%arg0: i32, %arg1: i32, %arg2: i32) -> (i32, i32) {
    %c0_i32 = arith.constant 0 : i32
    return %arg0, %arg1 : i32, i32
  }
}

module attributes {stable_mosaic.version = 11 : i64} {
  func.func @_matmul_bn_kernel(%arg0: i32, %arg1: i32, %arg2: i32, %arg3: memref<16x256xbf16, #tpu.memory_space<vmem>>, %arg4: memref<256x256xbf16, #tpu.memory_space<vmem>>, %arg5: memref<1x256xf32, #tpu.memory_space<vmem>>, %arg6: memref<1x256xf32, #tpu.memory_space<vmem>>, %arg7: memref<16x256xbf16, #tpu.memory_space<vmem>>, %arg8: memref<16x256xf32, #tpu.memory_space<vmem>>) attributes {dimension_semantics = [#tpu.dimension_semantics<parallel>, #tpu.dimension_semantics<parallel>, #tpu.dimension_semantics<arbitrary>], iteration_bounds = array<i64: 1, 2, 18>, scalar_prefetch = 0 : i64, scratch_operands = 1 : i64, tpu.core_type = #tpu.core_type<tc>, window_params = [{transform_indices = @transform_0, window_bounds = array<i64: 16, 256>}, {transform_indices = @transform_1, window_bounds = array<i64: 256, 256>}, {transform_indices = @transform_2, window_bounds = array<i64: 1, 256>}, {transform_indices = @transform_3, window_bounds = array<i64: 1, 256>}, {transform_indices = @transform_4, window_bounds = array<i64: 16, 256>}]} {
    %c0_i32 = arith.constant 0 : i32
    %0 = arith.cmpi eq, %arg2, %c0_i32 : i32
    %1 = arith.extui %0 : i1 to i32
    %c0_i32_0 = arith.constant 0 : i32
    %2 = arith.cmpi ne, %1, %c0_i32_0 : i32
    scf.if %2 {
      %cst_9 = arith.constant 0.000000e+00 : f32
      %12 = vector.broadcast %cst_9 : f32 to vector<16x256xf32>
      %c0_10 = arith.constant 0 : index
      %c0_11 = arith.constant 0 : index
      %13 = vector.load %arg8[%c0_10, %c0_11] : memref<16x256xf32, #tpu.memory_space<vmem>>, vector<16x256xf32>
      tpu.vector_store %arg8[%c0_10, %c0_11], %12 {strides = array<i32>} : memref<16x256xf32, #tpu.memory_space<vmem>>, vector<16x256xf32>,
    } else {
    }
    %c0 = arith.constant 0 : index
    %c0_1 = arith.constant 0 : index
    %3 = vector.load %arg8[%c0, %c0_1] : memref<16x256xf32, #tpu.memory_space<vmem>>, vector<16x256xf32>
    %c0_2 = arith.constant 0 : index
    %c0_3 = arith.constant 0 : index
    %4 = vector.load %arg3[%c0_2, %c0_3] : memref<16x256xbf16, #tpu.memory_space<vmem>>, vector<16x256xbf16>
    %c0_4 = arith.constant 0 : index
    %c0_5 = arith.constant 0 : index
    %5 = vector.load %arg4[%c0_4, %c0_5] : memref<256x256xbf16, #tpu.memory_space<vmem>>, vector<256x256xbf16>
    %cst = arith.constant dense<0.000000e+00> : vector<16x256xf32>
    %6 = tpu.matmul %4, %5, %cst {dimension_numbers = #tpu.dot_dimension_numbers<[1], [0], [0], [1], [0, 0, 1, 1], [], []>} : vector<16x256xbf16>, vector<256x256xbf16>, vector<16x256xf32> -> vector<16x256xf32>
    %7 = arith.addf %3, %6 : vector<16x256xf32>
    %c0_6 = arith.constant 0 : index
    %c0_7 = arith.constant 0 : index
    %8 = vector.load %arg8[%c0_6, %c0_7] : memref<16x256xf32, #tpu.memory_space<vmem>>, vector<16x256xf32>
    tpu.vector_store %arg8[%c0_6, %c0_7], %7 {strides = array<i32>} : memref<16x256xf32, #tpu.memory_space<vmem>>, vector<16x256xf32>,
    %c17_i32 = arith.constant 17 : i32
    %9 = arith.cmpi eq, %arg2, %c17_i32 : i32
    %10 = arith.extui %9 : i1 to i32
    %c0_i32_8 = arith.constant 0 : i32
    %11 = arith.cmpi ne, %10, %c0_i32_8 : i32
    scf.if %11 {
      %c0_9 = arith.constant 0 : index
      %c0_10 = arith.constant 0 : index
      %12 = vector.load %arg8[%c0_9, %c0_10] : memref<16x256xf32, #tpu.memory_space<vmem>>, vector<16x256xf32>
      %c0_11 = arith.constant 0 : index
      %c0_12 = arith.constant 0 : index
      %13 = vector.load %arg5[%c0_11, %c0_12] : memref<1x256xf32, #tpu.memory_space<vmem>>, vector<1x256xf32>
      %14 = vector.broadcast %13 : vector<1x256xf32> to vector<16x256xf32>
      %15 = arith.mulf %12, %14 : vector<16x256xf32>
      %c0_13 = arith.constant 0 : index
      %c0_14 = arith.constant 0 : index
      %16 = vector.load %arg6[%c0_13, %c0_14] : memref<1x256xf32, #tpu.memory_space<vmem>>, vector<1x256xf32>
      %17 = vector.broadcast %16 : vector<1x256xf32> to vector<16x256xf32>
      %18 = arith.addf %15, %17 : vector<16x256xf32>
      %cst_15 = arith.constant 0.000000e+00 : f32
      %19 = vector.broadcast %cst_15 : f32 to vector<16x256xf32>
      %20 = arith.maximumf %18, %19 : vector<16x256xf32>
      %21 = arith.truncf %20 : vector<16x256xf32> to vector<16x256xbf16>
      %c0_16 = arith.constant 0 : index
      %c0_17 = arith.constant 0 : index
      %22 = vector.load %arg7[%c0_16, %c0_17] : memref<16x256xbf16, #tpu.memory_space<vmem>>, vector<16x256xbf16>
      tpu.vector_store %arg7[%c0_16, %c0_17], %21 {strides = array<i32>} : memref<16x256xbf16, #tpu.memory_space<vmem>>, vector<16x256xbf16>,
    } else {
    }
    return
  }
  func.func @transform_0(%arg0: i32, %arg1: i32, %arg2: i32) -> (i32, i32) {
    %c0_i32 = arith.constant 0 : i32
    return %arg0, %arg2 : i32, i32
  }
  func.func @transform_1(%arg0: i32, %arg1: i32, %arg2: i32) -> (i32, i32) {
    %c0_i32 = arith.constant 0 : i32
    return %arg2, %arg1 : i32, i32
  }
  func.func @transform_2(%arg0: i32, %arg1: i32, %arg2: i32) -> (i32, i32) {
    %c0_i32 = arith.constant 0 : i32
    %c0_i32_0 = arith.constant 0 : i32
    return %c0_i32, %arg1 : i32, i32
  }
  func.func @transform_3(%arg0: i32, %arg1: i32, %arg2: i32) -> (i32, i32) {
    %c0_i32 = arith.constant 0 : i32
    %c0_i32_0 = arith.constant 0 : i32
    return %c0_i32, %arg1 : i32, i32
  }
  func.func @transform_4(%arg0: i32, %arg1: i32, %arg2: i32) -> (i32, i32) {
    %c0_i32 = arith.constant 0 : i32
    return %arg0, %arg1 : i32, i32
  }
}

module attributes {stable_mosaic.version = 11 : i64} {
  func.func @_matmul_bn_kernel(%arg0: i32, %arg1: i32, %arg2: i32, %arg3: memref<16x256xbf16, #tpu.memory_space<vmem>>, %arg4: memref<256x256xbf16, #tpu.memory_space<vmem>>, %arg5: memref<1x256xf32, #tpu.memory_space<vmem>>, %arg6: memref<1x256xf32, #tpu.memory_space<vmem>>, %arg7: memref<16x256xbf16, #tpu.memory_space<vmem>>, %arg8: memref<16x256xf32, #tpu.memory_space<vmem>>) attributes {dimension_semantics = [#tpu.dimension_semantics<parallel>, #tpu.dimension_semantics<parallel>, #tpu.dimension_semantics<arbitrary>], iteration_bounds = array<i64: 1, 2, 1>, scalar_prefetch = 0 : i64, scratch_operands = 1 : i64, tpu.core_type = #tpu.core_type<tc>, window_params = [{transform_indices = @transform_0, window_bounds = array<i64: 16, 256>}, {transform_indices = @transform_1, window_bounds = array<i64: 256, 256>}, {transform_indices = @transform_2, window_bounds = array<i64: 1, 256>}, {transform_indices = @transform_3, window_bounds = array<i64: 1, 256>}, {transform_indices = @transform_4, window_bounds = array<i64: 16, 256>}]} {
    %c0_i32 = arith.constant 0 : i32
    %0 = arith.cmpi eq, %arg2, %c0_i32 : i32
    %1 = arith.extui %0 : i1 to i32
    %c0_i32_0 = arith.constant 0 : i32
    %2 = arith.cmpi ne, %1, %c0_i32_0 : i32
    scf.if %2 {
      %cst_10 = arith.constant 0.000000e+00 : f32
      %12 = vector.broadcast %cst_10 : f32 to vector<16x256xf32>
      %c0_11 = arith.constant 0 : index
      %c0_12 = arith.constant 0 : index
      %13 = vector.load %arg8[%c0_11, %c0_12] : memref<16x256xf32, #tpu.memory_space<vmem>>, vector<16x256xf32>
      tpu.vector_store %arg8[%c0_11, %c0_12], %12 {strides = array<i32>} : memref<16x256xf32, #tpu.memory_space<vmem>>, vector<16x256xf32>,
    } else {
    }
    %c0 = arith.constant 0 : index
    %c0_1 = arith.constant 0 : index
    %3 = vector.load %arg8[%c0, %c0_1] : memref<16x256xf32, #tpu.memory_space<vmem>>, vector<16x256xf32>
    %c0_2 = arith.constant 0 : index
    %c0_3 = arith.constant 0 : index
    %4 = vector.load %arg3[%c0_2, %c0_3] : memref<16x256xbf16, #tpu.memory_space<vmem>>, vector<16x256xbf16>
    %c0_4 = arith.constant 0 : index
    %c0_5 = arith.constant 0 : index
    %5 = vector.load %arg4[%c0_4, %c0_5] : memref<256x256xbf16, #tpu.memory_space<vmem>>, vector<256x256xbf16>
    %cst = arith.constant dense<0.000000e+00> : vector<16x256xf32>
    %6 = tpu.matmul %4, %5, %cst {dimension_numbers = #tpu.dot_dimension_numbers<[1], [0], [0], [1], [0, 0, 1, 1], [], []>} : vector<16x256xbf16>, vector<256x256xbf16>, vector<16x256xf32> -> vector<16x256xf32>
    %7 = arith.addf %3, %6 : vector<16x256xf32>
    %c0_6 = arith.constant 0 : index
    %c0_7 = arith.constant 0 : index
    %8 = vector.load %arg8[%c0_6, %c0_7] : memref<16x256xf32, #tpu.memory_space<vmem>>, vector<16x256xf32>
    tpu.vector_store %arg8[%c0_6, %c0_7], %7 {strides = array<i32>} : memref<16x256xf32, #tpu.memory_space<vmem>>, vector<16x256xf32>,
    %c0_i32_8 = arith.constant 0 : i32
    %9 = arith.cmpi eq, %arg2, %c0_i32_8 : i32
    %10 = arith.extui %9 : i1 to i32
    %c0_i32_9 = arith.constant 0 : i32
    %11 = arith.cmpi ne, %10, %c0_i32_9 : i32
    scf.if %11 {
      %c0_10 = arith.constant 0 : index
      %c0_11 = arith.constant 0 : index
      %12 = vector.load %arg8[%c0_10, %c0_11] : memref<16x256xf32, #tpu.memory_space<vmem>>, vector<16x256xf32>
      %c0_12 = arith.constant 0 : index
      %c0_13 = arith.constant 0 : index
      %13 = vector.load %arg5[%c0_12, %c0_13] : memref<1x256xf32, #tpu.memory_space<vmem>>, vector<1x256xf32>
      %14 = vector.broadcast %13 : vector<1x256xf32> to vector<16x256xf32>
      %15 = arith.mulf %12, %14 : vector<16x256xf32>
      %c0_14 = arith.constant 0 : index
      %c0_15 = arith.constant 0 : index
      %16 = vector.load %arg6[%c0_14, %c0_15] : memref<1x256xf32, #tpu.memory_space<vmem>>, vector<1x256xf32>
      %17 = vector.broadcast %16 : vector<1x256xf32> to vector<16x256xf32>
      %18 = arith.addf %15, %17 : vector<16x256xf32>
      %19 = arith.truncf %18 : vector<16x256xf32> to vector<16x256xbf16>
      %c0_16 = arith.constant 0 : index
      %c0_17 = arith.constant 0 : index
      %20 = vector.load %arg7[%c0_16, %c0_17] : memref<16x256xbf16, #tpu.memory_space<vmem>>, vector<16x256xbf16>
      tpu.vector_store %arg7[%c0_16, %c0_17], %19 {strides = array<i32>} : memref<16x256xbf16, #tpu.memory_space<vmem>>, vector<16x256xbf16>,
    } else {
    }
    return
  }
  func.func @transform_0(%arg0: i32, %arg1: i32, %arg2: i32) -> (i32, i32) {
    %c0_i32 = arith.constant 0 : i32
    return %arg0, %arg2 : i32, i32
  }
  func.func @transform_1(%arg0: i32, %arg1: i32, %arg2: i32) -> (i32, i32) {
    %c0_i32 = arith.constant 0 : i32
    return %arg2, %arg1 : i32, i32
  }
  func.func @transform_2(%arg0: i32, %arg1: i32, %arg2: i32) -> (i32, i32) {
    %c0_i32 = arith.constant 0 : i32
    %c0_i32_0 = arith.constant 0 : i32
    return %c0_i32, %arg1 : i32, i32
  }
  func.func @transform_3(%arg0: i32, %arg1: i32, %arg2: i32) -> (i32, i32) {
    %c0_i32 = arith.constant 0 : i32
    %c0_i32_0 = arith.constant 0 : i32
    return %c0_i32, %arg1 : i32, i32
  }
  func.func @transform_4(%arg0: i32, %arg1: i32, %arg2: i32) -> (i32, i32) {
    %c0_i32 = arith.constant 0 : i32
    return %arg0, %arg1 : i32, i32
  }
}

module attributes {stable_mosaic.version = 11 : i64} {
  func.func @_matmul_bn_kernel(%arg0: i32, %arg1: i32, %arg2: i32, %arg3: memref<16x256xbf16, #tpu.memory_space<vmem>>, %arg4: memref<256x256xbf16, #tpu.memory_space<vmem>>, %arg5: memref<1x256xf32, #tpu.memory_space<vmem>>, %arg6: memref<1x256xf32, #tpu.memory_space<vmem>>, %arg7: memref<16x256xbf16, #tpu.memory_space<vmem>>, %arg8: memref<16x256xbf16, #tpu.memory_space<vmem>>, %arg9: memref<16x256xf32, #tpu.memory_space<vmem>>) attributes {dimension_semantics = [#tpu.dimension_semantics<parallel>, #tpu.dimension_semantics<parallel>, #tpu.dimension_semantics<arbitrary>], iteration_bounds = array<i64: 1, 2, 18>, scalar_prefetch = 0 : i64, scratch_operands = 1 : i64, tpu.core_type = #tpu.core_type<tc>, window_params = [{transform_indices = @transform_0, window_bounds = array<i64: 16, 256>}, {transform_indices = @transform_1, window_bounds = array<i64: 256, 256>}, {transform_indices = @transform_2, window_bounds = array<i64: 1, 256>}, {transform_indices = @transform_3, window_bounds = array<i64: 1, 256>}, {transform_indices = @transform_4, window_bounds = array<i64: 16, 256>}, {transform_indices = @transform_5, window_bounds = array<i64: 16, 256>}]} {
    %c0_i32 = arith.constant 0 : i32
    %0 = arith.cmpi eq, %arg2, %c0_i32 : i32
    %1 = arith.extui %0 : i1 to i32
    %c0_i32_0 = arith.constant 0 : i32
    %2 = arith.cmpi ne, %1, %c0_i32_0 : i32
    scf.if %2 {
      %cst_9 = arith.constant 0.000000e+00 : f32
      %12 = vector.broadcast %cst_9 : f32 to vector<16x256xf32>
      %c0_10 = arith.constant 0 : index
      %c0_11 = arith.constant 0 : index
      %13 = vector.load %arg9[%c0_10, %c0_11] : memref<16x256xf32, #tpu.memory_space<vmem>>, vector<16x256xf32>
      tpu.vector_store %arg9[%c0_10, %c0_11], %12 {strides = array<i32>} : memref<16x256xf32, #tpu.memory_space<vmem>>, vector<16x256xf32>,
    } else {
    }
    %c0 = arith.constant 0 : index
    %c0_1 = arith.constant 0 : index
    %3 = vector.load %arg9[%c0, %c0_1] : memref<16x256xf32, #tpu.memory_space<vmem>>, vector<16x256xf32>
    %c0_2 = arith.constant 0 : index
    %c0_3 = arith.constant 0 : index
    %4 = vector.load %arg3[%c0_2, %c0_3] : memref<16x256xbf16, #tpu.memory_space<vmem>>, vector<16x256xbf16>
    %c0_4 = arith.constant 0 : index
    %c0_5 = arith.constant 0 : index
    %5 = vector.load %arg4[%c0_4, %c0_5] : memref<256x256xbf16, #tpu.memory_space<vmem>>, vector<256x256xbf16>
    %cst = arith.constant dense<0.000000e+00> : vector<16x256xf32>
    %6 = tpu.matmul %4, %5, %cst {dimension_numbers = #tpu.dot_dimension_numbers<[1], [0], [0], [1], [0, 0, 1, 1], [], []>} : vector<16x256xbf16>, vector<256x256xbf16>, vector<16x256xf32> -> vector<16x256xf32>
    %7 = arith.addf %3, %6 : vector<16x256xf32>
    %c0_6 = arith.constant 0 : index
    %c0_7 = arith.constant 0 : index
    %8 = vector.load %arg9[%c0_6, %c0_7] : memref<16x256xf32, #tpu.memory_space<vmem>>, vector<16x256xf32>
    tpu.vector_store %arg9[%c0_6, %c0_7], %7 {strides = array<i32>} : memref<16x256xf32, #tpu.memory_space<vmem>>, vector<16x256xf32>,
    %c17_i32 = arith.constant 17 : i32
    %9 = arith.cmpi eq, %arg2, %c17_i32 : i32
    %10 = arith.extui %9 : i1 to i32
    %c0_i32_8 = arith.constant 0 : i32
    %11 = arith.cmpi ne, %10, %c0_i32_8 : i32
    scf.if %11 {
      %c0_9 = arith.constant 0 : index
      %c0_10 = arith.constant 0 : index
      %12 = vector.load %arg9[%c0_9, %c0_10] : memref<16x256xf32, #tpu.memory_space<vmem>>, vector<16x256xf32>
      %c0_11 = arith.constant 0 : index
      %c0_12 = arith.constant 0 : index
      %13 = vector.load %arg5[%c0_11, %c0_12] : memref<1x256xf32, #tpu.memory_space<vmem>>, vector<1x256xf32>
      %14 = vector.broadcast %13 : vector<1x256xf32> to vector<16x256xf32>
      %15 = arith.mulf %12, %14 : vector<16x256xf32>
      %c0_13 = arith.constant 0 : index
      %c0_14 = arith.constant 0 : index
      %16 = vector.load %arg6[%c0_13, %c0_14] : memref<1x256xf32, #tpu.memory_space<vmem>>, vector<1x256xf32>
      %17 = vector.broadcast %16 : vector<1x256xf32> to vector<16x256xf32>
      %18 = arith.addf %15, %17 : vector<16x256xf32>
      %c0_15 = arith.constant 0 : index
      %c0_16 = arith.constant 0 : index
      %19 = vector.load %arg7[%c0_15, %c0_16] : memref<16x256xbf16, #tpu.memory_space<vmem>>, vector<16x256xbf16>
      %20 = arith.extf %19 : vector<16x256xbf16> to vector<16x256xf32>
      %21 = arith.addf %18, %20 : vector<16x256xf32>
      %cst_17 = arith.constant 0.000000e+00 : f32
      %22 = vector.broadcast %cst_17 : f32 to vector<16x256xf32>
      %23 = arith.maximumf %21, %22 : vector<16x256xf32>
      %24 = arith.truncf %23 : vector<16x256xf32> to vector<16x256xbf16>
      %c0_18 = arith.constant 0 : index
      %c0_19 = arith.constant 0 : index
      %25 = vector.load %arg8[%c0_18, %c0_19] : memref<16x256xbf16, #tpu.memory_space<vmem>>, vector<16x256xbf16>
      tpu.vector_store %arg8[%c0_18, %c0_19], %24 {strides = array<i32>} : memref<16x256xbf16, #tpu.memory_space<vmem>>, vector<16x256xbf16>,
    } else {
    }
    return
  }
  func.func @transform_0(%arg0: i32, %arg1: i32, %arg2: i32) -> (i32, i32) {
    %c0_i32 = arith.constant 0 : i32
    return %arg0, %arg2 : i32, i32
  }
  func.func @transform_1(%arg0: i32, %arg1: i32, %arg2: i32) -> (i32, i32) {
    %c0_i32 = arith.constant 0 : i32
    return %arg2, %arg1 : i32, i32
  }
  func.func @transform_2(%arg0: i32, %arg1: i32, %arg2: i32) -> (i32, i32) {
    %c0_i32 = arith.constant 0 : i32
    %c0_i32_0 = arith.constant 0 : i32
    return %c0_i32, %arg1 : i32, i32
  }
  func.func @transform_3(%arg0: i32, %arg1: i32, %arg2: i32) -> (i32, i32) {
    %c0_i32 = arith.constant 0 : i32
    %c0_i32_0 = arith.constant 0 : i32
    return %c0_i32, %arg1 : i32, i32
  }
  func.func @transform_4(%arg0: i32, %arg1: i32, %arg2: i32) -> (i32, i32) {
    %c0_i32 = arith.constant 0 : i32
    return %arg0, %arg1 : i32, i32
  }
  func.func @transform_5(%arg0: i32, %arg1: i32, %arg2: i32) -> (i32, i32) {
    %c0_i32 = arith.constant 0 : i32
    return %arg0, %arg1 : i32, i32
  }
}

module attributes {stable_mosaic.version = 11 : i64} {
  func.func @_global_avgpool_kernel(%arg0: i32, %arg1: memref<2x1x512xbf16, #tpu.memory_space<vmem>>, %arg2: memref<2x512xf32, #tpu.memory_space<vmem>>) attributes {dimension_semantics = [#tpu.dimension_semantics<arbitrary>], iteration_bounds = array<i64: 1>, scalar_prefetch = 0 : i64, scratch_operands = 0 : i64, tpu.core_type = #tpu.core_type<tc>, window_params = [{pipeline_mode = #tpu.pipeline_mode<synchronous>, transform_indices = @transform_0, window_bounds = array<i64: 2, 1, 512>}, {pipeline_mode = #tpu.pipeline_mode<synchronous>, transform_indices = @transform_1, window_bounds = array<i64: 2, 512>}]} {
    %c0 = arith.constant 0 : index
    %c0_0 = arith.constant 0 : index
    %c0_1 = arith.constant 0 : index
    %0 = vector.load %arg1[%c0, %c0_0, %c0_1] : memref<2x1x512xbf16, #tpu.memory_space<vmem>>, vector<2x1x512xbf16>
    %1 = arith.extf %0 : vector<2x1x512xbf16> to vector<2x1x512xf32>
    %cst = arith.constant dense<0.000000e+00> : vector<2x512xf32>
    %2 = vector.multi_reduction <add>, %1, %cst [1] : vector<2x1x512xf32> to vector<2x512xf32>
    %cst_2 = arith.constant 1.000000e+00 : f32
    %3 = vector.broadcast %cst_2 : f32 to vector<2x512xf32>
    %4 = arith.mulf %2, %3 : vector<2x512xf32>
    %c0_3 = arith.constant 0 : index
    %c0_4 = arith.constant 0 : index
    %5 = vector.load %arg2[%c0_3, %c0_4] : memref<2x512xf32, #tpu.memory_space<vmem>>, vector<2x512xf32>
    tpu.vector_store %arg2[%c0_3, %c0_4], %4 {strides = array<i32>} : memref<2x512xf32, #tpu.memory_space<vmem>>, vector<2x512xf32>,
    return
  }
  func.func @transform_0(%arg0: i32) -> (i32, i32, i32) {
    %c0_i32 = arith.constant 0 : i32
    %c0_i32_0 = arith.constant 0 : i32
    %c0_i32_1 = arith.constant 0 : i32
    %c0_i32_2 = arith.constant 0 : i32
    return %c0_i32, %c0_i32_0, %c0_i32_1 : i32, i32, i32
  }
  func.func @transform_1(%arg0: i32) -> (i32, i32) {
    %c0_i32 = arith.constant 0 : i32
    %c0_i32_0 = arith.constant 0 : i32
    %c0_i32_1 = arith.constant 0 : i32
    return %c0_i32, %c0_i32_0 : i32, i32
  }
}

</mosaic_0001>

<bundles_post_ra>
// kernel: resnet_forward.22
= control target key start
LH: loop header
LB: loop body
LE: loop exit
PB: predicated region body
PF: predicated region fallthrough
CT: control target
= control target key end

     0   :  { %s992_s1 = inlined_call_operand.vmem [shape: bf16[256,128], index: 1, kind: input, shape index: {}]   ;;  %s993_s0 = inlined_call_operand.vmem [shape: bf16[128,256], index: 0, kind: input, shape index: {}]   ;;  %s994_s2 = inlined_call_operand.vmem [shape: f32[1,128], index: 2, kind: input, shape index: {}]   ;;  %s995_s3 = inlined_call_operand.vmem [shape: f32[1,128], index: 3, kind: input, shape index: {}]   ;;  %s996_s4 = inlined_call_operand.vmem [shape: bf16[128,128], index: 4, kind: output, shape index: {}]  }
   0x1   :  { %v765_v0 = vld [vmem:[%s992_s1 + $0x40] sm:$0xff]   ;;  %v767_v2 = vld [vmem:[%s992_s1 + $0x48] sm:$0xff]   ;;  %v769_v4 = vld [vmem:[%s992_s1 + $0x50] sm:$0xff]  }
   0x2   :  { %v766_v1 = vld [vmem:[%s992_s1] sm:$0xff]   ;;  %685 = vmatprep.subr.bf16.mxu0 %v765_v0  ;;  %749 = vmatprep.subr.bf16.mxu1 %v765_v0  ;;  %v768_v3 = vld [vmem:[%s992_s1 + $0x8] sm:$0xff]   ;;  %v770_v5 = vld [vmem:[%s992_s1 + $0x10] sm:$0xff]  }
   0x3   :  { %686 = vmatpush3.bf16.msra.mxu0 %v766_v1  ;;  %757 = vmatpush3.bf16.msra.mxu1 %v766_v1  ;;  %v771_v6 = vld [vmem:[%s992_s1 + $0x58] sm:$0xff]   ;;  %v773_v8 = vld [vmem:[%s992_s1 + $0x60] sm:$0xff]   ;;  %v775_v10 = vld [vmem:[%s992_s1 + $0x68] sm:$0xff]  }
   0x4   :  { %687 = vmatprep.subr.bf16.mxu0 %v767_v2  ;;  %750 = vmatprep.subr.bf16.mxu1 %v767_v2  ;;  %v772_v7 = vld [vmem:[%s992_s1 + $0x18] sm:$0xff]   ;;  %v774_v9 = vld [vmem:[%s992_s1 + $0x20] sm:$0xff]   ;;  %v776_v13 = vld [vmem:[%s992_s1 + $0x28] sm:$0xff]  }
   0x5   :  { %v783_v11 = vld [vmem:[%s993_s0 + $0x4] ss:$8 sps:$4 sm:$0xff]   ;;  %v777_v14 = vld [vmem:[%s992_s1 + $0x70] sm:$0xff]   ;;  %v779_v16 = vld [vmem:[%s992_s1 + $0x78] sm:$0xff]  }
   0x6   :  { %v786_v12 = vld [vmem:[%s993_s0 + $0x44] ss:$8 sps:$4 sm:$0xff]   ;;  %310 = vmatprep.mubr.bf16.mxu0 %v783_v11  ;;  %v778_v15 = vld [vmem:[%s992_s1 + $0x30] sm:$0xff]   ;;  %v780_v17 = vld [vmem:[%s992_s1 + $0x38] sm:$0xff]  }
   0x7   :  { %688 = vmatpush3.bf16.msra.mxu0 %v768_v3  ;;  %758 = vmatpush3.bf16.msra.mxu1 %v768_v3  ;;  %v781_v18 = vld [vmem:[%s993_s0] ss:$8 sps:$4 sm:$0xff]   ;;  %v787_v20 = vld [vmem:[%s993_s0 + $0x14] ss:$8 sps:$4 sm:$0xff]   ;;  %v791_v22 = vld [vmem:[%s993_s0 + $0x10] ss:$8 sps:$4 sm:$0xff]  }
   0x8   :  { %689 = vmatprep.subr.bf16.mxu0 %v769_v4  ;;  %751 = vmatprep.subr.bf16.mxu1 %v769_v4  ;;  %v784_v19 = vld [vmem:[%s993_s0 + $0x40] ss:$8 sps:$4 sm:$0xff]   ;;  %v789_v21 = vld [vmem:[%s993_s0 + $0x54] ss:$8 sps:$4 sm:$0xff]   ;;  %v792_v23 = vld [vmem:[%s993_s0 + $0x50] ss:$8 sps:$4 sm:$0xff]  }
   0x9   :  { %342 = vmatprep.mubr.bf16.mxu1 %v786_v12  ;;  %v793_v24 = vld [vmem:[%s993_s0 + $0x24] ss:$8 sps:$4 sm:$0xff]   ;;  %v797_v26 = vld [vmem:[%s993_s0 + $0x20] ss:$8 sps:$4 sm:$0xff]   ;;  %v799_v28 = vld [vmem:[%s993_s0 + $0x34] ss:$8 sps:$4 sm:$0xff]  }
   0xa   :  { %v795_v25 = vld [vmem:[%s993_s0 + $0x64] ss:$8 sps:$4 sm:$0xff]   ;;  %v798_v27 = vld [vmem:[%s993_s0 + $0x60] ss:$8 sps:$4 sm:$0xff]   ;;  %v801_v29 = vld [vmem:[%s993_s0 + $0x74] ss:$8 sps:$4 sm:$0xff]  }
   0xb   :  { %690 = vmatpush3.bf16.msra.mxu0 %v770_v5  ;;  %759 = vmatpush3.bf16.msra.mxu1 %v770_v5  ;;  %v803_v30 = vld [vmem:[%s993_s0 + $0x30] ss:$8 sps:$4 sm:$0xff]   ;;  %v929_v35 = vld [vmem:[%s994_s2] ss:$0 sm:$0xff] }
   0xc   :  { %691 = vmatprep.subr.bf16.mxu0 %v771_v6  ;;  %752 = vmatprep.subr.bf16.mxu1 %v771_v6  ;;  %v804_v31 = vld [vmem:[%s993_s0 + $0x70] ss:$8 sps:$4 sm:$0xff]   ;;  %v934_v41 = vld [vmem:[%s995_s3] ss:$0 sm:$0xff] }
   0xf   :  { %692 = vmatpush3.bf16.msra.mxu0 %v772_v7  ;;  %760 = vmatpush3.bf16.msra.mxu1 %v772_v7 }
  0x10   :  { %693 = vmatprep.subr.bf16.mxu0 %v773_v8  ;;  %753 = vmatprep.subr.bf16.mxu1 %v773_v8 }
  0x13   :  { %694 = vmatpush3.bf16.msra.mxu0 %v774_v9  ;;  %761 = vmatpush3.bf16.msra.mxu1 %v774_v9 }
  0x14   :  { %695 = vmatprep.subr.bf16.mxu0 %v775_v10  ;;  %754 = vmatprep.subr.bf16.mxu1 %v775_v10 }
  0x17   :  { %696 = vmatpush3.bf16.msra.mxu0 %v776_v13  ;;  %762 = vmatpush3.bf16.msra.mxu1 %v776_v13 }
  0x18   :  { %697 = vmatprep.subr.bf16.mxu0 %v777_v14  ;;  %755 = vmatprep.subr.bf16.mxu1 %v777_v14 }
  0x1b   :  { %698 = vmatpush3.bf16.msra.mxu0 %v778_v15  ;;  %763 = vmatpush3.bf16.msra.mxu1 %v778_v15 }
  0x1c   :  { %699 = vmatprep.subr.bf16.mxu0 %v779_v16  ;;  %756 = vmatprep.subr.bf16.mxu1 %v779_v16 }
  0x1f   :  { %700 = vmatpush3.bf16.msra.mxu0 %v780_v17  ;;  %764 = vmatpush3.bf16.msra.mxu1 %v780_v17 }
  0x22   :  { %311 = vmatmul.mubr.bf16.vlgmr.msra.gmra.mrb[0].mxu0 %v781_v18  ;;  %343 = vmatmul.mubr.bf16.vlgmr.msra.gmra.mrb[0].mxu1 %v784_v19 }
  0x23   :  { %318 = vmatprep.mubr.bf16.mxu0 %v787_v20  ;;  %350 = vmatprep.mubr.bf16.mxu1 %v789_v21 }
  0x2a   :  { %319 = vmatmul.mubr.bf16.gmra.mrb[4].mxu0 %v791_v22  ;;  %351 = vmatmul.mubr.bf16.gmra.mrb[4].mxu1 %v792_v23 }
  0x2b   :  { %326 = vmatprep.mubr.bf16.mxu0 %v793_v24  ;;  %358 = vmatprep.mubr.bf16.mxu1 %v795_v25 }
  0x32   :  { %327 = vmatmul.mubr.bf16.gmra.mrb[8].mxu0 %v797_v26  ;;  %359 = vmatmul.mubr.bf16.gmra.mrb[8].mxu1 %v798_v27 }
  0x33   :  { %334 = vmatprep.mubr.bf16.mxu0 %v799_v28  ;;  %366 = vmatprep.mubr.bf16.mxu1 %v801_v29 }
  0x3a   :  { %335 = vmatmul.mubr.bf16.gmra.mrb[12].mxu0 %v803_v30  ;;  %367 = vmatmul.mubr.bf16.gmra.mrb[12].mxu1 %v804_v31 }
  0xf5   :  { %v701_v32 = vpop.f32.mrb[0].mxu0  ;;  %v725_v33 = vpop.f32.mrb[0].mxu1 }
  0xf6   :  { %v702_v34 = vpop.f32.mrb[1].mxu0  ;;  %v726_v36 = vpop.f32.mrb[1].mxu1 }
  0xf7   :  { %v703_v37 = vadd.f32 %v702_v34, %v701_v32  ;;  %v727_v38 = vadd.f32 %v726_v36, %v725_v33  ;;  %v704_v39 = vpop.f32.mrb[2].mxu0  ;;  %v728_v40 = vpop.f32.mrb[2].mxu1 }
  0xf8   :  { %v705_v42 = vpop.f32.mrb[3].mxu0  ;;  %v729_v43 = vpop.f32.mrb[3].mxu1 }
  0xf9   :  { %v433_v44 = vmul.f32 %v703_v37, %v929_v35  ;;  %v441_v45 = vmul.f32 %v727_v38, %v929_v35  ;;  %v706_v46 = vadd.f32 %v705_v42, %v704_v39  ;;  %v730_v47 = vadd.f32 %v729_v43, %v728_v40 }
  0xfb   :  { %v456_v48 = vadd.f32 %v934_v41, %v433_v44  ;;  %v464_v49 = vadd.f32 %v934_v41, %v441_v45  ;;  %v434_v50 = vmul.f32 %v706_v46, %v929_v35  ;;  %v442_v51 = vmul.f32 %v730_v47, %v929_v35 }
  0xfd   :  { %v457_v52 = vadd.f32 %v934_v41, %v434_v50  ;;  %v465_v53 = vadd.f32 %v934_v41, %v442_v51  ;;  %v707_v54 = vpop.f32.mrb[4].mxu0  ;;  %v731_v55 = vpop.f32.mrb[4].mxu1  ;;  %v472_v56 = vmax.f32 %v456_v48, 0.0  ;;  %v480_v57 = vmax.f32 %v464_v49, 0.0 }
  0xfe   :  { %v708_v58 = vpop.f32.mrb[5].mxu0  ;;  %v732_v59 = vpop.f32.mrb[5].mxu1 }
  0xff   :  { %v473_v60 = vmax.f32 %v457_v52, 0.0  ;;  %v481_v61 = vmax.f32 %v465_v53, 0.0  ;;  %v709_v62 = vadd.f32 %v708_v58, %v707_v54  ;;  %v733_v63 = vadd.f32 %v732_v59, %v731_v55  ;;  %v710_v0 = vpop.f32.mrb[6].mxu0  ;;  %v734_v1 = vpop.f32.mrb[6].mxu1 }
 0x100   :  { %v711_v2 = vpop.f32.mrb[7].mxu0  ;;  %v735_v3 = vpop.f32.mrb[7].mxu1 }
 0x101   :  { %v641_v4 = vpack.c.bf16 %v473_v60, %v472_v56  ;;  %v661_v5 = vpack.c.bf16 %v481_v61, %v480_v57  ;;  %v435_v6 = vmul.f32 %v709_v62, %v929_v35  ;;  %v443_v7 = vmul.f32 %v733_v63, %v929_v35 }
 0x102   :  { %v712_v8 = vadd.f32 %v711_v2, %v710_v0  ;;  %v736_v9 = vadd.f32 %v735_v3, %v734_v1 }
 0x103   :  { %642 = vst [vmem:[%s996_s4] sm:$0xff] %v641_v4   ;;  %681 = vst [vmem:[%s996_s4 + $0x20] sm:$0xff] %v661_v5   ;;  %v458_v10 = vadd.f32 %v934_v41, %v435_v6  ;;  %v466_v11 = vadd.f32 %v934_v41, %v443_v7 }
 0x104   :  { %v436_v12 = vmul.f32 %v712_v8, %v929_v35  ;;  %v444_v13 = vmul.f32 %v736_v9, %v929_v35 }
 0x105   :  { %v713_v14 = vpop.f32.mrb[8].mxu0  ;;  %v737_v15 = vpop.f32.mrb[8].mxu1  ;;  %v474_v24 = vmax.f32 %v458_v10, 0.0  ;;  %v482_v25 = vmax.f32 %v466_v11, 0.0 }
 0x106   :  { %v459_v16 = vadd.f32 %v934_v41, %v436_v12  ;;  %v467_v17 = vadd.f32 %v934_v41, %v444_v13  ;;  %v714_v18 = vpop.f32.mrb[9].mxu0  ;;  %v738_v19 = vpop.f32.mrb[9].mxu1 }
 0x107   :  { %v715_v20 = vadd.f32 %v714_v18, %v713_v14  ;;  %v739_v21 = vadd.f32 %v738_v19, %v737_v15  ;;  %v716_v22 = vpop.f32.mrb[10].mxu0  ;;  %v740_v23 = vpop.f32.mrb[10].mxu1 }
 0x108   :  { %v475_v26 = vmax.f32 %v459_v16, 0.0  ;;  %v483_v27 = vmax.f32 %v467_v17, 0.0  ;;  %v717_v28 = vpop.f32.mrb[11].mxu0  ;;  %v741_v29 = vpop.f32.mrb[11].mxu1 }
 0x109   :  { %v437_v30 = vmul.f32 %v715_v20, %v929_v35  ;;  %v445_v31 = vmul.f32 %v739_v21, %v929_v35  ;;  %v718_v32 = vadd.f32 %v717_v28, %v716_v22  ;;  %v742_v33 = vadd.f32 %v741_v29, %v740_v23 }
 0x10a   :  { %v646_v34 = vpack.c.bf16 %v475_v26, %v474_v24  ;;  %v666_v36 = vpack.c.bf16 %v483_v27, %v482_v25 }
 0x10b   :  { %v460_v37 = vadd.f32 %v934_v41, %v437_v30  ;;  %v468_v38 = vadd.f32 %v934_v41, %v445_v31  ;;  %v438_v39 = vmul.f32 %v718_v32, %v929_v35  ;;  %v446_v40 = vmul.f32 %v742_v33, %v929_v35 }
 0x10c   :  { %678 = vst [vmem:[%s996_s4 + $0x8] sm:$0xff] %v646_v34   ;;  %682 = vst [vmem:[%s996_s4 + $0x28] sm:$0xff] %v666_v36  }
 0x10d   :  { %v461_v42 = vadd.f32 %v934_v41, %v438_v39  ;;  %v469_v43 = vadd.f32 %v934_v41, %v446_v40  ;;  %v719_v44 = vpop.f32.mrb[12].mxu0  ;;  %v743_v45 = vpop.f32.mrb[12].mxu1  ;;  %v476_v46 = vmax.f32 %v460_v37, 0.0  ;;  %v484_v47 = vmax.f32 %v468_v38, 0.0 }
 0x10e   :  { %v720_v48 = vpop.f32.mrb[13].mxu0  ;;  %v744_v49 = vpop.f32.mrb[13].mxu1 }
 0x10f   :  { %v477_v50 = vmax.f32 %v461_v42, 0.0  ;;  %v485_v51 = vmax.f32 %v469_v43, 0.0  ;;  %v721_v52 = vadd.f32 %v720_v48, %v719_v44  ;;  %v745_v53 = vadd.f32 %v744_v49, %v743_v45  ;;  %v722_v54 = vpop.f32.mrb[14].mxu0  ;;  %v746_v55 = vpop.f32.mrb[14].mxu1 }
 0x110   :  { %v723_v56 = vpop.f32.mrb[15].mxu0  ;;  %v747_v57 = vpop.f32.mrb[15].mxu1 }
 0x111   :  { %v651_v58 = vpack.c.bf16 %v477_v50, %v476_v46  ;;  %v671_v59 = vpack.c.bf16 %v485_v51, %v484_v47  ;;  %v439_v60 = vmul.f32 %v721_v52, %v929_v35  ;;  %v447_v61 = vmul.f32 %v745_v53, %v929_v35 }
 0x112   :  { %v724_v62 = vadd.f32 %v723_v56, %v722_v54  ;;  %v748_v63 = vadd.f32 %v747_v57, %v746_v55 }
 0x113   :  { %679 = vst [vmem:[%s996_s4 + $0x10] sm:$0xff] %v651_v58   ;;  %683 = vst [vmem:[%s996_s4 + $0x30] sm:$0xff] %v671_v59   ;;  %v462_v0 = vadd.f32 %v934_v41, %v439_v60  ;;  %v470_v1 = vadd.f32 %v934_v41, %v447_v61 }
 0x114   :  { %v440_v2 = vmul.f32 %v724_v62, %v929_v35  ;;  %v448_v3 = vmul.f32 %v748_v63, %v929_v35 }
 0x115   :  { %v478_v6 = vmax.f32 %v462_v0, 0.0  ;;  %v486_v7 = vmax.f32 %v470_v1, 0.0 }
 0x116   :  { %v463_v4 = vadd.f32 %v934_v41, %v440_v2  ;;  %v471_v5 = vadd.f32 %v934_v41, %v448_v3 }
 0x118   :  { %v479_v8 = vmax.f32 %v463_v4, 0.0  ;;  %v487_v9 = vmax.f32 %v471_v5, 0.0 }
 0x11a   :  { %v656_v10 = vpack.c.bf16 %v479_v8, %v478_v6  ;;  %v676_v11 = vpack.c.bf16 %v487_v9, %v486_v7 }
 0x11c   :  { %680 = vst [vmem:[%s996_s4 + $0x18] sm:$0xff] %v656_v10   ;;  %684 = vst [vmem:[%s996_s4 + $0x38] sm:$0xff] %v676_v11  }

// kernel: resnet_forward.23
= control target key start
LH: loop header
LB: loop body
LE: loop exit
PB: predicated region body
PF: predicated region fallthrough
CT: control target
= control target key end

     0   :  { %s594_s6 = smov 0   ;;  %s596_s7 = smov 0   ;;  %s705_s0 = inlined_call_operand.vmem [shape: bf16[4,2,5,5,64], index: 0, kind: input, shape index: {}]   ;;  %s706_s1 = inlined_call_operand.vmem [shape: bf16[2,4,4,64], index: 1, kind: output, shape index: {}]  }
   0x1   :  { %s598_s8 = smov 0  }
   0x2 LB: > { %s494_s9 = sadd.s32 4294967295, %s582_s8   ;;  %s611_s10 = sadd.s32 1, %s582_s8   ;;  %s582_s8 = sphi %s598_s8, %s710_s8   ;;  %s578_s7 = sphi %s596_s7, %s709_s7   ;;  %s574_s6 = sphi %s594_s6, %s708_s6  }
   0x3   : > { %s15_s11 = ssub.s32 %s582_s8, %s611_s10  ;;  %s18_s12 = sadd.s32 1, %s578_s7 }
   0x4   : > { %p16_p0 = scmp.eq.s32.totalorder %s15_s11, 0  ;;  %p25_p1 = scmp.ne.s32.totalorder %s578_s7, %s574_s6 }
   0x5   : > { %p26_p2 = scmp.eq.s32.totalorder %s582_s8, 0  ;;  %p497_p4 = scmp.ge.s32.totalorder %s582_s8, 2 }
   0x6   : > { %s620_s13 = scalar_select %p16_p0, %s578_s7, %s18_s12  }
   0x7   : > { %p27_p3 = por %p26_p2, %p25_p1  ;;  %77 = sbr.rel (%p497_p4) target bundleno = 25 (0x19), region = 16 }
   0xe   : > { %80 = sbr.rel (!%p27_p3) target bundleno = 25 (0x19), region = 20  ;;  %s82_s14 = sand.u32 (%p27_p3), 1, %s578_s7  }
   0xf   : > { %s534_s15 = smul.u32 (%p27_p3), 20, %s582_s8 }
  0x10   : > { %s533_s16 = smul.u32 (%p27_p3), 80, %s82_s14 }
  0x11   : > { %s87_s19 = scalar_lea.vmem (%p27_p3), %s705_s0, %s534_s15 }
  0x12   : > { %v103_v0 = vld [vmem:[%s87_s19] sm:$0xff] (%p27_p3)   ;;  %v107_v1 = vld [vmem:[%s87_s19 + $0x8] sm:$0xff] (%p27_p3)   ;;  %v111_v2 = vld [vmem:[%s87_s19 + $0x10] sm:$0xf] (%p27_p3)  ;;  %s84_s20 = scalar_lea.vmem (%p27_p3), [#allocation2], %s533_s16 }
  0x13   : > { %104 = vst [vmem:[%s84_s20] sm:$0xff] (%p27_p3), %v103_v0   ;;  %108 = vst [vmem:[%s84_s20 + $0x8] sm:$0xff] (%p27_p3), %v107_v1   ;;  %v113_v3 = vld [vmem:[%s87_s19 + $0x28] sm:$0xff] (%p27_p3)   ;;  %v117_v4 = vld [vmem:[%s87_s19 + $0x30] sm:$0xff] (%p27_p3)  }
  0x14   : > { %112 = vst [vmem:[%s84_s20 + $0x10] sm:$0xf] (%p27_p3), %v111_v2  ;;  %v121_v5 = vld [vmem:[%s87_s19 + $0x38] sm:$0xf] (%p27_p3)  ;;  %114 = vst [vmem:[%s84_s20 + $0x14] sm:$0xff] (%p27_p3), %v113_v3   ;;  %v123_v6 = vld [vmem:[%s87_s19 + $0x50] sm:$0xff] (%p27_p3)  }
  0x15   : > { %118 = vst [vmem:[%s84_s20 + $0x1c] sm:$0xff] %v117_v4   ;;  %122 = vst [vmem:[%s84_s20 + $0x24] sm:$0xf] %v121_v5  ;;  %v127_v7 = vld [vmem:[%s87_s19 + $0x58] sm:$0xff]   ;;  %v131_v8 = vld [vmem:[%s87_s19 + $0x60] sm:$0xf] }
  0x16   : > { %124 = vst [vmem:[%s84_s20 + $0x28] sm:$0xff] %v123_v6   ;;  %128 = vst [vmem:[%s84_s20 + $0x30] sm:$0xff] %v127_v7   ;;  %v133_v9 = vld [vmem:[%s87_s19 + $0x78] sm:$0xff]   ;;  %v137_v10 = vld [vmem:[%s87_s19 + $0x80] sm:$0xff]  }
  0x17   : > { %132 = vst [vmem:[%s84_s20 + $0x38] sm:$0xf] %v131_v8  ;;  %v141_v11 = vld [vmem:[%s87_s19 + $0x88] sm:$0xf]  ;;  %134 = vst [vmem:[%s84_s20 + $0x3c] sm:$0xff] %v133_v9  }
  0x18   : > { %138 = vst [vmem:[%s84_s20 + $0x44] sm:$0xff] %v137_v10   ;;  %142 = vst [vmem:[%s84_s20 + $0x4c] sm:$0xf] %v141_v11 }
  0x19 PF: > { %p499_p5 = scmp.ge.s32.totalorder %s582_s8, 1  ;;  %p204_p6 = scmp.lt.s32.totalorder %s582_s8, 3 }
  0x1b   : > { %p205_p7 = pnand %p499_p5, %p204_p6 }
  0x1c   : > { %s211_s21 = sand.u32 (!%p205_p7), 1, %s574_s6   ;;  %p646_p8 = scmp.lt.s32.totalorder (!%p205_p7), %s494_s9, 1  ;;  %vm428_vm0 = vcmask (!%p205_p7), 517120  }
  0x1d   : > { %208 = sbr.rel (%p205_p7) target bundleno = 73 (0x49), region = 61 }
  0x1e   : > { %s535_s22 = smul.u32 (!%p205_p7), 80, %s211_s21 }
  0x20   : > { %s631_s23 = scalar_lea.vmem (!%p205_p7), [#allocation2], %s535_s22 }
  0x21   : > { %v248_v12 = vld [vmem:[%s631_s23] sm:$0x7] (!%p205_p7)  ;;  %v514_v16 = vld [vmem:[%s631_s23 + $0x28] sm:$0x7] (!%p205_p7)  ;;  %v502_v17 = vld [vmem:[%s631_s23 + $0x14] sm:$0x3] (!%p205_p7) }
  0x22   : > { %v235_v13 = vld [vmem:[%s631_s23] sm:$0x3] (!%p205_p7)  ;;  %v253_v14 = vshrl.u32 (!%p205_p7), %v248_v12, 16  ;;  %v256_v15 = vshll.u32 (!%p205_p7), %v248_v12, 16  ;;  %v319_v18 = vshrl.u32 (!%p205_p7), %v514_v16, 16  ;;  %v322_v19 = vshll.u32 (!%p205_p7), %v514_v16, 16 }
  0x23   : > { %v526_v20 = vld [vmem:[%s631_s23 + $0x4] sm:$0x7] (!%p205_p7)  ;;  %v244_v28 = vmax.bf16 (!%p205_p7), %v502_v17, %v235_v13  ;;  %v506_v30 = vld [vmem:[%s631_s23 + $0x28] sm:$0x3] (!%p205_p7)  ;;  %v515_v34 = vld [vmem:[%s631_s23 + $0x2c] sm:$0x7] (!%p205_p7) }
  0x24   : > { %v255_v21 = vrot.slane %v253_v14, 4  ;;  %v258_v22 = vrot.slane %v256_v15, 5  ;;  %v321_v23 = vrot.slane %v319_v18, 4  ;;  %v324_v24 = vrot.slane %v322_v19, 5  ;;  %v249_v27 = vld [vmem:[%s631_s23 + $0x4] sm:$0x7] }
  0x25   : > { %v385_v25 = vshrl.u32 %v526_v20, 16  ;;  %v388_v26 = vshll.u32 %v526_v20, 16  ;;  %v236_v31 = vld [vmem:[%s631_s23 + $0x4] sm:$0x3]  ;;  %v262_v32 = vshrl.u32 %v249_v27, 16  ;;  %v265_v33 = vshll.u32 %v249_v27, 16 }
  0x26   : > { %v259_v29 = vor.u32 %v258_v22, %v255_v21  ;;  %v325_v36 = vor.u32 %v324_v24, %v321_v23  ;;  %v503_v37 = vld [vmem:[%s631_s23 + $0x18] sm:$0x3]  ;;  %v328_v38 = vshrl.u32 %v515_v34, 16  ;;  %v331_v39 = vshll.u32 %v515_v34, 16  ;;  %v527_v44 = vld [vmem:[%s631_s23 + $0x8] sm:$0x7] }
  0x27   : > { %v387_v40 = vrot.slane %v385_v25, 4  ;;  %v390_v41 = vrot.slane %v388_v26, 5  ;;  %v264_v42 = vrot.slane %v262_v32, 4  ;;  %v267_v43 = vrot.slane %v265_v33, 5  ;;  %v510_v48 = vld [vmem:[%s631_s23 + $0x3c] sm:$0x3] }
  0x28   : > { %v260_v35 = vrot.slane %v259_v29, 4  ;;  %v330_v46 = vrot.slane %v328_v38, 4  ;;  %v333_v47 = vrot.slane %v331_v39, 5  ;;  %v245_v49 = vmax.bf16 %v503_v37, %v236_v31  ;;  %v250_v53 = vld [vmem:[%s631_s23 + $0x8] sm:$0x7]  ;;  %s712_s9 = smov (!%p646_p8, %s494_s9), 1 }
  0x29   : > { %v268_v50 = vor.u32 %v267_v43, %v264_v42  ;;  %v394_v51 = vshrl.u32 %v527_v44, 16  ;;  %v397_v52 = vshll.u32 %v527_v44, 16  ;;  %v326_v55 = vrot.slane %v325_v36, 4  ;;  %v237_v57 = vld [vmem:[%s631_s23 + $0x8] sm:$0x3]  ;;  %s532_s25 = sshll.u32 %s712_s9, 3 }
  0x2a   : > { %v292_v45 = vmax.bf16 %v260_v35, %v244_v28  ;;  %v334_v56 = vor.u32 %v333_v47, %v330_v46  ;;  %v504_v58 = vld [vmem:[%s631_s23 + $0x1c] sm:$0x3]  ;;  %v271_v59 = vshrl.u32 %v250_v53, 16  ;;  %v391_v60 = vor.u32 %v390_v41, %v387_v40  ;;  %v516_v0 = vld [vmem:[%s631_s23 + $0x30] sm:$0x7]  ;;  %s676_s28 = scalar_lea.vmem %s706_s1, %s532_s25 }
  0x2b   : > { %v269_v61 = vrot.slane %v268_v50, 4  ;;  %v396_v62 = vrot.slane %v394_v51, 4  ;;  %v274_v63 = vshll.u32 %v250_v53, 16  ;;  %v507_v2 = vld [vmem:[%s631_s23 + $0x2c] sm:$0x3]  ;;  %v399_v3 = vrot.slane %v397_v52, 5 }
  0x2c   : > { %v301_v54 = vmax.bf16 %v506_v30, %v292_v45  ;;  %v273_v4 = vrot.slane %v271_v59, 4  ;;  %v337_v5 = vshrl.u32 %v516_v0, 16  ;;  %v518_v6 = vld [vmem:[%s631_s23 + $0x4] sm:$0x3]  ;;  %v246_v8 = vmax.bf16 %v504_v58, %v237_v57  ;;  %v528_v11 = vld [vmem:[%s631_s23 + $0xc] sm:$0x7] }
  0x2d   : > { %v293_v7 = vmax.bf16 %v269_v61, %v245_v49  ;;  %v276_v9 = vrot.slane %v274_v63, 5  ;;  %v340_v10 = vshll.u32 %v516_v0, 16  ;;  %v511_v13 = vld [vmem:[%s631_s23 + $0x40] sm:$0x3]  ;;  %v335_v14 = vrot.slane %v334_v56, 4 }
  0x2e   : > { %v310_v1 = vmax.bf16 %v510_v48, %v301_v54  ;;  %v339_v15 = vrot.slane %v337_v5, 4  ;;  %v403_v16 = vshrl.u32 %v528_v11, 16  ;;  %v522_v17 = vld [vmem:[%s631_s23 + $0x18] sm:$0x3]  ;;  %v406_v21 = vshll.u32 %v528_v11, 16 }
  0x2f   : > { %v302_v18 = vmax.bf16 %v507_v2, %v293_v7  ;;  %v277_v19 = vor.u32 %v276_v9, %v273_v4  ;;  %v342_v20 = vrot.slane %v340_v10, 5  ;;  %v251_v22 = vld [vmem:[%s631_s23 + $0xc] sm:$0x7]  ;;  %v392_v24 = vrot.slane %v391_v60, 4  ;;  %v519_v25 = vld [vmem:[%s631_s23 + $0x8] sm:$0x3] }
  0x30   : > { %v358_v12 = vmax.bf16 %v326_v55, %v310_v1  ;;  %v400_v26 = vor.u32 %v399_v3, %v396_v62  ;;  %v508_v29 = vld [vmem:[%s631_s23 + $0x30] sm:$0x3]  ;;  %v280_v31 = vshrl.u32 %v251_v22, 16  ;;  %v517_v32 = vld [vmem:[%s631_s23 + $0x34] sm:$0x7]  ;;  %v405_v35 = vrot.slane %v403_v16, 4 }
  0x31   : > { %v311_v27 = vmax.bf16 %v511_v13, %v302_v18  ;;  %v278_v28 = vrot.slane %v277_v19, 4  ;;  %v343_v30 = vor.u32 %v342_v20, %v339_v15  ;;  %v523_v34 = vld [vmem:[%s631_s23 + $0x1c] sm:$0x3]  ;;  %v238_v36 = vld [vmem:[%s631_s23 + $0xc] sm:$0x3]  ;;  %v283_v37 = vshll.u32 %v251_v22, 16 }
  0x32   : > { %v367_v23 = vmax.bf16 %v518_v6, %v358_v12  ;;  %v346_v38 = vshrl.u32 %v517_v32, 16  ;;  %v408_v41 = vrot.slane %v406_v21, 5  ;;  %v505_v42 = vld [vmem:[%s631_s23 + $0x20] sm:$0x3]  ;;  %v282_v43 = vrot.slane %v280_v31, 4 }
  0x33   : > { %v359_v39 = vmax.bf16 %v335_v14, %v311_v27  ;;  %v294_v40 = vmax.bf16 %v278_v28, %v246_v8  ;;  %v529_v44 = vld [vmem:[%s631_s23 + $0x10] sm:$0x7]  ;;  %v401_v46 = vrot.slane %v400_v26, 4  ;;  %v512_v47 = vld [vmem:[%s631_s23 + $0x44] sm:$0x3]  ;;  %v344_v48 = vrot.slane %v343_v30, 4 }
  0x34   : > { %v376_v33 = vmax.bf16 %v522_v17, %v367_v23  ;;  %v285_v49 = vrot.slane %v283_v37, 5  ;;  %v348_v52 = vrot.slane %v346_v38, 4  ;;  %v349_v53 = vshll.u32 %v517_v32, 16  ;;  %v520_v62 = vld [vmem:[%s631_s23 + $0xc] sm:$0x3] }
  0x35   : > { %v368_v50 = vmax.bf16 %v519_v25, %v359_v39  ;;  %v303_v51 = vmax.bf16 %v508_v29, %v294_v40  ;;  %v247_v54 = vmax.bf16 %v505_v42, %v238_v36  ;;  %v412_v56 = vshrl.u32 %v529_v44, 16  ;;  %v509_v2 = vld [vmem:[%s631_s23 + $0x34] sm:$0x3]  ;;  %v524_v4 = vld [vmem:[%s631_s23 + $0x20] sm:$0x3] }
  0x36   : > { %v424_v45 = vmax.bf16 %v392_v24, %v376_v33  ;;  %v286_v55 = vor.u32 %v285_v49, %v282_v43  ;;  %v415_v57 = vshll.u32 %v529_v44, 16  ;;  %v409_v60 = vor.u32 %v408_v41, %v405_v35  ;;  %v513_v10 = vld [vmem:[%s631_s23 + $0x48] sm:$0x3]  ;;  %v521_v17 = vld [vmem:[%s631_s23 + $0x10] sm:$0x3] }
  0x37   : > { %v377_v58 = vmax.bf16 %v523_v34, %v368_v50  ;;  %v312_v59 = vmax.bf16 %v512_v47, %v303_v51  ;;  %v351_v61 = vrot.slane %v349_v53, 5  ;;  %v414_v6 = vrot.slane %v412_v56, 4  ;;  %v525_v19 = vld [vmem:[%s631_s23 + $0x24] sm:$0x3] }
  0x38   : > { %429 = vst.msk [vmem:[%s676_s28] sm:$0x3] %vm428_vm0, %v424_v45  ;;  %v287_v63 = vrot.slane %v286_v55, 4  ;;  %v417_v7 = vrot.slane %v415_v57, 5  ;;  %v410_v9 = vrot.slane %v409_v60, 4 }
  0x39   : > { %v425_v0 = vmax.bf16 %v401_v46, %v377_v58  ;;  %v360_v1 = vmax.bf16 %v344_v48, %v312_v59  ;;  %v352_v3 = vor.u32 %v351_v61, %v348_v52 }
  0x3a   : > { %v295_v5 = vmax.bf16 %v287_v63, %v247_v54  ;;  %v418_v15 = vor.u32 %v417_v7, %v414_v6 }
  0x3b   : > { %430 = vst.msk [vmem:[%s676_s28 + $0x2] sm:$0x3] %vm428_vm0, %v425_v0  ;;  %v369_v8 = vmax.bf16 %v520_v62, %v360_v1  ;;  %v353_v12 = vrot.slane %v352_v3, 4 }
  0x3c   : > { %v304_v11 = vmax.bf16 %v509_v2, %v295_v5  ;;  %v419_v21 = vrot.slane %v418_v15, 4 }
  0x3d   : > { %v378_v13 = vmax.bf16 %v524_v4, %v369_v8 }
  0x3e   : > { %v313_v14 = vmax.bf16 %v513_v10, %v304_v11 }
  0x3f   : > { %v426_v16 = vmax.bf16 %v410_v9, %v378_v13 }
  0x40   : > { %v361_v18 = vmax.bf16 %v353_v12, %v313_v14 }
  0x41   : > { %431 = vst.msk [vmem:[%s676_s28 + $0x4] sm:$0x3] %vm428_vm0, %v426_v16 }
  0x42   : > { %v370_v20 = vmax.bf16 %v521_v17, %v361_v18 }
  0x44   : > { %v379_v22 = vmax.bf16 %v525_v19, %v370_v20 }
  0x46   : > { %v427_v23 = vmax.bf16 %v419_v21, %v379_v22 }
  0x48   : > { %432 = vst.msk [vmem:[%s676_s28 + $0x6] sm:$0x3] %vm428_vm0, %v427_v23 }
  0x49 PF: > { %p8_p9 = scmp.ge.s32.totalorder %s611_s10, 4   ;;  %s708_s6 = smov %s578_s7 }
  0x4a   : > { %s709_s7 = smov %s620_s13  ;;  %s710_s8 = smov %s611_s10 }
  0x4b   :  { %10 = sbr.rel (!%p8_p9) target bundleno = 2 (0x2), region = 105 }

// kernel: resnet_forward.24
= control target key start
LH: loop header
LB: loop body
LE: loop exit
PB: predicated region body
PF: predicated region fallthrough
CT: control target
= control target key end

     0   :  { %s867_s15 = smov 0   ;;  %s869_s16 = smov 0   ;;  %s963_s0 = inlined_call_operand.vmem [shape: bf16[32,640], index: 0, kind: input, shape index: {}]   ;;  %s964_s1 = inlined_call_operand.vmem [shape: bf16[640,128], index: 1, kind: input, shape index: {}]   ;;  %s965_s2 = inlined_call_operand.vmem [shape: f32[1,128], index: 2, kind: input, shape index: {}]   ;;  %s966_s3 = inlined_call_operand.vmem [shape: f32[1,128], index: 3, kind: input, shape index: {}]   ;;  %s967_s4 = inlined_call_operand.vmem [shape: bf16[32,128], index: 4, kind: output, shape index: {}]  }
   0x1   :  { %s871_s17 = smov 0   ;;  %s873_s18 = smov 0  }
   0x2   :  { %s875_s19 = smov 0  }
   0x3 LB: > { %s26_s20 = sadd.s32 1, %s835_s18  ;;  %p49_p1 = scmp.ne.s32.totalorder %s827_s16, %s823_s15  ;;  %s839_s19 = sphi %s875_s19, %s14_s19   ;;  %s835_s18 = sphi %s873_s18, %s971_s18   ;;  %s831_s17 = sphi %s871_s17, %s970_s17   ;;  %s827_s16 = sphi %s869_s16, %s969_s16   ;;  %s823_s15 = sphi %s867_s15, %s968_s15  }
   0x4   : > { %p27_p0 = scmp.ge.s32.totalorder %s26_s20, 5  ;;  %p50_p2 = scmp.eq.s32.totalorder %s839_s19, 0 }
   0x5   : > { %s42_s22 = sadd.s32 1, %s827_s16  ;;  %p676_p5 = scmp.ge.s32.totalorder %s839_s19, 5 }
   0x6   : > { %s973_s20 = smov (%p27_p0, %s26_s20), 0  ;;  %p51_p3 = por %p50_p2, %p49_p1 }
   0x7   : > { %s38_s21 = ssub.s32 %s835_s18, %s973_s20  ;;  %195 = sbr.rel (%p676_p5) target bundleno = 21 (0x15), region = 24 }
   0x8   : > { %p40_p4 = scmp.eq.s32.totalorder %s38_s21, 0 }
   0xa   : > { %s902_s23 = scalar_select %p40_p4, %s827_s16, %s42_s22  }
   0xe   : > { %198 = sbr.rel (!%p51_p3) target bundleno = 21 (0x15), region = 28  ;;  %s200_s24 = sand.u32 (%p51_p3), 1, %s827_s16  }
   0xf   : > { %s678_s25 = sshll.u32 (%p51_p3), %s835_s18, 2  ;;  %s677_s26 = sshll.u32 (%p51_p3), %s200_s24, 4 }
  0x10   : > { %s207_s29 = scalar_lea.vmem (%p51_p3), %s963_s0, %s678_s25  ;;  %s202_s30 = scalar_lea.vmem (%p51_p3), [#allocation3], %s677_s26 }
  0x11   : > { %v223_v0 = vld [vmem:[%s207_s29] sm:$0xf] (%p51_p3)  ;;  %v225_v1 = vld [vmem:[%s207_s29 + $0x14] sm:$0xf] (%p51_p3)  ;;  %v227_v2 = vld [vmem:[%s207_s29 + $0x28] sm:$0xf] (%p51_p3) }
  0x12   : > { %224 = vst [vmem:[%s202_s30] sm:$0xf] (%p51_p3), %v223_v0  ;;  %226 = vst [vmem:[%s202_s30 + $0x4] sm:$0xf] (%p51_p3), %v225_v1  ;;  %v229_v3 = vld [vmem:[%s207_s29 + $0x3c] sm:$0xf] (%p51_p3) }
  0x13   : > { %228 = vst [vmem:[%s202_s30 + $0x8] sm:$0xf] (%p51_p3), %v227_v2  ;;  %230 = vst [vmem:[%s202_s30 + $0xc] sm:$0xf] (%p51_p3), %v229_v3 }
  0x15 PF: > { %p679_p6 = scmp.ge.s32.totalorder %s839_s19, 1  ;;  %p272_p7 = scmp.lt.s32.totalorder %s839_s19, 6 }
  0x17   : > { %p273_p8 = pnand %p679_p6, %p272_p7 }
  0x18   : > { %s279_s5 = sand.u32 (!%p273_p8), 1, %s823_s15   ;;  %s681_s6 = sshll.u32 (!%p273_p8), %s831_s17, 4 }
  0x19   : > { %276 = sbr.rel (%p273_p8) target bundleno = 306 (0x132), region = 73  ;;  %s914_s7 = sshll.u32 (!%p273_p8), %s279_s5, 4 }
  0x1a   : > { %p323_p9 = scmp.lt.s32.totalorder (!%p273_p8), %s681_s6, 79  ;;  %s281_s12 = scalar_lea.vmem (!%p273_p8), [#allocation3], %s914_s7 }
  0x1b   : > { %p683_p10 = scmp.ne.s32.totalorder (!%p273_p8), %s831_s17, 0 }
  0x20   : > { %s975_s6 = smov (!%p323_p9, %s681_s6), 79  ;;  %350 = sbr.rel (%p683_p10) target bundleno = 39 (0x27), region = 81 }
  0x21   : > { %s682_s8 = sshll.u32 %s975_s6, 2  ;;  %v841_v4 = vmov (!%p683_p10), 0.0  }
  0x22   : > { %s919_s11 = scalar_lea.vmem %s964_s1, %s682_s8  ;;  %351 = vst [vmem:[#allocation2] sm:$0xff] (!%p683_p10), %v841_v4  ;;  %352 = vst [vmem:[#allocation2 + $0x8] sm:$0xff] (!%p683_p10), %v841_v4 }
  0x23   : > { %353 = vst [vmem:[#allocation2 + $0x10] sm:$0xff] (!%p683_p10), %v841_v4  ;;  %354 = vst [vmem:[#allocation2 + $0x18] sm:$0xff] (!%p683_p10), %v841_v4 }
  0x27 PF: > { %v791_v5 = vld [vmem:[%s919_s11] sm:$0xff]   ;;  %v792_v6 = vld [vmem:[%s919_s11 + $0x8] sm:$0xff]   ;;  %v793_v7 = vld [vmem:[%s919_s11 + $0x10] sm:$0xff]   ;;  %p694_p11 = scmp.ne.s32.totalorder %s831_s17, 4 }
  0x28   : > { %730 = vmatprep.subr.bf16.mxu0 %v791_v5  ;;  %v794_v8 = vld [vmem:[%s919_s11 + $0x18] sm:$0xff]   ;;  %v799_v9 = vld [vmem:[%s281_s12] sm:$0xff]   ;;  %v796_v11 = vld [vmem:[%s919_s11 + $0x28] sm:$0xff]  }
  0x29   : > { %731 = vmatpush3.bf16.msra.mxu0 %v791_v5  ;;  %746 = vmatprep.mubr.bf16.mxu0 %v799_v9  ;;  %v795_v10 = vld [vmem:[%s919_s11 + $0x20] sm:$0xff]   ;;  %v797_v12 = vld [vmem:[%s919_s11 + $0x30] sm:$0xff]   ;;  %v798_v13 = vld [vmem:[%s919_s11 + $0x38] sm:$0xff]  }
  0x2a   : > { %732 = vmatprep.subr.bf16.mxu0 %v792_v6  ;;  %v800_v14 = vld [vmem:[%s281_s12 + $0x8] sm:$0xff]   ;;  %v357_v15 = vld [vmem:[#allocation2 + $0x10] sm:$0xff]  ;;  %v355_v16 = vld [vmem:[#allocation2] sm:$0xff] }
  0x2b   : > { %v358_v18 = vld [vmem:[#allocation2 + $0x18] sm:$0xff]  ;;  %v356_v21 = vld [vmem:[#allocation2 + $0x8] sm:$0xff]  ;;  %v695_v29 = vld [vmem:[%s965_s2] ss:$0 sm:$0xff] (!%p694_p11) }
  0x2c   : > { %v696_v32 = vld [vmem:[%s966_s3] ss:$0 sm:$0xff] (!%p694_p11) }
  0x2d   : > { %733 = vmatpush3.bf16.msra.mxu0 %v792_v6 }
  0x2e   : > { %734 = vmatprep.subr.bf16.mxu0 %v793_v7 }
  0x31   : > { %735 = vmatpush3.bf16.msra.mxu0 %v793_v7 }
  0x32   : > { %736 = vmatprep.subr.bf16.mxu0 %v794_v8 }
  0x35   : > { %737 = vmatpush3.bf16.msra.mxu0 %v794_v8 }
  0x36   : > { %738 = vmatprep.subr.bf16.mxu0 %v795_v10 }
  0x39   : > { %739 = vmatpush3.bf16.msra.mxu0 %v795_v10 }
  0x3a   : > { %740 = vmatprep.subr.bf16.mxu0 %v796_v11 }
  0x3d   : > { %741 = vmatpush3.bf16.msra.mxu0 %v796_v11 }
  0x3e   : > { %742 = vmatprep.subr.bf16.mxu0 %v797_v12 }
  0x41   : > { %743 = vmatpush3.bf16.msra.mxu0 %v797_v12 }
  0x42   : > { %744 = vmatprep.subr.bf16.mxu0 %v798_v13 }
  0x45   : > { %745 = vmatpush3.bf16.msra.mxu0 %v798_v13 }
  0x48   : > { %747 = vmatmul.mubr.bf16.vlgmr.msra.gmra.mrb[0].mxu0 %v800_v14 }
 0x11b   : > { %v748_v17 = vpop.f32.mrb[0].mxu0  ;;  %499 = sbr.rel (%p694_p11) target bundleno = 306 (0x132), region = 85 }
 0x11c   : > { %v490_v19 = vadd.f32 %v748_v17, %v357_v15  ;;  %v473_v20 = vpop.f32.mrb[1].mxu0 }
 0x11d   : > { %v488_v22 = vadd.f32 %v473_v20, %v355_v16  ;;  %v749_v23 = vpop.f32.mrb[2].mxu0 }
 0x11e   : > { %494 = vst [vmem:[#allocation2 + $0x10] sm:$0xff] %v490_v19  ;;  %v491_v24 = vadd.f32 %v749_v23, %v358_v18  ;;  %v476_v25 = vpop.f32.mrb[3].mxu0 }
 0x11f   : > { %492 = vst [vmem:[#allocation2] sm:$0xff] %v488_v22  ;;  %v489_v26 = vadd.f32 %v476_v25, %v356_v21 }
 0x120   : > { %495 = vst [vmem:[#allocation2 + $0x18] sm:$0xff] %v491_v24 }
 0x121   : > { %493 = vst [vmem:[#allocation2 + $0x8] sm:$0xff] %v489_v26 }
 0x125   : > { %v502_v33 = vld [vmem:[#allocation2 + $0x10] sm:$0xff] }
 0x126   : > { %v500_v27 = vld [vmem:[#allocation2] sm:$0xff]  ;;  %v513_v35 = vmul.f32 %v695_v29, %v502_v33 }
 0x127   : > { %v511_v30 = vmul.f32 %v695_v29, %v500_v27  ;;  %v503_v34 = vld [vmem:[#allocation2 + $0x18] sm:$0xff] }
 0x128   : > { %v501_v28 = vld [vmem:[#allocation2 + $0x8] sm:$0xff]  ;;  %v514_v36 = vmul.f32 %v695_v29, %v503_v34  ;;  %v524_v39 = vadd.f32 %v696_v32, %v513_v35 }
 0x129   : > { %v512_v31 = vmul.f32 %v695_v29, %v501_v28  ;;  %v522_v37 = vadd.f32 %v696_v32, %v511_v30 }
 0x12a   : > { %v525_v40 = vadd.f32 %v696_v32, %v514_v36  ;;  %v528_v43 = vmax.f32 %v524_v39, 0.0 }
 0x12b   : > { %v523_v38 = vadd.f32 %v696_v32, %v512_v31  ;;  %v526_v41 = vmax.f32 %v522_v37, 0.0 }
 0x12c   : > { %v529_v44 = vmax.f32 %v525_v40, 0.0 }
 0x12d   : > { %v527_v42 = vmax.f32 %v523_v38, 0.0 }
 0x12e   : > { %v717_v46 = vpack.c.bf16 %v529_v44, %v528_v43 }
 0x12f   : > { %v712_v45 = vpack.c.bf16 %v527_v42, %v526_v41 }
 0x130   : > { %719 = vst [vmem:[%s967_s4 + $0x8] sm:$0xff] %v717_v46  }
 0x131   : > { %713 = vst [vmem:[%s967_s4] sm:$0xff] %v712_v45  }
 0x132 PF: > { %s14_s19 = sadd.s32 1, %s839_s19   ;;  %s968_s15 = smov %s827_s16 }
 0x133   : > { %p11_p12 = scmp.ge.s32.totalorder %s14_s19, 7   ;;  %s969_s16 = smov %s902_s23 }
 0x134   : > { %s970_s17 = smov %s835_s18  ;;  %s971_s18 = smov %s973_s20 }
 0x135   :  { %13 = sbr.rel (!%p11_p12) target bundleno = 3 (0x3), region = 129 }

// kernel: resnet_forward.25
= control target key start
LH: loop header
LB: loop body
LE: loop exit
PB: predicated region body
PF: predicated region fallthrough
CT: control target
= control target key end

     0   :  { %s972_s18 = smov 0   ;;  %s974_s19 = smov 0   ;;  %s1074_s0 = inlined_call_operand.vmem [shape: bf16[32,640], index: 0, kind: input, shape index: {}]   ;;  %s1075_s1 = inlined_call_operand.vmem [shape: bf16[640,128], index: 1, kind: input, shape index: {}]   ;;  %s1076_s2 = inlined_call_operand.vmem [shape: f32[1,128], index: 2, kind: input, shape index: {}]   ;;  %s1077_s3 = inlined_call_operand.vmem [shape: f32[1,128], index: 3, kind: input, shape index: {}]   ;;  %s1078_s4 = inlined_call_operand.vmem [shape: bf16[32,128], index: 4, kind: input, shape index: {}]   ;;  %s1079_s5 = inlined_call_operand.vmem [shape: bf16[32,128], index: 5, kind: output, shape index: {}]  }
   0x1   :  { %s976_s20 = smov 0   ;;  %s978_s21 = smov 0  }
   0x2   :  { %s980_s22 = smov 0  }
   0x3 LB: > { %s27_s23 = sadd.s32 1, %s935_s21  ;;  %p50_p1 = scmp.ne.s32.totalorder %s927_s19, %s923_s18  ;;  %s939_s22 = sphi %s980_s22, %s15_s22   ;;  %s935_s21 = sphi %s978_s21, %s1083_s21   ;;  %s931_s20 = sphi %s976_s20, %s1082_s20   ;;  %s927_s19 = sphi %s974_s19, %s1081_s19   ;;  %s923_s18 = sphi %s972_s18, %s1080_s18  }
   0x4   : > { %p28_p0 = scmp.ge.s32.totalorder %s27_s23, 5  ;;  %p51_p2 = scmp.eq.s32.totalorder %s939_s22, 0 }
   0x5   : > { %s43_s25 = sadd.s32 1, %s927_s19  ;;  %p767_p5 = scmp.ge.s32.totalorder %s939_s22, 5 }
   0x6   : > { %s1085_s23 = smov (%p28_p0, %s27_s23), 0  ;;  %p52_p3 = por %p51_p2, %p50_p1 }
   0x7   : > { %s39_s24 = ssub.s32 %s935_s21, %s1085_s23  ;;  %236 = sbr.rel (%p767_p5) target bundleno = 21 (0x15), region = 28 }
   0x8   : > { %p41_p4 = scmp.eq.s32.totalorder %s39_s24, 0 }
   0xa   : > { %s1007_s26 = scalar_select %p41_p4, %s927_s19, %s43_s25  }
   0xe   : > { %239 = sbr.rel (!%p52_p3) target bundleno = 21 (0x15), region = 32  ;;  %s241_s27 = sand.u32 (%p52_p3), 1, %s927_s19  }
   0xf   : > { %s769_s28 = sshll.u32 (%p52_p3), %s935_s21, 2  ;;  %s768_s29 = sshll.u32 (%p52_p3), %s241_s27, 4 }
  0x10   : > { %s248_s7 = scalar_lea.vmem (%p52_p3), %s1074_s0, %s769_s28  ;;  %s243_s8 = scalar_lea.vmem (%p52_p3), [#allocation3], %s768_s29 }
  0x11   : > { %v264_v0 = vld [vmem:[%s248_s7] sm:$0xf] (%p52_p3)  ;;  %v266_v1 = vld [vmem:[%s248_s7 + $0x14] sm:$0xf] (%p52_p3)  ;;  %v268_v2 = vld [vmem:[%s248_s7 + $0x28] sm:$0xf] (%p52_p3) }
  0x12   : > { %265 = vst [vmem:[%s243_s8] sm:$0xf] (%p52_p3), %v264_v0  ;;  %267 = vst [vmem:[%s243_s8 + $0x4] sm:$0xf] (%p52_p3), %v266_v1  ;;  %v270_v3 = vld [vmem:[%s248_s7 + $0x3c] sm:$0xf] (%p52_p3) }
  0x13   : > { %269 = vst [vmem:[%s243_s8 + $0x8] sm:$0xf] (%p52_p3), %v268_v2  ;;  %271 = vst [vmem:[%s243_s8 + $0xc] sm:$0xf] (%p52_p3), %v270_v3 }
  0x15 PF: > { %p770_p6 = scmp.ge.s32.totalorder %s939_s22, 1  ;;  %p313_p7 = scmp.lt.s32.totalorder %s939_s22, 6 }
  0x17   : > { %p314_p8 = pnand %p770_p6, %p313_p7 }
  0x18   : > { %s320_s9 = sand.u32 (!%p314_p8), 1, %s923_s18   ;;  %s772_s10 = sshll.u32 (!%p314_p8), %s931_s20, 4 }
  0x19   : > { %317 = sbr.rel (%p314_p8) target bundleno = 308 (0x134), region = 77  ;;  %s1019_s11 = sshll.u32 (!%p314_p8), %s320_s9, 4 }
  0x1a   : > { %p374_p9 = scmp.lt.s32.totalorder (!%p314_p8), %s772_s10, 79  ;;  %s322_s16 = scalar_lea.vmem (!%p314_p8), [#allocation3], %s1019_s11 }
  0x1b   : > { %p774_p10 = scmp.ne.s32.totalorder (!%p314_p8), %s931_s20, 0 }
  0x20   : > { %s1087_s10 = smov (!%p374_p9, %s772_s10), 79  ;;  %410 = sbr.rel (%p774_p10) target bundleno = 39 (0x27), region = 85 }
  0x21   : > { %s773_s12 = sshll.u32 %s1087_s10, 2  ;;  %v941_v4 = vmov (!%p774_p10), 0.0  }
  0x22   : > { %s1024_s15 = scalar_lea.vmem %s1075_s1, %s773_s12  ;;  %411 = vst [vmem:[#allocation2] sm:$0xff] (!%p774_p10), %v941_v4  ;;  %412 = vst [vmem:[#allocation2 + $0x8] sm:$0xff] (!%p774_p10), %v941_v4 }
  0x23   : > { %413 = vst [vmem:[#allocation2 + $0x10] sm:$0xff] (!%p774_p10), %v941_v4  ;;  %414 = vst [vmem:[#allocation2 + $0x18] sm:$0xff] (!%p774_p10), %v941_v4 }
  0x27 PF: > { %v891_v5 = vld [vmem:[%s1024_s15] sm:$0xff]   ;;  %v892_v6 = vld [vmem:[%s1024_s15 + $0x8] sm:$0xff]   ;;  %v893_v7 = vld [vmem:[%s1024_s15 + $0x10] sm:$0xff]   ;;  %p785_p11 = scmp.ne.s32.totalorder %s931_s20, 4 }
  0x28   : > { %830 = vmatprep.subr.bf16.mxu0 %v891_v5  ;;  %v894_v8 = vld [vmem:[%s1024_s15 + $0x18] sm:$0xff]   ;;  %v899_v9 = vld [vmem:[%s322_s16] sm:$0xff]   ;;  %v896_v11 = vld [vmem:[%s1024_s15 + $0x28] sm:$0xff]  }
  0x29   : > { %831 = vmatpush3.bf16.msra.mxu0 %v891_v5  ;;  %846 = vmatprep.mubr.bf16.mxu0 %v899_v9  ;;  %v895_v10 = vld [vmem:[%s1024_s15 + $0x20] sm:$0xff]   ;;  %v897_v12 = vld [vmem:[%s1024_s15 + $0x30] sm:$0xff]   ;;  %v898_v13 = vld [vmem:[%s1024_s15 + $0x38] sm:$0xff]  }
  0x2a   : > { %832 = vmatprep.subr.bf16.mxu0 %v892_v6  ;;  %v900_v14 = vld [vmem:[%s322_s16 + $0x8] sm:$0xff]   ;;  %v417_v15 = vld [vmem:[#allocation2 + $0x10] sm:$0xff]  ;;  %v415_v16 = vld [vmem:[#allocation2] sm:$0xff] }
  0x2b   : > { %v418_v18 = vld [vmem:[#allocation2 + $0x18] sm:$0xff]  ;;  %v416_v21 = vld [vmem:[#allocation2 + $0x8] sm:$0xff]  ;;  %v786_v29 = vld [vmem:[%s1076_s2] ss:$0 sm:$0xff] (!%p785_p11) }
  0x2c   : > { %v787_v32 = vld [vmem:[%s1077_s3] ss:$0 sm:$0xff] (!%p785_p11)  ;;  %v818_v39 = vld [vmem:[%s1078_s4 + $0x8] sm:$0xff] (!%p785_p11)  }
  0x2d   : > { %833 = vmatpush3.bf16.msra.mxu0 %v892_v6  ;;  %v801_v33 = vld [vmem:[%s1078_s4] sm:$0xff] (!%p785_p11)   ;;  %v806_v43 = vunpack.c.l.bf16 (!%p785_p11), %v818_v39  ;;  %v807_v45 = vunpack.c.h.bf16 (!%p785_p11), %v818_v39 }
  0x2e   : > { %834 = vmatprep.subr.bf16.mxu0 %v893_v7  ;;  %v802_v35 = vunpack.c.l.bf16 (!%p785_p11), %v801_v33  ;;  %v803_v36 = vunpack.c.h.bf16 (!%p785_p11), %v801_v33 }
  0x31   : > { %835 = vmatpush3.bf16.msra.mxu0 %v893_v7 }
  0x32   : > { %836 = vmatprep.subr.bf16.mxu0 %v894_v8 }
  0x35   : > { %837 = vmatpush3.bf16.msra.mxu0 %v894_v8 }
  0x36   : > { %838 = vmatprep.subr.bf16.mxu0 %v895_v10 }
  0x39   : > { %839 = vmatpush3.bf16.msra.mxu0 %v895_v10 }
  0x3a   : > { %840 = vmatprep.subr.bf16.mxu0 %v896_v11 }
  0x3d   : > { %841 = vmatpush3.bf16.msra.mxu0 %v896_v11 }
  0x3e   : > { %842 = vmatprep.subr.bf16.mxu0 %v897_v12 }
  0x41   : > { %843 = vmatpush3.bf16.msra.mxu0 %v897_v12 }
  0x42   : > { %844 = vmatprep.subr.bf16.mxu0 %v898_v13 }
  0x45   : > { %845 = vmatpush3.bf16.msra.mxu0 %v898_v13 }
  0x48   : > { %847 = vmatmul.mubr.bf16.vlgmr.msra.gmra.mrb[0].mxu0 %v900_v14 }
 0x11b   : > { %v848_v17 = vpop.f32.mrb[0].mxu0  ;;  %559 = sbr.rel (%p785_p11) target bundleno = 308 (0x134), region = 89 }
 0x11c   : > { %v550_v19 = vadd.f32 %v848_v17, %v417_v15  ;;  %v533_v20 = vpop.f32.mrb[1].mxu0 }
 0x11d   : > { %v548_v22 = vadd.f32 %v533_v20, %v415_v16  ;;  %v849_v23 = vpop.f32.mrb[2].mxu0 }
 0x11e   : > { %554 = vst [vmem:[#allocation2 + $0x10] sm:$0xff] %v550_v19  ;;  %v551_v24 = vadd.f32 %v849_v23, %v418_v18  ;;  %v536_v25 = vpop.f32.mrb[3].mxu0 }
 0x11f   : > { %552 = vst [vmem:[#allocation2] sm:$0xff] %v548_v22  ;;  %v549_v26 = vadd.f32 %v536_v25, %v416_v21 }
 0x120   : > { %555 = vst [vmem:[#allocation2 + $0x18] sm:$0xff] %v551_v24 }
 0x121   : > { %553 = vst [vmem:[#allocation2 + $0x8] sm:$0xff] %v549_v26 }
 0x125   : > { %v562_v34 = vld [vmem:[#allocation2 + $0x10] sm:$0xff] }
 0x126   : > { %v560_v27 = vld [vmem:[#allocation2] sm:$0xff]  ;;  %v573_v38 = vmul.f32 %v786_v29, %v562_v34 }
 0x127   : > { %v571_v30 = vmul.f32 %v786_v29, %v560_v27  ;;  %v563_v37 = vld [vmem:[#allocation2 + $0x18] sm:$0xff] }
 0x128   : > { %v561_v28 = vld [vmem:[#allocation2 + $0x8] sm:$0xff]  ;;  %v574_v42 = vmul.f32 %v786_v29, %v563_v37  ;;  %v584_v44 = vadd.f32 %v787_v32, %v573_v38 }
 0x129   : > { %v572_v31 = vmul.f32 %v786_v29, %v561_v28  ;;  %v582_v40 = vadd.f32 %v787_v32, %v571_v30 }
 0x12a   : > { %v585_v48 = vadd.f32 %v787_v32, %v574_v42  ;;  %v596_v49 = vadd.f32 %v806_v43, %v584_v44 }
 0x12b   : > { %v583_v41 = vadd.f32 %v787_v32, %v572_v31  ;;  %v594_v46 = vadd.f32 %v802_v35, %v582_v40 }
 0x12c   : > { %v597_v52 = vadd.f32 %v807_v45, %v585_v48  ;;  %v600_v53 = vmax.f32 %v596_v49, 0.0 }
 0x12d   : > { %v595_v47 = vadd.f32 %v803_v36, %v583_v41  ;;  %v598_v50 = vmax.f32 %v594_v46, 0.0 }
 0x12e   : > { %v601_v55 = vmax.f32 %v597_v52, 0.0 }
 0x12f   : > { %v599_v51 = vmax.f32 %v595_v47, 0.0 }
 0x130   : > { %v816_v56 = vpack.c.bf16 %v601_v55, %v600_v53 }
 0x131   : > { %v811_v54 = vpack.c.bf16 %v599_v51, %v598_v50 }
 0x132   : > { %819 = vst [vmem:[%s1079_s5 + $0x8] sm:$0xff] %v816_v56  }
 0x133   : > { %812 = vst [vmem:[%s1079_s5] sm:$0xff] %v811_v54  }
 0x134 PF: > { %s15_s22 = sadd.s32 1, %s939_s22   ;;  %s1080_s18 = smov %s927_s19 }
 0x135   : > { %p12_p12 = scmp.ge.s32.totalorder %s15_s22, 7   ;;  %s1081_s19 = smov %s1007_s26 }
 0x136   : > { %s1082_s20 = smov %s935_s21  ;;  %s1083_s21 = smov %s1085_s23 }
 0x137   :  { %14 = sbr.rel (!%p12_p12) target bundleno = 3 (0x3), region = 136 }

// kernel: resnet_forward.29
= control target key start
LH: loop header
LB: loop body
LE: loop exit
PB: predicated region body
PF: predicated region fallthrough
CT: control target
= control target key end

     0   :  { %s808_s15 = smov 0   ;;  %s810_s16 = smov 0   ;;  %s899_s0 = inlined_call_operand.vmem [shape: bf16[16,640], index: 0, kind: input, shape index: {}]   ;;  %s900_s1 = inlined_call_operand.vmem [shape: bf16[640,128], index: 1, kind: input, shape index: {}]   ;;  %s901_s2 = inlined_call_operand.vmem [shape: f32[1,128], index: 2, kind: input, shape index: {}]   ;;  %s902_s3 = inlined_call_operand.vmem [shape: f32[1,128], index: 3, kind: input, shape index: {}]   ;;  %s903_s4 = inlined_call_operand.vmem [shape: bf16[16,128], index: 4, kind: output, shape index: {}]  }
   0x1   :  { %s812_s17 = smov 0   ;;  %s814_s18 = smov 0  }
   0x2   :  { %s816_s19 = smov 0  }
   0x3 LB: > { %s26_s20 = sadd.s32 1, %s774_s18  ;;  %p49_p1 = scmp.ne.s32.totalorder %s766_s16, %s762_s15  ;;  %s778_s19 = sphi %s816_s19, %s14_s19   ;;  %s774_s18 = sphi %s814_s18, %s907_s18   ;;  %s770_s17 = sphi %s812_s17, %s906_s17   ;;  %s766_s16 = sphi %s810_s16, %s905_s16   ;;  %s762_s15 = sphi %s808_s15, %s904_s15  }
   0x4   : > { %p27_p0 = scmp.ge.s32.totalorder %s26_s20, 5  ;;  %p50_p2 = scmp.eq.s32.totalorder %s778_s19, 0 }
   0x5   : > { %s42_s22 = sadd.s32 1, %s766_s16  ;;  %p626_p5 = scmp.ge.s32.totalorder %s778_s19, 5 }
   0x6   : > { %s909_s20 = smov (%p27_p0, %s26_s20), 0  ;;  %p51_p3 = por %p50_p2, %p49_p1 }
   0x7   : > { %s38_s21 = ssub.s32 %s774_s18, %s909_s20  ;;  %195 = sbr.rel (%p626_p5) target bundleno = 21 (0x15), region = 24 }
   0x8   : > { %p40_p4 = scmp.eq.s32.totalorder %s38_s21, 0 }
   0xa   : > { %s843_s23 = scalar_select %p40_p4, %s766_s16, %s42_s22  }
   0xe   : > { %198 = sbr.rel (!%p51_p3) target bundleno = 21 (0x15), region = 28  ;;  %s200_s24 = sand.u32 (%p51_p3), 1, %s766_s16  }
   0xf   : > { %s628_s25 = sshll.u32 (%p51_p3), %s774_s18, 2  ;;  %s627_s26 = sshll.u32 (%p51_p3), %s200_s24, 3 }
  0x10   : > { %s207_s29 = scalar_lea.vmem (%p51_p3), %s899_s0, %s628_s25  ;;  %s202_s30 = scalar_lea.vmem (%p51_p3), [#allocation3], %s627_s26 }
  0x11   : > { %v223_v0 = vld [vmem:[%s207_s29] sm:$0xf] (%p51_p3)  ;;  %v225_v1 = vld [vmem:[%s207_s29 + $0x14] sm:$0xf] (%p51_p3) }
  0x12   : > { %224 = vst [vmem:[%s202_s30] sm:$0xf] (%p51_p3), %v223_v0  ;;  %226 = vst [vmem:[%s202_s30 + $0x4] sm:$0xf] (%p51_p3), %v225_v1 }
  0x15 PF: > { %p629_p6 = scmp.ge.s32.totalorder %s778_s19, 1  ;;  %p264_p7 = scmp.lt.s32.totalorder %s778_s19, 6 }
  0x17   : > { %p265_p8 = pnand %p629_p6, %p264_p7 }
  0x18   : > { %s271_s5 = sand.u32 (!%p265_p8), 1, %s762_s15   ;;  %s631_s6 = sshll.u32 (!%p265_p8), %s770_s17, 4 }
  0x19   : > { %268 = sbr.rel (%p265_p8) target bundleno = 305 (0x131), region = 73  ;;  %s855_s7 = sshll.u32 (!%p265_p8), %s271_s5, 3 }
  0x1a   : > { %p315_p9 = scmp.lt.s32.totalorder (!%p265_p8), %s631_s6, 79  ;;  %s273_s12 = scalar_lea.vmem (!%p265_p8), [#allocation3], %s855_s7 }
  0x1b   : > { %p633_p10 = scmp.ne.s32.totalorder (!%p265_p8), %s770_s17, 0 }
  0x20   : > { %s911_s6 = smov (!%p315_p9, %s631_s6), 79  ;;  %342 = sbr.rel (%p633_p10) target bundleno = 39 (0x27), region = 81 }
  0x21   : > { %s632_s8 = sshll.u32 %s911_s6, 2  ;;  %v780_v2 = vmov (!%p633_p10), 0.0  }
  0x22   : > { %s860_s11 = scalar_lea.vmem %s900_s1, %s632_s8  ;;  %343 = vst [vmem:[#allocation2] sm:$0xff] (!%p633_p10), %v780_v2  ;;  %344 = vst [vmem:[#allocation2 + $0x8] sm:$0xff] (!%p633_p10), %v780_v2 }
  0x27 PF: > { %v731_v3 = vld [vmem:[%s860_s11] sm:$0xff]   ;;  %v781_v4 = vmov 0.0   ;;  %v732_v5 = vld [vmem:[%s860_s11 + $0x8] sm:$0xff]   ;;  %vm782_vm0 = vmmov 0   ;;  %v733_v6 = vld [vmem:[%s860_s11 + $0x10] sm:$0xff]   ;;  %p643_p11 = scmp.ne.s32.totalorder %s770_s17, 4 }
  0x28   : > { %668 = vmatprep.subr.bf16.mxu0 %v781_v4  ;;  %684 = vmatprep.mubr.msk.bf16.mxu0 %vm782_vm0, %v781_v4  ;;  %v734_v7 = vld [vmem:[%s860_s11 + $0x18] sm:$0xff]   ;;  %v735_v8 = vld [vmem:[%s860_s11 + $0x20] sm:$0xff]   ;;  %v736_v9 = vld [vmem:[%s860_s11 + $0x28] sm:$0xff]  }
  0x29   : > { %669 = vmatpush3.bf16.msra.mxu0 %v731_v3  ;;  %v737_v10 = vld [vmem:[%s860_s11 + $0x30] sm:$0xff]   ;;  %v738_v11 = vld [vmem:[%s860_s11 + $0x38] sm:$0xff]   ;;  %v345_v13 = vld [vmem:[#allocation2] sm:$0xff] }
  0x2a   : > { %670 = vmatprep.subr.bf16.mxu0 %v781_v4  ;;  %v739_v12 = vld [vmem:[%s273_s12] sm:$0xff]   ;;  %v346_v15 = vld [vmem:[#allocation2 + $0x8] sm:$0xff]  ;;  %v644_v23 = vld [vmem:[%s901_s2] ss:$0 sm:$0xff] (!%p643_p11) }
  0x2b   : > { %v645_v26 = vld [vmem:[%s902_s3] ss:$0 sm:$0xff] (!%p643_p11) }
  0x2d   : > { %671 = vmatpush3.bf16.msra.mxu0 %v732_v5 }
  0x2e   : > { %672 = vmatprep.subr.bf16.mxu0 %v781_v4 }
  0x31   : > { %673 = vmatpush3.bf16.msra.mxu0 %v733_v6 }
  0x32   : > { %674 = vmatprep.subr.bf16.mxu0 %v781_v4 }
  0x35   : > { %675 = vmatpush3.bf16.msra.mxu0 %v734_v7 }
  0x36   : > { %676 = vmatprep.subr.bf16.mxu0 %v781_v4 }
  0x39   : > { %677 = vmatpush3.bf16.msra.mxu0 %v735_v8 }
  0x3a   : > { %678 = vmatprep.subr.bf16.mxu0 %v781_v4 }
  0x3d   : > { %679 = vmatpush3.bf16.msra.mxu0 %v736_v9 }
  0x3e   : > { %680 = vmatprep.subr.bf16.mxu0 %v781_v4 }
  0x41   : > { %681 = vmatpush3.bf16.msra.mxu0 %v737_v10 }
  0x42   : > { %682 = vmatprep.subr.bf16.mxu0 %v781_v4 }
  0x45   : > { %683 = vmatpush3.bf16.msra.mxu0 %v738_v11 }
  0x48   : > { %685 = vmatmul.mubr.bf16.vlgmr.msra.gmra.mrb[0].mxu0 %v739_v12 }
 0x11a   : > { %467 = sbr.rel (%p643_p11) target bundleno = 305 (0x131), region = 85 }
 0x11b   : > { %v453_v14 = vpop.f32.mrb[0].mxu0 }
 0x11c   : > { %v460_v16 = vadd.f32 %v453_v14, %v345_v13  ;;  %v686_v17 = vpop.f32.mrb[1].mxu0 }
 0x11d   : > { %v456_v18 = vpop.f32.mrb[2].mxu0 }
 0x11e   : > { %462 = vst [vmem:[#allocation2] sm:$0xff] %v460_v16  ;;  %v461_v19 = vadd.f32 %v456_v18, %v346_v15  ;;  %v687_v20 = vpop.f32.mrb[3].mxu0 }
 0x120   : > { %463 = vst [vmem:[#allocation2 + $0x8] sm:$0xff] %v461_v19 }
 0x125   : > { %v468_v21 = vld [vmem:[#allocation2] sm:$0xff] }
 0x126   : > { %v477_v24 = vmul.f32 %v644_v23, %v468_v21 }
 0x127   : > { %v469_v22 = vld [vmem:[#allocation2 + $0x8] sm:$0xff] }
 0x128   : > { %v478_v25 = vmul.f32 %v644_v23, %v469_v22  ;;  %v486_v27 = vadd.f32 %v645_v26, %v477_v24 }
 0x12a   : > { %v487_v28 = vadd.f32 %v645_v26, %v478_v25  ;;  %v488_v29 = vmax.f32 %v486_v27, 0.0 }
 0x12c   : > { %v489_v30 = vmax.f32 %v487_v28, 0.0 }
 0x12e   : > { %v657_v31 = vpack.c.bf16 %v489_v30, %v488_v29 }
 0x130   : > { %658 = vst [vmem:[%s903_s4] sm:$0xff] %v657_v31  }
 0x131 PF: > { %s14_s19 = sadd.s32 1, %s778_s19   ;;  %s904_s15 = smov %s766_s16 }
 0x132   : > { %p11_p12 = scmp.ge.s32.totalorder %s14_s19, 7   ;;  %s905_s16 = smov %s843_s23 }
 0x133   : > { %s906_s17 = smov %s774_s18  ;;  %s907_s18 = smov %s909_s20 }
 0x134   :  { %13 = sbr.rel (!%p11_p12) target bundleno = 3 (0x3), region = 129 }

// kernel: resnet_forward.28
= control target key start
LH: loop header
LB: loop body
LE: loop exit
PB: predicated region body
PF: predicated region fallthrough
CT: control target
= control target key end

     0   :  { %9 = vsyncpa [#allocation4], 0  ;;  %s278_s15 = smov [#allocation3]   ;;  %s351_s0 = inlined_call_operand.vmem [shape: bf16[16,128], index: 0, kind: input, shape index: {}]   ;;  %s352_s1 = inlined_call_operand.vmem [shape: bf16[128,128], index: 1, kind: input, shape index: {}]   ;;  %s353_s2 = inlined_call_operand.vmem [shape: f32[1,128], index: 2, kind: input, shape index: {}]   ;;  %s354_s3 = inlined_call_operand.hbm [shape: f32[1,128], index: 3, kind: input, shape index: {}]   ;;  %s355_s4 = inlined_call_operand.vmem [shape: bf16[16,128], index: 4, kind: output, shape index: {}]  }
   0x1   :  { %s22_s16 = sshll.u32 %s278_s15, 4  ;;  %s254_s19 = scalar_lea.hbm %s354_s3, 16  ;;  %s23_s16 = int_to_ptr.vmem [resolvable:$true] %s22_s16 }
   0x2   :  { %p255_p0 = scmp.ne.s32.totalorder %s354_s3, %s254_s19  ;;  %p258_p1 = scmp.lt.u32.totalorder %s254_s19, %s354_s3 }
   0x4   :  { %p260_p2 = pnand %p258_p1, %p255_p0 }
   0x6   :  { %263 = shalt.err (!%p260_p2)
}
   0x7   :  { %s264_s24 = scalar_lea.vmem %s23_s16, 16  ;;  %s268_s25 = scalar_lea.vmem %s23_s16, 32 }
   0x8   :  { %p265_p3 = scmp.ne.s32.totalorder %s23_s16, %s264_s24  ;;  %p269_p4 = scmp.lt.s32.totalorder %s23_s16, %s23_s16 }
   0x9   :  { %p270_p5 = scmp.lt.s32.totalorder %s268_s25, %s264_s24 }
   0xb   :  { %p271_p6 = por %p270_p5, %p269_p4 }
   0xd   :  { %p272_p7 = pnand %p271_p6, %p265_p3 }
   0xf   :  { %275 = shalt.err (!%p272_p7)
}
  0x10   :  { %25 = dma.hbm_to_vmem [thread:$0]  %s354_s3, 16, %s23_s16, [#allocation4]  }
  0x11   :  { %276 = dma.done.wait [#allocation4], 16  }
  0x12   :  { %277 = vsyncadd [#allocation4], 4294967280  ;;  %v279_v0 = vmov 0.0   ;;  %vm280_vm0 = vmmov 0   ;;  %v245_v1 = vld [vmem:[%s352_s1] sm:$0xff]   ;;  %v246_v2 = vld [vmem:[%s352_s1 + $0x8] sm:$0xff]  }
  0x13   :  { %222 = vmatprep.subr.bf16.mxu0 %v279_v0  ;;  %238 = vmatprep.mubr.msk.bf16.mxu0 %vm280_vm0, %v279_v0  ;;  %v247_v3 = vld [vmem:[%s352_s1 + $0x10] sm:$0xff]   ;;  %v248_v4 = vld [vmem:[%s352_s1 + $0x18] sm:$0xff]   ;;  %v249_v5 = vld [vmem:[%s352_s1 + $0x20] sm:$0xff]  }
  0x14   :  { %223 = vmatpush3.bf16.msra.mxu0 %v245_v1  ;;  %v250_v6 = vld [vmem:[%s352_s1 + $0x28] sm:$0xff]   ;;  %v251_v7 = vld [vmem:[%s352_s1 + $0x30] sm:$0xff]   ;;  %v252_v8 = vld [vmem:[%s352_s1 + $0x38] sm:$0xff]  }
  0x15   :  { %224 = vmatprep.subr.bf16.mxu0 %v279_v0  ;;  %v253_v9 = vld [vmem:[%s351_s0] sm:$0xff]  }
  0x16   :  { %v202_v10 = vld [vmem:[%s353_s2] ss:$0 sm:$0xff] }
  0x17   :  { %v203_v14 = vld [vmem:[#allocation3] ss:$0 sm:$0xff] }
  0x18   :  { %225 = vmatpush3.bf16.msra.mxu0 %v246_v2 }
  0x19   :  { %226 = vmatprep.subr.bf16.mxu0 %v279_v0 }
  0x1c   :  { %227 = vmatpush3.bf16.msra.mxu0 %v247_v3 }
  0x1d   :  { %228 = vmatprep.subr.bf16.mxu0 %v279_v0 }
  0x20   :  { %229 = vmatpush3.bf16.msra.mxu0 %v248_v4 }
  0x21   :  { %230 = vmatprep.subr.bf16.mxu0 %v279_v0 }
  0x24   :  { %231 = vmatpush3.bf16.msra.mxu0 %v249_v5 }
  0x25   :  { %232 = vmatprep.subr.bf16.mxu0 %v279_v0 }
  0x28   :  { %233 = vmatpush3.bf16.msra.mxu0 %v250_v6 }
  0x29   :  { %234 = vmatprep.subr.bf16.mxu0 %v279_v0 }
  0x2c   :  { %235 = vmatpush3.bf16.msra.mxu0 %v251_v7 }
  0x2d   :  { %236 = vmatprep.subr.bf16.mxu0 %v279_v0 }
  0x30   :  { %237 = vmatpush3.bf16.msra.mxu0 %v252_v8 }
  0x33   :  { %239 = vmatmul.mubr.bf16.vlgmr.msra.gmra.mrb[0].mxu0 %v253_v9 }
 0x106   :  { %v144_v11 = vpop.f32.mrb[0].mxu0 }
 0x107   :  { %v167_v12 = vmul.f32 %v202_v10, %v144_v11  ;;  %v240_v13 = vpop.f32.mrb[1].mxu0 }
 0x108   :  { %v147_v15 = vpop.f32.mrb[2].mxu0 }
 0x109   :  { %v168_v16 = vmul.f32 %v202_v10, %v147_v15  ;;  %v241_v17 = vpop.f32.mrb[3].mxu0  ;;  %v176_v18 = vadd.f32 %v203_v14, %v167_v12 }
 0x10b   :  { %v177_v19 = vadd.f32 %v203_v14, %v168_v16 }
 0x10d   :  { %v211_v20 = vpack.c.bf16 %v177_v19, %v176_v18 }
 0x10f   :  { %212 = vst [vmem:[%s355_s4] sm:$0xff] %v211_v20  }
 0x110   :  { %192 = vsyncpa [#allocation4], 1 }

// kernel: resnet_forward.30
= control target key start
LH: loop header
LB: loop body
LE: loop exit
PB: predicated region body
PF: predicated region fallthrough
CT: control target
= control target key end

     0   :  { %10 = vsyncpa [#allocation5], 0  ;;  %s1176_s0 = inlined_call_operand.vmem [shape: bf16[16,1152], index: 0, kind: input, shape index: {}]   ;;  %s1177_s1 = inlined_call_operand.vmem [shape: bf16[1152,128], index: 1, kind: input, shape index: {}]   ;;  %s1178_s2 = inlined_call_operand.hbm [shape: f32[1,128], index: 2, kind: input, shape index: {}]   ;;  %s1179_s3 = inlined_call_operand.hbm [shape: f32[1,128], index: 3, kind: input, shape index: {}]   ;;  %s1180_s4 = inlined_call_operand.vmem [shape: bf16[16,128], index: 4, kind: input, shape index: {}]   ;;  %s1181_s5 = inlined_call_operand.vmem [shape: bf16[16,128], index: 5, kind: output, shape index: {}]  }
   0x1   :  { %11 = vsyncpa [#allocation7], 0  ;;  %s1005_s18 = smov 0   ;;  %s1007_s19 = smov 0  }
   0x2   :  { %s1009_s20 = smov 0   ;;  %s1011_s21 = smov 0  }
   0x3   :  { %s1013_s22 = smov 0  }
   0x4 LB: > { %s720_s23 = sadd.s32 4294967295, %s968_s22   ;;  %s29_s24 = sadd.s32 1, %s964_s21  ;;  %s968_s22 = sphi %s1013_s22, %s17_s22   ;;  %s964_s21 = sphi %s1011_s21, %s1195_s21   ;;  %s960_s20 = sphi %s1009_s20, %s1194_s20   ;;  %s956_s19 = sphi %s1007_s19, %s1193_s19   ;;  %s952_s18 = sphi %s1005_s18, %s1192_s18  }
   0x5   : > { %p30_p0 = scmp.ge.s32.totalorder %s29_s24, 9  ;;  %s45_s25 = sadd.s32 1, %s956_s19 }
   0x6   : > { %p52_p1 = scmp.ne.s32.totalorder %s956_s19, %s952_s18  ;;  %p53_p2 = scmp.eq.s32.totalorder %s968_s22, 0 }
   0x7   : > { %s1197_s24 = smov (%p30_p0, %s29_s24), 0  ;;  %p721_p4 = scmp.ge.s32.totalorder %s968_s22, 1 }
   0x8   : > { %p1038_p3 = por %p53_p2, %p52_p1  ;;  %s41_s27 = ssub.s32 %s964_s21, %s1197_s24 }
   0x9   : > { %p205_p5 = scmp.lt.s32.totalorder %s968_s22, 10  ;;  %p43_p6 = scmp.eq.s32.totalorder %s41_s27, 0 }
   0xa   : > { %s1185_s26 = scalar_select %p1038_p3, 1, 0 }
   0xb   : > { %p1046_p7 = pnand %p721_p4, %p205_p5  ;;  %p1050_p8 = scmp.eq.s32.totalorder %s720_s23, 0 }
   0xc   : > { %s1055_s30 = scalar_select %p43_p6, %s956_s19, %s45_s25  }
   0xd   : > { %s1186_s28 = scalar_select %p1046_p7, 1, 0 }
   0xe   : > { %s1187_s29 = scalar_select %p1050_p8, 1, 0 }
   0xf   : > { %p801_p9 = pneg %p1046_p7  ;;  %s970_s6 = smov [#allocation4]  }
  0x10   : > { %s220_s7 = sshll.u32 %s970_s6, 4  ;;  %s971_s9 = smov [#allocation6]   ;;  %s221_s7 = int_to_ptr.vmem [resolvable:$true] %s220_s7 }
  0x11   : > { %p1061_p10 = pnand %p1050_p8, %p801_p9  ;;  %s233_s10 = sshll.u32 %s971_s9, 4  ;;  %s1065_s10 = int_to_ptr.vmem [resolvable:$true] %s233_s10 }
  0x12   : > { %s866_s13 = scalar_lea.hbm %s1178_s2, 16 }
  0x13   : > { %p867_p11 = scmp.ne.s32.totalorder %s1178_s2, %s866_s13  ;;  %p868_p12 = pneg %p1061_p10 }
  0x14   : > { %p873_p1 = scmp.lt.u32.totalorder %s866_s13, %s1178_s2 }
  0x15   : > { %p869_p13 = pnand %p868_p12, %p867_p11 }
  0x17   : > { %p870_p0 = pneg %p869_p13 }
  0x19   : > { %p875_p2 = pnand %p873_p1, %p870_p0 }
  0x1b   : > { %878 = shalt.err (!%p875_p2)
}
  0x1c   : > { %s879_s23 = scalar_lea.vmem %s221_s7, 16  ;;  %s886_s25 = scalar_lea.vmem %s221_s7, 32 }
  0x1d   : > { %p880_p4 = scmp.ne.s32.totalorder %s221_s7, %s879_s23  ;;  %p887_p9 = scmp.lt.s32.totalorder %s221_s7, %s221_s7 }
  0x1e   : > { %p888_p8 = scmp.lt.s32.totalorder %s886_s25, %s879_s23 }
  0x1f   : > { %p882_p5 = pnand %p880_p4, %p868_p12 }
  0x20   : > { %p889_p7 = por %p888_p8, %p887_p9 }
  0x21   : > { %p883_p6 = pneg %p882_p5 }
  0x23   : > { %p890_p3 = pnand %p889_p7, %p883_p6 }
  0x25   : > { %893 = shalt.err (!%p890_p3)
}
  0x26   : > { %804 = dma.hbm_to_vmem [thread:$0]  (!%p1061_p10), %s1178_s2, 16, %s221_s7, [#allocation5]  }
  0x27   : > { %s894_s12 = scalar_lea.hbm %s1179_s3, 16 }
  0x28   : > { %p895_p11 = scmp.ne.s32.totalorder %s1179_s3, %s894_s12  ;;  %p901_p3 = scmp.lt.u32.totalorder %s894_s12, %s1179_s3 }
  0x2a   : > { %p897_p8 = pnand %p895_p11, %p868_p12 }
  0x2c   : > { %p898_p7 = pneg %p897_p8 }
  0x2e   : > { %p903_p13 = pnand %p901_p3, %p898_p7 }
  0x30   : > { %906 = shalt.err (!%p903_p13)
}
  0x31   : > { %s907_s7 = scalar_lea.vmem %s1065_s10, 16  ;;  %s914_s17 = scalar_lea.vmem %s1065_s10, 32 }
  0x32   : > { %p908_p0 = scmp.ne.s32.totalorder %s1065_s10, %s907_s7  ;;  %p915_p4 = scmp.lt.s32.totalorder %s1065_s10, %s1065_s10 }
  0x33   : > { %p916_p5 = scmp.lt.s32.totalorder %s914_s17, %s907_s7 }
  0x34   : > { %p910_p1 = pnand %p908_p0, %p868_p12 }
  0x35   : > { %p917_p6 = por %p916_p5, %p915_p4 }
  0x36   : > { %p911_p2 = pneg %p910_p1 }
  0x38   : > { %p918_p9 = pnand %p917_p6, %p911_p2 }
  0x3a   : > { %921 = shalt.err (!%p918_p9)
}
  0x3b   : > { %807 = dma.hbm_to_vmem [thread:$0]  (!%p1061_p10), %s1179_s3, 16, %s1065_s10, [#allocation7]  }
  0x3c   : > { %p725_p11 = scmp.ge.s32.totalorder %s968_s22, 9 }
  0x3d   : > { %p1189_p12 = scmp.ne.s32.totalorder (!%p725_p11), %s1185_s26, 0 }
  0x3e   : > { %252 = sbr.rel (%p725_p11) target bundleno = 76 (0x4c), region = 28 }
  0x45   : > { %255 = sbr.rel (!%p1189_p12) target bundleno = 76 (0x4c), region = 32  ;;  %s257_s27 = sand.u32 (%p1189_p12), 1, %s956_s19  }
  0x46   : > { %s727_s6 = sshll.u32 (%p1189_p12), %s964_s21, 2  ;;  %s726_s9 = sshll.u32 (%p1189_p12), %s257_s27, 3 }
  0x47   : > { %s264_s8 = scalar_lea.vmem (%p1189_p12), %s1176_s0, %s727_s6  ;;  %s259_s13 = scalar_lea.vmem (%p1189_p12), [#allocation3], %s726_s9 }
  0x48   : > { %v280_v0 = vld [vmem:[%s264_s8] sm:$0xf] (%p1189_p12)  ;;  %v282_v1 = vld [vmem:[%s264_s8 + $0x24] sm:$0xf] (%p1189_p12) }
  0x49   : > { %281 = vst [vmem:[%s259_s13] sm:$0xf] (%p1189_p12), %v280_v0  ;;  %283 = vst [vmem:[%s259_s13 + $0x4] sm:$0xf] (%p1189_p12), %v282_v1 }
  0x4c PF: > { %p1190_p10 = scmp.ne.s32.totalorder %s1186_s28, 0 }
  0x4d   : > { %s328_s26 = sand.u32 (!%p1190_p10), 1, %s952_s18   ;;  %p1191_p8 = scmp.ne.s32.totalorder (!%p1190_p10), %s1187_s29, 0 }
  0x4e   : > { %325 = sbr.rel (%p1190_p10) target bundleno = 365 (0x16d), region = 77  ;;  %s1126_s10 = sshll.u32 (!%p1190_p10), %s328_s26, 3 }
  0x4f   : > { %s330_s14 = scalar_lea.vmem (!%p1190_p10), [#allocation3], %s1126_s10 }
  0x55   : > { %943 = dma.done.wait (%p1191_p8), [#allocation5], 16  }
  0x56   : > { %945 = vsyncadd (%p1191_p8), [#allocation5], 4294967280 }
  0x57   : > { %947 = dma.done.wait (%p1191_p8), [#allocation7], 16  }
  0x58   : > { %949 = vsyncadd (%p1191_p8), [#allocation7], 4294967280  ;;  %s732_s28 = sshll.u32 %s960_s20, 4  ;;  %p734_p3 = scmp.ne.s32.totalorder %s960_s20, 0 }
  0x59   : > { %p384_p7 = scmp.lt.s32.totalorder %s732_s28, 143  ;;  %v972_v2 = vmov (!%p734_p3), 0.0  }
  0x5a   : > { %414 = sbr.rel (%p734_p3) target bundleno = 97 (0x61), region = 93  ;;  %415 = vst [vmem:[#allocation2] sm:$0xff] (!%p734_p3), %v972_v2  ;;  %416 = vst [vmem:[#allocation2 + $0x8] sm:$0xff] (!%p734_p3), %v972_v2 }
  0x5b   : > { %s1199_s28 = smov (!%p384_p7, %s732_s28), 143 }
  0x5c   : > { %s733_s18 = sshll.u32 %s1199_s28, 2 }
  0x5d   : > { %s1141_s7 = scalar_lea.vmem %s1177_s1, %s733_s18 }
  0x61 PF: > { %v857_v3 = vld [vmem:[%s1141_s7] sm:$0xff]   ;;  %v973_v4 = vmov 0.0   ;;  %v858_v5 = vld [vmem:[%s1141_s7 + $0x8] sm:$0xff]   ;;  %vm974_vm0 = vmmov 0   ;;  %v859_v6 = vld [vmem:[%s1141_s7 + $0x10] sm:$0xff]   ;;  %p744_p13 = scmp.ne.s32.totalorder %s960_s20, 8 }
  0x62   : > { %773 = vmatprep.subr.bf16.mxu0 %v973_v4  ;;  %789 = vmatprep.mubr.msk.bf16.mxu0 %vm974_vm0, %v973_v4  ;;  %v860_v7 = vld [vmem:[%s1141_s7 + $0x18] sm:$0xff]   ;;  %v861_v8 = vld [vmem:[%s1141_s7 + $0x20] sm:$0xff]   ;;  %v862_v9 = vld [vmem:[%s1141_s7 + $0x28] sm:$0xff]  }
  0x63   : > { %774 = vmatpush3.bf16.msra.mxu0 %v857_v3  ;;  %v863_v10 = vld [vmem:[%s1141_s7 + $0x30] sm:$0xff]   ;;  %v864_v11 = vld [vmem:[%s1141_s7 + $0x38] sm:$0xff]   ;;  %v417_v13 = vld [vmem:[#allocation2] sm:$0xff] }
  0x64   : > { %775 = vmatprep.subr.bf16.mxu0 %v973_v4  ;;  %v865_v12 = vld [vmem:[%s330_s14] sm:$0xff]   ;;  %v418_v15 = vld [vmem:[#allocation2 + $0x8] sm:$0xff]  ;;  %v745_v23 = vld [vmem:[#allocation4] ss:$0 sm:$0xff] (!%p744_p13) }
  0x65   : > { %v746_v26 = vld [vmem:[#allocation6] ss:$0 sm:$0xff] (!%p744_p13) }
  0x66   : > { %v756_v27 = vld [vmem:[%s1180_s4] sm:$0xff] (!%p744_p13)  }
  0x67   : > { %776 = vmatpush3.bf16.msra.mxu0 %v858_v5  ;;  %v757_v28 = vunpack.c.l.bf16 (!%p744_p13), %v756_v27  ;;  %v758_v29 = vunpack.c.h.bf16 (!%p744_p13), %v756_v27 }
  0x68   : > { %777 = vmatprep.subr.bf16.mxu0 %v973_v4 }
  0x6b   : > { %778 = vmatpush3.bf16.msra.mxu0 %v859_v6 }
  0x6c   : > { %779 = vmatprep.subr.bf16.mxu0 %v973_v4 }
  0x6f   : > { %780 = vmatpush3.bf16.msra.mxu0 %v860_v7 }
  0x70   : > { %781 = vmatprep.subr.bf16.mxu0 %v973_v4 }
  0x73   : > { %782 = vmatpush3.bf16.msra.mxu0 %v861_v8 }
  0x74   : > { %783 = vmatprep.subr.bf16.mxu0 %v973_v4 }
  0x77   : > { %784 = vmatpush3.bf16.msra.mxu0 %v862_v9 }
  0x78   : > { %785 = vmatprep.subr.bf16.mxu0 %v973_v4 }
  0x7b   : > { %786 = vmatpush3.bf16.msra.mxu0 %v863_v10 }
  0x7c   : > { %787 = vmatprep.subr.bf16.mxu0 %v973_v4 }
  0x7f   : > { %788 = vmatpush3.bf16.msra.mxu0 %v864_v11 }
  0x82   : > { %790 = vmatmul.mubr.bf16.vlgmr.msra.gmra.mrb[0].mxu0 %v865_v12 }
 0x154   : > { %539 = sbr.rel (%p744_p13) target bundleno = 365 (0x16d), region = 97 }
 0x155   : > { %v525_v14 = vpop.f32.mrb[0].mxu0 }
 0x156   : > { %v532_v16 = vadd.f32 %v525_v14, %v417_v13  ;;  %v791_v17 = vpop.f32.mrb[1].mxu0 }
 0x157   : > { %v528_v18 = vpop.f32.mrb[2].mxu0 }
 0x158   : > { %534 = vst [vmem:[#allocation2] sm:$0xff] %v532_v16  ;;  %v533_v19 = vadd.f32 %v528_v18, %v418_v15  ;;  %v792_v20 = vpop.f32.mrb[3].mxu0 }
 0x15a   : > { %535 = vst [vmem:[#allocation2 + $0x8] sm:$0xff] %v533_v19 }
 0x15f   : > { %v540_v21 = vld [vmem:[#allocation2] sm:$0xff] }
 0x160   : > { %v549_v24 = vmul.f32 %v745_v23, %v540_v21 }
 0x161   : > { %v541_v22 = vld [vmem:[#allocation2 + $0x8] sm:$0xff] }
 0x162   : > { %v550_v25 = vmul.f32 %v745_v23, %v541_v22  ;;  %v558_v30 = vadd.f32 %v746_v26, %v549_v24 }
 0x164   : > { %v559_v31 = vadd.f32 %v746_v26, %v550_v25  ;;  %v564_v32 = vadd.f32 %v757_v28, %v558_v30 }
 0x166   : > { %v565_v33 = vadd.f32 %v758_v29, %v559_v31  ;;  %v566_v34 = vmax.f32 %v564_v32, 0.0 }
 0x168   : > { %v567_v35 = vmax.f32 %v565_v33, 0.0 }
 0x16a   : > { %v762_v36 = vpack.c.bf16 %v567_v35, %v566_v34 }
 0x16c   : > { %763 = vst [vmem:[%s1181_s5] sm:$0xff] %v762_v36  }
 0x16d PF: > { %s17_s22 = sadd.s32 1, %s968_s22   ;;  %s1192_s18 = smov %s956_s19 }
 0x16e   : > { %p14_p0 = scmp.ge.s32.totalorder %s17_s22, 11   ;;  %s1193_s19 = smov %s1055_s30 }
 0x16f   : > { %s1194_s20 = smov %s964_s21  ;;  %s1195_s21 = smov %s1197_s24 }
 0x170   :  { %16 = sbr.rel (!%p14_p0) target bundleno = 4 (0x4), region = 141 }
 0x177   :  { %606 = vsyncpa [#allocation5], 1 }
 0x178   :  { %608 = vsyncpa [#allocation5 + $0x1], 1 }
 0x179   :  { %609 = vsyncpa [#allocation7], 1 }

// kernel: resnet_forward.31
= control target key start
LH: loop header
LB: loop body
LE: loop exit
PB: predicated region body
PF: predicated region fallthrough
CT: control target
= control target key end

     0   :  { %9 = vsyncpa [#allocation5], 0  ;;  %s1079_s0 = inlined_call_operand.vmem [shape: bf16[16,1152], index: 0, kind: input, shape index: {}]   ;;  %s1080_s1 = inlined_call_operand.vmem [shape: bf16[1152,128], index: 1, kind: input, shape index: {}]   ;;  %s1081_s2 = inlined_call_operand.hbm [shape: f32[1,128], index: 2, kind: input, shape index: {}]   ;;  %s1082_s3 = inlined_call_operand.hbm [shape: f32[1,128], index: 3, kind: input, shape index: {}]   ;;  %s1083_s4 = inlined_call_operand.vmem [shape: bf16[16,128], index: 4, kind: output, shape index: {}]  }
   0x1   :  { %10 = vsyncpa [#allocation7], 0  ;;  %s911_s15 = smov 0   ;;  %s913_s16 = smov 0  }
   0x2   :  { %s915_s17 = smov 0   ;;  %s917_s18 = smov 0  }
   0x3   :  { %s919_s19 = smov 0  }
   0x4 LB: > { %s636_s20 = sadd.s32 4294967295, %s879_s19   ;;  %s28_s21 = sadd.s32 1, %s875_s18  ;;  %s879_s19 = sphi %s919_s19, %s16_s19   ;;  %s875_s18 = sphi %s917_s18, %s1097_s18   ;;  %s871_s17 = sphi %s915_s17, %s1096_s17   ;;  %s867_s16 = sphi %s913_s16, %s1095_s16   ;;  %s863_s15 = sphi %s911_s15, %s1094_s15  }
   0x5   : > { %p29_p0 = scmp.ge.s32.totalorder %s28_s21, 9  ;;  %s44_s22 = sadd.s32 1, %s867_s16 }
   0x6   : > { %p51_p1 = scmp.ne.s32.totalorder %s867_s16, %s863_s15  ;;  %p52_p2 = scmp.eq.s32.totalorder %s879_s19, 0 }
   0x7   : > { %s1099_s21 = smov (%p29_p0, %s28_s21), 0  ;;  %p637_p4 = scmp.ge.s32.totalorder %s879_s19, 1 }
   0x8   : > { %p944_p3 = por %p52_p2, %p51_p1  ;;  %s40_s24 = ssub.s32 %s875_s18, %s1099_s21 }
   0x9   : > { %p176_p5 = scmp.lt.s32.totalorder %s879_s19, 10  ;;  %p42_p6 = scmp.eq.s32.totalorder %s40_s24, 0 }
   0xa   : > { %s1087_s23 = scalar_select %p944_p3, 1, 0 }
   0xb   : > { %p952_p7 = pnand %p637_p4, %p176_p5  ;;  %p956_p8 = scmp.eq.s32.totalorder %s636_s20, 0 }
   0xc   : > { %s961_s27 = scalar_select %p42_p6, %s867_s16, %s44_s22  }
   0xd   : > { %s1088_s25 = scalar_select %p952_p7, 1, 0 }
   0xe   : > { %s1089_s26 = scalar_select %p956_p8, 1, 0 }
   0xf   : > { %p712_p9 = pneg %p952_p7  ;;  %s881_s28 = smov [#allocation4]  }
  0x10   : > { %s191_s29 = sshll.u32 %s881_s28, 4  ;;  %s882_s5 = smov [#allocation6]   ;;  %s192_s29 = int_to_ptr.vmem [resolvable:$true] %s191_s29 }
  0x11   : > { %p967_p10 = pnand %p956_p8, %p712_p9  ;;  %s204_s6 = sshll.u32 %s882_s5, 4  ;;  %s971_s6 = int_to_ptr.vmem [resolvable:$true] %s204_s6 }
  0x12   : > { %s777_s9 = scalar_lea.hbm %s1081_s2, 16 }
  0x13   : > { %p778_p11 = scmp.ne.s32.totalorder %s1081_s2, %s777_s9  ;;  %p779_p12 = pneg %p967_p10 }
  0x14   : > { %p784_p1 = scmp.lt.u32.totalorder %s777_s9, %s1081_s2 }
  0x15   : > { %p780_p13 = pnand %p779_p12, %p778_p11 }
  0x17   : > { %p781_p0 = pneg %p780_p13 }
  0x19   : > { %p786_p2 = pnand %p784_p1, %p781_p0 }
  0x1b   : > { %789 = shalt.err (!%p786_p2)
}
  0x1c   : > { %s790_s14 = scalar_lea.vmem %s192_s29, 16  ;;  %s797_s20 = scalar_lea.vmem %s192_s29, 32 }
  0x1d   : > { %p791_p4 = scmp.ne.s32.totalorder %s192_s29, %s790_s14  ;;  %p798_p9 = scmp.lt.s32.totalorder %s192_s29, %s192_s29 }
  0x1e   : > { %p799_p8 = scmp.lt.s32.totalorder %s797_s20, %s790_s14 }
  0x1f   : > { %p793_p5 = pnand %p791_p4, %p779_p12 }
  0x20   : > { %p800_p7 = por %p799_p8, %p798_p9 }
  0x21   : > { %p794_p6 = pneg %p793_p5 }
  0x23   : > { %p801_p3 = pnand %p800_p7, %p794_p6 }
  0x25   : > { %804 = shalt.err (!%p801_p3)
}
  0x26   : > { %715 = dma.hbm_to_vmem [thread:$0]  (!%p967_p10), %s1081_s2, 16, %s192_s29, [#allocation5]  }
  0x27   : > { %s805_s7 = scalar_lea.hbm %s1082_s3, 16 }
  0x28   : > { %p806_p11 = scmp.ne.s32.totalorder %s1082_s3, %s805_s7  ;;  %p812_p3 = scmp.lt.u32.totalorder %s805_s7, %s1082_s3 }
  0x2a   : > { %p808_p8 = pnand %p806_p11, %p779_p12 }
  0x2c   : > { %p809_p7 = pneg %p808_p8 }
  0x2e   : > { %p814_p13 = pnand %p812_p3, %p809_p7 }
  0x30   : > { %817 = shalt.err (!%p814_p13)
}
  0x31   : > { %s818_s29 = scalar_lea.vmem %s971_s6, 16  ;;  %s825_s12 = scalar_lea.vmem %s971_s6, 32 }
  0x32   : > { %p819_p0 = scmp.ne.s32.totalorder %s971_s6, %s818_s29  ;;  %p826_p4 = scmp.lt.s32.totalorder %s971_s6, %s971_s6 }
  0x33   : > { %p827_p5 = scmp.lt.s32.totalorder %s825_s12, %s818_s29 }
  0x34   : > { %p821_p1 = pnand %p819_p0, %p779_p12 }
  0x35   : > { %p828_p6 = por %p827_p5, %p826_p4 }
  0x36   : > { %p822_p2 = pneg %p821_p1 }
  0x38   : > { %p829_p9 = pnand %p828_p6, %p822_p2 }
  0x3a   : > { %832 = shalt.err (!%p829_p9)
}
  0x3b   : > { %718 = dma.hbm_to_vmem [thread:$0]  (!%p967_p10), %s1082_s3, 16, %s971_s6, [#allocation7]  }
  0x3c   : > { %p640_p11 = scmp.ge.s32.totalorder %s879_s19, 9 }
  0x3d   : > { %p1091_p12 = scmp.ne.s32.totalorder (!%p640_p11), %s1087_s23, 0 }
  0x3e   : > { %211 = sbr.rel (%p640_p11) target bundleno = 76 (0x4c), region = 24 }
  0x45   : > { %214 = sbr.rel (!%p1091_p12) target bundleno = 76 (0x4c), region = 28  ;;  %s216_s20 = sand.u32 (%p1091_p12), 1, %s867_s16  }
  0x46   : > { %s642_s22 = sshll.u32 (%p1091_p12), %s875_s18, 2  ;;  %s641_s24 = sshll.u32 (%p1091_p12), %s216_s20, 3 }
  0x47   : > { %s223_s30 = scalar_lea.vmem (%p1091_p12), %s1079_s0, %s642_s22  ;;  %s218_s7 = scalar_lea.vmem (%p1091_p12), [#allocation3], %s641_s24 }
  0x48   : > { %v239_v0 = vld [vmem:[%s223_s30] sm:$0xf] (%p1091_p12)  ;;  %v241_v1 = vld [vmem:[%s223_s30 + $0x24] sm:$0xf] (%p1091_p12) }
  0x49   : > { %240 = vst [vmem:[%s218_s7] sm:$0xf] (%p1091_p12), %v239_v0  ;;  %242 = vst [vmem:[%s218_s7 + $0x4] sm:$0xf] (%p1091_p12), %v241_v1 }
  0x4c PF: > { %p1092_p10 = scmp.ne.s32.totalorder %s1088_s25, 0 }
  0x4d   : > { %s287_s23 = sand.u32 (!%p1092_p10), 1, %s863_s15   ;;  %p1093_p8 = scmp.ne.s32.totalorder (!%p1092_p10), %s1089_s26, 0 }
  0x4e   : > { %284 = sbr.rel (%p1092_p10) target bundleno = 363 (0x16b), region = 73  ;;  %s1032_s6 = sshll.u32 (!%p1092_p10), %s287_s23, 3 }
  0x4f   : > { %s289_s8 = scalar_lea.vmem (!%p1092_p10), [#allocation3], %s1032_s6 }
  0x55   : > { %854 = dma.done.wait (%p1093_p8), [#allocation5], 16  }
  0x56   : > { %856 = vsyncadd (%p1093_p8), [#allocation5], 4294967280 }
  0x57   : > { %858 = dma.done.wait (%p1093_p8), [#allocation7], 16  }
  0x58   : > { %860 = vsyncadd (%p1093_p8), [#allocation7], 4294967280  ;;  %s647_s25 = sshll.u32 %s871_s17, 4  ;;  %p649_p3 = scmp.ne.s32.totalorder %s871_s17, 0 }
  0x59   : > { %p333_p7 = scmp.lt.s32.totalorder %s647_s25, 143  ;;  %v883_v2 = vmov (!%p649_p3), 0.0  }
  0x5a   : > { %354 = sbr.rel (%p649_p3) target bundleno = 97 (0x61), region = 89  ;;  %355 = vst [vmem:[#allocation2] sm:$0xff] (!%p649_p3), %v883_v2  ;;  %356 = vst [vmem:[#allocation2 + $0x8] sm:$0xff] (!%p649_p3), %v883_v2 }
  0x5b   : > { %s1101_s25 = smov (!%p333_p7, %s647_s25), 143 }
  0x5c   : > { %s648_s15 = sshll.u32 %s1101_s25, 2 }
  0x5d   : > { %s1047_s11 = scalar_lea.vmem %s1080_s1, %s648_s15 }
  0x61 PF: > { %v768_v3 = vld [vmem:[%s1047_s11] sm:$0xff]   ;;  %v884_v4 = vmov 0.0   ;;  %v769_v5 = vld [vmem:[%s1047_s11 + $0x8] sm:$0xff]   ;;  %vm885_vm0 = vmmov 0   ;;  %v770_v6 = vld [vmem:[%s1047_s11 + $0x10] sm:$0xff]   ;;  %p659_p13 = scmp.ne.s32.totalorder %s871_s17, 8 }
  0x62   : > { %684 = vmatprep.subr.bf16.mxu0 %v884_v4  ;;  %700 = vmatprep.mubr.msk.bf16.mxu0 %vm885_vm0, %v884_v4  ;;  %v771_v7 = vld [vmem:[%s1047_s11 + $0x18] sm:$0xff]   ;;  %v772_v8 = vld [vmem:[%s1047_s11 + $0x20] sm:$0xff]   ;;  %v773_v9 = vld [vmem:[%s1047_s11 + $0x28] sm:$0xff]  }
  0x63   : > { %685 = vmatpush3.bf16.msra.mxu0 %v768_v3  ;;  %v774_v10 = vld [vmem:[%s1047_s11 + $0x30] sm:$0xff]   ;;  %v775_v11 = vld [vmem:[%s1047_s11 + $0x38] sm:$0xff]   ;;  %v357_v13 = vld [vmem:[#allocation2] sm:$0xff] }
  0x64   : > { %686 = vmatprep.subr.bf16.mxu0 %v884_v4  ;;  %v776_v12 = vld [vmem:[%s289_s8] sm:$0xff]   ;;  %v358_v15 = vld [vmem:[#allocation2 + $0x8] sm:$0xff]  ;;  %v660_v23 = vld [vmem:[#allocation4] ss:$0 sm:$0xff] (!%p659_p13) }
  0x65   : > { %v661_v26 = vld [vmem:[#allocation6] ss:$0 sm:$0xff] (!%p659_p13) }
  0x67   : > { %687 = vmatpush3.bf16.msra.mxu0 %v769_v5 }
  0x68   : > { %688 = vmatprep.subr.bf16.mxu0 %v884_v4 }
  0x6b   : > { %689 = vmatpush3.bf16.msra.mxu0 %v770_v6 }
  0x6c   : > { %690 = vmatprep.subr.bf16.mxu0 %v884_v4 }
  0x6f   : > { %691 = vmatpush3.bf16.msra.mxu0 %v771_v7 }
  0x70   : > { %692 = vmatprep.subr.bf16.mxu0 %v884_v4 }
  0x73   : > { %693 = vmatpush3.bf16.msra.mxu0 %v772_v8 }
  0x74   : > { %694 = vmatprep.subr.bf16.mxu0 %v884_v4 }
  0x77   : > { %695 = vmatpush3.bf16.msra.mxu0 %v773_v9 }
  0x78   : > { %696 = vmatprep.subr.bf16.mxu0 %v884_v4 }
  0x7b   : > { %697 = vmatpush3.bf16.msra.mxu0 %v774_v10 }
  0x7c   : > { %698 = vmatprep.subr.bf16.mxu0 %v884_v4 }
  0x7f   : > { %699 = vmatpush3.bf16.msra.mxu0 %v775_v11 }
  0x82   : > { %701 = vmatmul.mubr.bf16.vlgmr.msra.gmra.mrb[0].mxu0 %v776_v12 }
 0x154   : > { %479 = sbr.rel (%p659_p13) target bundleno = 363 (0x16b), region = 93 }
 0x155   : > { %v465_v14 = vpop.f32.mrb[0].mxu0 }
 0x156   : > { %v472_v16 = vadd.f32 %v465_v14, %v357_v13  ;;  %v702_v17 = vpop.f32.mrb[1].mxu0 }
 0x157   : > { %v468_v18 = vpop.f32.mrb[2].mxu0 }
 0x158   : > { %474 = vst [vmem:[#allocation2] sm:$0xff] %v472_v16  ;;  %v473_v19 = vadd.f32 %v468_v18, %v358_v15  ;;  %v703_v20 = vpop.f32.mrb[3].mxu0 }
 0x15a   : > { %475 = vst [vmem:[#allocation2 + $0x8] sm:$0xff] %v473_v19 }
 0x15f   : > { %v480_v21 = vld [vmem:[#allocation2] sm:$0xff] }
 0x160   : > { %v489_v24 = vmul.f32 %v660_v23, %v480_v21 }
 0x161   : > { %v481_v22 = vld [vmem:[#allocation2 + $0x8] sm:$0xff] }
 0x162   : > { %v490_v25 = vmul.f32 %v660_v23, %v481_v22  ;;  %v498_v27 = vadd.f32 %v661_v26, %v489_v24 }
 0x164   : > { %v499_v28 = vadd.f32 %v661_v26, %v490_v25  ;;  %v500_v29 = vmax.f32 %v498_v27, 0.0 }
 0x166   : > { %v501_v30 = vmax.f32 %v499_v28, 0.0 }
 0x168   : > { %v673_v31 = vpack.c.bf16 %v501_v30, %v500_v29 }
 0x16a   : > { %674 = vst [vmem:[%s1083_s4] sm:$0xff] %v673_v31  }
 0x16b PF: > { %s16_s19 = sadd.s32 1, %s879_s19   ;;  %s1094_s15 = smov %s867_s16 }
 0x16c   : > { %p13_p0 = scmp.ge.s32.totalorder %s16_s19, 11   ;;  %s1095_s16 = smov %s961_s27 }
 0x16d   : > { %s1096_s17 = smov %s875_s18  ;;  %s1097_s18 = smov %s1099_s21 }
 0x16e   :  { %15 = sbr.rel (!%p13_p0) target bundleno = 4 (0x4), region = 134 }
 0x175   :  { %540 = vsyncpa [#allocation5], 1 }
 0x176   :  { %542 = vsyncpa [#allocation5 + $0x1], 1 }
 0x177   :  { %543 = vsyncpa [#allocation7], 1 }

// kernel: resnet_forward.34
= control target key start
LH: loop header
LB: loop body
LE: loop exit
PB: predicated region body
PF: predicated region fallthrough
CT: control target
= control target key end

     0   :  { %s895_s15 = smov 0   ;;  %s897_s16 = smov 0   ;;  %s997_s0 = inlined_call_operand.vmem [shape: bf16[16,1152], index: 0, kind: input, shape index: {}]   ;;  %s998_s1 = inlined_call_operand.vmem [shape: bf16[1152,256], index: 1, kind: input, shape index: {}]   ;;  %s999_s2 = inlined_call_operand.vmem [shape: f32[1,256], index: 2, kind: input, shape index: {}]   ;;  %s1000_s3 = inlined_call_operand.vmem [shape: f32[1,256], index: 3, kind: input, shape index: {}]   ;;  %s1001_s4 = inlined_call_operand.vmem [shape: bf16[16,256], index: 4, kind: output, shape index: {}]  }
   0x1   :  { %s899_s17 = smov 0   ;;  %s901_s18 = smov 0  }
   0x2   :  { %s903_s19 = smov 0  }
   0x3 LB: > { %s26_s20 = sadd.s32 1, %s862_s18  ;;  %p49_p1 = scmp.ne.s32.totalorder %s854_s16, %s850_s15  ;;  %s866_s19 = sphi %s903_s19, %s14_s19   ;;  %s862_s18 = sphi %s901_s18, %s1005_s18   ;;  %s858_s17 = sphi %s899_s17, %s1004_s17   ;;  %s854_s16 = sphi %s897_s16, %s1003_s16   ;;  %s850_s15 = sphi %s895_s15, %s1002_s15  }
   0x4   : > { %p27_p0 = scmp.ge.s32.totalorder %s26_s20, 9  ;;  %p50_p2 = scmp.eq.s32.totalorder %s866_s19, 0 }
   0x5   : > { %s42_s22 = sadd.s32 1, %s854_s16  ;;  %p725_p5 = scmp.ge.s32.totalorder %s866_s19, 9 }
   0x6   : > { %s1007_s20 = smov (%p27_p0, %s26_s20), 0  ;;  %p51_p3 = por %p50_p2, %p49_p1 }
   0x7   : > { %s38_s21 = ssub.s32 %s862_s18, %s1007_s20  ;;  %199 = sbr.rel (%p725_p5) target bundleno = 21 (0x15), region = 24 }
   0x8   : > { %p40_p4 = scmp.eq.s32.totalorder %s38_s21, 0 }
   0xa   : > { %s930_s23 = scalar_select %p40_p4, %s854_s16, %s42_s22  }
   0xe   : > { %202 = sbr.rel (!%p51_p3) target bundleno = 21 (0x15), region = 28  ;;  %s204_s24 = sand.u32 (%p51_p3), 1, %s854_s16  }
   0xf   : > { %s727_s25 = sshll.u32 (%p51_p3), %s862_s18, 2  ;;  %s726_s26 = sshll.u32 (%p51_p3), %s204_s24, 3 }
  0x10   : > { %s211_s29 = scalar_lea.vmem (%p51_p3), %s997_s0, %s727_s25  ;;  %s206_s30 = scalar_lea.vmem (%p51_p3), [#allocation3], %s726_s26 }
  0x11   : > { %v227_v0 = vld [vmem:[%s211_s29] sm:$0xf] (%p51_p3)  ;;  %v229_v1 = vld [vmem:[%s211_s29 + $0x24] sm:$0xf] (%p51_p3) }
  0x12   : > { %228 = vst [vmem:[%s206_s30] sm:$0xf] (%p51_p3), %v227_v0  ;;  %230 = vst [vmem:[%s206_s30 + $0x4] sm:$0xf] (%p51_p3), %v229_v1 }
  0x15 PF: > { %p728_p6 = scmp.ge.s32.totalorder %s866_s19, 1  ;;  %p271_p7 = scmp.lt.s32.totalorder %s866_s19, 10 }
  0x17   : > { %p272_p8 = pnand %p728_p6, %p271_p7 }
  0x18   : > { %s278_s5 = sand.u32 (!%p272_p8), 1, %s850_s15   ;;  %s730_s6 = sshll.u32 (!%p272_p8), %s858_s17, 4 }
  0x19   : > { %275 = sbr.rel (%p272_p8) target bundleno = 306 (0x132), region = 73  ;;  %s942_s7 = sshll.u32 (!%p272_p8), %s278_s5, 3 }
  0x1a   : > { %p329_p9 = scmp.lt.s32.totalorder (!%p272_p8), %s730_s6, 143  ;;  %s280_s12 = scalar_lea.vmem (!%p272_p8), [#allocation3], %s942_s7 }
  0x1b   : > { %p733_p10 = scmp.ne.s32.totalorder (!%p272_p8), %s858_s17, 0 }
  0x20   : > { %s1009_s6 = smov (!%p329_p9, %s730_s6), 143  ;;  %365 = sbr.rel (%p733_p10) target bundleno = 39 (0x27), region = 81 }
  0x21   : > { %s758_s8 = sshll.u32 %s1009_s6, 3  ;;  %v868_v2 = vmov (!%p733_p10), 0.0  }
  0x22   : > { %s947_s11 = scalar_lea.vmem %s998_s1, %s758_s8  ;;  %366 = vst [vmem:[#allocation2] sm:$0xff] (!%p733_p10), %v868_v2  ;;  %367 = vst [vmem:[#allocation2 + $0x8] sm:$0xff] (!%p733_p10), %v868_v2 }
  0x23   : > { %368 = vst [vmem:[#allocation2 + $0x10] sm:$0xff] (!%p733_p10), %v868_v2  ;;  %369 = vst [vmem:[#allocation2 + $0x18] sm:$0xff] (!%p733_p10), %v868_v2 }
  0x27 PF: > { %v803_v3 = vld [vmem:[%s947_s11 + $0x4] ss:$8 sps:$4 sm:$0xff]   ;;  %v805_v4 = vld [vmem:[%s947_s11] ss:$8 sps:$4 sm:$0xff]   ;;  %v869_v5 = vmov 0   ;;  %p751_p11 = scmp.ne.s32.totalorder %s858_s17, 8 }
  0x28   : > { %510 = vmatprep.mubr.bf16.mxu0 %v869_v5  ;;  %478 = vmatprep.subr.bf16.mxu0 %v803_v3  ;;  %v806_v6 = vld [vmem:[%s947_s11 + $0x14] ss:$8 sps:$4 sm:$0xff]   ;;  %v808_v7 = vld [vmem:[%s947_s11 + $0x10] ss:$8 sps:$4 sm:$0xff]   ;;  %v809_v8 = vld [vmem:[%s947_s11 + $0x24] ss:$8 sps:$4 sm:$0xff]   ;;  %v539_v33 = vlaneseq (!%p751_p11) }
  0x29   : > { %479 = vmatpush1.bf16.msra.mxu0 %v805_v4  ;;  %v811_v9 = vld [vmem:[%s947_s11 + $0x20] ss:$8 sps:$4 sm:$0xff]   ;;  %v812_v10 = vld [vmem:[%s947_s11 + $0x34] ss:$8 sps:$4 sm:$0xff]   ;;  %v814_v11 = vld [vmem:[%s947_s11 + $0x30] ss:$8 sps:$4 sm:$0xff]  }
  0x2a   : > { %480 = vmatprep.subr.bf16.mxu0 %v806_v6  ;;  %v815_v12 = vld [vmem:[%s947_s11 + $0x44] ss:$8 sps:$4 sm:$0xff]   ;;  %v817_v13 = vld [vmem:[%s947_s11 + $0x40] ss:$8 sps:$4 sm:$0xff]   ;;  %v818_v14 = vld [vmem:[%s947_s11 + $0x54] ss:$8 sps:$4 sm:$0xff]  }
  0x2b   : > { %v820_v15 = vld [vmem:[%s947_s11 + $0x50] ss:$8 sps:$4 sm:$0xff]   ;;  %v821_v16 = vld [vmem:[%s947_s11 + $0x64] ss:$8 sps:$4 sm:$0xff]   ;;  %v823_v17 = vld [vmem:[%s947_s11 + $0x60] ss:$8 sps:$4 sm:$0xff]  }
  0x2c   : > { %v824_v18 = vld [vmem:[%s947_s11 + $0x74] ss:$8 sps:$4 sm:$0xff]   ;;  %v826_v19 = vld [vmem:[%s947_s11 + $0x70] ss:$8 sps:$4 sm:$0xff]   ;;  %v827_v20 = vld [vmem:[%s280_s12] sm:$0xff]   ;;  %v540_v34 = vshrl.u32 (!%p751_p11), %v539_v33, 7 }
  0x2d   : > { %481 = vmatpush1.bf16.msra.mxu0 %v808_v7  ;;  %v370_v21 = vld [vmem:[#allocation2] sm:$0xff]  ;;  %v371_v22 = vld [vmem:[#allocation2 + $0x8] sm:$0xff]  ;;  %v372_v24 = vld [vmem:[#allocation2 + $0x10] sm:$0xff] }
  0x2e   : > { %482 = vmatprep.subr.bf16.mxu0 %v809_v8  ;;  %v373_v27 = vld [vmem:[#allocation2 + $0x18] sm:$0xff]  ;;  %v537_v35 = vld [vmem:[%s999_s2] sm:$0x3] (!%p751_p11)  ;;  %v541_v38 = vsub.s32 (!%p751_p11), 0, %v540_v34  ;;  %v545_v39 = vsub.s32 (!%p751_p11), 1, %v540_v34 }
  0x2f   : > { %v553_v36 = vld [vmem:[%s1000_s3] sm:$0x3] (!%p751_p11) }
  0x30   : > { %v542_v43 = vrot.slane (!%p751_p11), %v537_v35, %v541_v38  ;;  %v546_v44 = vrot.slane (!%p751_p11), %v537_v35, %v545_v39  ;;  %v558_v45 = vrot.slane (!%p751_p11), %v553_v36, %v541_v38  ;;  %v562_v46 = vrot.slane (!%p751_p11), %v553_v36, %v545_v39 }
  0x31   : > { %483 = vmatpush1.bf16.msra.mxu0 %v811_v9 }
  0x32   : > { %484 = vmatprep.subr.bf16.mxu0 %v812_v10 }
  0x35   : > { %485 = vmatpush1.bf16.msra.mxu0 %v814_v11 }
  0x36   : > { %486 = vmatprep.subr.bf16.mxu0 %v815_v12 }
  0x39   : > { %487 = vmatpush1.bf16.msra.mxu0 %v817_v13 }
  0x3a   : > { %488 = vmatprep.subr.bf16.mxu0 %v818_v14 }
  0x3d   : > { %489 = vmatpush1.bf16.msra.mxu0 %v820_v15 }
  0x3e   : > { %490 = vmatprep.subr.bf16.mxu0 %v821_v16 }
  0x41   : > { %491 = vmatpush1.bf16.msra.mxu0 %v823_v17 }
  0x42   : > { %492 = vmatprep.subr.bf16.mxu0 %v824_v18 }
  0x45   : > { %493 = vmatpush1.bf16.msra.mxu0 %v826_v19 }
  0x48   : > { %511 = vmatmul.mubr.bf16.vlgmr.msra.gmra.mrb[0].mxu0 %v827_v20 }
 0x11b   : > { %v512_v23 = vpop.f32.mrb[0].mxu0  ;;  %532 = sbr.rel (%p751_p11) target bundleno = 306 (0x132), region = 85 }
 0x11c   : > { %v521_v25 = vadd.f32 %v512_v23, %v370_v21  ;;  %v514_v26 = vpop.f32.mrb[1].mxu0 }
 0x11d   : > { %v522_v28 = vadd.f32 %v514_v26, %v371_v22  ;;  %v516_v29 = vpop.f32.mrb[2].mxu0 }
 0x11e   : > { %525 = vst [vmem:[#allocation2] sm:$0xff] %v521_v25  ;;  %v523_v30 = vadd.f32 %v516_v29, %v372_v24  ;;  %v518_v31 = vpop.f32.mrb[3].mxu0 }
 0x11f   : > { %526 = vst [vmem:[#allocation2 + $0x8] sm:$0xff] %v522_v28  ;;  %v524_v32 = vadd.f32 %v518_v31, %v373_v27 }
 0x120   : > { %527 = vst [vmem:[#allocation2 + $0x10] sm:$0xff] %v523_v30 }
 0x121   : > { %528 = vst [vmem:[#allocation2 + $0x18] sm:$0xff] %v524_v32 }
 0x125   : > { %v533_v37 = vld [vmem:[#allocation2] sm:$0xff] }
 0x126   : > { %v534_v40 = vld [vmem:[#allocation2 + $0x8] sm:$0xff]  ;;  %v549_v47 = vmul.f32 %v542_v43, %v533_v37 }
 0x127   : > { %v535_v41 = vld [vmem:[#allocation2 + $0x10] sm:$0xff]  ;;  %v550_v48 = vmul.f32 %v546_v44, %v534_v40 }
 0x128   : > { %v536_v42 = vld [vmem:[#allocation2 + $0x18] sm:$0xff]  ;;  %v551_v49 = vmul.f32 %v542_v43, %v535_v41  ;;  %v565_v51 = vadd.f32 %v558_v45, %v549_v47 }
 0x129   : > { %v552_v50 = vmul.f32 %v546_v44, %v536_v42  ;;  %v566_v52 = vadd.f32 %v562_v46, %v550_v48 }
 0x12a   : > { %v567_v53 = vadd.f32 %v558_v45, %v551_v49  ;;  %v569_v55 = vmax.f32 %v565_v51, 0.0 }
 0x12b   : > { %v568_v54 = vadd.f32 %v562_v46, %v552_v50  ;;  %v570_v56 = vmax.f32 %v566_v52, 0.0 }
 0x12c   : > { %v571_v57 = vmax.f32 %v567_v53, 0.0 }
 0x12d   : > { %v572_v58 = vmax.f32 %v568_v54, 0.0  ;;  %v759_v59 = vpack.c.bf16 %v570_v56, %v569_v55 }
 0x12f   : > { %v760_v60 = vpack.c.bf16 %v572_v58, %v571_v57  ;;  %585 = vst [vmem:[%s1001_s4] sm:$0xff] %v759_v59 }
 0x131   : > { %586 = vst [vmem:[%s1001_s4 + $0x8] sm:$0xff] %v760_v60 }
 0x132 PF: > { %s14_s19 = sadd.s32 1, %s866_s19   ;;  %s1002_s15 = smov %s854_s16 }
 0x133   : > { %p11_p12 = scmp.ge.s32.totalorder %s14_s19, 11   ;;  %s1003_s16 = smov %s930_s23 }
 0x134   : > { %s1004_s17 = smov %s862_s18  ;;  %s1005_s18 = smov %s1007_s20 }
 0x135   :  { %13 = sbr.rel (!%p11_p12) target bundleno = 3 (0x3), region = 129 }

// kernel: resnet_forward.36
= control target key start
LH: loop header
LB: loop body
LE: loop exit
PB: predicated region body
PF: predicated region fallthrough
CT: control target
= control target key end

     0   :  { %s1033_s15 = smov 0   ;;  %s1035_s16 = smov 0   ;;  %s1153_s0 = inlined_call_operand.vmem [shape: bf16[16,2304], index: 0, kind: input, shape index: {}]   ;;  %s1154_s1 = inlined_call_operand.vmem [shape: bf16[2304,256], index: 1, kind: input, shape index: {}]   ;;  %s1155_s2 = inlined_call_operand.vmem [shape: f32[1,256], index: 2, kind: input, shape index: {}]   ;;  %s1156_s3 = inlined_call_operand.vmem [shape: f32[1,256], index: 3, kind: input, shape index: {}]   ;;  %s1157_s4 = inlined_call_operand.vmem [shape: bf16[16,256], index: 4, kind: output, shape index: {}]  }
   0x1   :  { %s1037_s17 = smov 0   ;;  %s1039_s18 = smov 0  }
   0x2   :  { %s1041_s19 = smov 0  }
   0x3 LB: > { %s26_s20 = sadd.s32 1, %s1001_s18  ;;  %p49_p1 = scmp.ne.s32.totalorder %s993_s16, %s989_s15  ;;  %s1005_s19 = sphi %s1041_s19, %s14_s19   ;;  %s1001_s18 = sphi %s1039_s18, %s1161_s18   ;;  %s997_s17 = sphi %s1037_s17, %s1160_s17   ;;  %s993_s16 = sphi %s1035_s16, %s1159_s16   ;;  %s989_s15 = sphi %s1033_s15, %s1158_s15  }
   0x4   : > { %p27_p0 = scmp.ge.s32.totalorder %s26_s20, 9  ;;  %p50_p2 = scmp.eq.s32.totalorder %s1005_s19, 0 }
   0x5   : > { %s42_s22 = sadd.s32 1, %s993_s16  ;;  %p820_p5 = scmp.ge.s32.totalorder %s1005_s19, 9 }
   0x6   : > { %s1163_s20 = smov (%p27_p0, %s26_s20), 0  ;;  %p51_p3 = por %p50_p2, %p49_p1 }
   0x7   : > { %s38_s21 = ssub.s32 %s1001_s18, %s1163_s20  ;;  %199 = sbr.rel (%p820_p5) target bundleno = 21 (0x15), region = 24 }
   0x8   : > { %p40_p4 = scmp.eq.s32.totalorder %s38_s21, 0 }
   0xa   : > { %s1068_s23 = scalar_select %p40_p4, %s993_s16, %s42_s22  }
   0xe   : > { %202 = sbr.rel (!%p51_p3) target bundleno = 21 (0x15), region = 28  ;;  %s204_s24 = sand.u32 (%p51_p3), 1, %s993_s16  }
   0xf   : > { %s871_s25 = sshll.u32 (%p51_p3), %s1001_s18, 3  ;;  %s821_s26 = sshll.u32 (%p51_p3), %s204_s24, 4 }
  0x10   : > { %s212_s29 = scalar_lea.vmem (%p51_p3), %s1153_s0, %s871_s25  ;;  %s206_s30 = scalar_lea.vmem (%p51_p3), [#allocation3], %s821_s26 }
  0x11   : > { %v242_v0 = vld [vmem:[%s212_s29] sm:$0xff] (%p51_p3)  ;;  %v244_v1 = vld [vmem:[%s212_s29 + $0x48] sm:$0xff] (%p51_p3) }
  0x12   : > { %243 = vst [vmem:[%s206_s30] sm:$0xff] (%p51_p3), %v242_v0  ;;  %245 = vst [vmem:[%s206_s30 + $0x8] sm:$0xff] (%p51_p3), %v244_v1 }
  0x15 PF: > { %p824_p6 = scmp.ge.s32.totalorder %s1005_s19, 1  ;;  %p265_p7 = scmp.lt.s32.totalorder %s1005_s19, 10 }
  0x17   : > { %p266_p8 = pnand %p824_p6, %p265_p7 }
  0x18   : > { %s272_s5 = sand.u32 (!%p266_p8), 1, %s989_s15   ;;  %s826_s6 = sshll.u32 (!%p266_p8), %s997_s17, 5 }
  0x19   : > { %269 = sbr.rel (%p266_p8) target bundleno = 338 (0x152), region = 70  ;;  %s1080_s7 = sshll.u32 (!%p266_p8), %s272_s5, 4 }
  0x1a   : > { %p324_p9 = scmp.lt.s32.totalorder (!%p266_p8), %s826_s6, 287  ;;  %s274_s12 = scalar_lea.vmem (!%p266_p8), [#allocation3], %s1080_s7 }
  0x1b   : > { %p829_p10 = scmp.ne.s32.totalorder (!%p266_p8), %s997_s17, 0 }
  0x20   : > { %s1165_s6 = smov (!%p324_p9, %s826_s6), 287  ;;  %359 = sbr.rel (%p829_p10) target bundleno = 39 (0x27), region = 78 }
  0x21   : > { %s872_s8 = sshll.u32 %s1165_s6, 3  ;;  %v1007_v2 = vmov (!%p829_p10), 0.0  }
  0x22   : > { %s1085_s11 = scalar_lea.vmem %s1154_s1, %s872_s8  ;;  %360 = vst [vmem:[#allocation2] sm:$0xff] (!%p829_p10), %v1007_v2  ;;  %361 = vst [vmem:[#allocation2 + $0x8] sm:$0xff] (!%p829_p10), %v1007_v2 }
  0x23   : > { %362 = vst [vmem:[#allocation2 + $0x10] sm:$0xff] (!%p829_p10), %v1007_v2  ;;  %363 = vst [vmem:[#allocation2 + $0x18] sm:$0xff] (!%p829_p10), %v1007_v2 }
  0x27 PF: > { %v916_v3 = vld [vmem:[%s1085_s11 + $0x4] ss:$8 sps:$4 sm:$0xff]   ;;  %v918_v4 = vld [vmem:[%s1085_s11] ss:$8 sps:$4 sm:$0xff]   ;;  %v919_v5 = vld [vmem:[%s1085_s11 + $0x14] ss:$8 sps:$4 sm:$0xff]  }
  0x28   : > { %572 = vmatprep.subr.bf16.mxu0 %v916_v3  ;;  %v921_v6 = vld [vmem:[%s1085_s11 + $0x10] ss:$8 sps:$4 sm:$0xff]   ;;  %v922_v7 = vld [vmem:[%s1085_s11 + $0x24] ss:$8 sps:$4 sm:$0xff]   ;;  %v924_v8 = vld [vmem:[%s1085_s11 + $0x20] ss:$8 sps:$4 sm:$0xff]  }
  0x29   : > { %573 = vmatpush1.bf16.msra.mxu0 %v918_v4  ;;  %v925_v9 = vld [vmem:[%s1085_s11 + $0x34] ss:$8 sps:$4 sm:$0xff]   ;;  %v927_v10 = vld [vmem:[%s1085_s11 + $0x30] ss:$8 sps:$4 sm:$0xff]   ;;  %v928_v11 = vld [vmem:[%s1085_s11 + $0x44] ss:$8 sps:$4 sm:$0xff]  }
  0x2a   : > { %574 = vmatprep.subr.bf16.mxu0 %v919_v5  ;;  %v930_v12 = vld [vmem:[%s1085_s11 + $0x40] ss:$8 sps:$4 sm:$0xff]   ;;  %v931_v13 = vld [vmem:[%s1085_s11 + $0x54] ss:$8 sps:$4 sm:$0xff]   ;;  %v933_v14 = vld [vmem:[%s1085_s11 + $0x50] ss:$8 sps:$4 sm:$0xff]  }
  0x2b   : > { %v934_v15 = vld [vmem:[%s1085_s11 + $0x64] ss:$8 sps:$4 sm:$0xff]   ;;  %v936_v17 = vld [vmem:[%s1085_s11 + $0x60] ss:$8 sps:$4 sm:$0xff]   ;;  %v937_v18 = vld [vmem:[%s1085_s11 + $0x74] ss:$8 sps:$4 sm:$0xff]  }
  0x2c   : > { %v966_v16 = vld [vmem:[%s274_s12 + $0x4] ss:$8 sps:$4 sm:$0xff]   ;;  %v939_v19 = vld [vmem:[%s1085_s11 + $0x70] ss:$8 sps:$4 sm:$0xff]   ;;  %v942_v21 = vld [vmem:[%s1085_s11 + $0x80] ss:$8 sps:$4 sm:$0xff]  }
  0x2d   : > { %575 = vmatpush1.bf16.msra.mxu0 %v921_v6  ;;  %604 = vmatprep.mubr.bf16.mxu0 %v966_v16  ;;  %v940_v20 = vld [vmem:[%s1085_s11 + $0x84] ss:$8 sps:$4 sm:$0xff]   ;;  %v943_v22 = vld [vmem:[%s1085_s11 + $0x94] ss:$8 sps:$4 sm:$0xff]   ;;  %v945_v23 = vld [vmem:[%s1085_s11 + $0x90] ss:$8 sps:$4 sm:$0xff]  }
  0x2e   : > { %576 = vmatprep.subr.bf16.mxu0 %v922_v7  ;;  %v946_v24 = vld [vmem:[%s1085_s11 + $0xa4] ss:$8 sps:$4 sm:$0xff]   ;;  %v948_v25 = vld [vmem:[%s1085_s11 + $0xa0] ss:$8 sps:$4 sm:$0xff]   ;;  %v949_v26 = vld [vmem:[%s1085_s11 + $0xb4] ss:$8 sps:$4 sm:$0xff]  }
  0x2f   : > { %v951_v27 = vld [vmem:[%s1085_s11 + $0xb0] ss:$8 sps:$4 sm:$0xff]   ;;  %v952_v28 = vld [vmem:[%s1085_s11 + $0xc4] ss:$8 sps:$4 sm:$0xff]   ;;  %v954_v29 = vld [vmem:[%s1085_s11 + $0xc0] ss:$8 sps:$4 sm:$0xff]  }
  0x30   : > { %v955_v30 = vld [vmem:[%s1085_s11 + $0xd4] ss:$8 sps:$4 sm:$0xff]   ;;  %v957_v31 = vld [vmem:[%s1085_s11 + $0xd0] ss:$8 sps:$4 sm:$0xff]   ;;  %v958_v32 = vld [vmem:[%s1085_s11 + $0xe4] ss:$8 sps:$4 sm:$0xff]  }
  0x31   : > { %577 = vmatpush1.bf16.msra.mxu0 %v924_v8  ;;  %v960_v33 = vld [vmem:[%s1085_s11 + $0xe0] ss:$8 sps:$4 sm:$0xff]   ;;  %v961_v34 = vld [vmem:[%s1085_s11 + $0xf4] ss:$8 sps:$4 sm:$0xff]   ;;  %v963_v35 = vld [vmem:[%s1085_s11 + $0xf0] ss:$8 sps:$4 sm:$0xff]  }
  0x32   : > { %578 = vmatprep.subr.bf16.mxu0 %v925_v9  ;;  %v964_v36 = vld [vmem:[%s274_s12] ss:$8 sps:$4 sm:$0xff]   ;;  %p864_p11 = scmp.ne.s32.totalorder %s997_s17, 8 }
  0x33   : > { %v364_v37 = vld [vmem:[#allocation2] sm:$0xff]  ;;  %v365_v38 = vld [vmem:[#allocation2 + $0x8] sm:$0xff]  ;;  %v366_v40 = vld [vmem:[#allocation2 + $0x10] sm:$0xff]  ;;  %v633_v49 = vlaneseq (!%p864_p11) }
  0x34   : > { %v367_v43 = vld [vmem:[#allocation2 + $0x18] sm:$0xff]  ;;  %v631_v51 = vld [vmem:[%s1155_s2] sm:$0x3] (!%p864_p11) }
  0x35   : > { %579 = vmatpush1.bf16.msra.mxu0 %v927_v10  ;;  %v634_v50 = vshrl.u32 (!%p864_p11), %v633_v49, 7  ;;  %v647_v52 = vld [vmem:[%s1156_s3] sm:$0x3] (!%p864_p11) }
  0x36   : > { %580 = vmatprep.subr.bf16.mxu0 %v928_v11 }
  0x37   : > { %v635_v54 = vsub.s32 (!%p864_p11), 0, %v634_v50  ;;  %v639_v55 = vsub.s32 (!%p864_p11), 1, %v634_v50 }
  0x39   : > { %581 = vmatpush1.bf16.msra.mxu0 %v930_v12  ;;  %v636_v59 = vrot.slane (!%p864_p11), %v631_v51, %v635_v54  ;;  %v640_v60 = vrot.slane (!%p864_p11), %v631_v51, %v639_v55  ;;  %v652_v61 = vrot.slane (!%p864_p11), %v647_v52, %v635_v54  ;;  %v656_v62 = vrot.slane (!%p864_p11), %v647_v52, %v639_v55 }
  0x3a   : > { %582 = vmatprep.subr.bf16.mxu0 %v931_v13 }
  0x3d   : > { %583 = vmatpush1.bf16.msra.mxu0 %v933_v14 }
  0x3e   : > { %584 = vmatprep.subr.bf16.mxu0 %v934_v15 }
  0x41   : > { %585 = vmatpush1.bf16.msra.mxu0 %v936_v17 }
  0x42   : > { %586 = vmatprep.subr.bf16.mxu0 %v937_v18 }
  0x45   : > { %587 = vmatpush1.bf16.msra.mxu0 %v939_v19 }
  0x46   : > { %588 = vmatprep.subr.bf16.mxu0 %v940_v20 }
  0x49   : > { %589 = vmatpush1.bf16.msra.mxu0 %v942_v21 }
  0x4a   : > { %590 = vmatprep.subr.bf16.mxu0 %v943_v22 }
  0x4d   : > { %591 = vmatpush1.bf16.msra.mxu0 %v945_v23 }
  0x4e   : > { %592 = vmatprep.subr.bf16.mxu0 %v946_v24 }
  0x51   : > { %593 = vmatpush1.bf16.msra.mxu0 %v948_v25 }
  0x52   : > { %594 = vmatprep.subr.bf16.mxu0 %v949_v26 }
  0x55   : > { %595 = vmatpush1.bf16.msra.mxu0 %v951_v27 }
  0x56   : > { %596 = vmatprep.subr.bf16.mxu0 %v952_v28 }
  0x59   : > { %597 = vmatpush1.bf16.msra.mxu0 %v954_v29 }
  0x5a   : > { %598 = vmatprep.subr.bf16.mxu0 %v955_v30 }
  0x5d   : > { %599 = vmatpush1.bf16.msra.mxu0 %v957_v31 }
  0x5e   : > { %600 = vmatprep.subr.bf16.mxu0 %v958_v32 }
  0x61   : > { %601 = vmatpush1.bf16.msra.mxu0 %v960_v33 }
  0x62   : > { %602 = vmatprep.subr.bf16.mxu0 %v961_v34 }
  0x65   : > { %603 = vmatpush1.bf16.msra.mxu0 %v963_v35 }
  0x68   : > { %605 = vmatmul.mubr.bf16.vlgmr.msra.gmra.mrb[0].mxu0 %v964_v36 }
 0x13b   : > { %v606_v39 = vpop.f32.mrb[0].mxu0  ;;  %626 = sbr.rel (%p864_p11) target bundleno = 338 (0x152), region = 82 }
 0x13c   : > { %v615_v41 = vadd.f32 %v606_v39, %v364_v37  ;;  %v608_v42 = vpop.f32.mrb[1].mxu0 }
 0x13d   : > { %v616_v44 = vadd.f32 %v608_v42, %v365_v38  ;;  %v610_v45 = vpop.f32.mrb[2].mxu0 }
 0x13e   : > { %619 = vst [vmem:[#allocation2] sm:$0xff] %v615_v41  ;;  %v617_v46 = vadd.f32 %v610_v45, %v366_v40  ;;  %v612_v47 = vpop.f32.mrb[3].mxu0 }
 0x13f   : > { %620 = vst [vmem:[#allocation2 + $0x8] sm:$0xff] %v616_v44  ;;  %v618_v48 = vadd.f32 %v612_v47, %v367_v43 }
 0x140   : > { %621 = vst [vmem:[#allocation2 + $0x10] sm:$0xff] %v617_v46 }
 0x141   : > { %622 = vst [vmem:[#allocation2 + $0x18] sm:$0xff] %v618_v48 }
 0x145   : > { %v627_v53 = vld [vmem:[#allocation2] sm:$0xff] }
 0x146   : > { %v628_v56 = vld [vmem:[#allocation2 + $0x8] sm:$0xff]  ;;  %v643_v63 = vmul.f32 %v636_v59, %v627_v53 }
 0x147   : > { %v629_v57 = vld [vmem:[#allocation2 + $0x10] sm:$0xff]  ;;  %v644_v0 = vmul.f32 %v640_v60, %v628_v56 }
 0x148   : > { %v630_v58 = vld [vmem:[#allocation2 + $0x18] sm:$0xff]  ;;  %v645_v1 = vmul.f32 %v636_v59, %v629_v57  ;;  %v659_v3 = vadd.f32 %v652_v61, %v643_v63 }
 0x149   : > { %v646_v2 = vmul.f32 %v640_v60, %v630_v58  ;;  %v660_v4 = vadd.f32 %v656_v62, %v644_v0 }
 0x14a   : > { %v661_v5 = vadd.f32 %v652_v61, %v645_v1  ;;  %v663_v7 = vmax.f32 %v659_v3, 0.0 }
 0x14b   : > { %v662_v6 = vadd.f32 %v656_v62, %v646_v2  ;;  %v664_v8 = vmax.f32 %v660_v4, 0.0 }
 0x14c   : > { %v665_v9 = vmax.f32 %v661_v5, 0.0 }
 0x14d   : > { %v666_v10 = vmax.f32 %v662_v6, 0.0  ;;  %v873_v11 = vpack.c.bf16 %v664_v8, %v663_v7 }
 0x14f   : > { %v874_v12 = vpack.c.bf16 %v666_v10, %v665_v9  ;;  %679 = vst [vmem:[%s1157_s4] sm:$0xff] %v873_v11 }
 0x151   : > { %680 = vst [vmem:[%s1157_s4 + $0x8] sm:$0xff] %v874_v12 }
 0x152 PF: > { %s14_s19 = sadd.s32 1, %s1005_s19   ;;  %s1158_s15 = smov %s993_s16 }
 0x153   : > { %p11_p12 = scmp.ge.s32.totalorder %s14_s19, 11   ;;  %s1159_s16 = smov %s1068_s23 }
 0x154   : > { %s1160_s17 = smov %s1001_s18  ;;  %s1161_s18 = smov %s1163_s20 }
 0x155   :  { %13 = sbr.rel (!%p11_p12) target bundleno = 3 (0x3), region = 126 }

// kernel: resnet_forward.39
= control target key start
LH: loop header
LB: loop body
LE: loop exit
PB: predicated region body
PF: predicated region fallthrough
CT: control target
= control target key end

     0   :  { %s1295_s15 = smov 0   ;;  %s1297_s16 = smov 0   ;;  %s1591_s0 = inlined_call_operand.vmem [shape: bf16[16,2304], index: 0, kind: input, shape index: {}]   ;;  %s1592_s1 = inlined_call_operand.vmem [shape: bf16[2304,512], index: 1, kind: input, shape index: {}]   ;;  %s1593_s2 = inlined_call_operand.vmem [shape: f32[1,512], index: 2, kind: input, shape index: {}]   ;;  %s1594_s3 = inlined_call_operand.vmem [shape: f32[1,512], index: 3, kind: input, shape index: {}]   ;;  %s1595_s4 = inlined_call_operand.vmem [shape: bf16[16,512], index: 4, kind: output, shape index: {}]  }
   0x1   :  { %s1299_s17 = smov 0   ;;  %s1301_s18 = smov 0  }
   0x2   :  { %s1303_s19 = smov 0   ;;  %s1305_s20 = smov 0  }
   0x3   :  { %s1307_s21 = smov 0   ;;  %s1309_s22 = smov 0  }
   0x4   :  { %s1311_s23 = smov 0   ;;  %s1313_s24 = smov 0  }
   0x5   :  { %s1315_s25 = smov 0  }
   0x6 LB: > { %1599 = sst [smem:[#allocation6_spill]] %s1247_s20  ;;  %s975_s26 = sadd.s32 4294967295, %s1267_s25   ;;  %s1267_s25 = sphi %s1315_s25, %s14_s25   ;;  %s1263_s24 = sphi %s1313_s24, %s1617_s24   ;;  %s1259_s23 = sphi %s1311_s23, %s1616_s23   ;;  %s1255_s22 = sphi %s1309_s22, %s1615_s22   ;;  %s1251_s21 = sphi %s1307_s21, %s1614_s21   ;;  %s1247_s20 = sphi %s1305_s20, %s1607_s20   ;;  %s1243_s19 = sphi %s1303_s19, %s1606_s19   ;;  %s1239_s18 = sphi %s1301_s18, %s1613_s18   ;;  %s1235_s17 = sphi %s1299_s17, %s1612_s17   ;;  %s1231_s16 = sphi %s1297_s16, %s1611_s16   ;;  %s1227_s15 = sphi %s1295_s15, %s1610_s15  }
   0x7   : > { %s26_s27 = sadd.s32 1, %s1259_s23  ;;  %s29_s28 = sadd.s32 1, %s1263_s24 }
   0x8   : > { %p27_p0 = scmp.ge.s32.totalorder %s26_s27, 9  ;;  %s42_s29 = sadd.s32 1, %s1247_s20 }
   0x9   : > { %p49_p1 = scmp.ne.s32.totalorder %s1247_s20, %s1243_s19  ;;  %p50_p2 = scmp.eq.s32.totalorder %s1267_s25, 0 }
   0xa   : > { %s1619_s27 = smov (%p27_p0, %s26_s27), 0  ;;  %s1621_s28 = smov (!%p27_p0, %s29_s28), %s1263_s24 }
   0xb   : > { %1600 = sst [smem:[#allocation7_spill]] %s1619_s27  ;;  %s38_s30 = ssub.s32 %s1259_s23, %s1619_s27 }
   0xc   : > { %p31_p3 = scmp.ge.s32.totalorder %s1621_s28, 2  ;;  %p40_p4 = scmp.eq.s32.totalorder %s38_s30, 0 }
   0xd   : > { %p1362_p5 = por %p50_p2, %p49_p1  ;;  %s70_s6 = sadd.s32 1, %s1239_s18 }
   0xe   : > { %s1623_s28 = smov (%p31_p3, %s1621_s28), 0  ;;  %p77_p6 = scmp.ne.s32.totalorder %s1239_s18, %s1235_s17 }
   0xf   : > { %1602 = sst [smem:[#allocation8_spill]] %s1623_s28  ;;  %s66_s8 = ssub.s32 %s1263_s24, %s1623_s28 }
  0x10   : > { %s1370_s7 = scalar_select %p40_p4, %s1247_s20, %s42_s29  }
  0x11   : > { %s67_s9 = sor.u32 %s66_s8, %s38_s30  ;;  %p148_p7 = scmp.eq.s32.totalorder %s66_s8, 0 }
  0x12   : > { %1603 = sst [smem:[#allocation9_spill]] %s1370_s7  ;;  %p68_p8 = scmp.eq.s32.totalorder %s67_s9, 0 }
  0x13   : > { %p1376_p9 = por %p77_p6, %p50_p2  ;;  %s150_s11 = sadd.s32 1, %s1231_s16 }
  0x14   : > { %p160_p10 = scmp.ne.s32.totalorder %s1231_s16, %s1227_s15  ;;  %p161_p11 = scmp.eq.s32.totalorder %s975_s26, 17 }
  0x15   : > { %s1384_s12 = scalar_select %p68_p8, %s1239_s18, %s70_s6  }
  0x16   : > { %s1387_s13 = scalar_select %p148_p7, %s1231_s16, %s150_s11  }
  0x17   : > { %p1389_p12 = por %p161_p11, %p160_p10  ;;  %p978_p13 = scmp.ge.s32.totalorder %s1267_s25, 18 }
  0x19   : > { %183 = sbr.rel (%p978_p13) target bundleno = 62 (0x3e), region = 16 }
  0x20   : > { %186 = sbr.rel (!%p1362_p5) target bundleno = 39 (0x27), region = 20  ;;  %s188_s29 = sand.u32 (%p1362_p5), 1, %s1247_s20  }
  0x21   : > { %s1036_s30 = sshll.u32 (%p1362_p5), %s1259_s23, 3  ;;  %s979_s8 = sshll.u32 (%p1362_p5), %s188_s29, 4 }
  0x22   : > { %s196_s11 = scalar_lea.vmem (%p1362_p5), %s1591_s0, %s1036_s30  ;;  %s190_s26 = scalar_lea.vmem (%p1362_p5), [#allocation3], %s979_s8 }
  0x23   : > { %v226_v0 = vld [vmem:[%s196_s11] sm:$0xff] (%p1362_p5)  ;;  %v228_v1 = vld [vmem:[%s196_s11 + $0x48] sm:$0xff] (%p1362_p5) }
  0x24   : > { %227 = vst [vmem:[%s190_s26] sm:$0xff] (%p1362_p5), %v226_v0  ;;  %229 = vst [vmem:[%s190_s26 + $0x8] sm:$0xff] (%p1362_p5), %v228_v1 }
  0x27 PF: > { %235 = sbr.rel (!%p1376_p9) target bundleno = 62 (0x3e), region = 58  ;;  %s237_s5 = sand.u32 (%p1376_p9), 1, %s1239_s18  }
  0x28   : > { %s984_s28 = sshll.u32 (%p1376_p9), %s1263_s24, 1  ;;  %s982_s27 = sshll.u32 (%p1376_p9), %s237_s5, 8 }
  0x29   : > { %s1037_s29 = sshll.u32 (%p1376_p9), %s1259_s23, 7  ;;  %s1414_s10 = scalar_lea.vmem (%p1376_p9), [#allocation4], %s982_s27 }
  0x2a   : > { %s243_s7 = sadd.s32 (%p1376_p9), %s1037_s29, %s984_s28 }
  0x2b   : > { %s986_s20 = sshll.u32 (%p1376_p9), %s243_s7, 2 }
  0x2c   : > { %s1409_s9 = scalar_lea.vmem (%p1376_p9), %s1592_s1, %s986_s20 }
  0x2d   : > { %v335_v2 = vld [vmem:[%s1409_s9] sm:$0xff] (%p1376_p9)  ;;  %v337_v3 = vld [vmem:[%s1409_s9 + $0x10] sm:$0xff] (%p1376_p9) }
  0x2e   : > { %v339_v4 = vld [vmem:[%s1409_s9 + $0x20] sm:$0xff]  ;;  %336 = vst [vmem:[%s1414_s10] sm:$0xff] %v335_v2  ;;  %338 = vst [vmem:[%s1414_s10 + $0x8] sm:$0xff] %v337_v3  ;;  %v341_v5 = vld [vmem:[%s1409_s9 + $0x30] sm:$0xff] }
  0x2f   : > { %340 = vst [vmem:[%s1414_s10 + $0x10] sm:$0xff] %v339_v4  ;;  %v343_v6 = vld [vmem:[%s1409_s9 + $0x40] sm:$0xff]  ;;  %v345_v7 = vld [vmem:[%s1409_s9 + $0x50] sm:$0xff]  ;;  %342 = vst [vmem:[%s1414_s10 + $0x18] sm:$0xff] %v341_v5 }
  0x30   : > { %344 = vst [vmem:[%s1414_s10 + $0x20] sm:$0xff] %v343_v6  ;;  %346 = vst [vmem:[%s1414_s10 + $0x28] sm:$0xff] %v345_v7  ;;  %v347_v8 = vld [vmem:[%s1409_s9 + $0x60] sm:$0xff]  ;;  %v349_v9 = vld [vmem:[%s1409_s9 + $0x70] sm:$0xff] }
  0x31   : > { %v351_v10 = vld [vmem:[%s1409_s9 + $0x80] sm:$0xff]  ;;  %348 = vst [vmem:[%s1414_s10 + $0x30] sm:$0xff] %v347_v8  ;;  %350 = vst [vmem:[%s1414_s10 + $0x38] sm:$0xff] %v349_v9  ;;  %v353_v11 = vld [vmem:[%s1409_s9 + $0x90] sm:$0xff] }
  0x32   : > { %352 = vst [vmem:[%s1414_s10 + $0x40] sm:$0xff] %v351_v10  ;;  %v355_v12 = vld [vmem:[%s1409_s9 + $0xa0] sm:$0xff]  ;;  %v357_v13 = vld [vmem:[%s1409_s9 + $0xb0] sm:$0xff]  ;;  %354 = vst [vmem:[%s1414_s10 + $0x48] sm:$0xff] %v353_v11 }
  0x33   : > { %356 = vst [vmem:[%s1414_s10 + $0x50] sm:$0xff] %v355_v12  ;;  %358 = vst [vmem:[%s1414_s10 + $0x58] sm:$0xff] %v357_v13  ;;  %v359_v14 = vld [vmem:[%s1409_s9 + $0xc0] sm:$0xff]  ;;  %v361_v15 = vld [vmem:[%s1409_s9 + $0xd0] sm:$0xff] }
  0x34   : > { %v363_v16 = vld [vmem:[%s1409_s9 + $0xe0] sm:$0xff]  ;;  %360 = vst [vmem:[%s1414_s10 + $0x60] sm:$0xff] %v359_v14  ;;  %362 = vst [vmem:[%s1414_s10 + $0x68] sm:$0xff] %v361_v15  ;;  %v365_v17 = vld [vmem:[%s1409_s9 + $0xf0] sm:$0xff] }
  0x35   : > { %364 = vst [vmem:[%s1414_s10 + $0x70] sm:$0xff] %v363_v16  ;;  %v367_v18 = vld [vmem:[%s1409_s9 + $0x100] sm:$0xff]  ;;  %v369_v19 = vld [vmem:[%s1409_s9 + $0x110] sm:$0xff]  ;;  %366 = vst [vmem:[%s1414_s10 + $0x78] sm:$0xff] %v365_v17 }
  0x36   : > { %368 = vst [vmem:[%s1414_s10 + $0x80] sm:$0xff] %v367_v18  ;;  %370 = vst [vmem:[%s1414_s10 + $0x88] sm:$0xff] %v369_v19  ;;  %v371_v20 = vld [vmem:[%s1409_s9 + $0x120] sm:$0xff]  ;;  %v373_v21 = vld [vmem:[%s1409_s9 + $0x130] sm:$0xff] }
  0x37   : > { %v375_v22 = vld [vmem:[%s1409_s9 + $0x140] sm:$0xff]  ;;  %372 = vst [vmem:[%s1414_s10 + $0x90] sm:$0xff] %v371_v20  ;;  %374 = vst [vmem:[%s1414_s10 + $0x98] sm:$0xff] %v373_v21  ;;  %v377_v23 = vld [vmem:[%s1409_s9 + $0x150] sm:$0xff] }
  0x38   : > { %376 = vst [vmem:[%s1414_s10 + $0xa0] sm:$0xff] %v375_v22  ;;  %v379_v24 = vld [vmem:[%s1409_s9 + $0x160] sm:$0xff]  ;;  %v381_v25 = vld [vmem:[%s1409_s9 + $0x170] sm:$0xff]  ;;  %378 = vst [vmem:[%s1414_s10 + $0xa8] sm:$0xff] %v377_v23 }
  0x39   : > { %380 = vst [vmem:[%s1414_s10 + $0xb0] sm:$0xff] %v379_v24  ;;  %382 = vst [vmem:[%s1414_s10 + $0xb8] sm:$0xff] %v381_v25  ;;  %v383_v26 = vld [vmem:[%s1409_s9 + $0x180] sm:$0xff]  ;;  %v385_v27 = vld [vmem:[%s1409_s9 + $0x190] sm:$0xff] }
  0x3a   : > { %v387_v28 = vld [vmem:[%s1409_s9 + $0x1a0] sm:$0xff]  ;;  %384 = vst [vmem:[%s1414_s10 + $0xc0] sm:$0xff] %v383_v26  ;;  %386 = vst [vmem:[%s1414_s10 + $0xc8] sm:$0xff] %v385_v27  ;;  %v389_v29 = vld [vmem:[%s1409_s9 + $0x1b0] sm:$0xff] }
  0x3b   : > { %388 = vst [vmem:[%s1414_s10 + $0xd0] sm:$0xff] %v387_v28  ;;  %v391_v30 = vld [vmem:[%s1409_s9 + $0x1c0] sm:$0xff]  ;;  %v393_v31 = vld [vmem:[%s1409_s9 + $0x1d0] sm:$0xff]  ;;  %390 = vst [vmem:[%s1414_s10 + $0xd8] sm:$0xff] %v389_v29 }
  0x3c   : > { %392 = vst [vmem:[%s1414_s10 + $0xe0] sm:$0xff] %v391_v30  ;;  %394 = vst [vmem:[%s1414_s10 + $0xe8] sm:$0xff] %v393_v31  ;;  %v395_v32 = vld [vmem:[%s1409_s9 + $0x1e0] sm:$0xff]  ;;  %v397_v33 = vld [vmem:[%s1409_s9 + $0x1f0] sm:$0xff] }
  0x3d   : > { %396 = vst [vmem:[%s1414_s10 + $0xf0] sm:$0xff] %v395_v32  ;;  %398 = vst [vmem:[%s1414_s10 + $0xf8] sm:$0xff] %v397_v33 }
  0x3e PF: > { %p987_p0 = scmp.ge.s32.totalorder %s1267_s25, 1  ;;  %p419_p1 = scmp.lt.s32.totalorder %s1267_s25, 19 }
  0x40   : > { %p420_p2 = pnand %p987_p0, %p419_p1 }
  0x41   : > { %s426_s20 = sand.u32 (!%p420_p2), 1, %s1243_s19   ;;  %s433_s27 = sand.u32 (!%p420_p2), 1, %s1235_s17  }
  0x42   : > { %423 = sbr.rel (%p420_p2) target bundleno = 387 (0x183), region = 104  ;;  %s1481_s28 = sshll.u32 (!%p420_p2), %s426_s20, 4 }
  0x43   : > { %s989_s7 = sshll.u32 (!%p420_p2), %s433_s27, 8  ;;  %s466_s8 = sand.u32 (!%p420_p2), 1, %s1227_s15  }
  0x44   : > { %s991_s11 = sshll.u32 (!%p420_p2), %s1255_s22, 1  ;;  %s990_s26 = sshll.u32 (!%p420_p2), %s466_s8, 4 }
  0x45   : > { %p474_p3 = scmp.lt.s32.totalorder (!%p420_p2), %s991_s11, 3  ;;  %s428_s19 = scalar_lea.vmem (!%p420_p2), [#allocation3], %s1481_s28 }
  0x46   : > { %s1496_s10 = scalar_lea.vmem (!%p420_p2), [#allocation4], %s989_s7  ;;  %s1498_s20 = scalar_lea.vmem (!%p420_p2), [#allocation5], %s990_s26 }
  0x47   : > { %p993_p4 = scmp.ne.s32.totalorder (!%p420_p2), %s1251_s21, 0 }
  0x49   : > { %s1625_s11 = smov (!%p474_p3, %s991_s11), 3  ;;  %488 = sbr.rel (%p993_p4) target bundleno = 80 (0x50), region = 116 }
  0x4a   : > { %s476_s6 = scalar_lea.vmem %s1593_s2, %s1625_s11  ;;  %s481_s17 = scalar_lea.vmem %s1594_s3, %s1625_s11  ;;  %v1269_v34 = vmov (!%p993_p4), 0.0  }
  0x4b   : > { %489 = vst [vmem:[#allocation2] sm:$0xff] (!%p993_p4), %v1269_v34  ;;  %490 = vst [vmem:[#allocation2 + $0x8] sm:$0xff] (!%p993_p4), %v1269_v34 }
  0x4c   : > { %491 = vst [vmem:[#allocation2 + $0x10] sm:$0xff] (!%p993_p4), %v1269_v34  ;;  %492 = vst [vmem:[#allocation2 + $0x18] sm:$0xff] (!%p993_p4), %v1269_v34 }
  0x50 PF: > { %v1130_v35 = vld [vmem:[%s1496_s10 + $0x4] ss:$8 sps:$4 sm:$0xff]   ;;  %v1132_v36 = vld [vmem:[%s1496_s10] ss:$8 sps:$4 sm:$0xff]   ;;  %v1133_v37 = vld [vmem:[%s1496_s10 + $0x14] ss:$8 sps:$4 sm:$0xff]  }
  0x51   : > { %701 = vmatprep.subr.bf16.mxu0 %v1130_v35  ;;  %v1135_v38 = vld [vmem:[%s1496_s10 + $0x10] ss:$8 sps:$4 sm:$0xff]   ;;  %v1136_v39 = vld [vmem:[%s1496_s10 + $0x24] ss:$8 sps:$4 sm:$0xff]   ;;  %v1138_v40 = vld [vmem:[%s1496_s10 + $0x20] ss:$8 sps:$4 sm:$0xff]  }
  0x52   : > { %702 = vmatpush1.bf16.msra.mxu0 %v1132_v36  ;;  %v1139_v41 = vld [vmem:[%s1496_s10 + $0x34] ss:$8 sps:$4 sm:$0xff]   ;;  %v1141_v42 = vld [vmem:[%s1496_s10 + $0x30] ss:$8 sps:$4 sm:$0xff]   ;;  %v1142_v43 = vld [vmem:[%s1496_s10 + $0x44] ss:$8 sps:$4 sm:$0xff]  }
  0x53   : > { %703 = vmatprep.subr.bf16.mxu0 %v1133_v37  ;;  %v1144_v44 = vld [vmem:[%s1496_s10 + $0x40] ss:$8 sps:$4 sm:$0xff]   ;;  %v1145_v45 = vld [vmem:[%s1496_s10 + $0x54] ss:$8 sps:$4 sm:$0xff]   ;;  %v1147_v46 = vld [vmem:[%s1496_s10 + $0x50] ss:$8 sps:$4 sm:$0xff]  }
  0x54   : > { %v1148_v47 = vld [vmem:[%s1496_s10 + $0x64] ss:$8 sps:$4 sm:$0xff]   ;;  %v1150_v49 = vld [vmem:[%s1496_s10 + $0x60] ss:$8 sps:$4 sm:$0xff]   ;;  %v1151_v50 = vld [vmem:[%s1496_s10 + $0x74] ss:$8 sps:$4 sm:$0xff]  }
  0x55   : > { %v1180_v48 = vld [vmem:[%s428_s19 + $0x4] ss:$8 sps:$4 sm:$0xff]   ;;  %v1153_v51 = vld [vmem:[%s1496_s10 + $0x70] ss:$8 sps:$4 sm:$0xff]   ;;  %v1156_v53 = vld [vmem:[%s1496_s10 + $0x80] ss:$8 sps:$4 sm:$0xff]  }
  0x56   : > { %704 = vmatpush1.bf16.msra.mxu0 %v1135_v38  ;;  %733 = vmatprep.mubr.bf16.mxu0 %v1180_v48  ;;  %v1154_v52 = vld [vmem:[%s1496_s10 + $0x84] ss:$8 sps:$4 sm:$0xff]   ;;  %v1157_v54 = vld [vmem:[%s1496_s10 + $0x94] ss:$8 sps:$4 sm:$0xff]   ;;  %v1159_v55 = vld [vmem:[%s1496_s10 + $0x90] ss:$8 sps:$4 sm:$0xff]  }
  0x57   : > { %705 = vmatprep.subr.bf16.mxu0 %v1136_v39  ;;  %v1160_v56 = vld [vmem:[%s1496_s10 + $0xa4] ss:$8 sps:$4 sm:$0xff]   ;;  %v1162_v57 = vld [vmem:[%s1496_s10 + $0xa0] ss:$8 sps:$4 sm:$0xff]   ;;  %v1163_v58 = vld [vmem:[%s1496_s10 + $0xb4] ss:$8 sps:$4 sm:$0xff]  }
  0x58   : > { %v1165_v59 = vld [vmem:[%s1496_s10 + $0xb0] ss:$8 sps:$4 sm:$0xff]   ;;  %v1166_v60 = vld [vmem:[%s1496_s10 + $0xc4] ss:$8 sps:$4 sm:$0xff]   ;;  %v1168_v61 = vld [vmem:[%s1496_s10 + $0xc0] ss:$8 sps:$4 sm:$0xff]  }
  0x59   : > { %v1169_v62 = vld [vmem:[%s1496_s10 + $0xd4] ss:$8 sps:$4 sm:$0xff]   ;;  %v1171_v63 = vld [vmem:[%s1496_s10 + $0xd0] ss:$8 sps:$4 sm:$0xff]   ;;  %v1172_v0 = vld [vmem:[%s1496_s10 + $0xe4] ss:$8 sps:$4 sm:$0xff]  }
  0x5a   : > { %706 = vmatpush1.bf16.msra.mxu0 %v1138_v40  ;;  %v1174_v1 = vld [vmem:[%s1496_s10 + $0xe0] ss:$8 sps:$4 sm:$0xff]   ;;  %v1175_v2 = vld [vmem:[%s1496_s10 + $0xf4] ss:$8 sps:$4 sm:$0xff]   ;;  %v1177_v3 = vld [vmem:[%s1496_s10 + $0xf0] ss:$8 sps:$4 sm:$0xff]  }
  0x5b   : > { %707 = vmatprep.subr.bf16.mxu0 %v1139_v41  ;;  %v1178_v4 = vld [vmem:[%s428_s19] ss:$8 sps:$4 sm:$0xff]   ;;  %p1028_p5 = scmp.ne.s32.totalorder %s1251_s21, 8 }
  0x5c   : > { %v493_v5 = vld [vmem:[#allocation2] sm:$0xff]  ;;  %v494_v6 = vld [vmem:[#allocation2 + $0x8] sm:$0xff]  ;;  %v495_v8 = vld [vmem:[#allocation2 + $0x10] sm:$0xff]  ;;  %v762_v17 = vlaneseq (!%p1028_p5) }
  0x5d   : > { %v496_v11 = vld [vmem:[#allocation2 + $0x18] sm:$0xff]  ;;  %v760_v19 = vld [vmem:[%s476_s6] sm:$0x3] (!%p1028_p5) }
  0x5e   : > { %708 = vmatpush1.bf16.msra.mxu0 %v1141_v42  ;;  %v763_v18 = vshrl.u32 (!%p1028_p5), %v762_v17, 7  ;;  %v776_v20 = vld [vmem:[%s481_s17] sm:$0x3] (!%p1028_p5) }
  0x5f   : > { %709 = vmatprep.subr.bf16.mxu0 %v1142_v43 }
  0x60   : > { %v764_v22 = vsub.s32 (!%p1028_p5), 0, %v763_v18  ;;  %v768_v23 = vsub.s32 (!%p1028_p5), 1, %v763_v18 }
  0x62   : > { %710 = vmatpush1.bf16.msra.mxu0 %v1144_v44  ;;  %v765_v27 = vrot.slane (!%p1028_p5), %v760_v19, %v764_v22  ;;  %v769_v28 = vrot.slane (!%p1028_p5), %v760_v19, %v768_v23  ;;  %v781_v29 = vrot.slane (!%p1028_p5), %v776_v20, %v764_v22  ;;  %v785_v30 = vrot.slane (!%p1028_p5), %v776_v20, %v768_v23 }
  0x63   : > { %711 = vmatprep.subr.bf16.mxu0 %v1145_v45 }
  0x66   : > { %712 = vmatpush1.bf16.msra.mxu0 %v1147_v46 }
  0x67   : > { %713 = vmatprep.subr.bf16.mxu0 %v1148_v47 }
  0x6a   : > { %714 = vmatpush1.bf16.msra.mxu0 %v1150_v49 }
  0x6b   : > { %715 = vmatprep.subr.bf16.mxu0 %v1151_v50 }
  0x6e   : > { %716 = vmatpush1.bf16.msra.mxu0 %v1153_v51 }
  0x6f   : > { %717 = vmatprep.subr.bf16.mxu0 %v1154_v52 }
  0x72   : > { %718 = vmatpush1.bf16.msra.mxu0 %v1156_v53 }
  0x73   : > { %719 = vmatprep.subr.bf16.mxu0 %v1157_v54 }
  0x76   : > { %720 = vmatpush1.bf16.msra.mxu0 %v1159_v55 }
  0x77   : > { %721 = vmatprep.subr.bf16.mxu0 %v1160_v56 }
  0x7a   : > { %722 = vmatpush1.bf16.msra.mxu0 %v1162_v57 }
  0x7b   : > { %723 = vmatprep.subr.bf16.mxu0 %v1163_v58 }
  0x7e   : > { %724 = vmatpush1.bf16.msra.mxu0 %v1165_v59 }
  0x7f   : > { %725 = vmatprep.subr.bf16.mxu0 %v1166_v60 }
  0x82   : > { %726 = vmatpush1.bf16.msra.mxu0 %v1168_v61 }
  0x83   : > { %727 = vmatprep.subr.bf16.mxu0 %v1169_v62 }
  0x86   : > { %728 = vmatpush1.bf16.msra.mxu0 %v1171_v63 }
  0x87   : > { %729 = vmatprep.subr.bf16.mxu0 %v1172_v0 }
  0x8a   : > { %730 = vmatpush1.bf16.msra.mxu0 %v1174_v1 }
  0x8b   : > { %731 = vmatprep.subr.bf16.mxu0 %v1175_v2 }
  0x8e   : > { %732 = vmatpush1.bf16.msra.mxu0 %v1177_v3 }
  0x91   : > { %734 = vmatmul.mubr.bf16.vlgmr.msra.gmra.mrb[0].mxu0 %v1178_v4 }
 0x164   : > { %v735_v7 = vpop.f32.mrb[0].mxu0  ;;  %755 = sbr.rel (%p1028_p5) target bundleno = 379 (0x17b), region = 120 }
 0x165   : > { %v744_v9 = vadd.f32 %v735_v7, %v493_v5  ;;  %v737_v10 = vpop.f32.mrb[1].mxu0 }
 0x166   : > { %v745_v12 = vadd.f32 %v737_v10, %v494_v6  ;;  %v739_v13 = vpop.f32.mrb[2].mxu0 }
 0x167   : > { %748 = vst [vmem:[#allocation2] sm:$0xff] %v744_v9  ;;  %v746_v14 = vadd.f32 %v739_v13, %v495_v8  ;;  %v741_v15 = vpop.f32.mrb[3].mxu0 }
 0x168   : > { %749 = vst [vmem:[#allocation2 + $0x8] sm:$0xff] %v745_v12  ;;  %v747_v16 = vadd.f32 %v741_v15, %v496_v11 }
 0x169   : > { %750 = vst [vmem:[#allocation2 + $0x10] sm:$0xff] %v746_v14 }
 0x16a   : > { %751 = vst [vmem:[#allocation2 + $0x18] sm:$0xff] %v747_v16 }
 0x16e   : > { %v756_v21 = vld [vmem:[#allocation2] sm:$0xff] }
 0x16f   : > { %v757_v24 = vld [vmem:[#allocation2 + $0x8] sm:$0xff]  ;;  %v772_v31 = vmul.f32 %v765_v27, %v756_v21 }
 0x170   : > { %v758_v25 = vld [vmem:[#allocation2 + $0x10] sm:$0xff]  ;;  %v773_v32 = vmul.f32 %v769_v28, %v757_v24 }
 0x171   : > { %v759_v26 = vld [vmem:[#allocation2 + $0x18] sm:$0xff]  ;;  %v774_v33 = vmul.f32 %v765_v27, %v758_v25  ;;  %v788_v35 = vadd.f32 %v781_v29, %v772_v31 }
 0x172   : > { %v775_v34 = vmul.f32 %v769_v28, %v759_v26  ;;  %v789_v36 = vadd.f32 %v785_v30, %v773_v32 }
 0x173   : > { %v790_v37 = vadd.f32 %v781_v29, %v774_v33  ;;  %v792_v39 = vmax.f32 %v788_v35, 0.0 }
 0x174   : > { %v791_v38 = vadd.f32 %v785_v30, %v775_v34  ;;  %v793_v40 = vmax.f32 %v789_v36, 0.0 }
 0x175   : > { %v794_v41 = vmax.f32 %v790_v37, 0.0 }
 0x176   : > { %v795_v42 = vmax.f32 %v791_v38, 0.0  ;;  %v1038_v43 = vpack.c.bf16 %v793_v40, %v792_v39 }
 0x178   : > { %v1039_v44 = vpack.c.bf16 %v795_v42, %v794_v41  ;;  %808 = vst [vmem:[%s1498_s20] sm:$0xff] %v1038_v43 }
 0x17a   : > { %809 = vst [vmem:[%s1498_s20 + $0x8] sm:$0xff] %v1039_v44 }
 0x17b PF: > { %816 = sbr.rel (!%p1389_p12) target bundleno = 387 (0x183), region = 124  ;;  %s1040_s21 = sshll.u32 (%p1389_p12), %s1255_s22, 3 }
 0x17c   : > { %s822_s26 = scalar_lea.vmem (%p1389_p12), %s1595_s4, %s1040_s21 }
 0x17f   : > { %v852_v45 = vld [vmem:[%s1498_s20] sm:$0xff] (%p1389_p12) }
 0x180   : > { %853 = vst [vmem:[%s822_s26] sm:$0xff] (%p1389_p12), %v852_v45 }
 0x181   : > { %v854_v46 = vld [vmem:[%s1498_s20 + $0x8] sm:$0xff] (%p1389_p12) }
 0x182   : > { %855 = vst [vmem:[%s822_s26 + $0x10] sm:$0xff] %v854_v46 }
 0x183 PF: > { %s14_s25 = sadd.s32 1, %s1267_s25   ;;  %s1606_s19 = sld [smem:[#allocation6_spill]] }
 0x184   : > { %p11_p6 = scmp.ge.s32.totalorder %s14_s25, 20   ;;  %s1607_s20 = sld [smem:[#allocation9_spill]] }
 0x185   : > { %s1608_s14 = sld [smem:[#allocation7_spill]]  ;;  %s1609_s5 = sld [smem:[#allocation8_spill]] }
 0x186   : > { %s1610_s15 = smov %s1231_s16  ;;  %s1611_s16 = smov %s1387_s13 }
 0x187   : > { %s1612_s17 = smov %s1239_s18  ;;  %s1613_s18 = smov %s1384_s12 }
 0x188   : > { %s1614_s21 = smov %s1259_s23  ;;  %s1615_s22 = smov %s1263_s24 }
 0x189   :  { %13 = sbr.rel (!%p11_p6) target bundleno = 6 (0x6), region = 207 }
 0x18b   : > { %s1616_s23 = smov %s1608_s14  ;;  %s1617_s24 = smov %s1609_s5 }

// kernel: resnet_forward.33
= control target key start
LH: loop header
LB: loop body
LE: loop exit
PB: predicated region body
PF: predicated region fallthrough
CT: control target
= control target key end

     0   :  { %v289_v1 = vmov 0   ;;  %v194_v18 = vlaneseq  ;;  %s378_s1 = inlined_call_operand.vmem [shape: bf16[128,256], index: 1, kind: input, shape index: {}]   ;;  %s379_s0 = inlined_call_operand.vmem [shape: bf16[16,128], index: 0, kind: input, shape index: {}]   ;;  %s380_s2 = inlined_call_operand.vmem [shape: f32[1,256], index: 2, kind: input, shape index: {}]   ;;  %s381_s3 = inlined_call_operand.vmem [shape: f32[1,256], index: 3, kind: input, shape index: {}]   ;;  %s382_s4 = inlined_call_operand.vmem [shape: bf16[16,256], index: 4, kind: output, shape index: {}]  }
   0x1   :  { %v264_v0 = vld [vmem:[%s378_s1 + $0x4] ss:$8 sps:$4 sm:$0xff]   ;;  %166 = vmatprep.mubr.bf16.mxu0 %v289_v1  ;;  %v266_v2 = vld [vmem:[%s378_s1] ss:$8 sps:$4 sm:$0xff]   ;;  %v267_v3 = vld [vmem:[%s378_s1 + $0x14] ss:$8 sps:$4 sm:$0xff]  }
   0x2   :  { %134 = vmatprep.subr.bf16.mxu0 %v264_v0  ;;  %v269_v4 = vld [vmem:[%s378_s1 + $0x10] ss:$8 sps:$4 sm:$0xff]   ;;  %v270_v5 = vld [vmem:[%s378_s1 + $0x24] ss:$8 sps:$4 sm:$0xff]   ;;  %v272_v6 = vld [vmem:[%s378_s1 + $0x20] ss:$8 sps:$4 sm:$0xff]  }
   0x3   :  { %135 = vmatpush1.bf16.msra.mxu0 %v266_v2  ;;  %v273_v7 = vld [vmem:[%s378_s1 + $0x34] ss:$8 sps:$4 sm:$0xff]   ;;  %v275_v8 = vld [vmem:[%s378_s1 + $0x30] ss:$8 sps:$4 sm:$0xff]   ;;  %v276_v9 = vld [vmem:[%s378_s1 + $0x44] ss:$8 sps:$4 sm:$0xff]  }
   0x4   :  { %136 = vmatprep.subr.bf16.mxu0 %v267_v3  ;;  %v278_v10 = vld [vmem:[%s378_s1 + $0x40] ss:$8 sps:$4 sm:$0xff]   ;;  %v279_v11 = vld [vmem:[%s378_s1 + $0x54] ss:$8 sps:$4 sm:$0xff]   ;;  %v281_v12 = vld [vmem:[%s378_s1 + $0x50] ss:$8 sps:$4 sm:$0xff]  }
   0x5   :  { %v282_v13 = vld [vmem:[%s378_s1 + $0x64] ss:$8 sps:$4 sm:$0xff]   ;;  %v284_v14 = vld [vmem:[%s378_s1 + $0x60] ss:$8 sps:$4 sm:$0xff]   ;;  %v285_v15 = vld [vmem:[%s378_s1 + $0x74] ss:$8 sps:$4 sm:$0xff]  }
   0x6   :  { %v287_v16 = vld [vmem:[%s378_s1 + $0x70] ss:$8 sps:$4 sm:$0xff]   ;;  %v288_v17 = vld [vmem:[%s379_s0] sm:$0xff]   ;;  %v195_v19 = vshrl.u32 %v194_v18, 7 }
   0x7   :  { %137 = vmatpush1.bf16.msra.mxu0 %v269_v4  ;;  %v192_v21 = vld [vmem:[%s380_s2] sm:$0x3] }
   0x8   :  { %138 = vmatprep.subr.bf16.mxu0 %v270_v5  ;;  %v196_v20 = vsub.s32 0, %v195_v19  ;;  %v200_v22 = vsub.s32 1, %v195_v19  ;;  %v208_v23 = vld [vmem:[%s381_s3] sm:$0x3] }
   0xa   :  { %v197_v24 = vrot.slane %v192_v21, %v196_v20  ;;  %v201_v25 = vrot.slane %v192_v21, %v200_v22  ;;  %v213_v26 = vrot.slane %v208_v23, %v196_v20  ;;  %v217_v28 = vrot.slane %v208_v23, %v200_v22 }
   0xb   :  { %139 = vmatpush1.bf16.msra.mxu0 %v272_v6 }
   0xc   :  { %140 = vmatprep.subr.bf16.mxu0 %v273_v7 }
   0xf   :  { %141 = vmatpush1.bf16.msra.mxu0 %v275_v8 }
  0x10   :  { %142 = vmatprep.subr.bf16.mxu0 %v276_v9 }
  0x13   :  { %143 = vmatpush1.bf16.msra.mxu0 %v278_v10 }
  0x14   :  { %144 = vmatprep.subr.bf16.mxu0 %v279_v11 }
  0x17   :  { %145 = vmatpush1.bf16.msra.mxu0 %v281_v12 }
  0x18   :  { %146 = vmatprep.subr.bf16.mxu0 %v282_v13 }
  0x1b   :  { %147 = vmatpush1.bf16.msra.mxu0 %v284_v14 }
  0x1c   :  { %148 = vmatprep.subr.bf16.mxu0 %v285_v15 }
  0x1f   :  { %149 = vmatpush1.bf16.msra.mxu0 %v287_v16 }
  0x22   :  { %167 = vmatmul.mubr.bf16.vlgmr.msra.gmra.mrb[0].mxu0 %v288_v17 }
  0xf5   :  { %v168_v27 = vpop.f32.mrb[0].mxu0 }
  0xf6   :  { %v204_v29 = vmul.f32 %v197_v24, %v168_v27  ;;  %v170_v30 = vpop.f32.mrb[1].mxu0 }
  0xf7   :  { %v205_v31 = vmul.f32 %v201_v25, %v170_v30  ;;  %v172_v32 = vpop.f32.mrb[2].mxu0 }
  0xf8   :  { %v220_v33 = vadd.f32 %v213_v26, %v204_v29  ;;  %v206_v34 = vmul.f32 %v197_v24, %v172_v32  ;;  %v174_v35 = vpop.f32.mrb[3].mxu0 }
  0xf9   :  { %v221_v36 = vadd.f32 %v217_v28, %v205_v31  ;;  %v207_v37 = vmul.f32 %v201_v25, %v174_v35 }
  0xfa   :  { %v222_v38 = vadd.f32 %v213_v26, %v206_v34 }
  0xfb   :  { %v261_v39 = vpack.c.bf16 %v221_v36, %v220_v33  ;;  %v223_v40 = vadd.f32 %v217_v28, %v207_v37 }
  0xfd   :  { %236 = vst [vmem:[%s382_s4] sm:$0xff] %v261_v39  ;;  %v262_v41 = vpack.c.bf16 %v223_v40, %v222_v38 }
  0xff   :  { %237 = vst [vmem:[%s382_s4 + $0x8] sm:$0xff] %v262_v41 }

// kernel: resnet_forward.35
= control target key start
LH: loop header
LB: loop body
LE: loop exit
PB: predicated region body
PF: predicated region fallthrough
CT: control target
= control target key end

     0   :  { %s1138_s18 = smov 0   ;;  %s1140_s19 = smov 0   ;;  %s1264_s0 = inlined_call_operand.vmem [shape: bf16[16,2304], index: 0, kind: input, shape index: {}]   ;;  %s1265_s1 = inlined_call_operand.vmem [shape: bf16[2304,256], index: 1, kind: input, shape index: {}]   ;;  %s1266_s2 = inlined_call_operand.vmem [shape: f32[1,256], index: 2, kind: input, shape index: {}]   ;;  %s1267_s3 = inlined_call_operand.vmem [shape: f32[1,256], index: 3, kind: input, shape index: {}]   ;;  %s1268_s4 = inlined_call_operand.vmem [shape: bf16[16,256], index: 4, kind: input, shape index: {}]   ;;  %s1269_s5 = inlined_call_operand.vmem [shape: bf16[16,256], index: 5, kind: output, shape index: {}]  }
   0x1   :  { %s1142_s20 = smov 0   ;;  %s1144_s21 = smov 0  }
   0x2   :  { %s1146_s22 = smov 0  }
   0x3 LB: > { %s27_s23 = sadd.s32 1, %s1101_s21  ;;  %p50_p1 = scmp.ne.s32.totalorder %s1093_s19, %s1089_s18  ;;  %s1105_s22 = sphi %s1146_s22, %s15_s22   ;;  %s1101_s21 = sphi %s1144_s21, %s1273_s21   ;;  %s1097_s20 = sphi %s1142_s20, %s1272_s20   ;;  %s1093_s19 = sphi %s1140_s19, %s1271_s19   ;;  %s1089_s18 = sphi %s1138_s18, %s1270_s18  }
   0x4   : > { %p28_p0 = scmp.ge.s32.totalorder %s27_s23, 9  ;;  %p51_p2 = scmp.eq.s32.totalorder %s1105_s22, 0 }
   0x5   : > { %s43_s25 = sadd.s32 1, %s1093_s19  ;;  %p920_p5 = scmp.ge.s32.totalorder %s1105_s22, 9 }
   0x6   : > { %s1275_s23 = smov (%p28_p0, %s27_s23), 0  ;;  %p52_p3 = por %p51_p2, %p50_p1 }
   0x7   : > { %s39_s24 = ssub.s32 %s1101_s21, %s1275_s23  ;;  %243 = sbr.rel (%p920_p5) target bundleno = 21 (0x15), region = 28 }
   0x8   : > { %p41_p4 = scmp.eq.s32.totalorder %s39_s24, 0 }
   0xa   : > { %s1173_s26 = scalar_select %p41_p4, %s1093_s19, %s43_s25  }
   0xe   : > { %246 = sbr.rel (!%p52_p3) target bundleno = 21 (0x15), region = 32  ;;  %s248_s27 = sand.u32 (%p52_p3), 1, %s1093_s19  }
   0xf   : > { %s971_s28 = sshll.u32 (%p52_p3), %s1101_s21, 3  ;;  %s921_s29 = sshll.u32 (%p52_p3), %s248_s27, 4 }
  0x10   : > { %s256_s7 = scalar_lea.vmem (%p52_p3), %s1264_s0, %s971_s28  ;;  %s250_s8 = scalar_lea.vmem (%p52_p3), [#allocation3], %s921_s29 }
  0x11   : > { %v286_v0 = vld [vmem:[%s256_s7] sm:$0xff] (%p52_p3)  ;;  %v288_v1 = vld [vmem:[%s256_s7 + $0x48] sm:$0xff] (%p52_p3) }
  0x12   : > { %287 = vst [vmem:[%s250_s8] sm:$0xff] (%p52_p3), %v286_v0  ;;  %289 = vst [vmem:[%s250_s8 + $0x8] sm:$0xff] (%p52_p3), %v288_v1 }
  0x15 PF: > { %p924_p6 = scmp.ge.s32.totalorder %s1105_s22, 1  ;;  %p309_p7 = scmp.lt.s32.totalorder %s1105_s22, 10 }
  0x17   : > { %p310_p8 = pnand %p924_p6, %p309_p7 }
  0x18   : > { %s316_s9 = sand.u32 (!%p310_p8), 1, %s1089_s18   ;;  %s926_s10 = sshll.u32 (!%p310_p8), %s1097_s20, 5 }
  0x19   : > { %313 = sbr.rel (%p310_p8) target bundleno = 340 (0x154), region = 74  ;;  %s1185_s11 = sshll.u32 (!%p310_p8), %s316_s9, 4 }
  0x1a   : > { %p380_p9 = scmp.lt.s32.totalorder (!%p310_p8), %s926_s10, 287  ;;  %s318_s16 = scalar_lea.vmem (!%p310_p8), [#allocation3], %s1185_s11 }
  0x1b   : > { %p929_p10 = scmp.ne.s32.totalorder (!%p310_p8), %s1097_s20, 0 }
  0x20   : > { %s1277_s10 = smov (!%p380_p9, %s926_s10), 287  ;;  %427 = sbr.rel (%p929_p10) target bundleno = 39 (0x27), region = 82 }
  0x21   : > { %s972_s12 = sshll.u32 %s1277_s10, 3  ;;  %v1107_v2 = vmov (!%p929_p10), 0.0  }
  0x22   : > { %s1190_s15 = scalar_lea.vmem %s1265_s1, %s972_s12  ;;  %428 = vst [vmem:[#allocation2] sm:$0xff] (!%p929_p10), %v1107_v2  ;;  %429 = vst [vmem:[#allocation2 + $0x8] sm:$0xff] (!%p929_p10), %v1107_v2 }
  0x23   : > { %430 = vst [vmem:[#allocation2 + $0x10] sm:$0xff] (!%p929_p10), %v1107_v2  ;;  %431 = vst [vmem:[#allocation2 + $0x18] sm:$0xff] (!%p929_p10), %v1107_v2 }
  0x27 PF: > { %v1016_v3 = vld [vmem:[%s1190_s15 + $0x4] ss:$8 sps:$4 sm:$0xff]   ;;  %v1018_v4 = vld [vmem:[%s1190_s15] ss:$8 sps:$4 sm:$0xff]   ;;  %v1019_v5 = vld [vmem:[%s1190_s15 + $0x14] ss:$8 sps:$4 sm:$0xff]  }
  0x28   : > { %640 = vmatprep.subr.bf16.mxu0 %v1016_v3  ;;  %v1021_v6 = vld [vmem:[%s1190_s15 + $0x10] ss:$8 sps:$4 sm:$0xff]   ;;  %v1022_v7 = vld [vmem:[%s1190_s15 + $0x24] ss:$8 sps:$4 sm:$0xff]   ;;  %v1024_v8 = vld [vmem:[%s1190_s15 + $0x20] ss:$8 sps:$4 sm:$0xff]  }
  0x29   : > { %641 = vmatpush1.bf16.msra.mxu0 %v1018_v4  ;;  %v1025_v9 = vld [vmem:[%s1190_s15 + $0x34] ss:$8 sps:$4 sm:$0xff]   ;;  %v1027_v10 = vld [vmem:[%s1190_s15 + $0x30] ss:$8 sps:$4 sm:$0xff]   ;;  %v1028_v11 = vld [vmem:[%s1190_s15 + $0x44] ss:$8 sps:$4 sm:$0xff]  }
  0x2a   : > { %642 = vmatprep.subr.bf16.mxu0 %v1019_v5  ;;  %v1030_v12 = vld [vmem:[%s1190_s15 + $0x40] ss:$8 sps:$4 sm:$0xff]   ;;  %v1031_v13 = vld [vmem:[%s1190_s15 + $0x54] ss:$8 sps:$4 sm:$0xff]   ;;  %v1033_v14 = vld [vmem:[%s1190_s15 + $0x50] ss:$8 sps:$4 sm:$0xff]  }
  0x2b   : > { %v1034_v15 = vld [vmem:[%s1190_s15 + $0x64] ss:$8 sps:$4 sm:$0xff]   ;;  %v1036_v17 = vld [vmem:[%s1190_s15 + $0x60] ss:$8 sps:$4 sm:$0xff]   ;;  %v1037_v18 = vld [vmem:[%s1190_s15 + $0x74] ss:$8 sps:$4 sm:$0xff]  }
  0x2c   : > { %v1066_v16 = vld [vmem:[%s318_s16 + $0x4] ss:$8 sps:$4 sm:$0xff]   ;;  %v1039_v19 = vld [vmem:[%s1190_s15 + $0x70] ss:$8 sps:$4 sm:$0xff]   ;;  %v1042_v21 = vld [vmem:[%s1190_s15 + $0x80] ss:$8 sps:$4 sm:$0xff]  }
  0x2d   : > { %643 = vmatpush1.bf16.msra.mxu0 %v1021_v6  ;;  %672 = vmatprep.mubr.bf16.mxu0 %v1066_v16  ;;  %v1040_v20 = vld [vmem:[%s1190_s15 + $0x84] ss:$8 sps:$4 sm:$0xff]   ;;  %v1043_v22 = vld [vmem:[%s1190_s15 + $0x94] ss:$8 sps:$4 sm:$0xff]   ;;  %v1045_v23 = vld [vmem:[%s1190_s15 + $0x90] ss:$8 sps:$4 sm:$0xff]  }
  0x2e   : > { %644 = vmatprep.subr.bf16.mxu0 %v1022_v7  ;;  %v1046_v24 = vld [vmem:[%s1190_s15 + $0xa4] ss:$8 sps:$4 sm:$0xff]   ;;  %v1048_v25 = vld [vmem:[%s1190_s15 + $0xa0] ss:$8 sps:$4 sm:$0xff]   ;;  %v1049_v26 = vld [vmem:[%s1190_s15 + $0xb4] ss:$8 sps:$4 sm:$0xff]  }
  0x2f   : > { %v1051_v27 = vld [vmem:[%s1190_s15 + $0xb0] ss:$8 sps:$4 sm:$0xff]   ;;  %v1052_v28 = vld [vmem:[%s1190_s15 + $0xc4] ss:$8 sps:$4 sm:$0xff]   ;;  %v1054_v29 = vld [vmem:[%s1190_s15 + $0xc0] ss:$8 sps:$4 sm:$0xff]  }
  0x30   : > { %v1055_v30 = vld [vmem:[%s1190_s15 + $0xd4] ss:$8 sps:$4 sm:$0xff]   ;;  %v1057_v31 = vld [vmem:[%s1190_s15 + $0xd0] ss:$8 sps:$4 sm:$0xff]   ;;  %v1058_v32 = vld [vmem:[%s1190_s15 + $0xe4] ss:$8 sps:$4 sm:$0xff]  }
  0x31   : > { %645 = vmatpush1.bf16.msra.mxu0 %v1024_v8  ;;  %v1060_v33 = vld [vmem:[%s1190_s15 + $0xe0] ss:$8 sps:$4 sm:$0xff]   ;;  %v1061_v34 = vld [vmem:[%s1190_s15 + $0xf4] ss:$8 sps:$4 sm:$0xff]   ;;  %v1063_v35 = vld [vmem:[%s1190_s15 + $0xf0] ss:$8 sps:$4 sm:$0xff]  }
  0x32   : > { %646 = vmatprep.subr.bf16.mxu0 %v1025_v9  ;;  %v1064_v36 = vld [vmem:[%s318_s16] ss:$8 sps:$4 sm:$0xff]   ;;  %p964_p11 = scmp.ne.s32.totalorder %s1097_s20, 8 }
  0x33   : > { %v432_v37 = vld [vmem:[#allocation2] sm:$0xff]  ;;  %v433_v38 = vld [vmem:[#allocation2 + $0x8] sm:$0xff]  ;;  %v434_v40 = vld [vmem:[#allocation2 + $0x10] sm:$0xff]  ;;  %v701_v49 = vlaneseq (!%p964_p11) }
  0x34   : > { %v435_v43 = vld [vmem:[#allocation2 + $0x18] sm:$0xff]  ;;  %v699_v51 = vld [vmem:[%s1266_s2] sm:$0x3] (!%p964_p11)  ;;  %v732_v57 = vld [vmem:[%s1268_s4 + $0x8] sm:$0xff] (!%p964_p11) }
  0x35   : > { %647 = vmatpush1.bf16.msra.mxu0 %v1027_v10  ;;  %v702_v50 = vshrl.u32 (!%p964_p11), %v701_v49, 7  ;;  %v715_v52 = vld [vmem:[%s1267_s3] sm:$0x3] (!%p964_p11)  ;;  %v735_v3 = vunpack.c.l.bf16 (!%p964_p11), %v732_v57  ;;  %v736_v4 = vunpack.c.h.bf16 (!%p964_p11), %v732_v57 }
  0x36   : > { %648 = vmatprep.subr.bf16.mxu0 %v1028_v11  ;;  %v731_v56 = vld [vmem:[%s1268_s4] sm:$0xff] (!%p964_p11) }
  0x37   : > { %v703_v54 = vsub.s32 (!%p964_p11), 0, %v702_v50  ;;  %v707_v55 = vsub.s32 (!%p964_p11), 1, %v702_v50  ;;  %v733_v1 = vunpack.c.l.bf16 (!%p964_p11), %v731_v56  ;;  %v734_v2 = vunpack.c.h.bf16 (!%p964_p11), %v731_v56 }
  0x39   : > { %649 = vmatpush1.bf16.msra.mxu0 %v1030_v12  ;;  %v704_v61 = vrot.slane (!%p964_p11), %v699_v51, %v703_v54  ;;  %v708_v62 = vrot.slane (!%p964_p11), %v699_v51, %v707_v55  ;;  %v720_v63 = vrot.slane (!%p964_p11), %v715_v52, %v703_v54  ;;  %v724_v0 = vrot.slane (!%p964_p11), %v715_v52, %v707_v55 }
  0x3a   : > { %650 = vmatprep.subr.bf16.mxu0 %v1031_v13 }
  0x3d   : > { %651 = vmatpush1.bf16.msra.mxu0 %v1033_v14 }
  0x3e   : > { %652 = vmatprep.subr.bf16.mxu0 %v1034_v15 }
  0x41   : > { %653 = vmatpush1.bf16.msra.mxu0 %v1036_v17 }
  0x42   : > { %654 = vmatprep.subr.bf16.mxu0 %v1037_v18 }
  0x45   : > { %655 = vmatpush1.bf16.msra.mxu0 %v1039_v19 }
  0x46   : > { %656 = vmatprep.subr.bf16.mxu0 %v1040_v20 }
  0x49   : > { %657 = vmatpush1.bf16.msra.mxu0 %v1042_v21 }
  0x4a   : > { %658 = vmatprep.subr.bf16.mxu0 %v1043_v22 }
  0x4d   : > { %659 = vmatpush1.bf16.msra.mxu0 %v1045_v23 }
  0x4e   : > { %660 = vmatprep.subr.bf16.mxu0 %v1046_v24 }
  0x51   : > { %661 = vmatpush1.bf16.msra.mxu0 %v1048_v25 }
  0x52   : > { %662 = vmatprep.subr.bf16.mxu0 %v1049_v26 }
  0x55   : > { %663 = vmatpush1.bf16.msra.mxu0 %v1051_v27 }
  0x56   : > { %664 = vmatprep.subr.bf16.mxu0 %v1052_v28 }
  0x59   : > { %665 = vmatpush1.bf16.msra.mxu0 %v1054_v29 }
  0x5a   : > { %666 = vmatprep.subr.bf16.mxu0 %v1055_v30 }
  0x5d   : > { %667 = vmatpush1.bf16.msra.mxu0 %v1057_v31 }
  0x5e   : > { %668 = vmatprep.subr.bf16.mxu0 %v1058_v32 }
  0x61   : > { %669 = vmatpush1.bf16.msra.mxu0 %v1060_v33 }
  0x62   : > { %670 = vmatprep.subr.bf16.mxu0 %v1061_v34 }
  0x65   : > { %671 = vmatpush1.bf16.msra.mxu0 %v1063_v35 }
  0x68   : > { %673 = vmatmul.mubr.bf16.vlgmr.msra.gmra.mrb[0].mxu0 %v1064_v36 }
 0x13b   : > { %v674_v39 = vpop.f32.mrb[0].mxu0  ;;  %694 = sbr.rel (%p964_p11) target bundleno = 340 (0x154), region = 86 }
 0x13c   : > { %v683_v41 = vadd.f32 %v674_v39, %v432_v37  ;;  %v676_v42 = vpop.f32.mrb[1].mxu0 }
 0x13d   : > { %v684_v44 = vadd.f32 %v676_v42, %v433_v38  ;;  %v678_v45 = vpop.f32.mrb[2].mxu0 }
 0x13e   : > { %687 = vst [vmem:[#allocation2] sm:$0xff] %v683_v41  ;;  %v685_v46 = vadd.f32 %v678_v45, %v434_v40  ;;  %v680_v47 = vpop.f32.mrb[3].mxu0 }
 0x13f   : > { %688 = vst [vmem:[#allocation2 + $0x8] sm:$0xff] %v684_v44  ;;  %v686_v48 = vadd.f32 %v680_v47, %v435_v43 }
 0x140   : > { %689 = vst [vmem:[#allocation2 + $0x10] sm:$0xff] %v685_v46 }
 0x141   : > { %690 = vst [vmem:[#allocation2 + $0x18] sm:$0xff] %v686_v48 }
 0x145   : > { %v695_v53 = vld [vmem:[#allocation2] sm:$0xff] }
 0x146   : > { %v696_v58 = vld [vmem:[#allocation2 + $0x8] sm:$0xff]  ;;  %v711_v5 = vmul.f32 %v704_v61, %v695_v53 }
 0x147   : > { %v697_v59 = vld [vmem:[#allocation2 + $0x10] sm:$0xff]  ;;  %v712_v6 = vmul.f32 %v708_v62, %v696_v58 }
 0x148   : > { %v698_v60 = vld [vmem:[#allocation2 + $0x18] sm:$0xff]  ;;  %v713_v7 = vmul.f32 %v704_v61, %v697_v59  ;;  %v727_v9 = vadd.f32 %v720_v63, %v711_v5 }
 0x149   : > { %v714_v8 = vmul.f32 %v708_v62, %v698_v60  ;;  %v728_v10 = vadd.f32 %v724_v0, %v712_v6 }
 0x14a   : > { %v729_v11 = vadd.f32 %v720_v63, %v713_v7  ;;  %v737_v13 = vadd.f32 %v733_v1, %v727_v9 }
 0x14b   : > { %v730_v12 = vadd.f32 %v724_v0, %v714_v8  ;;  %v738_v14 = vadd.f32 %v734_v2, %v728_v10 }
 0x14c   : > { %v739_v15 = vadd.f32 %v735_v3, %v729_v11  ;;  %v741_v17 = vmax.f32 %v737_v13, 0.0 }
 0x14d   : > { %v740_v16 = vadd.f32 %v736_v4, %v730_v12  ;;  %v742_v18 = vmax.f32 %v738_v14, 0.0 }
 0x14e   : > { %v743_v19 = vmax.f32 %v739_v15, 0.0 }
 0x14f   : > { %v744_v20 = vmax.f32 %v740_v16, 0.0  ;;  %v973_v21 = vpack.c.bf16 %v742_v18, %v741_v17 }
 0x151   : > { %v974_v22 = vpack.c.bf16 %v744_v20, %v743_v19  ;;  %757 = vst [vmem:[%s1269_s5] sm:$0xff] %v973_v21 }
 0x153   : > { %758 = vst [vmem:[%s1269_s5 + $0x8] sm:$0xff] %v974_v22 }
 0x154 PF: > { %s15_s22 = sadd.s32 1, %s1105_s22   ;;  %s1270_s18 = smov %s1093_s19 }
 0x155   : > { %p12_p12 = scmp.ge.s32.totalorder %s15_s22, 11   ;;  %s1271_s19 = smov %s1173_s26 }
 0x156   : > { %s1272_s20 = smov %s1101_s21  ;;  %s1273_s21 = smov %s1275_s23 }
 0x157   :  { %14 = sbr.rel (!%p12_p12) target bundleno = 3 (0x3), region = 133 }

// kernel: resnet_forward.41
= control target key start
LH: loop header
LB: loop body
LE: loop exit
PB: predicated region body
PF: predicated region fallthrough
CT: control target
= control target key end

     0   :  { %s1295_s15 = smov 0   ;;  %s1297_s16 = smov 0   ;;  %s1591_s0 = inlined_call_operand.vmem [shape: bf16[16,4608], index: 0, kind: input, shape index: {}]   ;;  %s1592_s1 = inlined_call_operand.vmem [shape: bf16[4608,512], index: 1, kind: input, shape index: {}]   ;;  %s1593_s2 = inlined_call_operand.vmem [shape: f32[1,512], index: 2, kind: input, shape index: {}]   ;;  %s1594_s3 = inlined_call_operand.vmem [shape: f32[1,512], index: 3, kind: input, shape index: {}]   ;;  %s1595_s4 = inlined_call_operand.vmem [shape: bf16[16,512], index: 4, kind: output, shape index: {}]  }
   0x1   :  { %s1299_s17 = smov 0   ;;  %s1301_s18 = smov 0  }
   0x2   :  { %s1303_s19 = smov 0   ;;  %s1305_s20 = smov 0  }
   0x3   :  { %s1307_s21 = smov 0   ;;  %s1309_s22 = smov 0  }
   0x4   :  { %s1311_s23 = smov 0   ;;  %s1313_s24 = smov 0  }
   0x5   :  { %s1315_s25 = smov 0  }
   0x6 LB: > { %1599 = sst [smem:[#allocation6_spill]] %s1247_s20  ;;  %s975_s26 = sadd.s32 4294967295, %s1267_s25   ;;  %s1267_s25 = sphi %s1315_s25, %s14_s25   ;;  %s1263_s24 = sphi %s1313_s24, %s1617_s24   ;;  %s1259_s23 = sphi %s1311_s23, %s1616_s23   ;;  %s1255_s22 = sphi %s1309_s22, %s1615_s22   ;;  %s1251_s21 = sphi %s1307_s21, %s1614_s21   ;;  %s1247_s20 = sphi %s1305_s20, %s1607_s20   ;;  %s1243_s19 = sphi %s1303_s19, %s1606_s19   ;;  %s1239_s18 = sphi %s1301_s18, %s1613_s18   ;;  %s1235_s17 = sphi %s1299_s17, %s1612_s17   ;;  %s1231_s16 = sphi %s1297_s16, %s1611_s16   ;;  %s1227_s15 = sphi %s1295_s15, %s1610_s15  }
   0x7   : > { %s26_s27 = sadd.s32 1, %s1259_s23  ;;  %s29_s28 = sadd.s32 1, %s1263_s24 }
   0x8   : > { %p27_p0 = scmp.ge.s32.totalorder %s26_s27, 18  ;;  %s42_s29 = sadd.s32 1, %s1247_s20 }
   0x9   : > { %p49_p1 = scmp.ne.s32.totalorder %s1247_s20, %s1243_s19  ;;  %p50_p2 = scmp.eq.s32.totalorder %s1267_s25, 0 }
   0xa   : > { %s1619_s27 = smov (%p27_p0, %s26_s27), 0  ;;  %s1621_s28 = smov (!%p27_p0, %s29_s28), %s1263_s24 }
   0xb   : > { %1600 = sst [smem:[#allocation7_spill]] %s1619_s27  ;;  %s38_s30 = ssub.s32 %s1259_s23, %s1619_s27 }
   0xc   : > { %p31_p3 = scmp.ge.s32.totalorder %s1621_s28, 2  ;;  %p40_p4 = scmp.eq.s32.totalorder %s38_s30, 0 }
   0xd   : > { %p1362_p5 = por %p50_p2, %p49_p1  ;;  %s70_s6 = sadd.s32 1, %s1239_s18 }
   0xe   : > { %s1623_s28 = smov (%p31_p3, %s1621_s28), 0  ;;  %p77_p6 = scmp.ne.s32.totalorder %s1239_s18, %s1235_s17 }
   0xf   : > { %1602 = sst [smem:[#allocation8_spill]] %s1623_s28  ;;  %s66_s8 = ssub.s32 %s1263_s24, %s1623_s28 }
  0x10   : > { %s1370_s7 = scalar_select %p40_p4, %s1247_s20, %s42_s29  }
  0x11   : > { %s67_s9 = sor.u32 %s66_s8, %s38_s30  ;;  %p148_p7 = scmp.eq.s32.totalorder %s66_s8, 0 }
  0x12   : > { %1603 = sst [smem:[#allocation9_spill]] %s1370_s7  ;;  %p68_p8 = scmp.eq.s32.totalorder %s67_s9, 0 }
  0x13   : > { %p1376_p9 = por %p77_p6, %p50_p2  ;;  %s150_s11 = sadd.s32 1, %s1231_s16 }
  0x14   : > { %p160_p10 = scmp.ne.s32.totalorder %s1231_s16, %s1227_s15  ;;  %p161_p11 = scmp.eq.s32.totalorder %s975_s26, 35 }
  0x15   : > { %s1384_s12 = scalar_select %p68_p8, %s1239_s18, %s70_s6  }
  0x16   : > { %s1387_s13 = scalar_select %p148_p7, %s1231_s16, %s150_s11  }
  0x17   : > { %p1389_p12 = por %p161_p11, %p160_p10  ;;  %p978_p13 = scmp.ge.s32.totalorder %s1267_s25, 36 }
  0x19   : > { %183 = sbr.rel (%p978_p13) target bundleno = 62 (0x3e), region = 16 }
  0x20   : > { %186 = sbr.rel (!%p1362_p5) target bundleno = 39 (0x27), region = 20  ;;  %s188_s29 = sand.u32 (%p1362_p5), 1, %s1247_s20  }
  0x21   : > { %s1036_s30 = sshll.u32 (%p1362_p5), %s1259_s23, 3  ;;  %s979_s8 = sshll.u32 (%p1362_p5), %s188_s29, 4 }
  0x22   : > { %s196_s11 = scalar_lea.vmem (%p1362_p5), %s1591_s0, %s1036_s30  ;;  %s190_s26 = scalar_lea.vmem (%p1362_p5), [#allocation3], %s979_s8 }
  0x23   : > { %v226_v0 = vld [vmem:[%s196_s11] sm:$0xff] (%p1362_p5)  ;;  %v228_v1 = vld [vmem:[%s196_s11 + $0x90] sm:$0xff] (%p1362_p5) }
  0x24   : > { %227 = vst [vmem:[%s190_s26] sm:$0xff] (%p1362_p5), %v226_v0  ;;  %229 = vst [vmem:[%s190_s26 + $0x8] sm:$0xff] (%p1362_p5), %v228_v1 }
  0x27 PF: > { %235 = sbr.rel (!%p1376_p9) target bundleno = 62 (0x3e), region = 58  ;;  %s237_s5 = sand.u32 (%p1376_p9), 1, %s1239_s18  }
  0x28   : > { %s984_s28 = sshll.u32 (%p1376_p9), %s1263_s24, 1  ;;  %s982_s27 = sshll.u32 (%p1376_p9), %s237_s5, 8 }
  0x29   : > { %s1037_s29 = sshll.u32 (%p1376_p9), %s1259_s23, 7  ;;  %s1414_s10 = scalar_lea.vmem (%p1376_p9), [#allocation4], %s982_s27 }
  0x2a   : > { %s243_s7 = sadd.s32 (%p1376_p9), %s1037_s29, %s984_s28 }
  0x2b   : > { %s986_s20 = sshll.u32 (%p1376_p9), %s243_s7, 2 }
  0x2c   : > { %s1409_s9 = scalar_lea.vmem (%p1376_p9), %s1592_s1, %s986_s20 }
  0x2d   : > { %v335_v2 = vld [vmem:[%s1409_s9] sm:$0xff] (%p1376_p9)  ;;  %v337_v3 = vld [vmem:[%s1409_s9 + $0x10] sm:$0xff] (%p1376_p9) }
  0x2e   : > { %v339_v4 = vld [vmem:[%s1409_s9 + $0x20] sm:$0xff]  ;;  %336 = vst [vmem:[%s1414_s10] sm:$0xff] %v335_v2  ;;  %338 = vst [vmem:[%s1414_s10 + $0x8] sm:$0xff] %v337_v3  ;;  %v341_v5 = vld [vmem:[%s1409_s9 + $0x30] sm:$0xff] }
  0x2f   : > { %340 = vst [vmem:[%s1414_s10 + $0x10] sm:$0xff] %v339_v4  ;;  %v343_v6 = vld [vmem:[%s1409_s9 + $0x40] sm:$0xff]  ;;  %v345_v7 = vld [vmem:[%s1409_s9 + $0x50] sm:$0xff]  ;;  %342 = vst [vmem:[%s1414_s10 + $0x18] sm:$0xff] %v341_v5 }
  0x30   : > { %344 = vst [vmem:[%s1414_s10 + $0x20] sm:$0xff] %v343_v6  ;;  %346 = vst [vmem:[%s1414_s10 + $0x28] sm:$0xff] %v345_v7  ;;  %v347_v8 = vld [vmem:[%s1409_s9 + $0x60] sm:$0xff]  ;;  %v349_v9 = vld [vmem:[%s1409_s9 + $0x70] sm:$0xff] }
  0x31   : > { %v351_v10 = vld [vmem:[%s1409_s9 + $0x80] sm:$0xff]  ;;  %348 = vst [vmem:[%s1414_s10 + $0x30] sm:$0xff] %v347_v8  ;;  %350 = vst [vmem:[%s1414_s10 + $0x38] sm:$0xff] %v349_v9  ;;  %v353_v11 = vld [vmem:[%s1409_s9 + $0x90] sm:$0xff] }
  0x32   : > { %352 = vst [vmem:[%s1414_s10 + $0x40] sm:$0xff] %v351_v10  ;;  %v355_v12 = vld [vmem:[%s1409_s9 + $0xa0] sm:$0xff]  ;;  %v357_v13 = vld [vmem:[%s1409_s9 + $0xb0] sm:$0xff]  ;;  %354 = vst [vmem:[%s1414_s10 + $0x48] sm:$0xff] %v353_v11 }
  0x33   : > { %356 = vst [vmem:[%s1414_s10 + $0x50] sm:$0xff] %v355_v12  ;;  %358 = vst [vmem:[%s1414_s10 + $0x58] sm:$0xff] %v357_v13  ;;  %v359_v14 = vld [vmem:[%s1409_s9 + $0xc0] sm:$0xff]  ;;  %v361_v15 = vld [vmem:[%s1409_s9 + $0xd0] sm:$0xff] }
  0x34   : > { %v363_v16 = vld [vmem:[%s1409_s9 + $0xe0] sm:$0xff]  ;;  %360 = vst [vmem:[%s1414_s10 + $0x60] sm:$0xff] %v359_v14  ;;  %362 = vst [vmem:[%s1414_s10 + $0x68] sm:$0xff] %v361_v15  ;;  %v365_v17 = vld [vmem:[%s1409_s9 + $0xf0] sm:$0xff] }
  0x35   : > { %364 = vst [vmem:[%s1414_s10 + $0x70] sm:$0xff] %v363_v16  ;;  %v367_v18 = vld [vmem:[%s1409_s9 + $0x100] sm:$0xff]  ;;  %v369_v19 = vld [vmem:[%s1409_s9 + $0x110] sm:$0xff]  ;;  %366 = vst [vmem:[%s1414_s10 + $0x78] sm:$0xff] %v365_v17 }
  0x36   : > { %368 = vst [vmem:[%s1414_s10 + $0x80] sm:$0xff] %v367_v18  ;;  %370 = vst [vmem:[%s1414_s10 + $0x88] sm:$0xff] %v369_v19  ;;  %v371_v20 = vld [vmem:[%s1409_s9 + $0x120] sm:$0xff]  ;;  %v373_v21 = vld [vmem:[%s1409_s9 + $0x130] sm:$0xff] }
  0x37   : > { %v375_v22 = vld [vmem:[%s1409_s9 + $0x140] sm:$0xff]  ;;  %372 = vst [vmem:[%s1414_s10 + $0x90] sm:$0xff] %v371_v20  ;;  %374 = vst [vmem:[%s1414_s10 + $0x98] sm:$0xff] %v373_v21  ;;  %v377_v23 = vld [vmem:[%s1409_s9 + $0x150] sm:$0xff] }
  0x38   : > { %376 = vst [vmem:[%s1414_s10 + $0xa0] sm:$0xff] %v375_v22  ;;  %v379_v24 = vld [vmem:[%s1409_s9 + $0x160] sm:$0xff]  ;;  %v381_v25 = vld [vmem:[%s1409_s9 + $0x170] sm:$0xff]  ;;  %378 = vst [vmem:[%s1414_s10 + $0xa8] sm:$0xff] %v377_v23 }
  0x39   : > { %380 = vst [vmem:[%s1414_s10 + $0xb0] sm:$0xff] %v379_v24  ;;  %382 = vst [vmem:[%s1414_s10 + $0xb8] sm:$0xff] %v381_v25  ;;  %v383_v26 = vld [vmem:[%s1409_s9 + $0x180] sm:$0xff]  ;;  %v385_v27 = vld [vmem:[%s1409_s9 + $0x190] sm:$0xff] }
  0x3a   : > { %v387_v28 = vld [vmem:[%s1409_s9 + $0x1a0] sm:$0xff]  ;;  %384 = vst [vmem:[%s1414_s10 + $0xc0] sm:$0xff] %v383_v26  ;;  %386 = vst [vmem:[%s1414_s10 + $0xc8] sm:$0xff] %v385_v27  ;;  %v389_v29 = vld [vmem:[%s1409_s9 + $0x1b0] sm:$0xff] }
  0x3b   : > { %388 = vst [vmem:[%s1414_s10 + $0xd0] sm:$0xff] %v387_v28  ;;  %v391_v30 = vld [vmem:[%s1409_s9 + $0x1c0] sm:$0xff]  ;;  %v393_v31 = vld [vmem:[%s1409_s9 + $0x1d0] sm:$0xff]  ;;  %390 = vst [vmem:[%s1414_s10 + $0xd8] sm:$0xff] %v389_v29 }
  0x3c   : > { %392 = vst [vmem:[%s1414_s10 + $0xe0] sm:$0xff] %v391_v30  ;;  %394 = vst [vmem:[%s1414_s10 + $0xe8] sm:$0xff] %v393_v31  ;;  %v395_v32 = vld [vmem:[%s1409_s9 + $0x1e0] sm:$0xff]  ;;  %v397_v33 = vld [vmem:[%s1409_s9 + $0x1f0] sm:$0xff] }
  0x3d   : > { %396 = vst [vmem:[%s1414_s10 + $0xf0] sm:$0xff] %v395_v32  ;;  %398 = vst [vmem:[%s1414_s10 + $0xf8] sm:$0xff] %v397_v33 }
  0x3e PF: > { %p987_p0 = scmp.ge.s32.totalorder %s1267_s25, 1  ;;  %p419_p1 = scmp.lt.s32.totalorder %s1267_s25, 37 }
  0x40   : > { %p420_p2 = pnand %p987_p0, %p419_p1 }
  0x41   : > { %s426_s20 = sand.u32 (!%p420_p2), 1, %s1243_s19   ;;  %s433_s27 = sand.u32 (!%p420_p2), 1, %s1235_s17  }
  0x42   : > { %423 = sbr.rel (%p420_p2) target bundleno = 387 (0x183), region = 104  ;;  %s1481_s28 = sshll.u32 (!%p420_p2), %s426_s20, 4 }
  0x43   : > { %s989_s7 = sshll.u32 (!%p420_p2), %s433_s27, 8  ;;  %s466_s8 = sand.u32 (!%p420_p2), 1, %s1227_s15  }
  0x44   : > { %s991_s11 = sshll.u32 (!%p420_p2), %s1255_s22, 1  ;;  %s990_s26 = sshll.u32 (!%p420_p2), %s466_s8, 4 }
  0x45   : > { %p474_p3 = scmp.lt.s32.totalorder (!%p420_p2), %s991_s11, 3  ;;  %s428_s19 = scalar_lea.vmem (!%p420_p2), [#allocation3], %s1481_s28 }
  0x46   : > { %s1496_s10 = scalar_lea.vmem (!%p420_p2), [#allocation4], %s989_s7  ;;  %s1498_s20 = scalar_lea.vmem (!%p420_p2), [#allocation5], %s990_s26 }
  0x47   : > { %p993_p4 = scmp.ne.s32.totalorder (!%p420_p2), %s1251_s21, 0 }
  0x49   : > { %s1625_s11 = smov (!%p474_p3, %s991_s11), 3  ;;  %488 = sbr.rel (%p993_p4) target bundleno = 80 (0x50), region = 116 }
  0x4a   : > { %s476_s6 = scalar_lea.vmem %s1593_s2, %s1625_s11  ;;  %s481_s17 = scalar_lea.vmem %s1594_s3, %s1625_s11  ;;  %v1269_v34 = vmov (!%p993_p4), 0.0  }
  0x4b   : > { %489 = vst [vmem:[#allocation2] sm:$0xff] (!%p993_p4), %v1269_v34  ;;  %490 = vst [vmem:[#allocation2 + $0x8] sm:$0xff] (!%p993_p4), %v1269_v34 }
  0x4c   : > { %491 = vst [vmem:[#allocation2 + $0x10] sm:$0xff] (!%p993_p4), %v1269_v34  ;;  %492 = vst [vmem:[#allocation2 + $0x18] sm:$0xff] (!%p993_p4), %v1269_v34 }
  0x50 PF: > { %v1130_v35 = vld [vmem:[%s1496_s10 + $0x4] ss:$8 sps:$4 sm:$0xff]   ;;  %v1132_v36 = vld [vmem:[%s1496_s10] ss:$8 sps:$4 sm:$0xff]   ;;  %v1133_v37 = vld [vmem:[%s1496_s10 + $0x14] ss:$8 sps:$4 sm:$0xff]  }
  0x51   : > { %701 = vmatprep.subr.bf16.mxu0 %v1130_v35  ;;  %v1135_v38 = vld [vmem:[%s1496_s10 + $0x10] ss:$8 sps:$4 sm:$0xff]   ;;  %v1136_v39 = vld [vmem:[%s1496_s10 + $0x24] ss:$8 sps:$4 sm:$0xff]   ;;  %v1138_v40 = vld [vmem:[%s1496_s10 + $0x20] ss:$8 sps:$4 sm:$0xff]  }
  0x52   : > { %702 = vmatpush1.bf16.msra.mxu0 %v1132_v36  ;;  %v1139_v41 = vld [vmem:[%s1496_s10 + $0x34] ss:$8 sps:$4 sm:$0xff]   ;;  %v1141_v42 = vld [vmem:[%s1496_s10 + $0x30] ss:$8 sps:$4 sm:$0xff]   ;;  %v1142_v43 = vld [vmem:[%s1496_s10 + $0x44] ss:$8 sps:$4 sm:$0xff]  }
  0x53   : > { %703 = vmatprep.subr.bf16.mxu0 %v1133_v37  ;;  %v1144_v44 = vld [vmem:[%s1496_s10 + $0x40] ss:$8 sps:$4 sm:$0xff]   ;;  %v1145_v45 = vld [vmem:[%s1496_s10 + $0x54] ss:$8 sps:$4 sm:$0xff]   ;;  %v1147_v46 = vld [vmem:[%s1496_s10 + $0x50] ss:$8 sps:$4 sm:$0xff]  }
  0x54   : > { %v1148_v47 = vld [vmem:[%s1496_s10 + $0x64] ss:$8 sps:$4 sm:$0xff]   ;;  %v1150_v49 = vld [vmem:[%s1496_s10 + $0x60] ss:$8 sps:$4 sm:$0xff]   ;;  %v1151_v50 = vld [vmem:[%s1496_s10 + $0x74] ss:$8 sps:$4 sm:$0xff]  }
  0x55   : > { %v1180_v48 = vld [vmem:[%s428_s19 + $0x4] ss:$8 sps:$4 sm:$0xff]   ;;  %v1153_v51 = vld [vmem:[%s1496_s10 + $0x70] ss:$8 sps:$4 sm:$0xff]   ;;  %v1156_v53 = vld [vmem:[%s1496_s10 + $0x80] ss:$8 sps:$4 sm:$0xff]  }
  0x56   : > { %704 = vmatpush1.bf16.msra.mxu0 %v1135_v38  ;;  %733 = vmatprep.mubr.bf16.mxu0 %v1180_v48  ;;  %v1154_v52 = vld [vmem:[%s1496_s10 + $0x84] ss:$8 sps:$4 sm:$0xff]   ;;  %v1157_v54 = vld [vmem:[%s1496_s10 + $0x94] ss:$8 sps:$4 sm:$0xff]   ;;  %v1159_v55 = vld [vmem:[%s1496_s10 + $0x90] ss:$8 sps:$4 sm:$0xff]  }
  0x57   : > { %705 = vmatprep.subr.bf16.mxu0 %v1136_v39  ;;  %v1160_v56 = vld [vmem:[%s1496_s10 + $0xa4] ss:$8 sps:$4 sm:$0xff]   ;;  %v1162_v57 = vld [vmem:[%s1496_s10 + $0xa0] ss:$8 sps:$4 sm:$0xff]   ;;  %v1163_v58 = vld [vmem:[%s1496_s10 + $0xb4] ss:$8 sps:$4 sm:$0xff]  }
  0x58   : > { %v1165_v59 = vld [vmem:[%s1496_s10 + $0xb0] ss:$8 sps:$4 sm:$0xff]   ;;  %v1166_v60 = vld [vmem:[%s1496_s10 + $0xc4] ss:$8 sps:$4 sm:$0xff]   ;;  %v1168_v61 = vld [vmem:[%s1496_s10 + $0xc0] ss:$8 sps:$4 sm:$0xff]  }
  0x59   : > { %v1169_v62 = vld [vmem:[%s1496_s10 + $0xd4] ss:$8 sps:$4 sm:$0xff]   ;;  %v1171_v63 = vld [vmem:[%s1496_s10 + $0xd0] ss:$8 sps:$4 sm:$0xff]   ;;  %v1172_v0 = vld [vmem:[%s1496_s10 + $0xe4] ss:$8 sps:$4 sm:$0xff]  }
  0x5a   : > { %706 = vmatpush1.bf16.msra.mxu0 %v1138_v40  ;;  %v1174_v1 = vld [vmem:[%s1496_s10 + $0xe0] ss:$8 sps:$4 sm:$0xff]   ;;  %v1175_v2 = vld [vmem:[%s1496_s10 + $0xf4] ss:$8 sps:$4 sm:$0xff]   ;;  %v1177_v3 = vld [vmem:[%s1496_s10 + $0xf0] ss:$8 sps:$4 sm:$0xff]  }
  0x5b   : > { %707 = vmatprep.subr.bf16.mxu0 %v1139_v41  ;;  %v1178_v4 = vld [vmem:[%s428_s19] ss:$8 sps:$4 sm:$0xff]   ;;  %p1028_p5 = scmp.ne.s32.totalorder %s1251_s21, 17 }
  0x5c   : > { %v493_v5 = vld [vmem:[#allocation2] sm:$0xff]  ;;  %v494_v6 = vld [vmem:[#allocation2 + $0x8] sm:$0xff]  ;;  %v495_v8 = vld [vmem:[#allocation2 + $0x10] sm:$0xff]  ;;  %v762_v17 = vlaneseq (!%p1028_p5) }
  0x5d   : > { %v496_v11 = vld [vmem:[#allocation2 + $0x18] sm:$0xff]  ;;  %v760_v19 = vld [vmem:[%s476_s6] sm:$0x3] (!%p1028_p5) }
  0x5e   : > { %708 = vmatpush1.bf16.msra.mxu0 %v1141_v42  ;;  %v763_v18 = vshrl.u32 (!%p1028_p5), %v762_v17, 7  ;;  %v776_v20 = vld [vmem:[%s481_s17] sm:$0x3] (!%p1028_p5) }
  0x5f   : > { %709 = vmatprep.subr.bf16.mxu0 %v1142_v43 }
  0x60   : > { %v764_v22 = vsub.s32 (!%p1028_p5), 0, %v763_v18  ;;  %v768_v23 = vsub.s32 (!%p1028_p5), 1, %v763_v18 }
  0x62   : > { %710 = vmatpush1.bf16.msra.mxu0 %v1144_v44  ;;  %v765_v27 = vrot.slane (!%p1028_p5), %v760_v19, %v764_v22  ;;  %v769_v28 = vrot.slane (!%p1028_p5), %v760_v19, %v768_v23  ;;  %v781_v29 = vrot.slane (!%p1028_p5), %v776_v20, %v764_v22  ;;  %v785_v30 = vrot.slane (!%p1028_p5), %v776_v20, %v768_v23 }
  0x63   : > { %711 = vmatprep.subr.bf16.mxu0 %v1145_v45 }
  0x66   : > { %712 = vmatpush1.bf16.msra.mxu0 %v1147_v46 }
  0x67   : > { %713 = vmatprep.subr.bf16.mxu0 %v1148_v47 }
  0x6a   : > { %714 = vmatpush1.bf16.msra.mxu0 %v1150_v49 }
  0x6b   : > { %715 = vmatprep.subr.bf16.mxu0 %v1151_v50 }
  0x6e   : > { %716 = vmatpush1.bf16.msra.mxu0 %v1153_v51 }
  0x6f   : > { %717 = vmatprep.subr.bf16.mxu0 %v1154_v52 }
  0x72   : > { %718 = vmatpush1.bf16.msra.mxu0 %v1156_v53 }
  0x73   : > { %719 = vmatprep.subr.bf16.mxu0 %v1157_v54 }
  0x76   : > { %720 = vmatpush1.bf16.msra.mxu0 %v1159_v55 }
  0x77   : > { %721 = vmatprep.subr.bf16.mxu0 %v1160_v56 }
  0x7a   : > { %722 = vmatpush1.bf16.msra.mxu0 %v1162_v57 }
  0x7b   : > { %723 = vmatprep.subr.bf16.mxu0 %v1163_v58 }
  0x7e   : > { %724 = vmatpush1.bf16.msra.mxu0 %v1165_v59 }
  0x7f   : > { %725 = vmatprep.subr.bf16.mxu0 %v1166_v60 }
  0x82   : > { %726 = vmatpush1.bf16.msra.mxu0 %v1168_v61 }
  0x83   : > { %727 = vmatprep.subr.bf16.mxu0 %v1169_v62 }
  0x86   : > { %728 = vmatpush1.bf16.msra.mxu0 %v1171_v63 }
  0x87   : > { %729 = vmatprep.subr.bf16.mxu0 %v1172_v0 }
  0x8a   : > { %730 = vmatpush1.bf16.msra.mxu0 %v1174_v1 }
  0x8b   : > { %731 = vmatprep.subr.bf16.mxu0 %v1175_v2 }
  0x8e   : > { %732 = vmatpush1.bf16.msra.mxu0 %v1177_v3 }
  0x91   : > { %734 = vmatmul.mubr.bf16.vlgmr.msra.gmra.mrb[0].mxu0 %v1178_v4 }
 0x164   : > { %v735_v7 = vpop.f32.mrb[0].mxu0  ;;  %755 = sbr.rel (%p1028_p5) target bundleno = 379 (0x17b), region = 120 }
 0x165   : > { %v744_v9 = vadd.f32 %v735_v7, %v493_v5  ;;  %v737_v10 = vpop.f32.mrb[1].mxu0 }
 0x166   : > { %v745_v12 = vadd.f32 %v737_v10, %v494_v6  ;;  %v739_v13 = vpop.f32.mrb[2].mxu0 }
 0x167   : > { %748 = vst [vmem:[#allocation2] sm:$0xff] %v744_v9  ;;  %v746_v14 = vadd.f32 %v739_v13, %v495_v8  ;;  %v741_v15 = vpop.f32.mrb[3].mxu0 }
 0x168   : > { %749 = vst [vmem:[#allocation2 + $0x8] sm:$0xff] %v745_v12  ;;  %v747_v16 = vadd.f32 %v741_v15, %v496_v11 }
 0x169   : > { %750 = vst [vmem:[#allocation2 + $0x10] sm:$0xff] %v746_v14 }
 0x16a   : > { %751 = vst [vmem:[#allocation2 + $0x18] sm:$0xff] %v747_v16 }
 0x16e   : > { %v756_v21 = vld [vmem:[#allocation2] sm:$0xff] }
 0x16f   : > { %v757_v24 = vld [vmem:[#allocation2 + $0x8] sm:$0xff]  ;;  %v772_v31 = vmul.f32 %v765_v27, %v756_v21 }
 0x170   : > { %v758_v25 = vld [vmem:[#allocation2 + $0x10] sm:$0xff]  ;;  %v773_v32 = vmul.f32 %v769_v28, %v757_v24 }
 0x171   : > { %v759_v26 = vld [vmem:[#allocation2 + $0x18] sm:$0xff]  ;;  %v774_v33 = vmul.f32 %v765_v27, %v758_v25  ;;  %v788_v35 = vadd.f32 %v781_v29, %v772_v31 }
 0x172   : > { %v775_v34 = vmul.f32 %v769_v28, %v759_v26  ;;  %v789_v36 = vadd.f32 %v785_v30, %v773_v32 }
 0x173   : > { %v790_v37 = vadd.f32 %v781_v29, %v774_v33  ;;  %v792_v39 = vmax.f32 %v788_v35, 0.0 }
 0x174   : > { %v791_v38 = vadd.f32 %v785_v30, %v775_v34  ;;  %v793_v40 = vmax.f32 %v789_v36, 0.0 }
 0x175   : > { %v794_v41 = vmax.f32 %v790_v37, 0.0 }
 0x176   : > { %v795_v42 = vmax.f32 %v791_v38, 0.0  ;;  %v1038_v43 = vpack.c.bf16 %v793_v40, %v792_v39 }
 0x178   : > { %v1039_v44 = vpack.c.bf16 %v795_v42, %v794_v41  ;;  %808 = vst [vmem:[%s1498_s20] sm:$0xff] %v1038_v43 }
 0x17a   : > { %809 = vst [vmem:[%s1498_s20 + $0x8] sm:$0xff] %v1039_v44 }
 0x17b PF: > { %816 = sbr.rel (!%p1389_p12) target bundleno = 387 (0x183), region = 124  ;;  %s1040_s21 = sshll.u32 (%p1389_p12), %s1255_s22, 3 }
 0x17c   : > { %s822_s26 = scalar_lea.vmem (%p1389_p12), %s1595_s4, %s1040_s21 }
 0x17f   : > { %v852_v45 = vld [vmem:[%s1498_s20] sm:$0xff] (%p1389_p12) }
 0x180   : > { %853 = vst [vmem:[%s822_s26] sm:$0xff] (%p1389_p12), %v852_v45 }
 0x181   : > { %v854_v46 = vld [vmem:[%s1498_s20 + $0x8] sm:$0xff] (%p1389_p12) }
 0x182   : > { %855 = vst [vmem:[%s822_s26 + $0x10] sm:$0xff] %v854_v46 }
 0x183 PF: > { %s14_s25 = sadd.s32 1, %s1267_s25   ;;  %s1606_s19 = sld [smem:[#allocation6_spill]] }
 0x184   : > { %p11_p6 = scmp.ge.s32.totalorder %s14_s25, 38   ;;  %s1607_s20 = sld [smem:[#allocation9_spill]] }
 0x185   : > { %s1608_s14 = sld [smem:[#allocation7_spill]]  ;;  %s1609_s5 = sld [smem:[#allocation8_spill]] }
 0x186   : > { %s1610_s15 = smov %s1231_s16  ;;  %s1611_s16 = smov %s1387_s13 }
 0x187   : > { %s1612_s17 = smov %s1239_s18  ;;  %s1613_s18 = smov %s1384_s12 }
 0x188   : > { %s1614_s21 = smov %s1259_s23  ;;  %s1615_s22 = smov %s1263_s24 }
 0x189   :  { %13 = sbr.rel (!%p11_p6) target bundleno = 6 (0x6), region = 207 }
 0x18b   : > { %s1616_s23 = smov %s1608_s14  ;;  %s1617_s24 = smov %s1609_s5 }

// kernel: resnet_forward.38
= control target key start
LH: loop header
LB: loop body
LE: loop exit
PB: predicated region body
PF: predicated region fallthrough
CT: control target
= control target key end

     0   :  { %s1156_s15 = smov 0   ;;  %s1158_s16 = smov 0   ;;  %s1347_s0 = inlined_call_operand.vmem [shape: bf16[16,256], index: 0, kind: input, shape index: {}]   ;;  %s1348_s1 = inlined_call_operand.vmem [shape: bf16[256,512], index: 1, kind: input, shape index: {}]   ;;  %s1349_s2 = inlined_call_operand.vmem [shape: f32[1,512], index: 2, kind: input, shape index: {}]   ;;  %s1350_s3 = inlined_call_operand.vmem [shape: f32[1,512], index: 3, kind: input, shape index: {}]   ;;  %s1351_s4 = inlined_call_operand.vmem [shape: bf16[16,512], index: 4, kind: output, shape index: {}]  }
   0x1   :  { %s1160_s17 = smov 0   ;;  %s1162_s18 = smov 0  }
   0x2   :  { %s1164_s19 = smov 0  }
   0x3 LB: > { %s29_s20 = sadd.s32 1, %s1125_s18  ;;  %s942_s21 = sadd.s32 4294967295, %s1129_s19   ;;  %s1129_s19 = sphi %s1164_s19, %s14_s19   ;;  %s1125_s18 = sphi %s1162_s18, %s1356_s18   ;;  %s1121_s17 = sphi %s1160_s17, %s1355_s17   ;;  %s1117_s16 = sphi %s1158_s16, %s1354_s16   ;;  %s1113_s15 = sphi %s1156_s15, %s1353_s15  }
   0x4   : > { %p31_p0 = scmp.ge.s32.totalorder %s29_s20, 2  ;;  %p77_p1 = scmp.ne.s32.totalorder %s1117_s16, %s1113_s15 }
   0x5   : > { %p78_p2 = scmp.eq.s32.totalorder %s1129_s19, 0  ;;  %p161_p4 = scmp.eq.s32.totalorder %s942_s21, 1 }
   0x6   : > { %s1358_s20 = smov (%p31_p0, %s29_s20), 0  ;;  %s70_s23 = sadd.s32 1, %s1117_s16 }
   0x7   : > { %p79_p3 = por %p78_p2, %p77_p1  ;;  %s66_s22 = ssub.s32 %s1125_s18, %s1358_s20 }
   0x8   : > { %p68_p5 = scmp.eq.s32.totalorder %s66_s22, 0  ;;  %p1191_p6 = por %p161_p4, %p77_p1 }
   0x9   : > { %p946_p7 = scmp.ge.s32.totalorder %s1129_s19, 2 }
   0xa   : > { %s1196_s25 = scalar_select %p68_p5, %s1117_s16, %s70_s23  }
   0xb   : > { %198 = sbr.rel (%p946_p7) target bundleno = 38 (0x26), region = 20 }
  0x12   : > { %201 = sbr.rel (!%p79_p3) target bundleno = 38 (0x26), region = 24  ;;  %s203_s26 = sand.u32 (%p79_p3), 1, %s1117_s16  }
  0x13   : > { %s996_s27 = sshll.u32 (%p79_p3), %s1125_s18, 3  ;;  %s947_s28 = sshll.u32 (%p79_p3), %s203_s26, 8 }
  0x14   : > { %s1204_s5 = scalar_lea.vmem (%p79_p3), %s1348_s1, %s996_s27  ;;  %s1209_s6 = scalar_lea.vmem (%p79_p3), [#allocation3], %s947_s28 }
  0x15   : > { %v301_v0 = vld [vmem:[%s1204_s5] sm:$0xff] (%p79_p3)  ;;  %v303_v1 = vld [vmem:[%s1204_s5 + $0x10] sm:$0xff] (%p79_p3) }
  0x16   : > { %v305_v2 = vld [vmem:[%s1204_s5 + $0x20] sm:$0xff] (%p79_p3)  ;;  %302 = vst [vmem:[%s1209_s6] sm:$0xff] (%p79_p3), %v301_v0  ;;  %304 = vst [vmem:[%s1209_s6 + $0x8] sm:$0xff] (%p79_p3), %v303_v1  ;;  %v307_v3 = vld [vmem:[%s1204_s5 + $0x30] sm:$0xff] (%p79_p3) }
  0x17   : > { %306 = vst [vmem:[%s1209_s6 + $0x10] sm:$0xff] (%p79_p3), %v305_v2  ;;  %v309_v4 = vld [vmem:[%s1204_s5 + $0x40] sm:$0xff] (%p79_p3)  ;;  %v311_v5 = vld [vmem:[%s1204_s5 + $0x50] sm:$0xff] (%p79_p3)  ;;  %308 = vst [vmem:[%s1209_s6 + $0x18] sm:$0xff] (%p79_p3), %v307_v3 }
  0x18   : > { %310 = vst [vmem:[%s1209_s6 + $0x20] sm:$0xff] (%p79_p3), %v309_v4  ;;  %312 = vst [vmem:[%s1209_s6 + $0x28] sm:$0xff] (%p79_p3), %v311_v5  ;;  %v313_v6 = vld [vmem:[%s1204_s5 + $0x60] sm:$0xff] (%p79_p3)  ;;  %v315_v7 = vld [vmem:[%s1204_s5 + $0x70] sm:$0xff] (%p79_p3) }
  0x19   : > { %v317_v8 = vld [vmem:[%s1204_s5 + $0x80] sm:$0xff]  ;;  %314 = vst [vmem:[%s1209_s6 + $0x30] sm:$0xff] %v313_v6  ;;  %316 = vst [vmem:[%s1209_s6 + $0x38] sm:$0xff] %v315_v7  ;;  %v319_v9 = vld [vmem:[%s1204_s5 + $0x90] sm:$0xff] }
  0x1a   : > { %318 = vst [vmem:[%s1209_s6 + $0x40] sm:$0xff] %v317_v8  ;;  %v321_v10 = vld [vmem:[%s1204_s5 + $0xa0] sm:$0xff]  ;;  %v323_v11 = vld [vmem:[%s1204_s5 + $0xb0] sm:$0xff]  ;;  %320 = vst [vmem:[%s1209_s6 + $0x48] sm:$0xff] %v319_v9 }
  0x1b   : > { %322 = vst [vmem:[%s1209_s6 + $0x50] sm:$0xff] %v321_v10  ;;  %324 = vst [vmem:[%s1209_s6 + $0x58] sm:$0xff] %v323_v11  ;;  %v325_v12 = vld [vmem:[%s1204_s5 + $0xc0] sm:$0xff]  ;;  %v327_v13 = vld [vmem:[%s1204_s5 + $0xd0] sm:$0xff] }
  0x1c   : > { %v329_v14 = vld [vmem:[%s1204_s5 + $0xe0] sm:$0xff]  ;;  %326 = vst [vmem:[%s1209_s6 + $0x60] sm:$0xff] %v325_v12  ;;  %328 = vst [vmem:[%s1209_s6 + $0x68] sm:$0xff] %v327_v13  ;;  %v331_v15 = vld [vmem:[%s1204_s5 + $0xf0] sm:$0xff] }
  0x1d   : > { %330 = vst [vmem:[%s1209_s6 + $0x70] sm:$0xff] %v329_v14  ;;  %v333_v16 = vld [vmem:[%s1204_s5 + $0x100] sm:$0xff]  ;;  %v335_v17 = vld [vmem:[%s1204_s5 + $0x110] sm:$0xff]  ;;  %332 = vst [vmem:[%s1209_s6 + $0x78] sm:$0xff] %v331_v15 }
  0x1e   : > { %334 = vst [vmem:[%s1209_s6 + $0x80] sm:$0xff] %v333_v16  ;;  %336 = vst [vmem:[%s1209_s6 + $0x88] sm:$0xff] %v335_v17  ;;  %v337_v18 = vld [vmem:[%s1204_s5 + $0x120] sm:$0xff]  ;;  %v339_v19 = vld [vmem:[%s1204_s5 + $0x130] sm:$0xff] }
  0x1f   : > { %v341_v20 = vld [vmem:[%s1204_s5 + $0x140] sm:$0xff]  ;;  %338 = vst [vmem:[%s1209_s6 + $0x90] sm:$0xff] %v337_v18  ;;  %340 = vst [vmem:[%s1209_s6 + $0x98] sm:$0xff] %v339_v19  ;;  %v343_v21 = vld [vmem:[%s1204_s5 + $0x150] sm:$0xff] }
  0x20   : > { %342 = vst [vmem:[%s1209_s6 + $0xa0] sm:$0xff] %v341_v20  ;;  %v345_v22 = vld [vmem:[%s1204_s5 + $0x160] sm:$0xff]  ;;  %v347_v23 = vld [vmem:[%s1204_s5 + $0x170] sm:$0xff]  ;;  %344 = vst [vmem:[%s1209_s6 + $0xa8] sm:$0xff] %v343_v21 }
  0x21   : > { %346 = vst [vmem:[%s1209_s6 + $0xb0] sm:$0xff] %v345_v22  ;;  %348 = vst [vmem:[%s1209_s6 + $0xb8] sm:$0xff] %v347_v23  ;;  %v349_v24 = vld [vmem:[%s1204_s5 + $0x180] sm:$0xff]  ;;  %v351_v25 = vld [vmem:[%s1204_s5 + $0x190] sm:$0xff] }
  0x22   : > { %v353_v26 = vld [vmem:[%s1204_s5 + $0x1a0] sm:$0xff]  ;;  %350 = vst [vmem:[%s1209_s6 + $0xc0] sm:$0xff] %v349_v24  ;;  %352 = vst [vmem:[%s1209_s6 + $0xc8] sm:$0xff] %v351_v25  ;;  %v355_v27 = vld [vmem:[%s1204_s5 + $0x1b0] sm:$0xff] }
  0x23   : > { %354 = vst [vmem:[%s1209_s6 + $0xd0] sm:$0xff] %v353_v26  ;;  %v357_v28 = vld [vmem:[%s1204_s5 + $0x1c0] sm:$0xff]  ;;  %v359_v29 = vld [vmem:[%s1204_s5 + $0x1d0] sm:$0xff]  ;;  %356 = vst [vmem:[%s1209_s6 + $0xd8] sm:$0xff] %v355_v27 }
  0x24   : > { %358 = vst [vmem:[%s1209_s6 + $0xe0] sm:$0xff] %v357_v28  ;;  %360 = vst [vmem:[%s1209_s6 + $0xe8] sm:$0xff] %v359_v29  ;;  %v361_v30 = vld [vmem:[%s1204_s5 + $0x1e0] sm:$0xff]  ;;  %v363_v31 = vld [vmem:[%s1204_s5 + $0x1f0] sm:$0xff] }
  0x25   : > { %362 = vst [vmem:[%s1209_s6 + $0xf0] sm:$0xff] %v361_v30  ;;  %364 = vst [vmem:[%s1209_s6 + $0xf8] sm:$0xff] %v363_v31 }
  0x26 PF: > { %p950_p8 = scmp.ge.s32.totalorder %s1129_s19, 1  ;;  %p385_p9 = scmp.lt.s32.totalorder %s1129_s19, 3 }
  0x28   : > { %p386_p10 = pnand %p950_p8, %p385_p9 }
  0x29   : > { %s392_s7 = sand.u32 (!%p386_p10), 1, %s1113_s15   ;;  %v1090_v32 = vld [vmem:[%s1347_s0 + $0x4] ss:$8 sps:$4 sm:$0xff] (!%p386_p10)   ;;  %v1088_v1 = vld [vmem:[%s1347_s0] ss:$8 sps:$4 sm:$0xff] (!%p386_p10)   ;;  %s953_s14 = sshll.u32 (!%p386_p10), %s1121_s17, 1  ;;  %v736_v2 = vlaneseq (!%p386_p10) }
  0x2a   : > { %389 = sbr.rel (%p386_p10) target bundleno = 339 (0x153), region = 70  ;;  %s951_s8 = sshll.u32 (!%p386_p10), %s392_s7, 8  ;;  %708 = vmatprep.mubr.bf16.mxu0 (!%p386_p10), %v1090_v32 }
  0x2b   : > { %s1280_s11 = scalar_lea.vmem (!%p386_p10), [#allocation3], %s951_s8  ;;  %p449_p11 = scmp.lt.s32.totalorder (!%p386_p10), %s953_s14, 3  ;;  %v737_v3 = vshrl.u32 (!%p386_p10), %v736_v2, 7 }
  0x2c   : > { %v1040_v33 = vld [vmem:[%s1280_s11 + $0x4] ss:$8 sps:$4 sm:$0xff] (!%p386_p10)   ;;  %v1042_v34 = vld [vmem:[%s1280_s11] ss:$8 sps:$4 sm:$0xff] (!%p386_p10)   ;;  %v1043_v35 = vld [vmem:[%s1280_s11 + $0x14] ss:$8 sps:$4 sm:$0xff] (!%p386_p10)  }
  0x2d   : > { %676 = vmatprep.subr.bf16.mxu0 (!%p386_p10), %v1040_v33  ;;  %v1045_v36 = vld [vmem:[%s1280_s11 + $0x10] ss:$8 sps:$4 sm:$0xff] (!%p386_p10)   ;;  %v1046_v37 = vld [vmem:[%s1280_s11 + $0x24] ss:$8 sps:$4 sm:$0xff] (!%p386_p10)   ;;  %v1048_v38 = vld [vmem:[%s1280_s11 + $0x20] ss:$8 sps:$4 sm:$0xff] (!%p386_p10)  }
  0x2e   : > { %677 = vmatpush1.bf16.msra.mxu0 (!%p386_p10), %v1042_v34  ;;  %v1049_v39 = vld [vmem:[%s1280_s11 + $0x34] ss:$8 sps:$4 sm:$0xff] (!%p386_p10)   ;;  %v1051_v40 = vld [vmem:[%s1280_s11 + $0x30] ss:$8 sps:$4 sm:$0xff] (!%p386_p10)   ;;  %v1052_v41 = vld [vmem:[%s1280_s11 + $0x44] ss:$8 sps:$4 sm:$0xff] (!%p386_p10)  }
  0x2f   : > { %678 = vmatprep.subr.bf16.mxu0 (!%p386_p10), %v1043_v35  ;;  %v1054_v42 = vld [vmem:[%s1280_s11 + $0x40] ss:$8 sps:$4 sm:$0xff] (!%p386_p10)   ;;  %v1055_v43 = vld [vmem:[%s1280_s11 + $0x54] ss:$8 sps:$4 sm:$0xff] (!%p386_p10)   ;;  %v1057_v44 = vld [vmem:[%s1280_s11 + $0x50] ss:$8 sps:$4 sm:$0xff] (!%p386_p10)  }
  0x30   : > { %v1058_v45 = vld [vmem:[%s1280_s11 + $0x64] ss:$8 sps:$4 sm:$0xff] (!%p386_p10)   ;;  %v1060_v46 = vld [vmem:[%s1280_s11 + $0x60] ss:$8 sps:$4 sm:$0xff] (!%p386_p10)   ;;  %v1061_v47 = vld [vmem:[%s1280_s11 + $0x74] ss:$8 sps:$4 sm:$0xff] (!%p386_p10)  }
  0x31   : > { %v1063_v48 = vld [vmem:[%s1280_s11 + $0x70] ss:$8 sps:$4 sm:$0xff]   ;;  %v1064_v49 = vld [vmem:[%s1280_s11 + $0x84] ss:$8 sps:$4 sm:$0xff]   ;;  %v1066_v50 = vld [vmem:[%s1280_s11 + $0x80] ss:$8 sps:$4 sm:$0xff]  }
  0x32   : > { %679 = vmatpush1.bf16.msra.mxu0 %v1045_v36  ;;  %v1067_v51 = vld [vmem:[%s1280_s11 + $0x94] ss:$8 sps:$4 sm:$0xff]   ;;  %v1069_v52 = vld [vmem:[%s1280_s11 + $0x90] ss:$8 sps:$4 sm:$0xff]   ;;  %v1070_v53 = vld [vmem:[%s1280_s11 + $0xa4] ss:$8 sps:$4 sm:$0xff]  }
  0x33   : > { %680 = vmatprep.subr.bf16.mxu0 %v1046_v37  ;;  %v1072_v54 = vld [vmem:[%s1280_s11 + $0xa0] ss:$8 sps:$4 sm:$0xff]   ;;  %v1073_v55 = vld [vmem:[%s1280_s11 + $0xb4] ss:$8 sps:$4 sm:$0xff]   ;;  %v1075_v56 = vld [vmem:[%s1280_s11 + $0xb0] ss:$8 sps:$4 sm:$0xff]  }
  0x34   : > { %v1076_v57 = vld [vmem:[%s1280_s11 + $0xc4] ss:$8 sps:$4 sm:$0xff]   ;;  %v1078_v58 = vld [vmem:[%s1280_s11 + $0xc0] ss:$8 sps:$4 sm:$0xff]   ;;  %v1079_v59 = vld [vmem:[%s1280_s11 + $0xd4] ss:$8 sps:$4 sm:$0xff]  }
  0x35   : > { %v1081_v60 = vld [vmem:[%s1280_s11 + $0xd0] ss:$8 sps:$4 sm:$0xff]   ;;  %v1082_v61 = vld [vmem:[%s1280_s11 + $0xe4] ss:$8 sps:$4 sm:$0xff]   ;;  %v1084_v62 = vld [vmem:[%s1280_s11 + $0xe0] ss:$8 sps:$4 sm:$0xff]  }
  0x36   : > { %681 = vmatpush1.bf16.msra.mxu0 %v1048_v38  ;;  %v1085_v63 = vld [vmem:[%s1280_s11 + $0xf4] ss:$8 sps:$4 sm:$0xff]   ;;  %v1087_v0 = vld [vmem:[%s1280_s11 + $0xf0] ss:$8 sps:$4 sm:$0xff]   ;;  %s1360_s14 = smov (!%p449_p11, %s953_s14), 3  ;;  %v738_v4 = vsub.s32 0, %v737_v3 }
  0x37   : > { %682 = vmatprep.subr.bf16.mxu0 %v1049_v39  ;;  %s451_s23 = scalar_lea.vmem %s1349_s2, %s1360_s14  ;;  %s456_s28 = scalar_lea.vmem %s1350_s3, %s1360_s14  ;;  %v742_v6 = vsub.s32 1, %v737_v3 }
  0x38   : > { %v734_v5 = vld [vmem:[%s451_s23] sm:$0x3]  ;;  %s952_s29 = sshll.u32 %s392_s7, 4  ;;  %s999_s15 = sshll.u32 (%p1191_p6), %s1121_s17, 3 }
  0x39   : > { %v750_v7 = vld [vmem:[%s456_s28] sm:$0x3]  ;;  %v739_v8 = vrot.slane %v734_v5, %v738_v4  ;;  %v743_v9 = vrot.slane %v734_v5, %v742_v6  ;;  %s433_s30 = scalar_lea.vmem [#allocation4], %s952_s29  ;;  %s792_s7 = scalar_lea.vmem (%p1191_p6), %s1351_s4, %s999_s15 }
  0x3a   : > { %683 = vmatpush1.bf16.msra.mxu0 %v1051_v40  ;;  %v755_v10 = vrot.slane %v750_v7, %v738_v4  ;;  %v759_v12 = vrot.slane %v750_v7, %v742_v6 }
  0x3b   : > { %684 = vmatprep.subr.bf16.mxu0 %v1052_v41 }
  0x3e   : > { %685 = vmatpush1.bf16.msra.mxu0 %v1054_v42 }
  0x3f   : > { %686 = vmatprep.subr.bf16.mxu0 %v1055_v43 }
  0x42   : > { %687 = vmatpush1.bf16.msra.mxu0 %v1057_v44 }
  0x43   : > { %688 = vmatprep.subr.bf16.mxu0 %v1058_v45 }
  0x46   : > { %689 = vmatpush1.bf16.msra.mxu0 %v1060_v46 }
  0x47   : > { %690 = vmatprep.subr.bf16.mxu0 %v1061_v47 }
  0x4a   : > { %691 = vmatpush1.bf16.msra.mxu0 %v1063_v48 }
  0x4b   : > { %692 = vmatprep.subr.bf16.mxu0 %v1064_v49 }
  0x4e   : > { %693 = vmatpush1.bf16.msra.mxu0 %v1066_v50 }
  0x4f   : > { %694 = vmatprep.subr.bf16.mxu0 %v1067_v51 }
  0x52   : > { %695 = vmatpush1.bf16.msra.mxu0 %v1069_v52 }
  0x53   : > { %696 = vmatprep.subr.bf16.mxu0 %v1070_v53 }
  0x56   : > { %697 = vmatpush1.bf16.msra.mxu0 %v1072_v54 }
  0x57   : > { %698 = vmatprep.subr.bf16.mxu0 %v1073_v55 }
  0x5a   : > { %699 = vmatpush1.bf16.msra.mxu0 %v1075_v56 }
  0x5b   : > { %700 = vmatprep.subr.bf16.mxu0 %v1076_v57 }
  0x5e   : > { %701 = vmatpush1.bf16.msra.mxu0 %v1078_v58 }
  0x5f   : > { %702 = vmatprep.subr.bf16.mxu0 %v1079_v59 }
  0x62   : > { %703 = vmatpush1.bf16.msra.mxu0 %v1081_v60 }
  0x63   : > { %704 = vmatprep.subr.bf16.mxu0 %v1082_v61 }
  0x66   : > { %705 = vmatpush1.bf16.msra.mxu0 %v1084_v62 }
  0x67   : > { %706 = vmatprep.subr.bf16.mxu0 %v1085_v63 }
  0x6a   : > { %707 = vmatpush1.bf16.msra.mxu0 %v1087_v0 }
  0x6d   : > { %709 = vmatmul.mubr.bf16.vlgmr.msra.gmra.mrb[0].mxu0 %v1088_v1 }
 0x140   : > { %v710_v11 = vpop.f32.mrb[0].mxu0 }
 0x141   : > { %v746_v13 = vmul.f32 %v739_v8, %v710_v11  ;;  %v712_v14 = vpop.f32.mrb[1].mxu0 }
 0x142   : > { %v747_v15 = vmul.f32 %v743_v9, %v712_v14  ;;  %v714_v16 = vpop.f32.mrb[2].mxu0 }
 0x143   : > { %v762_v17 = vadd.f32 %v755_v10, %v746_v13  ;;  %v748_v18 = vmul.f32 %v739_v8, %v714_v16  ;;  %v716_v19 = vpop.f32.mrb[3].mxu0 }
 0x144   : > { %v763_v20 = vadd.f32 %v759_v12, %v747_v15  ;;  %v749_v21 = vmul.f32 %v743_v9, %v716_v19  ;;  %786 = sbr.rel (!%p1191_p6) target bundleno = 339 (0x153), region = 86 }
 0x145   : > { %v764_v22 = vadd.f32 %v755_v10, %v748_v18 }
 0x146   : > { %v997_v23 = vpack.c.bf16 %v763_v20, %v762_v17  ;;  %v765_v24 = vadd.f32 %v759_v12, %v749_v21 }
 0x148   : > { %778 = vst [vmem:[%s433_s30] sm:$0xff] %v997_v23  ;;  %v998_v25 = vpack.c.bf16 %v765_v24, %v764_v22 }
 0x14a   : > { %779 = vst [vmem:[%s433_s30 + $0x8] sm:$0xff] %v998_v25 }
 0x14f   : > { %v822_v26 = vld [vmem:[%s433_s30] sm:$0xff] }
 0x150   : > { %823 = vst [vmem:[%s792_s7] sm:$0xff] %v822_v26 }
 0x151   : > { %v824_v27 = vld [vmem:[%s433_s30 + $0x8] sm:$0xff] }
 0x152   : > { %825 = vst [vmem:[%s792_s7 + $0x10] sm:$0xff] %v824_v27 }
 0x153 PF: > { %s14_s19 = sadd.s32 1, %s1129_s19   ;;  %s1353_s15 = smov %s1117_s16 }
 0x154   : > { %p11_p12 = scmp.ge.s32.totalorder %s14_s19, 4   ;;  %s1354_s16 = smov %s1196_s25 }
 0x155   : > { %s1355_s17 = smov %s1125_s18  ;;  %s1356_s18 = smov %s1358_s20 }
 0x156   :  { %13 = sbr.rel (!%p11_p12) target bundleno = 3 (0x3), region = 164 }

// kernel: resnet_forward.40
= control target key start
LH: loop header
LB: loop body
LE: loop exit
PB: predicated region body
PF: predicated region fallthrough
CT: control target
= control target key end

     0   :  { %s1429_s18 = smov 0   ;;  %s1431_s19 = smov 0   ;;  %s1750_s0 = inlined_call_operand.vmem [shape: bf16[16,4608], index: 0, kind: input, shape index: {}]   ;;  %s1751_s1 = inlined_call_operand.vmem [shape: bf16[4608,512], index: 1, kind: input, shape index: {}]   ;;  %s1752_s2 = inlined_call_operand.vmem [shape: f32[1,512], index: 2, kind: input, shape index: {}]   ;;  %s1753_s3 = inlined_call_operand.vmem [shape: f32[1,512], index: 3, kind: input, shape index: {}]   ;;  %s1754_s4 = inlined_call_operand.vmem [shape: bf16[16,512], index: 4, kind: input, shape index: {}]   ;;  %s1755_s5 = inlined_call_operand.vmem [shape: bf16[16,512], index: 5, kind: output, shape index: {}]  }
   0x1   :  { %s1433_s20 = smov 0   ;;  %s1435_s21 = smov 0  }
   0x2   :  { %s1437_s22 = smov 0   ;;  %s1439_s23 = smov 0  }
   0x3   :  { %s1441_s24 = smov 0   ;;  %s1443_s25 = smov 0  }
   0x4   :  { %s1445_s26 = smov 0   ;;  %s1447_s27 = smov 0  }
   0x5   :  { %s1449_s28 = smov 0  }
   0x6 LB: > { %1759 = sst [smem:[#allocation7_spill]] %s1376_s23  ;;  %s1099_s29 = sadd.s32 4294967295, %s1396_s28   ;;  %s1396_s28 = sphi %s1449_s28, %s15_s28   ;;  %s1392_s27 = sphi %s1447_s27, %s1783_s27   ;;  %s1388_s26 = sphi %s1445_s26, %s1782_s26   ;;  %s1384_s25 = sphi %s1443_s25, %s1781_s25   ;;  %s1380_s24 = sphi %s1441_s24, %s1780_s24   ;;  %s1376_s23 = sphi %s1439_s23, %s1779_s23   ;;  %s1372_s22 = sphi %s1437_s22, %s1771_s22   ;;  %s1368_s21 = sphi %s1435_s21, %s1778_s21   ;;  %s1364_s20 = sphi %s1433_s20, %s1777_s20   ;;  %s1360_s19 = sphi %s1431_s19, %s1776_s19   ;;  %s1356_s18 = sphi %s1429_s18, %s1775_s18  }
   0x7   : > { %s27_s30 = sadd.s32 1, %s1388_s26  ;;  %s30_s6 = sadd.s32 1, %s1392_s27 }
   0x8   : > { %p28_p0 = scmp.ge.s32.totalorder %s27_s30, 18  ;;  %s43_s7 = sadd.s32 1, %s1376_s23 }
   0x9   : > { %p50_p1 = scmp.ne.s32.totalorder %s1376_s23, %s1372_s22  ;;  %p51_p2 = scmp.eq.s32.totalorder %s1396_s28, 0 }
   0xa   : > { %s1785_s30 = smov (%p28_p0, %s27_s30), 0  ;;  %s1787_s6 = smov (!%p28_p0, %s30_s6), %s1392_s27 }
   0xb   : > { %1760 = sst [smem:[#allocation8_spill]] %s1785_s30  ;;  %s39_s8 = ssub.s32 %s1388_s26, %s1785_s30 }
   0xc   : > { %p32_p3 = scmp.ge.s32.totalorder %s1787_s6, 2  ;;  %p41_p4 = scmp.eq.s32.totalorder %s39_s8, 0 }
   0xd   : > { %p1498_p5 = por %p51_p2, %p50_p1  ;;  %s71_s10 = sadd.s32 1, %s1368_s21 }
   0xe   : > { %s1789_s6 = smov (%p32_p3, %s1787_s6), 0  ;;  %p78_p6 = scmp.ne.s32.totalorder %s1368_s21, %s1364_s20 }
   0xf   : > { %1762 = sst [smem:[#allocation9_spill]] %s1789_s6  ;;  %s67_s12 = ssub.s32 %s1392_s27, %s1789_s6 }
  0x10   : > { %s1506_s11 = scalar_select %p41_p4, %s1376_s23, %s43_s7  }
  0x11   : > { %s68_s13 = sor.u32 %s67_s12, %s39_s8  ;;  %p149_p7 = scmp.eq.s32.totalorder %s67_s12, 0 }
  0x12   : > { %1763 = sst [smem:[#allocation10_spill]] %s1506_s11  ;;  %p69_p8 = scmp.eq.s32.totalorder %s68_s13, 0 }
  0x13   : > { %p1514_p9 = por %p78_p6, %p51_p2  ;;  %s151_s15 = sadd.s32 1, %s1360_s19 }
  0x14   : > { %p158_p10 = scmp.ne.s32.totalorder %s1360_s19, %s1356_s18  ;;  %p190_p12 = scmp.eq.s32.totalorder %s1099_s29, 35 }
  0x15   : > { %s1522_s16 = scalar_select %p69_p8, %s1368_s21, %s71_s10  }
  0x16   : > { %s1525_s17 = scalar_select %p149_p7, %s1360_s19, %s151_s15  }
  0x17   : > { %1765 = sst [smem:[#allocation11_spill]] %s1522_s16  ;;  %p1529_p11 = por %p158_p10, %p51_p2 }
  0x18   : > { %1766 = sst [smem:[#allocation12_spill]] %s1525_s17  ;;  %p1533_p13 = por %p190_p12, %p158_p10 }
  0x19   : > { %p1102_p0 = scmp.ge.s32.totalorder %s1396_s28, 36 }
  0x1b   : > { %212 = sbr.rel (%p1102_p0) target bundleno = 71 (0x47), region = 16 }
  0x22   : > { %215 = sbr.rel (!%p1498_p5) target bundleno = 41 (0x29), region = 20  ;;  %s217_s10 = sand.u32 (%p1498_p5), 1, %s1376_s23  }
  0x23   : > { %s1164_s12 = sshll.u32 (%p1498_p5), %s1388_s26, 3  ;;  %s1103_s13 = sshll.u32 (%p1498_p5), %s217_s10, 4 }
  0x24   : > { %s225_s30 = scalar_lea.vmem (%p1498_p5), %s1750_s0, %s1164_s12  ;;  %s219_s29 = scalar_lea.vmem (%p1498_p5), [#allocation3], %s1103_s13 }
  0x25   : > { %v255_v0 = vld [vmem:[%s225_s30] sm:$0xff] (%p1498_p5)  ;;  %v257_v1 = vld [vmem:[%s225_s30 + $0x90] sm:$0xff] (%p1498_p5) }
  0x26   : > { %256 = vst [vmem:[%s219_s29] sm:$0xff] (%p1498_p5), %v255_v0  ;;  %258 = vst [vmem:[%s219_s29 + $0x8] sm:$0xff] (%p1498_p5), %v257_v1 }
  0x29 PF: > { %264 = sbr.rel (!%p1514_p9) target bundleno = 64 (0x40), region = 58  ;;  %s266_s9 = sand.u32 (%p1514_p9), 1, %s1368_s21  }
  0x2a   : > { %s1108_s11 = sshll.u32 (%p1514_p9), %s1392_s27, 1  ;;  %s1106_s23 = sshll.u32 (%p1514_p9), %s266_s9, 8 }
  0x2b   : > { %s1165_s10 = sshll.u32 (%p1514_p9), %s1388_s26, 7  ;;  %s1558_s14 = scalar_lea.vmem (%p1514_p9), [#allocation4], %s1106_s23 }
  0x2c   : > { %s272_s16 = sadd.s32 (%p1514_p9), %s1165_s10, %s1108_s11 }
  0x2d   : > { %s1110_s17 = sshll.u32 (%p1514_p9), %s272_s16, 2 }
  0x2e   : > { %s1553_s30 = scalar_lea.vmem (%p1514_p9), %s1751_s1, %s1110_s17 }
  0x2f   : > { %v364_v2 = vld [vmem:[%s1553_s30] sm:$0xff] (%p1514_p9)  ;;  %v366_v3 = vld [vmem:[%s1553_s30 + $0x10] sm:$0xff] (%p1514_p9) }
  0x30   : > { %v368_v4 = vld [vmem:[%s1553_s30 + $0x20] sm:$0xff]  ;;  %365 = vst [vmem:[%s1558_s14] sm:$0xff] %v364_v2  ;;  %367 = vst [vmem:[%s1558_s14 + $0x8] sm:$0xff] %v366_v3  ;;  %v370_v5 = vld [vmem:[%s1553_s30 + $0x30] sm:$0xff] }
  0x31   : > { %369 = vst [vmem:[%s1558_s14 + $0x10] sm:$0xff] %v368_v4  ;;  %v372_v6 = vld [vmem:[%s1553_s30 + $0x40] sm:$0xff]  ;;  %v374_v7 = vld [vmem:[%s1553_s30 + $0x50] sm:$0xff]  ;;  %371 = vst [vmem:[%s1558_s14 + $0x18] sm:$0xff] %v370_v5 }
  0x32   : > { %373 = vst [vmem:[%s1558_s14 + $0x20] sm:$0xff] %v372_v6  ;;  %375 = vst [vmem:[%s1558_s14 + $0x28] sm:$0xff] %v374_v7  ;;  %v376_v8 = vld [vmem:[%s1553_s30 + $0x60] sm:$0xff]  ;;  %v378_v9 = vld [vmem:[%s1553_s30 + $0x70] sm:$0xff] }
  0x33   : > { %v380_v10 = vld [vmem:[%s1553_s30 + $0x80] sm:$0xff]  ;;  %377 = vst [vmem:[%s1558_s14 + $0x30] sm:$0xff] %v376_v8  ;;  %379 = vst [vmem:[%s1558_s14 + $0x38] sm:$0xff] %v378_v9  ;;  %v382_v11 = vld [vmem:[%s1553_s30 + $0x90] sm:$0xff] }
  0x34   : > { %381 = vst [vmem:[%s1558_s14 + $0x40] sm:$0xff] %v380_v10  ;;  %v384_v12 = vld [vmem:[%s1553_s30 + $0xa0] sm:$0xff]  ;;  %v386_v13 = vld [vmem:[%s1553_s30 + $0xb0] sm:$0xff]  ;;  %383 = vst [vmem:[%s1558_s14 + $0x48] sm:$0xff] %v382_v11 }
  0x35   : > { %385 = vst [vmem:[%s1558_s14 + $0x50] sm:$0xff] %v384_v12  ;;  %387 = vst [vmem:[%s1558_s14 + $0x58] sm:$0xff] %v386_v13  ;;  %v388_v14 = vld [vmem:[%s1553_s30 + $0xc0] sm:$0xff]  ;;  %v390_v15 = vld [vmem:[%s1553_s30 + $0xd0] sm:$0xff] }
  0x36   : > { %v392_v16 = vld [vmem:[%s1553_s30 + $0xe0] sm:$0xff]  ;;  %389 = vst [vmem:[%s1558_s14 + $0x60] sm:$0xff] %v388_v14  ;;  %391 = vst [vmem:[%s1558_s14 + $0x68] sm:$0xff] %v390_v15  ;;  %v394_v17 = vld [vmem:[%s1553_s30 + $0xf0] sm:$0xff] }
  0x37   : > { %393 = vst [vmem:[%s1558_s14 + $0x70] sm:$0xff] %v392_v16  ;;  %v396_v18 = vld [vmem:[%s1553_s30 + $0x100] sm:$0xff]  ;;  %v398_v19 = vld [vmem:[%s1553_s30 + $0x110] sm:$0xff]  ;;  %395 = vst [vmem:[%s1558_s14 + $0x78] sm:$0xff] %v394_v17 }
  0x38   : > { %397 = vst [vmem:[%s1558_s14 + $0x80] sm:$0xff] %v396_v18  ;;  %399 = vst [vmem:[%s1558_s14 + $0x88] sm:$0xff] %v398_v19  ;;  %v400_v20 = vld [vmem:[%s1553_s30 + $0x120] sm:$0xff]  ;;  %v402_v21 = vld [vmem:[%s1553_s30 + $0x130] sm:$0xff] }
  0x39   : > { %v404_v22 = vld [vmem:[%s1553_s30 + $0x140] sm:$0xff]  ;;  %401 = vst [vmem:[%s1558_s14 + $0x90] sm:$0xff] %v400_v20  ;;  %403 = vst [vmem:[%s1558_s14 + $0x98] sm:$0xff] %v402_v21  ;;  %v406_v23 = vld [vmem:[%s1553_s30 + $0x150] sm:$0xff] }
  0x3a   : > { %405 = vst [vmem:[%s1558_s14 + $0xa0] sm:$0xff] %v404_v22  ;;  %v408_v24 = vld [vmem:[%s1553_s30 + $0x160] sm:$0xff]  ;;  %v410_v25 = vld [vmem:[%s1553_s30 + $0x170] sm:$0xff]  ;;  %407 = vst [vmem:[%s1558_s14 + $0xa8] sm:$0xff] %v406_v23 }
  0x3b   : > { %409 = vst [vmem:[%s1558_s14 + $0xb0] sm:$0xff] %v408_v24  ;;  %411 = vst [vmem:[%s1558_s14 + $0xb8] sm:$0xff] %v410_v25  ;;  %v412_v26 = vld [vmem:[%s1553_s30 + $0x180] sm:$0xff]  ;;  %v414_v27 = vld [vmem:[%s1553_s30 + $0x190] sm:$0xff] }
  0x3c   : > { %v416_v28 = vld [vmem:[%s1553_s30 + $0x1a0] sm:$0xff]  ;;  %413 = vst [vmem:[%s1558_s14 + $0xc0] sm:$0xff] %v412_v26  ;;  %415 = vst [vmem:[%s1558_s14 + $0xc8] sm:$0xff] %v414_v27  ;;  %v418_v29 = vld [vmem:[%s1553_s30 + $0x1b0] sm:$0xff] }
  0x3d   : > { %417 = vst [vmem:[%s1558_s14 + $0xd0] sm:$0xff] %v416_v28  ;;  %v420_v30 = vld [vmem:[%s1553_s30 + $0x1c0] sm:$0xff]  ;;  %v422_v31 = vld [vmem:[%s1553_s30 + $0x1d0] sm:$0xff]  ;;  %419 = vst [vmem:[%s1558_s14 + $0xd8] sm:$0xff] %v418_v29 }
  0x3e   : > { %421 = vst [vmem:[%s1558_s14 + $0xe0] sm:$0xff] %v420_v30  ;;  %423 = vst [vmem:[%s1558_s14 + $0xe8] sm:$0xff] %v422_v31  ;;  %v424_v32 = vld [vmem:[%s1553_s30 + $0x1e0] sm:$0xff]  ;;  %v426_v33 = vld [vmem:[%s1553_s30 + $0x1f0] sm:$0xff] }
  0x3f   : > { %425 = vst [vmem:[%s1558_s14 + $0xf0] sm:$0xff] %v424_v32  ;;  %427 = vst [vmem:[%s1558_s14 + $0xf8] sm:$0xff] %v426_v33 }
  0x40 PF: > { %449 = sbr.rel (!%p1529_p11) target bundleno = 71 (0x47), region = 104  ;;  %s451_s23 = sand.u32 (%p1529_p11), 1, %s1360_s19  }
  0x41   : > { %s1166_s11 = sshll.u32 (%p1529_p11), %s1392_s27, 3  ;;  %s1111_s16 = sshll.u32 (%p1529_p11), %s451_s23, 4 }
  0x42   : > { %s459_s15 = scalar_lea.vmem (%p1529_p11), %s1754_s4, %s1166_s11  ;;  %s453_s29 = scalar_lea.vmem (%p1529_p11), [#allocation5], %s1111_s16 }
  0x43   : > { %v489_v34 = vld [vmem:[%s459_s15] sm:$0xff] (%p1529_p11)  ;;  %v491_v35 = vld [vmem:[%s459_s15 + $0x10] sm:$0xff] (%p1529_p11) }
  0x44   : > { %490 = vst [vmem:[%s453_s29] sm:$0xff] (%p1529_p11), %v489_v34  ;;  %492 = vst [vmem:[%s453_s29 + $0x8] sm:$0xff] (%p1529_p11), %v491_v35 }
  0x47 PF: > { %p1114_p1 = scmp.ge.s32.totalorder %s1396_s28, 1  ;;  %p497_p2 = scmp.lt.s32.totalorder %s1396_s28, 37 }
  0x49   : > { %p498_p3 = pnand %p1114_p1, %p497_p2 }
  0x4a   : > { %s504_s7 = sand.u32 (!%p498_p3), 1, %s1372_s22   ;;  %s511_s9 = sand.u32 (!%p498_p3), 1, %s1364_s20  }
  0x4b   : > { %501 = sbr.rel (%p498_p3) target bundleno = 398 (0x18e), region = 142  ;;  %s1632_s10 = sshll.u32 (!%p498_p3), %s504_s7, 4 }
  0x4c   : > { %s1116_s6 = sshll.u32 (!%p498_p3), %s511_s9, 8  ;;  %s518_s12 = sand.u32 (!%p498_p3), 1, %s1356_s18  }
  0x4d   : > { %s1119_s30 = sshll.u32 (!%p498_p3), %s1384_s25, 1  ;;  %s1636_s14 = sshll.u32 (!%p498_p3), %s518_s12, 4 }
  0x4e   : > { %p565_p4 = scmp.lt.s32.totalorder (!%p498_p3), %s1119_s30, 3  ;;  %s506_s13 = scalar_lea.vmem (!%p498_p3), [#allocation3], %s1632_s10 }
  0x4f   : > { %s1649_s18 = scalar_lea.vmem (!%p498_p3), [#allocation4], %s1116_s6  ;;  %s520_s15 = scalar_lea.vmem (!%p498_p3), [#allocation5], %s1636_s14 }
  0x50   : > { %s1653_s29 = scalar_lea.vmem (!%p498_p3), [#allocation6], %s1636_s14  ;;  %p1121_p5 = scmp.ne.s32.totalorder (!%p498_p3), %s1380_s24, 0 }
  0x52   : > { %s1791_s30 = smov (!%p565_p4, %s1119_s30), 3  ;;  %581 = sbr.rel (%p1121_p5) target bundleno = 89 (0x59), region = 158 }
  0x53   : > { %s567_s22 = scalar_lea.vmem %s1752_s2, %s1791_s30  ;;  %s572_s17 = scalar_lea.vmem %s1753_s3, %s1791_s30  ;;  %v1398_v36 = vmov (!%p1121_p5), 0.0  }
  0x54   : > { %582 = vst [vmem:[#allocation2] sm:$0xff] (!%p1121_p5), %v1398_v36  ;;  %583 = vst [vmem:[#allocation2 + $0x8] sm:$0xff] (!%p1121_p5), %v1398_v36 }
  0x55   : > { %584 = vst [vmem:[#allocation2 + $0x10] sm:$0xff] (!%p1121_p5), %v1398_v36  ;;  %585 = vst [vmem:[#allocation2 + $0x18] sm:$0xff] (!%p1121_p5), %v1398_v36 }
  0x59 PF: > { %v1259_v37 = vld [vmem:[%s1649_s18 + $0x4] ss:$8 sps:$4 sm:$0xff]   ;;  %v1261_v38 = vld [vmem:[%s1649_s18] ss:$8 sps:$4 sm:$0xff]   ;;  %v1262_v39 = vld [vmem:[%s1649_s18 + $0x14] ss:$8 sps:$4 sm:$0xff]  }
  0x5a   : > { %794 = vmatprep.subr.bf16.mxu0 %v1259_v37  ;;  %v1264_v40 = vld [vmem:[%s1649_s18 + $0x10] ss:$8 sps:$4 sm:$0xff]   ;;  %v1265_v41 = vld [vmem:[%s1649_s18 + $0x24] ss:$8 sps:$4 sm:$0xff]   ;;  %v1267_v42 = vld [vmem:[%s1649_s18 + $0x20] ss:$8 sps:$4 sm:$0xff]  }
  0x5b   : > { %795 = vmatpush1.bf16.msra.mxu0 %v1261_v38  ;;  %v1268_v43 = vld [vmem:[%s1649_s18 + $0x34] ss:$8 sps:$4 sm:$0xff]   ;;  %v1270_v44 = vld [vmem:[%s1649_s18 + $0x30] ss:$8 sps:$4 sm:$0xff]   ;;  %v1271_v45 = vld [vmem:[%s1649_s18 + $0x44] ss:$8 sps:$4 sm:$0xff]  }
  0x5c   : > { %796 = vmatprep.subr.bf16.mxu0 %v1262_v39  ;;  %v1273_v46 = vld [vmem:[%s1649_s18 + $0x40] ss:$8 sps:$4 sm:$0xff]   ;;  %v1274_v47 = vld [vmem:[%s1649_s18 + $0x54] ss:$8 sps:$4 sm:$0xff]   ;;  %v1276_v48 = vld [vmem:[%s1649_s18 + $0x50] ss:$8 sps:$4 sm:$0xff]  }
  0x5d   : > { %v1277_v49 = vld [vmem:[%s1649_s18 + $0x64] ss:$8 sps:$4 sm:$0xff]   ;;  %v1279_v51 = vld [vmem:[%s1649_s18 + $0x60] ss:$8 sps:$4 sm:$0xff]   ;;  %v1280_v52 = vld [vmem:[%s1649_s18 + $0x74] ss:$8 sps:$4 sm:$0xff]  }
  0x5e   : > { %v1309_v50 = vld [vmem:[%s506_s13 + $0x4] ss:$8 sps:$4 sm:$0xff]   ;;  %v1282_v53 = vld [vmem:[%s1649_s18 + $0x70] ss:$8 sps:$4 sm:$0xff]   ;;  %v1285_v55 = vld [vmem:[%s1649_s18 + $0x80] ss:$8 sps:$4 sm:$0xff]  }
  0x5f   : > { %797 = vmatpush1.bf16.msra.mxu0 %v1264_v40  ;;  %826 = vmatprep.mubr.bf16.mxu0 %v1309_v50  ;;  %v1283_v54 = vld [vmem:[%s1649_s18 + $0x84] ss:$8 sps:$4 sm:$0xff]   ;;  %v1286_v56 = vld [vmem:[%s1649_s18 + $0x94] ss:$8 sps:$4 sm:$0xff]   ;;  %v1288_v57 = vld [vmem:[%s1649_s18 + $0x90] ss:$8 sps:$4 sm:$0xff]  }
  0x60   : > { %798 = vmatprep.subr.bf16.mxu0 %v1265_v41  ;;  %v1289_v58 = vld [vmem:[%s1649_s18 + $0xa4] ss:$8 sps:$4 sm:$0xff]   ;;  %v1291_v59 = vld [vmem:[%s1649_s18 + $0xa0] ss:$8 sps:$4 sm:$0xff]   ;;  %v1292_v60 = vld [vmem:[%s1649_s18 + $0xb4] ss:$8 sps:$4 sm:$0xff]  }
  0x61   : > { %v1294_v61 = vld [vmem:[%s1649_s18 + $0xb0] ss:$8 sps:$4 sm:$0xff]   ;;  %v1295_v62 = vld [vmem:[%s1649_s18 + $0xc4] ss:$8 sps:$4 sm:$0xff]   ;;  %v1297_v63 = vld [vmem:[%s1649_s18 + $0xc0] ss:$8 sps:$4 sm:$0xff]  }
  0x62   : > { %v1298_v0 = vld [vmem:[%s1649_s18 + $0xd4] ss:$8 sps:$4 sm:$0xff]   ;;  %v1300_v1 = vld [vmem:[%s1649_s18 + $0xd0] ss:$8 sps:$4 sm:$0xff]   ;;  %v1301_v2 = vld [vmem:[%s1649_s18 + $0xe4] ss:$8 sps:$4 sm:$0xff]  }
  0x63   : > { %799 = vmatpush1.bf16.msra.mxu0 %v1267_v42  ;;  %v1303_v3 = vld [vmem:[%s1649_s18 + $0xe0] ss:$8 sps:$4 sm:$0xff]   ;;  %v1304_v4 = vld [vmem:[%s1649_s18 + $0xf4] ss:$8 sps:$4 sm:$0xff]   ;;  %v1306_v5 = vld [vmem:[%s1649_s18 + $0xf0] ss:$8 sps:$4 sm:$0xff]  }
  0x64   : > { %800 = vmatprep.subr.bf16.mxu0 %v1268_v43  ;;  %v1307_v6 = vld [vmem:[%s506_s13] ss:$8 sps:$4 sm:$0xff]   ;;  %p1156_p6 = scmp.ne.s32.totalorder %s1380_s24, 17 }
  0x65   : > { %v586_v7 = vld [vmem:[#allocation2] sm:$0xff]  ;;  %v587_v8 = vld [vmem:[#allocation2 + $0x8] sm:$0xff]  ;;  %v588_v10 = vld [vmem:[#allocation2 + $0x10] sm:$0xff]  ;;  %v855_v19 = vlaneseq (!%p1156_p6) }
  0x66   : > { %v589_v13 = vld [vmem:[#allocation2 + $0x18] sm:$0xff]  ;;  %v853_v21 = vld [vmem:[%s567_s22] sm:$0x3] (!%p1156_p6) }
  0x67   : > { %801 = vmatpush1.bf16.msra.mxu0 %v1270_v44  ;;  %v856_v20 = vshrl.u32 (!%p1156_p6), %v855_v19, 7  ;;  %v869_v22 = vld [vmem:[%s572_s17] sm:$0x3] (!%p1156_p6)  ;;  %v886_v27 = vld [vmem:[%s520_s15 + $0x8] sm:$0xff] (!%p1156_p6) }
  0x68   : > { %802 = vmatprep.subr.bf16.mxu0 %v1271_v45  ;;  %v885_v26 = vld [vmem:[%s520_s15] sm:$0xff] (!%p1156_p6)  ;;  %v889_v37 = vunpack.c.l.bf16 (!%p1156_p6), %v886_v27  ;;  %v890_v38 = vunpack.c.h.bf16 (!%p1156_p6), %v886_v27 }
  0x69   : > { %v857_v24 = vsub.s32 (!%p1156_p6), 0, %v856_v20  ;;  %v861_v25 = vsub.s32 (!%p1156_p6), 1, %v856_v20  ;;  %v887_v35 = vunpack.c.l.bf16 (!%p1156_p6), %v885_v26  ;;  %v888_v36 = vunpack.c.h.bf16 (!%p1156_p6), %v885_v26 }
  0x6b   : > { %803 = vmatpush1.bf16.msra.mxu0 %v1273_v46  ;;  %v858_v31 = vrot.slane (!%p1156_p6), %v853_v21, %v857_v24  ;;  %v862_v32 = vrot.slane (!%p1156_p6), %v853_v21, %v861_v25  ;;  %v874_v33 = vrot.slane (!%p1156_p6), %v869_v22, %v857_v24  ;;  %v878_v34 = vrot.slane (!%p1156_p6), %v869_v22, %v861_v25 }
  0x6c   : > { %804 = vmatprep.subr.bf16.mxu0 %v1274_v47 }
  0x6f   : > { %805 = vmatpush1.bf16.msra.mxu0 %v1276_v48 }
  0x70   : > { %806 = vmatprep.subr.bf16.mxu0 %v1277_v49 }
  0x73   : > { %807 = vmatpush1.bf16.msra.mxu0 %v1279_v51 }
  0x74   : > { %808 = vmatprep.subr.bf16.mxu0 %v1280_v52 }
  0x77   : > { %809 = vmatpush1.bf16.msra.mxu0 %v1282_v53 }
  0x78   : > { %810 = vmatprep.subr.bf16.mxu0 %v1283_v54 }
  0x7b   : > { %811 = vmatpush1.bf16.msra.mxu0 %v1285_v55 }
  0x7c   : > { %812 = vmatprep.subr.bf16.mxu0 %v1286_v56 }
  0x7f   : > { %813 = vmatpush1.bf16.msra.mxu0 %v1288_v57 }
  0x80   : > { %814 = vmatprep.subr.bf16.mxu0 %v1289_v58 }
  0x83   : > { %815 = vmatpush1.bf16.msra.mxu0 %v1291_v59 }
  0x84   : > { %816 = vmatprep.subr.bf16.mxu0 %v1292_v60 }
  0x87   : > { %817 = vmatpush1.bf16.msra.mxu0 %v1294_v61 }
  0x88   : > { %818 = vmatprep.subr.bf16.mxu0 %v1295_v62 }
  0x8b   : > { %819 = vmatpush1.bf16.msra.mxu0 %v1297_v63 }
  0x8c   : > { %820 = vmatprep.subr.bf16.mxu0 %v1298_v0 }
  0x8f   : > { %821 = vmatpush1.bf16.msra.mxu0 %v1300_v1 }
  0x90   : > { %822 = vmatprep.subr.bf16.mxu0 %v1301_v2 }
  0x93   : > { %823 = vmatpush1.bf16.msra.mxu0 %v1303_v3 }
  0x94   : > { %824 = vmatprep.subr.bf16.mxu0 %v1304_v4 }
  0x97   : > { %825 = vmatpush1.bf16.msra.mxu0 %v1306_v5 }
  0x9a   : > { %827 = vmatmul.mubr.bf16.vlgmr.msra.gmra.mrb[0].mxu0 %v1307_v6 }
 0x16d   : > { %v828_v9 = vpop.f32.mrb[0].mxu0  ;;  %848 = sbr.rel (%p1156_p6) target bundleno = 390 (0x186), region = 162 }
 0x16e   : > { %v837_v11 = vadd.f32 %v828_v9, %v586_v7  ;;  %v830_v12 = vpop.f32.mrb[1].mxu0 }
 0x16f   : > { %v838_v14 = vadd.f32 %v830_v12, %v587_v8  ;;  %v832_v15 = vpop.f32.mrb[2].mxu0 }
 0x170   : > { %841 = vst [vmem:[#allocation2] sm:$0xff] %v837_v11  ;;  %v839_v16 = vadd.f32 %v832_v15, %v588_v10  ;;  %v834_v17 = vpop.f32.mrb[3].mxu0 }
 0x171   : > { %842 = vst [vmem:[#allocation2 + $0x8] sm:$0xff] %v838_v14  ;;  %v840_v18 = vadd.f32 %v834_v17, %v589_v13 }
 0x172   : > { %843 = vst [vmem:[#allocation2 + $0x10] sm:$0xff] %v839_v16 }
 0x173   : > { %844 = vst [vmem:[#allocation2 + $0x18] sm:$0xff] %v840_v18 }
 0x177   : > { %v849_v23 = vld [vmem:[#allocation2] sm:$0xff] }
 0x178   : > { %v850_v28 = vld [vmem:[#allocation2 + $0x8] sm:$0xff]  ;;  %v865_v39 = vmul.f32 %v858_v31, %v849_v23 }
 0x179   : > { %v851_v29 = vld [vmem:[#allocation2 + $0x10] sm:$0xff]  ;;  %v866_v40 = vmul.f32 %v862_v32, %v850_v28 }
 0x17a   : > { %v852_v30 = vld [vmem:[#allocation2 + $0x18] sm:$0xff]  ;;  %v867_v41 = vmul.f32 %v858_v31, %v851_v29  ;;  %v881_v43 = vadd.f32 %v874_v33, %v865_v39 }
 0x17b   : > { %v868_v42 = vmul.f32 %v862_v32, %v852_v30  ;;  %v882_v44 = vadd.f32 %v878_v34, %v866_v40 }
 0x17c   : > { %v883_v45 = vadd.f32 %v874_v33, %v867_v41  ;;  %v891_v47 = vadd.f32 %v887_v35, %v881_v43 }
 0x17d   : > { %v884_v46 = vadd.f32 %v878_v34, %v868_v42  ;;  %v892_v48 = vadd.f32 %v888_v36, %v882_v44 }
 0x17e   : > { %v893_v49 = vadd.f32 %v889_v37, %v883_v45  ;;  %v895_v51 = vmax.f32 %v891_v47, 0.0 }
 0x17f   : > { %v894_v50 = vadd.f32 %v890_v38, %v884_v46  ;;  %v896_v52 = vmax.f32 %v892_v48, 0.0 }
 0x180   : > { %v897_v53 = vmax.f32 %v893_v49, 0.0 }
 0x181   : > { %v898_v54 = vmax.f32 %v894_v50, 0.0  ;;  %v1167_v55 = vpack.c.bf16 %v896_v52, %v895_v51 }
 0x183   : > { %v1168_v56 = vpack.c.bf16 %v898_v54, %v897_v53  ;;  %911 = vst [vmem:[%s1653_s29] sm:$0xff] %v1167_v55 }
 0x185   : > { %912 = vst [vmem:[%s1653_s29 + $0x8] sm:$0xff] %v1168_v56 }
 0x186 PF: > { %919 = sbr.rel (!%p1533_p13) target bundleno = 398 (0x18e), region = 166  ;;  %s1169_s24 = sshll.u32 (%p1533_p13), %s1384_s25, 3 }
 0x187   : > { %s925_s14 = scalar_lea.vmem (%p1533_p13), %s1755_s5, %s1169_s24 }
 0x18a   : > { %v955_v57 = vld [vmem:[%s1653_s29] sm:$0xff] (%p1533_p13) }
 0x18b   : > { %956 = vst [vmem:[%s925_s14] sm:$0xff] (%p1533_p13), %v955_v57 }
 0x18c   : > { %v957_v58 = vld [vmem:[%s1653_s29 + $0x8] sm:$0xff] (%p1533_p13) }
 0x18d   : > { %958 = vst [vmem:[%s925_s14 + $0x10] sm:$0xff] %v957_v58 }
 0x18e PF: > { %s15_s28 = sadd.s32 1, %s1396_s28   ;;  %s1769_s8 = sld [smem:[#allocation12_spill]] }
 0x18f   : > { %p12_p7 = scmp.ge.s32.totalorder %s15_s28, 38   ;;  %s1770_s23 = sld [smem:[#allocation11_spill]] }
 0x190   : > { %s1771_s22 = sld [smem:[#allocation7_spill]]  ;;  %s1772_s11 = sld [smem:[#allocation10_spill]] }
 0x191   : > { %s1773_s16 = sld [smem:[#allocation8_spill]]  ;;  %s1774_s17 = sld [smem:[#allocation9_spill]] }
 0x192   : > { %s1775_s18 = smov %s1360_s19  ;;  %s1777_s20 = smov %s1368_s21 }
 0x193   : > { %s1780_s24 = smov %s1388_s26  ;;  %s1781_s25 = smov %s1392_s27 }
 0x194   : > { %s1776_s19 = smov %s1769_s8  ;;  %14 = sbr.rel (!%p12_p7) target bundleno = 6 (0x6), region = 257 }
 0x195   : > { %s1778_s21 = smov %s1770_s23 }
 0x196   : > { %s1779_s23 = smov %s1772_s11 }
 0x197   : > { %s1782_s26 = smov %s1773_s16  ;;  %s1783_s27 = smov %s1774_s17 }

// kernel: resnet_forward.43
= control target key start
LH: loop header
LB: loop body
LE: loop exit
PB: predicated region body
PF: predicated region fallthrough
CT: control target
= control target key end

     0   :  { %s101_s0 = inlined_call_operand.vmem [shape: bf16[2,1,512], index: 0, kind: input, shape index: {}]   ;;  %s102_s1 = inlined_call_operand.hbm [shape: f32[2,512], index: 1, kind: output, shape index: {}]  }
   0x1   :  { %v47_v0 = vld [vmem:[%s101_s0] sm:$0xff]  }
   0x2   :  { %v48_v1 = vunpack.c.l.bf16 %v47_v0  ;;  %v49_v2 = vunpack.c.h.bf16 %v47_v0 }
   0x3   :  { %6 = vsyncpa [#allocation3], 0  ;;  %vm22_vm0 = vcmask 1041409   ;;  %vm24_vm1 = vcmask 1043459   ;;  %vm26_vm2 = vcmask 1045509   ;;  %s75_s8 = smov [#allocation2]  }
   0x4   :  { %v21_v3 = vrot.slane %v49_v2, 7  ;;  %s38_s9 = sshll.u32 %s75_s8, 4  ;;  %vm28_vm3 = vcmask 1047559   ;;  %s39_s9 = int_to_ptr.vmem [resolvable:$true] %s38_s9 }
   0x5   :  { %s51_s10 = scalar_lea.vmem %s39_s9, 128  ;;  %p56_p1 = scmp.lt.s32.totalorder %s39_s9, %s39_s9 }
   0x6   :  { %v23_v4 = vsel %vm22_vm0, %v21_v3, %v48_v1  ;;  %p52_p0 = scmp.ne.s32.totalorder %s39_s9, %s51_s10  ;;  %p57_p2 = scmp.lt.s32.totalorder %s51_s10, %s51_s10 }
   0x7   :  { %v25_v5 = vsel %vm24_vm1, %v21_v3, %v23_v4 }
   0x8   :  { %v27_v6 = vsel %vm26_vm2, %v21_v3, %v25_v5  ;;  %p58_p3 = por %p57_p2, %p56_p1 }
   0x9   :  { %v29_v7 = vsel %vm28_vm3, %v21_v3, %v27_v6 }
   0xa   :  { %31 = vst [vmem:[#allocation2] sm:$0xff] %v29_v7  ;;  %p59_p4 = pnand %p58_p3, %p52_p0 }
   0xc   :  { %62 = shalt.err (!%p59_p4)
}
   0xd   :  { %s63_s12 = scalar_lea.hbm %s102_s1, 128 }
   0xe   :  { %p64_p5 = scmp.ne.s32.totalorder %s102_s1, %s63_s12  ;;  %p67_p6 = scmp.lt.u32.totalorder %s63_s12, %s102_s1 }
  0x10   :  { %p69_p7 = pnand %p67_p6, %p64_p5 }
  0x12   :  { %72 = shalt.err (!%p69_p7)
}
  0x13   :  { %41 = dma.vmem_to_hbm [thread:$0]  %s39_s9, 128, %s102_s1, [#allocation3]  }
  0x14   :  { %73 = dma.done.wait [#allocation3], 128  }
  0x15   :  { %74 = vsyncadd [#allocation3], 4294967168 }
  0x16   :  { %45 = vsyncpa [#allocation3], 1 }

</bundles_post_ra>
